<compile_context>
chip_gen: v7x
topology: tpu7x:2x2x1
jax: 0.10.0
libtpu: 0.0.40
codegen_flags: <defaults>
</compile_context>

<pallas_src>
import functools

import jax
import jax.numpy as jnp
from jax.experimental import pallas as pl
from jax.experimental.pallas import tpu as pltpu


# ----------------------- generation-aware VMEM budget ------------------------
_VMEM_LIMIT_CACHE = None


def _vmem_limit_bytes():
    """~3/4 of physical VMEM, capped at 96 MiB (v5e/v6e) / 48 MiB (v7x)."""
    global _VMEM_LIMIT_CACHE
    if _VMEM_LIMIT_CACHE is None:
        try:
            cap = int(pltpu.get_tpu_info().vmem_capacity_bytes)
        except Exception:
            cap = 64 * 1024 * 1024          # conservative (v7x-sized) fallback
        _VMEM_LIMIT_CACHE = max(32 * 1024 * 1024,
                                min((cap * 3) // 4, 96 * 1024 * 1024))
    return _VMEM_LIMIT_CACHE


# ------------------------------ Pallas kernels --------------------------------
def _conv4x4s2_kernel(x_ref, w_ref, b_ref, o_ref, *, rb, wo, apply_lrelu):
    """One grid step computes `rb` output rows of one image.

    x_ref : (1, Hs, Ws, 4*Cin)  bf16  padded + 2x2 space-to-depth input
                                      (whole image, resident across row axis)
    w_ref : (4, 4*Cin, Cout)    bf16  per-(i,j) weights of the 2x2 s2d conv
    b_ref : (1, 1, Cout)        f32
    o_ref : (1, rb, Wo, Cout)
    """
    row0 = pl.program_id(1) * rb
    bias = b_ref[0]                                          # (1, Cout) f32
    for rr in range(rb):                                     # static unroll, rb <= 8
        acc = jnp.zeros(o_ref.shape[2:], jnp.float32)        # (Wo, Cout)
        for idx in range(4):                                 # 2x2 stride-1 conv
            i, j = idx // 2, idx % 2
            a = x_ref[0, row0 + rr + i, j:j + wo, :]          # (Wo, 4*Cin) bf16
            acc += jnp.dot(a, w_ref[idx],
                           preferred_element_type=jnp.float32)
        out = acc + bias
        if apply_lrelu:
            out = jnp.where(out > 0, out, 0.2 * out)          # LeakyReLU(0.2)
        o_ref[0, rr] = out.astype(o_ref.dtype)


def _classifier4x4s2_kernel(x_ref, w_ref, b_ref, o_ref, *, wo):
    """Cout == 1 classifier: lane-dense multiply + lane reduction (no padded GEMM).

    x_ref : (1, Hs, Ws, 4*Cin) bf16
    w_ref : (4, 1, 4*Cin)      f32
    b_ref : (1, 1)             f32
    o_ref : (1, 1, Wo, 1)      f32
    """
    r = pl.program_id(1)
    s = jnp.zeros((wo, x_ref.shape[-1]), jnp.float32)
    for idx in range(4):
        i, j = idx // 2, idx % 2
        a = x_ref[0, r + i, j:j + wo, :].astype(jnp.float32)  # (Wo, 4*Cin)
        s += a * w_ref[idx]                                   # bcast (1, 4*Cin)
    out = jnp.sum(s, axis=-1, keepdims=True) + b_ref[...]     # (Wo, 1)
    o_ref[0, 0] = out.astype(o_ref.dtype)


# --------------------------- layer wrappers (NHWC) ----------------------------
def _pad_s2d(x):
    """(N,H,W,C) -> zero-pad 1 + 2x2 space-to-depth -> (N, Hs, Ws, 4C).

    Channel order of the 4C axis is (q, p, ci) with ci fastest, matching the
    weight layout produced by _reorder_weight.  Extra rows/cols added to make
    the padded size even are never read by any conv window.
    """
    n, h, w, c = x.shape
    ho = (h - 2) // 2 + 1
    wo = (w - 2) // 2 + 1
    hp = h + 2 + ((h + 2) % 2)
    wp = w + 2 + ((w + 2) % 2)
    xp = jnp.pad(x, ((0, 0), (1, hp - h - 1), (1, wp - w - 1), (0, 0)))
    hs, ws = hp // 2, wp // 2
    xs = (xp.reshape(n, hs, 2, ws, 2, c)
            .transpose(0, 1, 3, 2, 4, 5)            # (n, hh, ww, q, p, ci)
            .reshape(n, hs, ws, 4 * c))
    return xs, ho, wo


def _row_block(ho, cap=8):
    """Largest divisor of ho that is <= cap (rows computed per grid step)."""
    for d in range(min(cap, ho), 0, -1):
        if ho % d == 0:
            return d
    return 1


def _conv_layer(xs, ho, wo, w4, b, *, apply_lrelu, out_dtype):
    n, hs, ws, c4 = xs.shape
    cout = w4.shape[-1]
    rb = _row_block(ho)
    grid = (n, ho // rb)
    kernel = functools.partial(_conv4x4s2_kernel, rb=rb, wo=wo,
                               apply_lrelu=apply_lrelu)
    bytes_accessed = (xs.size * xs.dtype.itemsize
                      + w4.size * w4.dtype.itemsize
                      + b.size * 4
                      + n * ho * wo * cout * jnp.dtype(out_dtype).itemsize)
    return pl.pallas_call(
        kernel,
        out_shape=jax.ShapeDtypeStruct((n, ho, wo, cout), out_dtype),
        grid_spec=pltpu.PrefetchScalarGridSpec(
            num_scalar_prefetch=0,
            grid=grid,
            in_specs=[
                # whole s2d image per batch element; index ignores the row axis
                # so the block stays VMEM-resident across it (one HBM read).
                pl.BlockSpec((1, hs, ws, c4), lambda nn, t: (nn, 0, 0, 0)),
                # full weight / bias, constant across the grid (fetched once).
                pl.BlockSpec((4, c4, cout), lambda nn, t: (0, 0, 0)),
                pl.BlockSpec((1, 1, cout), lambda nn, t: (0, 0, 0)),
            ],
            out_specs=pl.BlockSpec((1, rb, wo, cout),
                                   lambda nn, t: (nn, t, 0, 0)),
        ),
        compiler_params=pltpu.CompilerParams(
            dimension_semantics=("parallel", "arbitrary"),
            vmem_limit_bytes=_vmem_limit_bytes(),
        ),
        cost_estimate=pl.CostEstimate(
            flops=2 * n * ho * wo * 4 * c4 * cout,
            transcendentals=0,
            bytes_accessed=bytes_accessed,
        ),
    )(xs, w4, b)


def _classifier_layer(xs, ho, wo, w4, b):
    n, hs, ws, c4 = xs.shape
    kernel = functools.partial(_classifier4x4s2_kernel, wo=wo)
    return pl.pallas_call(
        kernel,
        out_shape=jax.ShapeDtypeStruct((n, ho, wo, 1), jnp.float32),
        grid_spec=pltpu.PrefetchScalarGridSpec(
            num_scalar_prefetch=0,
            grid=(n, ho),
            in_specs=[
                pl.BlockSpec((1, hs, ws, c4), lambda nn, r: (nn, 0, 0, 0)),
                pl.BlockSpec((4, 1, c4), lambda nn, r: (0, 0, 0)),
                pl.BlockSpec((1, 1), lambda nn, r: (0, 0)),
            ],
            out_specs=pl.BlockSpec((1, 1, wo, 1), lambda nn, r: (nn, r, 0, 0)),
        ),
        compiler_params=pltpu.CompilerParams(
            dimension_semantics=("parallel", "arbitrary"),
            vmem_limit_bytes=_vmem_limit_bytes(),
        ),
    )(xs, w4, b)


# ----------------------------- parameters -------------------------------------
def init_params(key, n_class, ndf=64):
    chans = [(n_class, ndf), (ndf, ndf * 2), (ndf * 2, ndf * 4),
             (ndf * 4, ndf * 8), (ndf * 8, 1)]
    params = []
    for i, (cin, cout) in enumerate(chans):
        kw_, kb_ = jax.random.split(jax.random.fold_in(key, i))
        w = 0.02 * jax.random.normal(kw_, (cout, cin, 4, 4), jnp.float32)
        b = 0.02 * jax.random.normal(kb_, (cout,), jnp.float32)
        params.append((w, b))
    return params


def _reorder_weight(w_oihw):
    """OIHW (Cout,Cin,4,4) -> (4, 4*Cin, Cout) matching the s2d input layout.

    First axis: (i, j) = (kh//2, kw//2);  second axis: (q, p, ci) with ci fastest,
    where kh = 2*i + q and kw = 2*j + p.
    """
    cout, cin, _, _ = w_oihw.shape
    w6 = w_oihw.reshape(cout, cin, 2, 2, 2, 2)          # (co, ci, i, q, j, p)
    return w6.transpose(2, 4, 3, 5, 1, 0).reshape(4, 4 * cin, cout)


def prepare_params(params):
    """One-time conversion to kernel-ready layout (hoisted out of the forward)."""
    prepared = []
    for w, b in params[:4]:
        cout = w.shape[0]
        prepared.append((_reorder_weight(w).astype(jnp.bfloat16),
                         b.reshape(1, 1, cout).astype(jnp.float32)))
    wc, bc = params[4]                                   # Cout == 1 classifier
    wc4 = _reorder_weight(wc).transpose(0, 2, 1).astype(jnp.float32)  # (4,1,4*Cin)
    prepared.append((wc4, bc.reshape(1, 1).astype(jnp.float32)))
    return prepared


# ------------------------------ forward pass -----------------------------------
def domain_classifier_forward(prepared, x, is_reverse=False):
    # grad_reverse is identity in the forward pass (it only flips gradients),
    # so is_reverse does not change forward semantics.
    del is_reverse
    h = jnp.transpose(x, (0, 2, 3, 1)).astype(jnp.bfloat16)      # NCHW -> NHWC
    for w4, b in prepared[:4]:
        xs, ho, wo = _pad_s2d(h)
        h = _conv_layer(xs, ho, wo, w4, b,
                        apply_lrelu=True, out_dtype=jnp.bfloat16)
    wc4, bc = prepared[4]
    xs, ho, wo = _pad_s2d(h)
    out = _classifier_layer(xs, ho, wo, wc4, bc)                 # (N,Ho,Wo,1) f32
    return jnp.transpose(out, (0, 3, 1, 2))                      # NHWC -> NCHW


# -------------------------------- reference ------------------------------------
def _reference_forward(params, x):
    def conv(x, w, b):
        y = jax.lax.conv_general_dilated(
            x, w, window_strides=(2, 2), padding=((1, 1), (1, 1)),
            dimension_numbers=('NCHW', 'OIHW', 'NCHW'))
        return y + b[None, :, None, None]

    def lrelu(x):
        return jnp.where(x > 0, x, 0.2 * x)

    (w1, b1), (w2, b2), (w3, b3), (w4, b4), (wc, bc) = params
    x = lrelu(conv(x, w1, b1))
    x = lrelu(conv(x, w2, b2))
    x = lrelu(conv(x, w3, b3))
    x = lrelu(conv(x, w4, b4))
    return conv(x, wc, bc)


# ---------------------------------- main ----------------------------------------
if __name__ == "__main__":
    key = jax.random.PRNGKey(0)
    n_class, ndf = 4, 8          # small synthetic config (PyTorch default ndf=64)
    batch, H, W = 2, 32, 32      # 5 stride-2 convs: 32 -> 16 -> 8 -> 4 -> 2 -> 1

    kx, kp = jax.random.split(key)
    x = jax.random.normal(kx, (batch, n_class, H, W), jnp.float32)
    params = init_params(kp, n_class, ndf)
    prepared = prepare_params(params)    # weight repack/cast hoisted out of forward

    fwd = jax.jit(domain_classifier_forward)
    out = jax.block_until_ready(fwd(prepared, x))

    ref = jax.block_until_ready(_reference_forward(params, x))
    assert out.shape == (batch, 1, 1, 1), out.shape

    # bf16 activations/weights on the MXU (f32 accumulate) -> compare with a
    # relative-to-scale tolerance instead of a tight absolute one.
    err = float(jnp.max(jnp.abs(out.astype(jnp.float32) - ref)))
    scale = float(jnp.max(jnp.abs(ref))) + 1e-12
    assert err / scale < 5e-2, f"relative max err {err / scale}"

    print("KERNEL_OK")
</pallas_src>

<mosaic_0001>
module attributes {stable_mosaic.version = 11 : i64} {
  func.func @_conv4x4s2_kernel(%arg0: i32, %arg1: i32, %arg2: memref<1x17x17x16xbf16, #tpu.memory_space<vmem>>, %arg3: memref<4x16x8xbf16, #tpu.memory_space<vmem>>, %arg4: memref<1x1x8xf32, #tpu.memory_space<vmem>>, %arg5: memref<1x8x16x8xbf16, #tpu.memory_space<vmem>>) attributes {dimension_semantics = [#tpu.dimension_semantics<parallel>, #tpu.dimension_semantics<arbitrary>], iteration_bounds = array<i64: 2, 2>, scalar_prefetch = 0 : i64, scratch_operands = 0 : i64, tpu.core_type = #tpu.core_type<tc>, window_params = [{transform_indices = @transform_0, window_bounds = array<i64: 1, 17, 17, 16>}, {pipeline_mode = #tpu.pipeline_mode<synchronous>, transform_indices = @transform_1, window_bounds = array<i64: 4, 16, 8>}, {pipeline_mode = #tpu.pipeline_mode<synchronous>, transform_indices = @transform_2, window_bounds = array<i64: 1, 1, 8>}, {transform_indices = @transform_3, window_bounds = array<i64: 1, 8, 16, 8>}]} {
    %c8_i32 = arith.constant 8 : i32
    %0 = arith.muli %arg1, %c8_i32 : i32
    %c0 = arith.constant 0 : index
    %c0_0 = arith.constant 0 : index
    %c0_1 = arith.constant 0 : index
    %1 = vector.load %arg4[%c0, %c0_0, %c0_1] : memref<1x1x8xf32, #tpu.memory_space<vmem>>, vector<1x1x8xf32>
    %2 = vector.shape_cast %1 : vector<1x1x8xf32> to vector<1x8xf32>
    %cst = arith.constant 0.000000e+00 : f32
    %3 = vector.broadcast %cst : f32 to vector<16x8xf32>
    %c0_i32 = arith.constant 0 : i32
    %4 = arith.addi %0, %c0_i32 : i32
    %c0_i32_2 = arith.constant 0 : i32
    %5 = arith.addi %4, %c0_i32_2 : i32
    %c0_3 = arith.constant 0 : index
    %6 = arith.index_cast %5 : i32 to index
    %c0_4 = arith.constant 0 : index
    %c0_5 = arith.constant 0 : index
    %7 = vector.load %arg2[%c0_3, %6, %c0_4, %c0_5] : memref<1x17x17x16xbf16, #tpu.memory_space<vmem>>, vector<1x1x16x16xbf16>
    %8 = vector.shape_cast %7 : vector<1x1x16x16xbf16> to vector<16x16xbf16>
    %c0_6 = arith.constant 0 : index
    %c0_7 = arith.constant 0 : index
    %c0_8 = arith.constant 0 : index
    %9 = vector.load %arg3[%c0_6, %c0_7, %c0_8] : memref<4x16x8xbf16, #tpu.memory_space<vmem>>, vector<1x16x8xbf16>
    %10 = vector.shape_cast %9 : vector<1x16x8xbf16> to vector<16x8xbf16>
    %cst_9 = arith.constant dense<0.000000e+00> : vector<16x8xf32>
    %11 = tpu.matmul %8, %10, %cst_9 {dimension_numbers = #tpu.dot_dimension_numbers<[1], [0], [0], [1], [0, 0, 1, 1], [], []>} : vector<16x16xbf16>, vector<16x8xbf16>, vector<16x8xf32> -> vector<16x8xf32>
    %12 = arith.addf %3, %11 : vector<16x8xf32>
    %c0_i32_10 = arith.constant 0 : i32
    %13 = arith.addi %0, %c0_i32_10 : i32
    %c0_i32_11 = arith.constant 0 : i32
    %14 = arith.addi %13, %c0_i32_11 : i32
    %c0_12 = arith.constant 0 : index
    %15 = arith.index_cast %14 : i32 to index
    %c1 = arith.constant 1 : index
    %c0_13 = arith.constant 0 : index
    %16 = vector.load %arg2[%c0_12, %15, %c1, %c0_13] : memref<1x17x17x16xbf16, #tpu.memory_space<vmem>>, vector<1x1x16x16xbf16>
    %17 = vector.shape_cast %16 : vector<1x1x16x16xbf16> to vector<16x16xbf16>
    %c1_14 = arith.constant 1 : index
    %c0_15 = arith.constant 0 : index
    %c0_16 = arith.constant 0 : index
    %18 = vector.load %arg3[%c1_14, %c0_15, %c0_16] : memref<4x16x8xbf16, #tpu.memory_space<vmem>>, vector<1x16x8xbf16>
    %19 = vector.shape_cast %18 : vector<1x16x8xbf16> to vector<16x8xbf16>
    %cst_17 = arith.constant dense<0.000000e+00> : vector<16x8xf32>
    %20 = tpu.matmul %17, %19, %cst_17 {dimension_numbers = #tpu.dot_dimension_numbers<[1], [0], [0], [1], [0, 0, 1, 1], [], []>} : vector<16x16xbf16>, vector<16x8xbf16>, vector<16x8xf32> -> vector<16x8xf32>
    %21 = arith.addf %12, %20 : vector<16x8xf32>
    %c0_i32_18 = arith.constant 0 : i32
    %22 = arith.addi %0, %c0_i32_18 : i32
    %c1_i32 = arith.constant 1 : i32
    %23 = arith.addi %22, %c1_i32 : i32
    %c0_19 = arith.constant 0 : index
    %24 = arith.index_cast %23 : i32 to index
    %c0_20 = arith.constant 0 : index
    %c0_21 = arith.constant 0 : index
    %25 = vector.load %arg2[%c0_19, %24, %c0_20, %c0_21] : memref<1x17x17x16xbf16, #tpu.memory_space<vmem>>, vector<1x1x16x16xbf16>
    %26 = vector.shape_cast %25 : vector<1x1x16x16xbf16> to vector<16x16xbf16>
    %c2 = arith.constant 2 : index
    %c0_22 = arith.constant 0 : index
    %c0_23 = arith.constant 0 : index
    %27 = vector.load %arg3[%c2, %c0_22, %c0_23] : memref<4x16x8xbf16, #tpu.memory_space<vmem>>, vector<1x16x8xbf16>
    %28 = vector.shape_cast %27 : vector<1x16x8xbf16> to vector<16x8xbf16>
    %cst_24 = arith.constant dense<0.000000e+00> : vector<16x8xf32>
    %29 = tpu.matmul %26, %28, %cst_24 {dimension_numbers = #tpu.dot_dimension_numbers<[1], [0], [0], [1], [0, 0, 1, 1], [], []>} : vector<16x16xbf16>, vector<16x8xbf16>, vector<16x8xf32> -> vector<16x8xf32>
    %30 = arith.addf %21, %29 : vector<16x8xf32>
    %c0_i32_25 = arith.constant 0 : i32
    %31 = arith.addi %0, %c0_i32_25 : i32
    %c1_i32_26 = arith.constant 1 : i32
    %32 = arith.addi %31, %c1_i32_26 : i32
    %c0_27 = arith.constant 0 : index
    %33 = arith.index_cast %32 : i32 to index
    %c1_28 = arith.constant 1 : index
    %c0_29 = arith.constant 0 : index
    %34 = vector.load %arg2[%c0_27, %33, %c1_28, %c0_29] : memref<1x17x17x16xbf16, #tpu.memory_space<vmem>>, vector<1x1x16x16xbf16>
    %35 = vector.shape_cast %34 : vector<1x1x16x16xbf16> to vector<16x16xbf16>
    %c3 = arith.constant 3 : index
    %c0_30 = arith.constant 0 : index
    %c0_31 = arith.constant 0 : index
    %36 = vector.load %arg3[%c3, %c0_30, %c0_31] : memref<4x16x8xbf16, #tpu.memory_space<vmem>>, vector<1x16x8xbf16>
    %37 = vector.shape_cast %36 : vector<1x16x8xbf16> to vector<16x8xbf16>
    %cst_32 = arith.constant dense<0.000000e+00> : vector<16x8xf32>
    %38 = tpu.matmul %35, %37, %cst_32 {dimension_numbers = #tpu.dot_dimension_numbers<[1], [0], [0], [1], [0, 0, 1, 1], [], []>} : vector<16x16xbf16>, vector<16x8xbf16>, vector<16x8xf32> -> vector<16x8xf32>
    %39 = arith.addf %30, %38 : vector<16x8xf32>
    %40 = vector.broadcast %2 : vector<1x8xf32> to vector<16x8xf32>
    %41 = arith.addf %39, %40 : vector<16x8xf32>
    %cst_33 = arith.constant 0.000000e+00 : f32
    %42 = vector.broadcast %cst_33 : f32 to vector<16x8xf32>
    %43 = arith.cmpf ogt, %41, %42 : vector<16x8xf32>
    %cst_34 = arith.constant 2.000000e-01 : f32
    %44 = vector.broadcast %cst_34 : f32 to vector<16x8xf32>
    %45 = arith.mulf %44, %41 : vector<16x8xf32>
    %46 = arith.select %43, %41, %45 : vector<16x8xi1>, vector<16x8xf32>
    %47 = arith.truncf %46 : vector<16x8xf32> to vector<16x8xbf16>
    %c0_35 = arith.constant 0 : index
    %c0_36 = arith.constant 0 : index
    %c0_37 = arith.constant 0 : index
    %c0_38 = arith.constant 0 : index
    %48 = vector.load %arg5[%c0_35, %c0_36, %c0_37, %c0_38] : memref<1x8x16x8xbf16, #tpu.memory_space<vmem>>, vector<1x1x16x8xbf16>
    %49 = vector.shape_cast %48 : vector<1x1x16x8xbf16> to vector<16x8xbf16>
    %50 = vector.shape_cast %47 : vector<16x8xbf16> to vector<1x1x16x8xbf16>
    tpu.vector_store %arg5[%c0_35, %c0_36, %c0_37, %c0_38], %50 {strides = array<i32>} : memref<1x8x16x8xbf16, #tpu.memory_space<vmem>>, vector<1x1x16x8xbf16>,
    %cst_39 = arith.constant 0.000000e+00 : f32
    %51 = vector.broadcast %cst_39 : f32 to vector<16x8xf32>
    %c1_i32_40 = arith.constant 1 : i32
    %52 = arith.addi %0, %c1_i32_40 : i32
    %c0_i32_41 = arith.constant 0 : i32
    %53 = arith.addi %52, %c0_i32_41 : i32
    %c0_42 = arith.constant 0 : index
    %54 = arith.index_cast %53 : i32 to index
    %c0_43 = arith.constant 0 : index
    %c0_44 = arith.constant 0 : index
    %55 = vector.load %arg2[%c0_42, %54, %c0_43, %c0_44] : memref<1x17x17x16xbf16, #tpu.memory_space<vmem>>, vector<1x1x16x16xbf16>
    %56 = vector.shape_cast %55 : vector<1x1x16x16xbf16> to vector<16x16xbf16>
    %c0_45 = arith.constant 0 : index
    %c0_46 = arith.constant 0 : index
    %c0_47 = arith.constant 0 : index
    %57 = vector.load %arg3[%c0_45, %c0_46, %c0_47] : memref<4x16x8xbf16, #tpu.memory_space<vmem>>, vector<1x16x8xbf16>
    %58 = vector.shape_cast %57 : vector<1x16x8xbf16> to vector<16x8xbf16>
    %cst_48 = arith.constant dense<0.000000e+00> : vector<16x8xf32>
    %59 = tpu.matmul %56, %58, %cst_48 {dimension_numbers = #tpu.dot_dimension_numbers<[1], [0], [0], [1], [0, 0, 1, 1], [], []>} : vector<16x16xbf16>, vector<16x8xbf16>, vector<16x8xf32> -> vector<16x8xf32>
    %60 = arith.addf %51, %59 : vector<16x8xf32>
    %c1_i32_49 = arith.constant 1 : i32
    %61 = arith.addi %0, %c1_i32_49 : i32
    %c0_i32_50 = arith.constant 0 : i32
    %62 = arith.addi %61, %c0_i32_50 : i32
    %c0_51 = arith.constant 0 : index
    %63 = arith.index_cast %62 : i32 to index
    %c1_52 = arith.constant 1 : index
    %c0_53 = arith.constant 0 : index
    %64 = vector.load %arg2[%c0_51, %63, %c1_52, %c0_53] : memref<1x17x17x16xbf16, #tpu.memory_space<vmem>>, vector<1x1x16x16xbf16>
    %65 = vector.shape_cast %64 : vector<1x1x16x16xbf16> to vector<16x16xbf16>
    %c1_54 = arith.constant 1 : index
    %c0_55 = arith.constant 0 : index
    %c0_56 = arith.constant 0 : index
    %66 = vector.load %arg3[%c1_54, %c0_55, %c0_56] : memref<4x16x8xbf16, #tpu.memory_space<vmem>>, vector<1x16x8xbf16>
    %67 = vector.shape_cast %66 : vector<1x16x8xbf16> to vector<16x8xbf16>
    %cst_57 = arith.constant dense<0.000000e+00> : vector<16x8xf32>
    %68 = tpu.matmul %65, %67, %cst_57 {dimension_numbers = #tpu.dot_dimension_numbers<[1], [0], [0], [1], [0, 0, 1, 1], [], []>} : vector<16x16xbf16>, vector<16x8xbf16>, vector<16x8xf32> -> vector<16x8xf32>
    %69 = arith.addf %60, %68 : vector<16x8xf32>
    %c1_i32_58 = arith.constant 1 : i32
    %70 = arith.addi %0, %c1_i32_58 : i32
    %c1_i32_59 = arith.constant 1 : i32
    %71 = arith.addi %70, %c1_i32_59 : i32
    %c0_60 = arith.constant 0 : index
    %72 = arith.index_cast %71 : i32 to index
    %c0_61 = arith.constant 0 : index
    %c0_62 = arith.constant 0 : index
    %73 = vector.load %arg2[%c0_60, %72, %c0_61, %c0_62] : memref<1x17x17x16xbf16, #tpu.memory_space<vmem>>, vector<1x1x16x16xbf16>
    %74 = vector.shape_cast %73 : vector<1x1x16x16xbf16> to vector<16x16xbf16>
    %c2_63 = arith.constant 2 : index
    %c0_64 = arith.constant 0 : index
    %c0_65 = arith.constant 0 : index
    %75 = vector.load %arg3[%c2_63, %c0_64, %c0_65] : memref<4x16x8xbf16, #tpu.memory_space<vmem>>, vector<1x16x8xbf16>
    %76 = vector.shape_cast %75 : vector<1x16x8xbf16> to vector<16x8xbf16>
    %cst_66 = arith.constant dense<0.000000e+00> : vector<16x8xf32>
    %77 = tpu.matmul %74, %76, %cst_66 {dimension_numbers = #tpu.dot_dimension_numbers<[1], [0], [0], [1], [0, 0, 1, 1], [], []>} : vector<16x16xbf16>, vector<16x8xbf16>, vector<16x8xf32> -> vector<16x8xf32>
    %78 = arith.addf %69, %77 : vector<16x8xf32>
    %c1_i32_67 = arith.constant 1 : i32
    %79 = arith.addi %0, %c1_i32_67 : i32
    %c1_i32_68 = arith.constant 1 : i32
    %80 = arith.addi %79, %c1_i32_68 : i32
    %c0_69 = arith.constant 0 : index
    %81 = arith.index_cast %80 : i32 to index
    %c1_70 = arith.constant 1 : index
    %c0_71 = arith.constant 0 : index
    %82 = vector.load %arg2[%c0_69, %81, %c1_70, %c0_71] : memref<1x17x17x16xbf16, #tpu.memory_space<vmem>>, vector<1x1x16x16xbf16>
    %83 = vector.shape_cast %82 : vector<1x1x16x16xbf16> to vector<16x16xbf16>
    %c3_72 = arith.constant 3 : index
    %c0_73 = arith.constant 0 : index
    %c0_74 = arith.constant 0 : index
    %84 = vector.load %arg3[%c3_72, %c0_73, %c0_74] : memref<4x16x8xbf16, #tpu.memory_space<vmem>>, vector<1x16x8xbf16>
    %85 = vector.shape_cast %84 : vector<1x16x8xbf16> to vector<16x8xbf16>
    %cst_75 = arith.constant dense<0.000000e+00> : vector<16x8xf32>
    %86 = tpu.matmul %83, %85, %cst_75 {dimension_numbers = #tpu.dot_dimension_numbers<[1], [0], [0], [1], [0, 0, 1, 1], [], []>} : vector<16x16xbf16>, vector<16x8xbf16>, vector<16x8xf32> -> vector<16x8xf32>
    %87 = arith.addf %78, %86 : vector<16x8xf32>
    %88 = vector.broadcast %2 : vector<1x8xf32> to vector<16x8xf32>
    %89 = arith.addf %87, %88 : vector<16x8xf32>
    %cst_76 = arith.constant 0.000000e+00 : f32
    %90 = vector.broadcast %cst_76 : f32 to vector<16x8xf32>
    %91 = arith.cmpf ogt, %89, %90 : vector<16x8xf32>
    %cst_77 = arith.constant 2.000000e-01 : f32
    %92 = vector.broadcast %cst_77 : f32 to vector<16x8xf32>
    %93 = arith.mulf %92, %89 : vector<16x8xf32>
    %94 = arith.select %91, %89, %93 : vector<16x8xi1>, vector<16x8xf32>
    %95 = arith.truncf %94 : vector<16x8xf32> to vector<16x8xbf16>
    %c0_78 = arith.constant 0 : index
    %c1_79 = arith.constant 1 : index
    %c0_80 = arith.constant 0 : index
    %c0_81 = arith.constant 0 : index
    %96 = vector.load %arg5[%c0_78, %c1_79, %c0_80, %c0_81] : memref<1x8x16x8xbf16, #tpu.memory_space<vmem>>, vector<1x1x16x8xbf16>
    %97 = vector.shape_cast %96 : vector<1x1x16x8xbf16> to vector<16x8xbf16>
    %98 = vector.shape_cast %95 : vector<16x8xbf16> to vector<1x1x16x8xbf16>
    tpu.vector_store %arg5[%c0_78, %c1_79, %c0_80, %c0_81], %98 {strides = array<i32>} : memref<1x8x16x8xbf16, #tpu.memory_space<vmem>>, vector<1x1x16x8xbf16>,
    %cst_82 = arith.constant 0.000000e+00 : f32
    %99 = vector.broadcast %cst_82 : f32 to vector<16x8xf32>
    %c2_i32 = arith.constant 2 : i32
    %100 = arith.addi %0, %c2_i32 : i32
    %c0_i32_83 = arith.constant 0 : i32
    %101 = arith.addi %100, %c0_i32_83 : i32
    %c0_84 = arith.constant 0 : index
    %102 = arith.index_cast %101 : i32 to index
    %c0_85 = arith.constant 0 : index
    %c0_86 = arith.constant 0 : index
    %103 = vector.load %arg2[%c0_84, %102, %c0_85, %c0_86] : memref<1x17x17x16xbf16, #tpu.memory_space<vmem>>, vector<1x1x16x16xbf16>
    %104 = vector.shape_cast %103 : vector<1x1x16x16xbf16> to vector<16x16xbf16>
    %c0_87 = arith.constant 0 : index
    %c0_88 = arith.constant 0 : index
    %c0_89 = arith.constant 0 : index
    %105 = vector.load %arg3[%c0_87, %c0_88, %c0_89] : memref<4x16x8xbf16, #tpu.memory_space<vmem>>, vector<1x16x8xbf16>
    %106 = vector.shape_cast %105 : vector<1x16x8xbf16> to vector<16x8xbf16>
    %cst_90 = arith.constant dense<0.000000e+00> : vector<16x8xf32>
    %107 = tpu.matmul %104, %106, %cst_90 {dimension_numbers = #tpu.dot_dimension_numbers<[1], [0], [0], [1], [0, 0, 1, 1], [], []>} : vector<16x16xbf16>, vector<16x8xbf16>, vector<16x8xf32> -> vector<16x8xf32>
    %108 = arith.addf %99, %107 : vector<16x8xf32>
    %c2_i32_91 = arith.constant 2 : i32
    %109 = arith.addi %0, %c2_i32_91 : i32
    %c0_i32_92 = arith.constant 0 : i32
    %110 = arith.addi %109, %c0_i32_92 : i32
    %c0_93 = arith.constant 0 : index
    %111 = arith.index_cast %110 : i32 to index
    %c1_94 = arith.constant 1 : index
    %c0_95 = arith.constant 0 : index
    %112 = vector.load %arg2[%c0_93, %111, %c1_94, %c0_95] : memref<1x17x17x16xbf16, #tpu.memory_space<vmem>>, vector<1x1x16x16xbf16>
    %113 = vector.shape_cast %112 : vector<1x1x16x16xbf16> to vector<16x16xbf16>
    %c1_96 = arith.constant 1 : index
    %c0_97 = arith.constant 0 : index
    %c0_98 = arith.constant 0 : index
    %114 = vector.load %arg3[%c1_96, %c0_97, %c0_98] : memref<4x16x8xbf16, #tpu.memory_space<vmem>>, vector<1x16x8xbf16>
    %115 = vector.shape_cast %114 : vector<1x16x8xbf16> to vector<16x8xbf16>
    %cst_99 = arith.constant dense<0.000000e+00> : vector<16x8xf32>
    %116 = tpu.matmul %113, %115, %cst_99 {dimension_numbers = #tpu.dot_dimension_numbers<[1], [0], [0], [1], [0, 0, 1, 1], [], []>} : vector<16x16xbf16>, vector<16x8xbf16>, vector<16x8xf32> -> vector<16x8xf32>
    %117 = arith.addf %108, %116 : vector<16x8xf32>
    %c2_i32_100 = arith.constant 2 : i32
    %118 = arith.addi %0, %c2_i32_100 : i32
    %c1_i32_101 = arith.constant 1 : i32
    %119 = arith.addi %118, %c1_i32_101 : i32
    %c0_102 = arith.constant 0 : index
    %120 = arith.index_cast %119 : i32 to index
    %c0_103 = arith.constant 0 : index
    %c0_104 = arith.constant 0 : index
    %121 = vector.load %arg2[%c0_102, %120, %c0_103, %c0_104] : memref<1x17x17x16xbf16, #tpu.memory_space<vmem>>, vector<1x1x16x16xbf16>
    %122 = vector.shape_cast %121 : vector<1x1x16x16xbf16> to vector<16x16xbf16>
    %c2_105 = arith.constant 2 : index
    %c0_106 = arith.constant 0 : index
    %c0_107 = arith.constant 0 : index
    %123 = vector.load %arg3[%c2_105, %c0_106, %c0_107] : memref<4x16x8xbf16, #tpu.memory_space<vmem>>, vector<1x16x8xbf16>
    %124 = vector.shape_cast %123 : vector<1x16x8xbf16> to vector<16x8xbf16>
    %cst_108 = arith.constant dense<0.000000e+00> : vector<16x8xf32>
    %125 = tpu.matmul %122, %124, %cst_108 {dimension_numbers = #tpu.dot_dimension_numbers<[1], [0], [0], [1], [0, 0, 1, 1], [], []>} : vector<16x16xbf16>, vector<16x8xbf16>, vector<16x8xf32> -> vector<16x8xf32>
    %126 = arith.addf %117, %125 : vector<16x8xf32>
    %c2_i32_109 = arith.constant 2 : i32
    %127 = arith.addi %0, %c2_i32_109 : i32
    %c1_i32_110 = arith.constant 1 : i32
    %128 = arith.addi %127, %c1_i32_110 : i32
    %c0_111 = arith.constant 0 : index
    %129 = arith.index_cast %128 : i32 to index
    %c1_112 = arith.constant 1 : index
    %c0_113 = arith.constant 0 : index
    %130 = vector.load %arg2[%c0_111, %129, %c1_112, %c0_113] : memref<1x17x17x16xbf16, #tpu.memory_space<vmem>>, vector<1x1x16x16xbf16>
    %131 = vector.shape_cast %130 : vector<1x1x16x16xbf16> to vector<16x16xbf16>
    %c3_114 = arith.constant 3 : index
    %c0_115 = arith.constant 0 : index
    %c0_116 = arith.constant 0 : index
    %132 = vector.load %arg3[%c3_114, %c0_115, %c0_116] : memref<4x16x8xbf16, #tpu.memory_space<vmem>>, vector<1x16x8xbf16>
    %133 = vector.shape_cast %132 : vector<1x16x8xbf16> to vector<16x8xbf16>
    %cst_117 = arith.constant dense<0.000000e+00> : vector<16x8xf32>
    %134 = tpu.matmul %131, %133, %cst_117 {dimension_numbers = #tpu.dot_dimension_numbers<[1], [0], [0], [1], [0, 0, 1, 1], [], []>} : vector<16x16xbf16>, vector<16x8xbf16>, vector<16x8xf32> -> vector<16x8xf32>
    %135 = arith.addf %126, %134 : vector<16x8xf32>
    %136 = vector.broadcast %2 : vector<1x8xf32> to vector<16x8xf32>
    %137 = arith.addf %135, %136 : vector<16x8xf32>
    %cst_118 = arith.constant 0.000000e+00 : f32
    %138 = vector.broadcast %cst_118 : f32 to vector<16x8xf32>
    %139 = arith.cmpf ogt, %137, %138 : vector<16x8xf32>
    %cst_119 = arith.constant 2.000000e-01 : f32
    %140 = vector.broadcast %cst_119 : f32 to vector<16x8xf32>
    %141 = arith.mulf %140, %137 : vector<16x8xf32>
    %142 = arith.select %139, %137, %141 : vector<16x8xi1>, vector<16x8xf32>
    %143 = arith.truncf %142 : vector<16x8xf32> to vector<16x8xbf16>
    %c0_120 = arith.constant 0 : index
    %c2_121 = arith.constant 2 : index
    %c0_122 = arith.constant 0 : index
    %c0_123 = arith.constant 0 : index
    %144 = vector.load %arg5[%c0_120, %c2_121, %c0_122, %c0_123] : memref<1x8x16x8xbf16, #tpu.memory_space<vmem>>, vector<1x1x16x8xbf16>
    %145 = vector.shape_cast %144 : vector<1x1x16x8xbf16> to vector<16x8xbf16>
    %146 = vector.shape_cast %143 : vector<16x8xbf16> to vector<1x1x16x8xbf16>
    tpu.vector_store %arg5[%c0_120, %c2_121, %c0_122, %c0_123], %146 {strides = array<i32>} : memref<1x8x16x8xbf16, #tpu.memory_space<vmem>>, vector<1x1x16x8xbf16>,
    %cst_124 = arith.constant 0.000000e+00 : f32
    %147 = vector.broadcast %cst_124 : f32 to vector<16x8xf32>
    %c3_i32 = arith.constant 3 : i32
    %148 = arith.addi %0, %c3_i32 : i32
    %c0_i32_125 = arith.constant 0 : i32
    %149 = arith.addi %148, %c0_i32_125 : i32
    %c0_126 = arith.constant 0 : index
    %150 = arith.index_cast %149 : i32 to index
    %c0_127 = arith.constant 0 : index
    %c0_128 = arith.constant 0 : index
    %151 = vector.load %arg2[%c0_126, %150, %c0_127, %c0_128] : memref<1x17x17x16xbf16, #tpu.memory_space<vmem>>, vector<1x1x16x16xbf16>
    %152 = vector.shape_cast %151 : vector<1x1x16x16xbf16> to vector<16x16xbf16>
    %c0_129 = arith.constant 0 : index
    %c0_130 = arith.constant 0 : index
    %c0_131 = arith.constant 0 : index
    %153 = vector.load %arg3[%c0_129, %c0_130, %c0_131] : memref<4x16x8xbf16, #tpu.memory_space<vmem>>, vector<1x16x8xbf16>
    %154 = vector.shape_cast %153 : vector<1x16x8xbf16> to vector<16x8xbf16>
    %cst_132 = arith.constant dense<0.000000e+00> : vector<16x8xf32>
    %155 = tpu.matmul %152, %154, %cst_132 {dimension_numbers = #tpu.dot_dimension_numbers<[1], [0], [0], [1], [0, 0, 1, 1], [], []>} : vector<16x16xbf16>, vector<16x8xbf16>, vector<16x8xf32> -> vector<16x8xf32>
    %156 = arith.addf %147, %155 : vector<16x8xf32>
    %c3_i32_133 = arith.constant 3 : i32
    %157 = arith.addi %0, %c3_i32_133 : i32
    %c0_i32_134 = arith.constant 0 : i32
    %158 = arith.addi %157, %c0_i32_134 : i32
    %c0_135 = arith.constant 0 : index
    %159 = arith.index_cast %158 : i32 to index
    %c1_136 = arith.constant 1 : index
    %c0_137 = arith.constant 0 : index
    %160 = vector.load %arg2[%c0_135, %159, %c1_136, %c0_137] : memref<1x17x17x16xbf16, #tpu.memory_space<vmem>>, vector<1x1x16x16xbf16>
    %161 = vector.shape_cast %160 : vector<1x1x16x16xbf16> to vector<16x16xbf16>
    %c1_138 = arith.constant 1 : index
    %c0_139 = arith.constant 0 : index
    %c0_140 = arith.constant 0 : index
    %162 = vector.load %arg3[%c1_138, %c0_139, %c0_140] : memref<4x16x8xbf16, #tpu.memory_space<vmem>>, vector<1x16x8xbf16>
    %163 = vector.shape_cast %162 : vector<1x16x8xbf16> to vector<16x8xbf16>
    %cst_141 = arith.constant dense<0.000000e+00> : vector<16x8xf32>
    %164 = tpu.matmul %161, %163, %cst_141 {dimension_numbers = #tpu.dot_dimension_numbers<[1], [0], [0], [1], [0, 0, 1, 1], [], []>} : vector<16x16xbf16>, vector<16x8xbf16>, vector<16x8xf32> -> vector<16x8xf32>
    %165 = arith.addf %156, %164 : vector<16x8xf32>
    %c3_i32_142 = arith.constant 3 : i32
    %166 = arith.addi %0, %c3_i32_142 : i32
    %c1_i32_143 = arith.constant 1 : i32
    %167 = arith.addi %166, %c1_i32_143 : i32
    %c0_144 = arith.constant 0 : index
    %168 = arith.index_cast %167 : i32 to index
    %c0_145 = arith.constant 0 : index
    %c0_146 = arith.constant 0 : index
    %169 = vector.load %arg2[%c0_144, %168, %c0_145, %c0_146] : memref<1x17x17x16xbf16, #tpu.memory_space<vmem>>, vector<1x1x16x16xbf16>
    %170 = vector.shape_cast %169 : vector<1x1x16x16xbf16> to vector<16x16xbf16>
    %c2_147 = arith.constant 2 : index
    %c0_148 = arith.constant 0 : index
    %c0_149 = arith.constant 0 : index
    %171 = vector.load %arg3[%c2_147, %c0_148, %c0_149] : memref<4x16x8xbf16, #tpu.memory_space<vmem>>, vector<1x16x8xbf16>
    %172 = vector.shape_cast %171 : vector<1x16x8xbf16> to vector<16x8xbf16>
    %cst_150 = arith.constant dense<0.000000e+00> : vector<16x8xf32>
    %173 = tpu.matmul %170, %172, %cst_150 {dimension_numbers = #tpu.dot_dimension_numbers<[1], [0], [0], [1], [0, 0, 1, 1], [], []>} : vector<16x16xbf16>, vector<16x8xbf16>, vector<16x8xf32> -> vector<16x8xf32>
    %174 = arith.addf %165, %173 : vector<16x8xf32>
    %c3_i32_151 = arith.constant 3 : i32
    %175 = arith.addi %0, %c3_i32_151 : i32
    %c1_i32_152 = arith.constant 1 : i32
    %176 = arith.addi %175, %c1_i32_152 : i32
    %c0_153 = arith.constant 0 : index
    %177 = arith.index_cast %176 : i32 to index
    %c1_154 = arith.constant 1 : index
    %c0_155 = arith.constant 0 : index
    %178 = vector.load %arg2[%c0_153, %177, %c1_154, %c0_155] : memref<1x17x17x16xbf16, #tpu.memory_space<vmem>>, vector<1x1x16x16xbf16>
    %179 = vector.shape_cast %178 : vector<1x1x16x16xbf16> to vector<16x16xbf16>
    %c3_156 = arith.constant 3 : index
    %c0_157 = arith.constant 0 : index
    %c0_158 = arith.constant 0 : index
    %180 = vector.load %arg3[%c3_156, %c0_157, %c0_158] : memref<4x16x8xbf16, #tpu.memory_space<vmem>>, vector<1x16x8xbf16>
    %181 = vector.shape_cast %180 : vector<1x16x8xbf16> to vector<16x8xbf16>
    %cst_159 = arith.constant dense<0.000000e+00> : vector<16x8xf32>
    %182 = tpu.matmul %179, %181, %cst_159 {dimension_numbers = #tpu.dot_dimension_numbers<[1], [0], [0], [1], [0, 0, 1, 1], [], []>} : vector<16x16xbf16>, vector<16x8xbf16>, vector<16x8xf32> -> vector<16x8xf32>
    %183 = arith.addf %174, %182 : vector<16x8xf32>
    %184 = vector.broadcast %2 : vector<1x8xf32> to vector<16x8xf32>
    %185 = arith.addf %183, %184 : vector<16x8xf32>
    %cst_160 = arith.constant 0.000000e+00 : f32
    %186 = vector.broadcast %cst_160 : f32 to vector<16x8xf32>
    %187 = arith.cmpf ogt, %185, %186 : vector<16x8xf32>
    %cst_161 = arith.constant 2.000000e-01 : f32
    %188 = vector.broadcast %cst_161 : f32 to vector<16x8xf32>
    %189 = arith.mulf %188, %185 : vector<16x8xf32>
    %190 = arith.select %187, %185, %189 : vector<16x8xi1>, vector<16x8xf32>
    %191 = arith.truncf %190 : vector<16x8xf32> to vector<16x8xbf16>
    %c0_162 = arith.constant 0 : index
    %c3_163 = arith.constant 3 : index
    %c0_164 = arith.constant 0 : index
    %c0_165 = arith.constant 0 : index
    %192 = vector.load %arg5[%c0_162, %c3_163, %c0_164, %c0_165] : memref<1x8x16x8xbf16, #tpu.memory_space<vmem>>, vector<1x1x16x8xbf16>
    %193 = vector.shape_cast %192 : vector<1x1x16x8xbf16> to vector<16x8xbf16>
    %194 = vector.shape_cast %191 : vector<16x8xbf16> to vector<1x1x16x8xbf16>
    tpu.vector_store %arg5[%c0_162, %c3_163, %c0_164, %c0_165], %194 {strides = array<i32>} : memref<1x8x16x8xbf16, #tpu.memory_space<vmem>>, vector<1x1x16x8xbf16>,
    %cst_166 = arith.constant 0.000000e+00 : f32
    %195 = vector.broadcast %cst_166 : f32 to vector<16x8xf32>
    %c4_i32 = arith.constant 4 : i32
    %196 = arith.addi %0, %c4_i32 : i32
    %c0_i32_167 = arith.constant 0 : i32
    %197 = arith.addi %196, %c0_i32_167 : i32
    %c0_168 = arith.constant 0 : index
    %198 = arith.index_cast %197 : i32 to index
    %c0_169 = arith.constant 0 : index
    %c0_170 = arith.constant 0 : index
    %199 = vector.load %arg2[%c0_168, %198, %c0_169, %c0_170] : memref<1x17x17x16xbf16, #tpu.memory_space<vmem>>, vector<1x1x16x16xbf16>
    %200 = vector.shape_cast %199 : vector<1x1x16x16xbf16> to vector<16x16xbf16>
    %c0_171 = arith.constant 0 : index
    %c0_172 = arith.constant 0 : index
    %c0_173 = arith.constant 0 : index
    %201 = vector.load %arg3[%c0_171, %c0_172, %c0_173] : memref<4x16x8xbf16, #tpu.memory_space<vmem>>, vector<1x16x8xbf16>
    %202 = vector.shape_cast %201 : vector<1x16x8xbf16> to vector<16x8xbf16>
    %cst_174 = arith.constant dense<0.000000e+00> : vector<16x8xf32>
    %203 = tpu.matmul %200, %202, %cst_174 {dimension_numbers = #tpu.dot_dimension_numbers<[1], [0], [0], [1], [0, 0, 1, 1], [], []>} : vector<16x16xbf16>, vector<16x8xbf16>, vector<16x8xf32> -> vector<16x8xf32>
    %204 = arith.addf %195, %203 : vector<16x8xf32>
    %c4_i32_175 = arith.constant 4 : i32
    %205 = arith.addi %0, %c4_i32_175 : i32
    %c0_i32_176 = arith.constant 0 : i32
    %206 = arith.addi %205, %c0_i32_176 : i32
    %c0_177 = arith.constant 0 : index
    %207 = arith.index_cast %206 : i32 to index
    %c1_178 = arith.constant 1 : index
    %c0_179 = arith.constant 0 : index
    %208 = vector.load %arg2[%c0_177, %207, %c1_178, %c0_179] : memref<1x17x17x16xbf16, #tpu.memory_space<vmem>>, vector<1x1x16x16xbf16>
    %209 = vector.shape_cast %208 : vector<1x1x16x16xbf16> to vector<16x16xbf16>
    %c1_180 = arith.constant 1 : index
    %c0_181 = arith.constant 0 : index
    %c0_182 = arith.constant 0 : index
    %210 = vector.load %arg3[%c1_180, %c0_181, %c0_182] : memref<4x16x8xbf16, #tpu.memory_space<vmem>>, vector<1x16x8xbf16>
    %211 = vector.shape_cast %210 : vector<1x16x8xbf16> to vector<16x8xbf16>
    %cst_183 = arith.constant dense<0.000000e+00> : vector<16x8xf32>
    %212 = tpu.matmul %209, %211, %cst_183 {dimension_numbers = #tpu.dot_dimension_numbers<[1], [0], [0], [1], [0, 0, 1, 1], [], []>} : vector<16x16xbf16>, vector<16x8xbf16>, vector<16x8xf32> -> vector<16x8xf32>
    %213 = arith.addf %204, %212 : vector<16x8xf32>
    %c4_i32_184 = arith.constant 4 : i32
    %214 = arith.addi %0, %c4_i32_184 : i32
    %c1_i32_185 = arith.constant 1 : i32
    %215 = arith.addi %214, %c1_i32_185 : i32
    %c0_186 = arith.constant 0 : index
    %216 = arith.index_cast %215 : i32 to index
    %c0_187 = arith.constant 0 : index
    %c0_188 = arith.constant 0 : index
    %217 = vector.load %arg2[%c0_186, %216, %c0_187, %c0_188] : memref<1x17x17x16xbf16, #tpu.memory_space<vmem>>, vector<1x1x16x16xbf16>
    %218 = vector.shape_cast %217 : vector<1x1x16x16xbf16> to vector<16x16xbf16>
    %c2_189 = arith.constant 2 : index
    %c0_190 = arith.constant 0 : index
    %c0_191 = arith.constant 0 : index
    %219 = vector.load %arg3[%c2_189, %c0_190, %c0_191] : memref<4x16x8xbf16, #tpu.memory_space<vmem>>, vector<1x16x8xbf16>
    %220 = vector.shape_cast %219 : vector<1x16x8xbf16> to vector<16x8xbf16>
    %cst_192 = arith.constant dense<0.000000e+00> : vector<16x8xf32>
    %221 = tpu.matmul %218, %220, %cst_192 {dimension_numbers = #tpu.dot_dimension_numbers<[1], [0], [0], [1], [0, 0, 1, 1], [], []>} : vector<16x16xbf16>, vector<16x8xbf16>, vector<16x8xf32> -> vector<16x8xf32>
    %222 = arith.addf %213, %221 : vector<16x8xf32>
    %c4_i32_193 = arith.constant 4 : i32
    %223 = arith.addi %0, %c4_i32_193 : i32
    %c1_i32_194 = arith.constant 1 : i32
    %224 = arith.addi %223, %c1_i32_194 : i32
    %c0_195 = arith.constant 0 : index
    %225 = arith.index_cast %224 : i32 to index
    %c1_196 = arith.constant 1 : index
    %c0_197 = arith.constant 0 : index
    %226 = vector.load %arg2[%c0_195, %225, %c1_196, %c0_197] : memref<1x17x17x16xbf16, #tpu.memory_space<vmem>>, vector<1x1x16x16xbf16>
    %227 = vector.shape_cast %226 : vector<1x1x16x16xbf16> to vector<16x16xbf16>
    %c3_198 = arith.constant 3 : index
    %c0_199 = arith.constant 0 : index
    %c0_200 = arith.constant 0 : index
    %228 = vector.load %arg3[%c3_198, %c0_199, %c0_200] : memref<4x16x8xbf16, #tpu.memory_space<vmem>>, vector<1x16x8xbf16>
    %229 = vector.shape_cast %228 : vector<1x16x8xbf16> to vector<16x8xbf16>
    %cst_201 = arith.constant dense<0.000000e+00> : vector<16x8xf32>
    %230 = tpu.matmul %227, %229, %cst_201 {dimension_numbers = #tpu.dot_dimension_numbers<[1], [0], [0], [1], [0, 0, 1, 1], [], []>} : vector<16x16xbf16>, vector<16x8xbf16>, vector<16x8xf32> -> vector<16x8xf32>
    %231 = arith.addf %222, %230 : vector<16x8xf32>
    %232 = vector.broadcast %2 : vector<1x8xf32> to vector<16x8xf32>
    %233 = arith.addf %231, %232 : vector<16x8xf32>
    %cst_202 = arith.constant 0.000000e+00 : f32
    %234 = vector.broadcast %cst_202 : f32 to vector<16x8xf32>
    %235 = arith.cmpf ogt, %233, %234 : vector<16x8xf32>
    %cst_203 = arith.constant 2.000000e-01 : f32
    %236 = vector.broadcast %cst_203 : f32 to vector<16x8xf32>
    %237 = arith.mulf %236, %233 : vector<16x8xf32>
    %238 = arith.select %235, %233, %237 : vector<16x8xi1>, vector<16x8xf32>
    %239 = arith.truncf %238 : vector<16x8xf32> to vector<16x8xbf16>
    %c0_204 = arith.constant 0 : index
    %c4 = arith.constant 4 : index
    %c0_205 = arith.constant 0 : index
    %c0_206 = arith.constant 0 : index
    %240 = vector.load %arg5[%c0_204, %c4, %c0_205, %c0_206] : memref<1x8x16x8xbf16, #tpu.memory_space<vmem>>, vector<1x1x16x8xbf16>
    %241 = vector.shape_cast %240 : vector<1x1x16x8xbf16> to vector<16x8xbf16>
    %242 = vector.shape_cast %239 : vector<16x8xbf16> to vector<1x1x16x8xbf16>
    tpu.vector_store %arg5[%c0_204, %c4, %c0_205, %c0_206], %242 {strides = array<i32>} : memref<1x8x16x8xbf16, #tpu.memory_space<vmem>>, vector<1x1x16x8xbf16>,
    %cst_207 = arith.constant 0.000000e+00 : f32
    %243 = vector.broadcast %cst_207 : f32 to vector<16x8xf32>
    %c5_i32 = arith.constant 5 : i32
    %244 = arith.addi %0, %c5_i32 : i32
    %c0_i32_208 = arith.constant 0 : i32
    %245 = arith.addi %244, %c0_i32_208 : i32
    %c0_209 = arith.constant 0 : index
    %246 = arith.index_cast %245 : i32 to index
    %c0_210 = arith.constant 0 : index
    %c0_211 = arith.constant 0 : index
    %247 = vector.load %arg2[%c0_209, %246, %c0_210, %c0_211] : memref<1x17x17x16xbf16, #tpu.memory_space<vmem>>, vector<1x1x16x16xbf16>
    %248 = vector.shape_cast %247 : vector<1x1x16x16xbf16> to vector<16x16xbf16>
    %c0_212 = arith.constant 0 : index
    %c0_213 = arith.constant 0 : index
    %c0_214 = arith.constant 0 : index
    %249 = vector.load %arg3[%c0_212, %c0_213, %c0_214] : memref<4x16x8xbf16, #tpu.memory_space<vmem>>, vector<1x16x8xbf16>
    %250 = vector.shape_cast %249 : vector<1x16x8xbf16> to vector<16x8xbf16>
    %cst_215 = arith.constant dense<0.000000e+00> : vector<16x8xf32>
    %251 = tpu.matmul %248, %250, %cst_215 {dimension_numbers = #tpu.dot_dimension_numbers<[1], [0], [0], [1], [0, 0, 1, 1], [], []>} : vector<16x16xbf16>, vector<16x8xbf16>, vector<16x8xf32> -> vector<16x8xf32>
    %252 = arith.addf %243, %251 : vector<16x8xf32>
    %c5_i32_216 = arith.constant 5 : i32
    %253 = arith.addi %0, %c5_i32_216 : i32
    %c0_i32_217 = arith.constant 0 : i32
    %254 = arith.addi %253, %c0_i32_217 : i32
    %c0_218 = arith.constant 0 : index
    %255 = arith.index_cast %254 : i32 to index
    %c1_219 = arith.constant 1 : index
    %c0_220 = arith.constant 0 : index
    %256 = vector.load %arg2[%c0_218, %255, %c1_219, %c0_220] : memref<1x17x17x16xbf16, #tpu.memory_space<vmem>>, vector<1x1x16x16xbf16>
    %257 = vector.shape_cast %256 : vector<1x1x16x16xbf16> to vector<16x16xbf16>
    %c1_221 = arith.constant 1 : index
    %c0_222 = arith.constant 0 : index
    %c0_223 = arith.constant 0 : index
    %258 = vector.load %arg3[%c1_221, %c0_222, %c0_223] : memref<4x16x8xbf16, #tpu.memory_space<vmem>>, vector<1x16x8xbf16>
    %259 = vector.shape_cast %258 : vector<1x16x8xbf16> to vector<16x8xbf16>
    %cst_224 = arith.constant dense<0.000000e+00> : vector<16x8xf32>
    %260 = tpu.matmul %257, %259, %cst_224 {dimension_numbers = #tpu.dot_dimension_numbers<[1], [0], [0], [1], [0, 0, 1, 1], [], []>} : vector<16x16xbf16>, vector<16x8xbf16>, vector<16x8xf32> -> vector<16x8xf32>
    %261 = arith.addf %252, %260 : vector<16x8xf32>
    %c5_i32_225 = arith.constant 5 : i32
    %262 = arith.addi %0, %c5_i32_225 : i32
    %c1_i32_226 = arith.constant 1 : i32
    %263 = arith.addi %262, %c1_i32_226 : i32
    %c0_227 = arith.constant 0 : index
    %264 = arith.index_cast %263 : i32 to index
    %c0_228 = arith.constant 0 : index
    %c0_229 = arith.constant 0 : index
    %265 = vector.load %arg2[%c0_227, %264, %c0_228, %c0_229] : memref<1x17x17x16xbf16, #tpu.memory_space<vmem>>, vector<1x1x16x16xbf16>
    %266 = vector.shape_cast %265 : vector<1x1x16x16xbf16> to vector<16x16xbf16>
    %c2_230 = arith.constant 2 : index
    %c0_231 = arith.constant 0 : index
    %c0_232 = arith.constant 0 : index
    %267 = vector.load %arg3[%c2_230, %c0_231, %c0_232] : memref<4x16x8xbf16, #tpu.memory_space<vmem>>, vector<1x16x8xbf16>
    %268 = vector.shape_cast %267 : vector<1x16x8xbf16> to vector<16x8xbf16>
    %cst_233 = arith.constant dense<0.000000e+00> : vector<16x8xf32>
    %269 = tpu.matmul %266, %268, %cst_233 {dimension_numbers = #tpu.dot_dimension_numbers<[1], [0], [0], [1], [0, 0, 1, 1], [], []>} : vector<16x16xbf16>, vector<16x8xbf16>, vector<16x8xf32> -> vector<16x8xf32>
    %270 = arith.addf %261, %269 : vector<16x8xf32>
    %c5_i32_234 = arith.constant 5 : i32
    %271 = arith.addi %0, %c5_i32_234 : i32
    %c1_i32_235 = arith.constant 1 : i32
    %272 = arith.addi %271, %c1_i32_235 : i32
    %c0_236 = arith.constant 0 : index
    %273 = arith.index_cast %272 : i32 to index
    %c1_237 = arith.constant 1 : index
    %c0_238 = arith.constant 0 : index
    %274 = vector.load %arg2[%c0_236, %273, %c1_237, %c0_238] : memref<1x17x17x16xbf16, #tpu.memory_space<vmem>>, vector<1x1x16x16xbf16>
    %275 = vector.shape_cast %274 : vector<1x1x16x16xbf16> to vector<16x16xbf16>
    %c3_239 = arith.constant 3 : index
    %c0_240 = arith.constant 0 : index
    %c0_241 = arith.constant 0 : index
    %276 = vector.load %arg3[%c3_239, %c0_240, %c0_241] : memref<4x16x8xbf16, #tpu.memory_space<vmem>>, vector<1x16x8xbf16>
    %277 = vector.shape_cast %276 : vector<1x16x8xbf16> to vector<16x8xbf16>
    %cst_242 = arith.constant dense<0.000000e+00> : vector<16x8xf32>
    %278 = tpu.matmul %275, %277, %cst_242 {dimension_numbers = #tpu.dot_dimension_numbers<[1], [0], [0], [1], [0, 0, 1, 1], [], []>} : vector<16x16xbf16>, vector<16x8xbf16>, vector<16x8xf32> -> vector<16x8xf32>
    %279 = arith.addf %270, %278 : vector<16x8xf32>
    %280 = vector.broadcast %2 : vector<1x8xf32> to vector<16x8xf32>
    %281 = arith.addf %279, %280 : vector<16x8xf32>
    %cst_243 = arith.constant 0.000000e+00 : f32
    %282 = vector.broadcast %cst_243 : f32 to vector<16x8xf32>
    %283 = arith.cmpf ogt, %281, %282 : vector<16x8xf32>
    %cst_244 = arith.constant 2.000000e-01 : f32
    %284 = vector.broadcast %cst_244 : f32 to vector<16x8xf32>
    %285 = arith.mulf %284, %281 : vector<16x8xf32>
    %286 = arith.select %283, %281, %285 : vector<16x8xi1>, vector<16x8xf32>
    %287 = arith.truncf %286 : vector<16x8xf32> to vector<16x8xbf16>
    %c0_245 = arith.constant 0 : index
    %c5 = arith.constant 5 : index
    %c0_246 = arith.constant 0 : index
    %c0_247 = arith.constant 0 : index
    %288 = vector.load %arg5[%c0_245, %c5, %c0_246, %c0_247] : memref<1x8x16x8xbf16, #tpu.memory_space<vmem>>, vector<1x1x16x8xbf16>
    %289 = vector.shape_cast %288 : vector<1x1x16x8xbf16> to vector<16x8xbf16>
    %290 = vector.shape_cast %287 : vector<16x8xbf16> to vector<1x1x16x8xbf16>
    tpu.vector_store %arg5[%c0_245, %c5, %c0_246, %c0_247], %290 {strides = array<i32>} : memref<1x8x16x8xbf16, #tpu.memory_space<vmem>>, vector<1x1x16x8xbf16>,
    %cst_248 = arith.constant 0.000000e+00 : f32
    %291 = vector.broadcast %cst_248 : f32 to vector<16x8xf32>
    %c6_i32 = arith.constant 6 : i32
    %292 = arith.addi %0, %c6_i32 : i32
    %c0_i32_249 = arith.constant 0 : i32
    %293 = arith.addi %292, %c0_i32_249 : i32
    %c0_250 = arith.constant 0 : index
    %294 = arith.index_cast %293 : i32 to index
    %c0_251 = arith.constant 0 : index
    %c0_252 = arith.constant 0 : index
    %295 = vector.load %arg2[%c0_250, %294, %c0_251, %c0_252] : memref<1x17x17x16xbf16, #tpu.memory_space<vmem>>, vector<1x1x16x16xbf16>
    %296 = vector.shape_cast %295 : vector<1x1x16x16xbf16> to vector<16x16xbf16>
    %c0_253 = arith.constant 0 : index
    %c0_254 = arith.constant 0 : index
    %c0_255 = arith.constant 0 : index
    %297 = vector.load %arg3[%c0_253, %c0_254, %c0_255] : memref<4x16x8xbf16, #tpu.memory_space<vmem>>, vector<1x16x8xbf16>
    %298 = vector.shape_cast %297 : vector<1x16x8xbf16> to vector<16x8xbf16>
    %cst_256 = arith.constant dense<0.000000e+00> : vector<16x8xf32>
    %299 = tpu.matmul %296, %298, %cst_256 {dimension_numbers = #tpu.dot_dimension_numbers<[1], [0], [0], [1], [0, 0, 1, 1], [], []>} : vector<16x16xbf16>, vector<16x8xbf16>, vector<16x8xf32> -> vector<16x8xf32>
    %300 = arith.addf %291, %299 : vector<16x8xf32>
    %c6_i32_257 = arith.constant 6 : i32
    %301 = arith.addi %0, %c6_i32_257 : i32
    %c0_i32_258 = arith.constant 0 : i32
    %302 = arith.addi %301, %c0_i32_258 : i32
    %c0_259 = arith.constant 0 : index
    %303 = arith.index_cast %302 : i32 to index
    %c1_260 = arith.constant 1 : index
    %c0_261 = arith.constant 0 : index
    %304 = vector.load %arg2[%c0_259, %303, %c1_260, %c0_261] : memref<1x17x17x16xbf16, #tpu.memory_space<vmem>>, vector<1x1x16x16xbf16>
    %305 = vector.shape_cast %304 : vector<1x1x16x16xbf16> to vector<16x16xbf16>
    %c1_262 = arith.constant 1 : index
    %c0_263 = arith.constant 0 : index
    %c0_264 = arith.constant 0 : index
    %306 = vector.load %arg3[%c1_262, %c0_263, %c0_264] : memref<4x16x8xbf16, #tpu.memory_space<vmem>>, vector<1x16x8xbf16>
    %307 = vector.shape_cast %306 : vector<1x16x8xbf16> to vector<16x8xbf16>
    %cst_265 = arith.constant dense<0.000000e+00> : vector<16x8xf32>
    %308 = tpu.matmul %305, %307, %cst_265 {dimension_numbers = #tpu.dot_dimension_numbers<[1], [0], [0], [1], [0, 0, 1, 1], [], []>} : vector<16x16xbf16>, vector<16x8xbf16>, vector<16x8xf32> -> vector<16x8xf32>
    %309 = arith.addf %300, %308 : vector<16x8xf32>
    %c6_i32_266 = arith.constant 6 : i32
    %310 = arith.addi %0, %c6_i32_266 : i32
    %c1_i32_267 = arith.constant 1 : i32
    %311 = arith.addi %310, %c1_i32_267 : i32
    %c0_268 = arith.constant 0 : index
    %312 = arith.index_cast %311 : i32 to index
    %c0_269 = arith.constant 0 : index
    %c0_270 = arith.constant 0 : index
    %313 = vector.load %arg2[%c0_268, %312, %c0_269, %c0_270] : memref<1x17x17x16xbf16, #tpu.memory_space<vmem>>, vector<1x1x16x16xbf16>
    %314 = vector.shape_cast %313 : vector<1x1x16x16xbf16> to vector<16x16xbf16>
    %c2_271 = arith.constant 2 : index
    %c0_272 = arith.constant 0 : index
    %c0_273 = arith.constant 0 : index
    %315 = vector.load %arg3[%c2_271, %c0_272, %c0_273] : memref<4x16x8xbf16, #tpu.memory_space<vmem>>, vector<1x16x8xbf16>
    %316 = vector.shape_cast %315 : vector<1x16x8xbf16> to vector<16x8xbf16>
    %cst_274 = arith.constant dense<0.000000e+00> : vector<16x8xf32>
    %317 = tpu.matmul %314, %316, %cst_274 {dimension_numbers = #tpu.dot_dimension_numbers<[1], [0], [0], [1], [0, 0, 1, 1], [], []>} : vector<16x16xbf16>, vector<16x8xbf16>, vector<16x8xf32> -> vector<16x8xf32>
    %318 = arith.addf %309, %317 : vector<16x8xf32>
    %c6_i32_275 = arith.constant 6 : i32
    %319 = arith.addi %0, %c6_i32_275 : i32
    %c1_i32_276 = arith.constant 1 : i32
    %320 = arith.addi %319, %c1_i32_276 : i32
    %c0_277 = arith.constant 0 : index
    %321 = arith.index_cast %320 : i32 to index
    %c1_278 = arith.constant 1 : index
    %c0_279 = arith.constant 0 : index
    %322 = vector.load %arg2[%c0_277, %321, %c1_278, %c0_279] : memref<1x17x17x16xbf16, #tpu.memory_space<vmem>>, vector<1x1x16x16xbf16>
    %323 = vector.shape_cast %322 : vector<1x1x16x16xbf16> to vector<16x16xbf16>
    %c3_280 = arith.constant 3 : index
    %c0_281 = arith.constant 0 : index
    %c0_282 = arith.constant 0 : index
    %324 = vector.load %arg3[%c3_280, %c0_281, %c0_282] : memref<4x16x8xbf16, #tpu.memory_space<vmem>>, vector<1x16x8xbf16>
    %325 = vector.shape_cast %324 : vector<1x16x8xbf16> to vector<16x8xbf16>
    %cst_283 = arith.constant dense<0.000000e+00> : vector<16x8xf32>
    %326 = tpu.matmul %323, %325, %cst_283 {dimension_numbers = #tpu.dot_dimension_numbers<[1], [0], [0], [1], [0, 0, 1, 1], [], []>} : vector<16x16xbf16>, vector<16x8xbf16>, vector<16x8xf32> -> vector<16x8xf32>
    %327 = arith.addf %318, %326 : vector<16x8xf32>
    %328 = vector.broadcast %2 : vector<1x8xf32> to vector<16x8xf32>
    %329 = arith.addf %327, %328 : vector<16x8xf32>
    %cst_284 = arith.constant 0.000000e+00 : f32
    %330 = vector.broadcast %cst_284 : f32 to vector<16x8xf32>
    %331 = arith.cmpf ogt, %329, %330 : vector<16x8xf32>
    %cst_285 = arith.constant 2.000000e-01 : f32
    %332 = vector.broadcast %cst_285 : f32 to vector<16x8xf32>
    %333 = arith.mulf %332, %329 : vector<16x8xf32>
    %334 = arith.select %331, %329, %333 : vector<16x8xi1>, vector<16x8xf32>
    %335 = arith.truncf %334 : vector<16x8xf32> to vector<16x8xbf16>
    %c0_286 = arith.constant 0 : index
    %c6 = arith.constant 6 : index
    %c0_287 = arith.constant 0 : index
    %c0_288 = arith.constant 0 : index
    %336 = vector.load %arg5[%c0_286, %c6, %c0_287, %c0_288] : memref<1x8x16x8xbf16, #tpu.memory_space<vmem>>, vector<1x1x16x8xbf16>
    %337 = vector.shape_cast %336 : vector<1x1x16x8xbf16> to vector<16x8xbf16>
    %338 = vector.shape_cast %335 : vector<16x8xbf16> to vector<1x1x16x8xbf16>
    tpu.vector_store %arg5[%c0_286, %c6, %c0_287, %c0_288], %338 {strides = array<i32>} : memref<1x8x16x8xbf16, #tpu.memory_space<vmem>>, vector<1x1x16x8xbf16>,
    %cst_289 = arith.constant 0.000000e+00 : f32
    %339 = vector.broadcast %cst_289 : f32 to vector<16x8xf32>
    %c7_i32 = arith.constant 7 : i32
    %340 = arith.addi %0, %c7_i32 : i32
    %c0_i32_290 = arith.constant 0 : i32
    %341 = arith.addi %340, %c0_i32_290 : i32
    %c0_291 = arith.constant 0 : index
    %342 = arith.index_cast %341 : i32 to index
    %c0_292 = arith.constant 0 : index
    %c0_293 = arith.constant 0 : index
    %343 = vector.load %arg2[%c0_291, %342, %c0_292, %c0_293] : memref<1x17x17x16xbf16, #tpu.memory_space<vmem>>, vector<1x1x16x16xbf16>
    %344 = vector.shape_cast %343 : vector<1x1x16x16xbf16> to vector<16x16xbf16>
    %c0_294 = arith.constant 0 : index
    %c0_295 = arith.constant 0 : index
    %c0_296 = arith.constant 0 : index
    %345 = vector.load %arg3[%c0_294, %c0_295, %c0_296] : memref<4x16x8xbf16, #tpu.memory_space<vmem>>, vector<1x16x8xbf16>
    %346 = vector.shape_cast %345 : vector<1x16x8xbf16> to vector<16x8xbf16>
    %cst_297 = arith.constant dense<0.000000e+00> : vector<16x8xf32>
    %347 = tpu.matmul %344, %346, %cst_297 {dimension_numbers = #tpu.dot_dimension_numbers<[1], [0], [0], [1], [0, 0, 1, 1], [], []>} : vector<16x16xbf16>, vector<16x8xbf16>, vector<16x8xf32> -> vector<16x8xf32>
    %348 = arith.addf %339, %347 : vector<16x8xf32>
    %c7_i32_298 = arith.constant 7 : i32
    %349 = arith.addi %0, %c7_i32_298 : i32
    %c0_i32_299 = arith.constant 0 : i32
    %350 = arith.addi %349, %c0_i32_299 : i32
    %c0_300 = arith.constant 0 : index
    %351 = arith.index_cast %350 : i32 to index
    %c1_301 = arith.constant 1 : index
    %c0_302 = arith.constant 0 : index
    %352 = vector.load %arg2[%c0_300, %351, %c1_301, %c0_302] : memref<1x17x17x16xbf16, #tpu.memory_space<vmem>>, vector<1x1x16x16xbf16>
    %353 = vector.shape_cast %352 : vector<1x1x16x16xbf16> to vector<16x16xbf16>
    %c1_303 = arith.constant 1 : index
    %c0_304 = arith.constant 0 : index
    %c0_305 = arith.constant 0 : index
    %354 = vector.load %arg3[%c1_303, %c0_304, %c0_305] : memref<4x16x8xbf16, #tpu.memory_space<vmem>>, vector<1x16x8xbf16>
    %355 = vector.shape_cast %354 : vector<1x16x8xbf16> to vector<16x8xbf16>
    %cst_306 = arith.constant dense<0.000000e+00> : vector<16x8xf32>
    %356 = tpu.matmul %353, %355, %cst_306 {dimension_numbers = #tpu.dot_dimension_numbers<[1], [0], [0], [1], [0, 0, 1, 1], [], []>} : vector<16x16xbf16>, vector<16x8xbf16>, vector<16x8xf32> -> vector<16x8xf32>
    %357 = arith.addf %348, %356 : vector<16x8xf32>
    %c7_i32_307 = arith.constant 7 : i32
    %358 = arith.addi %0, %c7_i32_307 : i32
    %c1_i32_308 = arith.constant 1 : i32
    %359 = arith.addi %358, %c1_i32_308 : i32
    %c0_309 = arith.constant 0 : index
    %360 = arith.index_cast %359 : i32 to index
    %c0_310 = arith.constant 0 : index
    %c0_311 = arith.constant 0 : index
    %361 = vector.load %arg2[%c0_309, %360, %c0_310, %c0_311] : memref<1x17x17x16xbf16, #tpu.memory_space<vmem>>, vector<1x1x16x16xbf16>
    %362 = vector.shape_cast %361 : vector<1x1x16x16xbf16> to vector<16x16xbf16>
    %c2_312 = arith.constant 2 : index
    %c0_313 = arith.constant 0 : index
    %c0_314 = arith.constant 0 : index
    %363 = vector.load %arg3[%c2_312, %c0_313, %c0_314] : memref<4x16x8xbf16, #tpu.memory_space<vmem>>, vector<1x16x8xbf16>
    %364 = vector.shape_cast %363 : vector<1x16x8xbf16> to vector<16x8xbf16>
    %cst_315 = arith.constant dense<0.000000e+00> : vector<16x8xf32>
    %365 = tpu.matmul %362, %364, %cst_315 {dimension_numbers = #tpu.dot_dimension_numbers<[1], [0], [0], [1], [0, 0, 1, 1], [], []>} : vector<16x16xbf16>, vector<16x8xbf16>, vector<16x8xf32> -> vector<16x8xf32>
    %366 = arith.addf %357, %365 : vector<16x8xf32>
    %c7_i32_316 = arith.constant 7 : i32
    %367 = arith.addi %0, %c7_i32_316 : i32
    %c1_i32_317 = arith.constant 1 : i32
    %368 = arith.addi %367, %c1_i32_317 : i32
    %c0_318 = arith.constant 0 : index
    %369 = arith.index_cast %368 : i32 to index
    %c1_319 = arith.constant 1 : index
    %c0_320 = arith.constant 0 : index
    %370 = vector.load %arg2[%c0_318, %369, %c1_319, %c0_320] : memref<1x17x17x16xbf16, #tpu.memory_space<vmem>>, vector<1x1x16x16xbf16>
    %371 = vector.shape_cast %370 : vector<1x1x16x16xbf16> to vector<16x16xbf16>
    %c3_321 = arith.constant 3 : index
    %c0_322 = arith.constant 0 : index
    %c0_323 = arith.constant 0 : index
    %372 = vector.load %arg3[%c3_321, %c0_322, %c0_323] : memref<4x16x8xbf16, #tpu.memory_space<vmem>>, vector<1x16x8xbf16>
    %373 = vector.shape_cast %372 : vector<1x16x8xbf16> to vector<16x8xbf16>
    %cst_324 = arith.constant dense<0.000000e+00> : vector<16x8xf32>
    %374 = tpu.matmul %371, %373, %cst_324 {dimension_numbers = #tpu.dot_dimension_numbers<[1], [0], [0], [1], [0, 0, 1, 1], [], []>} : vector<16x16xbf16>, vector<16x8xbf16>, vector<16x8xf32> -> vector<16x8xf32>
    %375 = arith.addf %366, %374 : vector<16x8xf32>
    %376 = vector.broadcast %2 : vector<1x8xf32> to vector<16x8xf32>
    %377 = arith.addf %375, %376 : vector<16x8xf32>
    %cst_325 = arith.constant 0.000000e+00 : f32
    %378 = vector.broadcast %cst_325 : f32 to vector<16x8xf32>
    %379 = arith.cmpf ogt, %377, %378 : vector<16x8xf32>
    %cst_326 = arith.constant 2.000000e-01 : f32
    %380 = vector.broadcast %cst_326 : f32 to vector<16x8xf32>
    %381 = arith.mulf %380, %377 : vector<16x8xf32>
    %382 = arith.select %379, %377, %381 : vector<16x8xi1>, vector<16x8xf32>
    %383 = arith.truncf %382 : vector<16x8xf32> to vector<16x8xbf16>
    %c0_327 = arith.constant 0 : index
    %c7 = arith.constant 7 : index
    %c0_328 = arith.constant 0 : index
    %c0_329 = arith.constant 0 : index
    %384 = vector.load %arg5[%c0_327, %c7, %c0_328, %c0_329] : memref<1x8x16x8xbf16, #tpu.memory_space<vmem>>, vector<1x1x16x8xbf16>
    %385 = vector.shape_cast %384 : vector<1x1x16x8xbf16> to vector<16x8xbf16>
    %386 = vector.shape_cast %383 : vector<16x8xbf16> to vector<1x1x16x8xbf16>
    tpu.vector_store %arg5[%c0_327, %c7, %c0_328, %c0_329], %386 {strides = array<i32>} : memref<1x8x16x8xbf16, #tpu.memory_space<vmem>>, vector<1x1x16x8xbf16>,
    return
  }
  func.func @transform_0(%arg0: i32, %arg1: i32) -> (i32, i32, i32, i32) {
    %c0_i32 = arith.constant 0 : i32
    %c0_i32_0 = arith.constant 0 : i32
    %c0_i32_1 = arith.constant 0 : i32
    %c0_i32_2 = arith.constant 0 : i32
    return %arg0, %c0_i32, %c0_i32_0, %c0_i32_1 : i32, i32, i32, i32
  }
  func.func @transform_1(%arg0: i32, %arg1: i32) -> (i32, i32, i32) {
    %c0_i32 = arith.constant 0 : i32
    %c0_i32_0 = arith.constant 0 : i32
    %c0_i32_1 = arith.constant 0 : i32
    %c0_i32_2 = arith.constant 0 : i32
    return %c0_i32, %c0_i32_0, %c0_i32_1 : i32, i32, i32
  }
  func.func @transform_2(%arg0: i32, %arg1: i32) -> (i32, i32, i32) {
    %c0_i32 = arith.constant 0 : i32
    %c0_i32_0 = arith.constant 0 : i32
    %c0_i32_1 = arith.constant 0 : i32
    %c0_i32_2 = arith.constant 0 : i32
    return %c0_i32, %c0_i32_0, %c0_i32_1 : i32, i32, i32
  }
  func.func @transform_3(%arg0: i32, %arg1: i32) -> (i32, i32, i32, i32) {
    %c0_i32 = arith.constant 0 : i32
    %c0_i32_0 = arith.constant 0 : i32
    %c0_i32_1 = arith.constant 0 : i32
    return %arg0, %arg1, %c0_i32, %c0_i32_0 : i32, i32, i32, i32
  }
}

module attributes {stable_mosaic.version = 11 : i64} {
  func.func @_conv4x4s2_kernel(%arg0: i32, %arg1: i32, %arg2: memref<1x9x9x32xbf16, #tpu.memory_space<vmem>>, %arg3: memref<4x32x16xbf16, #tpu.memory_space<vmem>>, %arg4: memref<1x1x16xf32, #tpu.memory_space<vmem>>, %arg5: memref<1x8x8x16xbf16, #tpu.memory_space<vmem>>) attributes {dimension_semantics = [#tpu.dimension_semantics<parallel>, #tpu.dimension_semantics<arbitrary>], iteration_bounds = array<i64: 2, 1>, scalar_prefetch = 0 : i64, scratch_operands = 0 : i64, tpu.core_type = #tpu.core_type<tc>, window_params = [{transform_indices = @transform_0, window_bounds = array<i64: 1, 9, 9, 32>}, {pipeline_mode = #tpu.pipeline_mode<synchronous>, transform_indices = @transform_1, window_bounds = array<i64: 4, 32, 16>}, {pipeline_mode = #tpu.pipeline_mode<synchronous>, transform_indices = @transform_2, window_bounds = array<i64: 1, 1, 16>}, {transform_indices = @transform_3, window_bounds = array<i64: 1, 8, 8, 16>}]} {
    %c8_i32 = arith.constant 8 : i32
    %0 = arith.muli %arg1, %c8_i32 : i32
    %c0 = arith.constant 0 : index
    %c0_0 = arith.constant 0 : index
    %c0_1 = arith.constant 0 : index
    %1 = vector.load %arg4[%c0, %c0_0, %c0_1] : memref<1x1x16xf32, #tpu.memory_space<vmem>>, vector<1x1x16xf32>
    %2 = vector.shape_cast %1 : vector<1x1x16xf32> to vector<1x16xf32>
    %cst = arith.constant 0.000000e+00 : f32
    %3 = vector.broadcast %cst : f32 to vector<8x16xf32>
    %c0_i32 = arith.constant 0 : i32
    %4 = arith.addi %0, %c0_i32 : i32
    %c0_i32_2 = arith.constant 0 : i32
    %5 = arith.addi %4, %c0_i32_2 : i32
    %c0_3 = arith.constant 0 : index
    %6 = arith.index_cast %5 : i32 to index
    %c0_4 = arith.constant 0 : index
    %c0_5 = arith.constant 0 : index
    %7 = vector.load %arg2[%c0_3, %6, %c0_4, %c0_5] : memref<1x9x9x32xbf16, #tpu.memory_space<vmem>>, vector<1x1x8x32xbf16>
    %8 = vector.shape_cast %7 : vector<1x1x8x32xbf16> to vector<8x32xbf16>
    %c0_6 = arith.constant 0 : index
    %c0_7 = arith.constant 0 : index
    %c0_8 = arith.constant 0 : index
    %9 = vector.load %arg3[%c0_6, %c0_7, %c0_8] : memref<4x32x16xbf16, #tpu.memory_space<vmem>>, vector<1x32x16xbf16>
    %10 = vector.shape_cast %9 : vector<1x32x16xbf16> to vector<32x16xbf16>
    %cst_9 = arith.constant dense<0.000000e+00> : vector<8x16xf32>
    %11 = tpu.matmul %8, %10, %cst_9 {dimension_numbers = #tpu.dot_dimension_numbers<[1], [0], [0], [1], [0, 0, 1, 1], [], []>} : vector<8x32xbf16>, vector<32x16xbf16>, vector<8x16xf32> -> vector<8x16xf32>
    %12 = arith.addf %3, %11 : vector<8x16xf32>
    %c0_i32_10 = arith.constant 0 : i32
    %13 = arith.addi %0, %c0_i32_10 : i32
    %c0_i32_11 = arith.constant 0 : i32
    %14 = arith.addi %13, %c0_i32_11 : i32
    %c0_12 = arith.constant 0 : index
    %15 = arith.index_cast %14 : i32 to index
    %c1 = arith.constant 1 : index
    %c0_13 = arith.constant 0 : index
    %16 = vector.load %arg2[%c0_12, %15, %c1, %c0_13] : memref<1x9x9x32xbf16, #tpu.memory_space<vmem>>, vector<1x1x8x32xbf16>
    %17 = vector.shape_cast %16 : vector<1x1x8x32xbf16> to vector<8x32xbf16>
    %c1_14 = arith.constant 1 : index
    %c0_15 = arith.constant 0 : index
    %c0_16 = arith.constant 0 : index
    %18 = vector.load %arg3[%c1_14, %c0_15, %c0_16] : memref<4x32x16xbf16, #tpu.memory_space<vmem>>, vector<1x32x16xbf16>
    %19 = vector.shape_cast %18 : vector<1x32x16xbf16> to vector<32x16xbf16>
    %cst_17 = arith.constant dense<0.000000e+00> : vector<8x16xf32>
    %20 = tpu.matmul %17, %19, %cst_17 {dimension_numbers = #tpu.dot_dimension_numbers<[1], [0], [0], [1], [0, 0, 1, 1], [], []>} : vector<8x32xbf16>, vector<32x16xbf16>, vector<8x16xf32> -> vector<8x16xf32>
    %21 = arith.addf %12, %20 : vector<8x16xf32>
    %c0_i32_18 = arith.constant 0 : i32
    %22 = arith.addi %0, %c0_i32_18 : i32
    %c1_i32 = arith.constant 1 : i32
    %23 = arith.addi %22, %c1_i32 : i32
    %c0_19 = arith.constant 0 : index
    %24 = arith.index_cast %23 : i32 to index
    %c0_20 = arith.constant 0 : index
    %c0_21 = arith.constant 0 : index
    %25 = vector.load %arg2[%c0_19, %24, %c0_20, %c0_21] : memref<1x9x9x32xbf16, #tpu.memory_space<vmem>>, vector<1x1x8x32xbf16>
    %26 = vector.shape_cast %25 : vector<1x1x8x32xbf16> to vector<8x32xbf16>
    %c2 = arith.constant 2 : index
    %c0_22 = arith.constant 0 : index
    %c0_23 = arith.constant 0 : index
    %27 = vector.load %arg3[%c2, %c0_22, %c0_23] : memref<4x32x16xbf16, #tpu.memory_space<vmem>>, vector<1x32x16xbf16>
    %28 = vector.shape_cast %27 : vector<1x32x16xbf16> to vector<32x16xbf16>
    %cst_24 = arith.constant dense<0.000000e+00> : vector<8x16xf32>
    %29 = tpu.matmul %26, %28, %cst_24 {dimension_numbers = #tpu.dot_dimension_numbers<[1], [0], [0], [1], [0, 0, 1, 1], [], []>} : vector<8x32xbf16>, vector<32x16xbf16>, vector<8x16xf32> -> vector<8x16xf32>
    %30 = arith.addf %21, %29 : vector<8x16xf32>
    %c0_i32_25 = arith.constant 0 : i32
    %31 = arith.addi %0, %c0_i32_25 : i32
    %c1_i32_26 = arith.constant 1 : i32
    %32 = arith.addi %31, %c1_i32_26 : i32
    %c0_27 = arith.constant 0 : index
    %33 = arith.index_cast %32 : i32 to index
    %c1_28 = arith.constant 1 : index
    %c0_29 = arith.constant 0 : index
    %34 = vector.load %arg2[%c0_27, %33, %c1_28, %c0_29] : memref<1x9x9x32xbf16, #tpu.memory_space<vmem>>, vector<1x1x8x32xbf16>
    %35 = vector.shape_cast %34 : vector<1x1x8x32xbf16> to vector<8x32xbf16>
    %c3 = arith.constant 3 : index
    %c0_30 = arith.constant 0 : index
    %c0_31 = arith.constant 0 : index
    %36 = vector.load %arg3[%c3, %c0_30, %c0_31] : memref<4x32x16xbf16, #tpu.memory_space<vmem>>, vector<1x32x16xbf16>
    %37 = vector.shape_cast %36 : vector<1x32x16xbf16> to vector<32x16xbf16>
    %cst_32 = arith.constant dense<0.000000e+00> : vector<8x16xf32>
    %38 = tpu.matmul %35, %37, %cst_32 {dimension_numbers = #tpu.dot_dimension_numbers<[1], [0], [0], [1], [0, 0, 1, 1], [], []>} : vector<8x32xbf16>, vector<32x16xbf16>, vector<8x16xf32> -> vector<8x16xf32>
    %39 = arith.addf %30, %38 : vector<8x16xf32>
    %40 = vector.broadcast %2 : vector<1x16xf32> to vector<8x16xf32>
    %41 = arith.addf %39, %40 : vector<8x16xf32>
    %cst_33 = arith.constant 0.000000e+00 : f32
    %42 = vector.broadcast %cst_33 : f32 to vector<8x16xf32>
    %43 = arith.cmpf ogt, %41, %42 : vector<8x16xf32>
    %cst_34 = arith.constant 2.000000e-01 : f32
    %44 = vector.broadcast %cst_34 : f32 to vector<8x16xf32>
    %45 = arith.mulf %44, %41 : vector<8x16xf32>
    %46 = arith.select %43, %41, %45 : vector<8x16xi1>, vector<8x16xf32>
    %47 = arith.truncf %46 : vector<8x16xf32> to vector<8x16xbf16>
    %c0_35 = arith.constant 0 : index
    %c0_36 = arith.constant 0 : index
    %c0_37 = arith.constant 0 : index
    %c0_38 = arith.constant 0 : index
    %48 = vector.load %arg5[%c0_35, %c0_36, %c0_37, %c0_38] : memref<1x8x8x16xbf16, #tpu.memory_space<vmem>>, vector<1x1x8x16xbf16>
    %49 = vector.shape_cast %48 : vector<1x1x8x16xbf16> to vector<8x16xbf16>
    %50 = vector.shape_cast %47 : vector<8x16xbf16> to vector<1x1x8x16xbf16>
    tpu.vector_store %arg5[%c0_35, %c0_36, %c0_37, %c0_38], %50 {strides = array<i32>} : memref<1x8x8x16xbf16, #tpu.memory_space<vmem>>, vector<1x1x8x16xbf16>,
    %cst_39 = arith.constant 0.000000e+00 : f32
    %51 = vector.broadcast %cst_39 : f32 to vector<8x16xf32>
    %c1_i32_40 = arith.constant 1 : i32
    %52 = arith.addi %0, %c1_i32_40 : i32
    %c0_i32_41 = arith.constant 0 : i32
    %53 = arith.addi %52, %c0_i32_41 : i32
    %c0_42 = arith.constant 0 : index
    %54 = arith.index_cast %53 : i32 to index
    %c0_43 = arith.constant 0 : index
    %c0_44 = arith.constant 0 : index
    %55 = vector.load %arg2[%c0_42, %54, %c0_43, %c0_44] : memref<1x9x9x32xbf16, #tpu.memory_space<vmem>>, vector<1x1x8x32xbf16>
    %56 = vector.shape_cast %55 : vector<1x1x8x32xbf16> to vector<8x32xbf16>
    %c0_45 = arith.constant 0 : index
    %c0_46 = arith.constant 0 : index
    %c0_47 = arith.constant 0 : index
    %57 = vector.load %arg3[%c0_45, %c0_46, %c0_47] : memref<4x32x16xbf16, #tpu.memory_space<vmem>>, vector<1x32x16xbf16>
    %58 = vector.shape_cast %57 : vector<1x32x16xbf16> to vector<32x16xbf16>
    %cst_48 = arith.constant dense<0.000000e+00> : vector<8x16xf32>
    %59 = tpu.matmul %56, %58, %cst_48 {dimension_numbers = #tpu.dot_dimension_numbers<[1], [0], [0], [1], [0, 0, 1, 1], [], []>} : vector<8x32xbf16>, vector<32x16xbf16>, vector<8x16xf32> -> vector<8x16xf32>
    %60 = arith.addf %51, %59 : vector<8x16xf32>
    %c1_i32_49 = arith.constant 1 : i32
    %61 = arith.addi %0, %c1_i32_49 : i32
    %c0_i32_50 = arith.constant 0 : i32
    %62 = arith.addi %61, %c0_i32_50 : i32
    %c0_51 = arith.constant 0 : index
    %63 = arith.index_cast %62 : i32 to index
    %c1_52 = arith.constant 1 : index
    %c0_53 = arith.constant 0 : index
    %64 = vector.load %arg2[%c0_51, %63, %c1_52, %c0_53] : memref<1x9x9x32xbf16, #tpu.memory_space<vmem>>, vector<1x1x8x32xbf16>
    %65 = vector.shape_cast %64 : vector<1x1x8x32xbf16> to vector<8x32xbf16>
    %c1_54 = arith.constant 1 : index
    %c0_55 = arith.constant 0 : index
    %c0_56 = arith.constant 0 : index
    %66 = vector.load %arg3[%c1_54, %c0_55, %c0_56] : memref<4x32x16xbf16, #tpu.memory_space<vmem>>, vector<1x32x16xbf16>
    %67 = vector.shape_cast %66 : vector<1x32x16xbf16> to vector<32x16xbf16>
    %cst_57 = arith.constant dense<0.000000e+00> : vector<8x16xf32>
    %68 = tpu.matmul %65, %67, %cst_57 {dimension_numbers = #tpu.dot_dimension_numbers<[1], [0], [0], [1], [0, 0, 1, 1], [], []>} : vector<8x32xbf16>, vector<32x16xbf16>, vector<8x16xf32> -> vector<8x16xf32>
    %69 = arith.addf %60, %68 : vector<8x16xf32>
    %c1_i32_58 = arith.constant 1 : i32
    %70 = arith.addi %0, %c1_i32_58 : i32
    %c1_i32_59 = arith.constant 1 : i32
    %71 = arith.addi %70, %c1_i32_59 : i32
    %c0_60 = arith.constant 0 : index
    %72 = arith.index_cast %71 : i32 to index
    %c0_61 = arith.constant 0 : index
    %c0_62 = arith.constant 0 : index
    %73 = vector.load %arg2[%c0_60, %72, %c0_61, %c0_62] : memref<1x9x9x32xbf16, #tpu.memory_space<vmem>>, vector<1x1x8x32xbf16>
    %74 = vector.shape_cast %73 : vector<1x1x8x32xbf16> to vector<8x32xbf16>
    %c2_63 = arith.constant 2 : index
    %c0_64 = arith.constant 0 : index
    %c0_65 = arith.constant 0 : index
    %75 = vector.load %arg3[%c2_63, %c0_64, %c0_65] : memref<4x32x16xbf16, #tpu.memory_space<vmem>>, vector<1x32x16xbf16>
    %76 = vector.shape_cast %75 : vector<1x32x16xbf16> to vector<32x16xbf16>
    %cst_66 = arith.constant dense<0.000000e+00> : vector<8x16xf32>
    %77 = tpu.matmul %74, %76, %cst_66 {dimension_numbers = #tpu.dot_dimension_numbers<[1], [0], [0], [1], [0, 0, 1, 1], [], []>} : vector<8x32xbf16>, vector<32x16xbf16>, vector<8x16xf32> -> vector<8x16xf32>
    %78 = arith.addf %69, %77 : vector<8x16xf32>
    %c1_i32_67 = arith.constant 1 : i32
    %79 = arith.addi %0, %c1_i32_67 : i32
    %c1_i32_68 = arith.constant 1 : i32
    %80 = arith.addi %79, %c1_i32_68 : i32
    %c0_69 = arith.constant 0 : index
    %81 = arith.index_cast %80 : i32 to index
    %c1_70 = arith.constant 1 : index
    %c0_71 = arith.constant 0 : index
    %82 = vector.load %arg2[%c0_69, %81, %c1_70, %c0_71] : memref<1x9x9x32xbf16, #tpu.memory_space<vmem>>, vector<1x1x8x32xbf16>
    %83 = vector.shape_cast %82 : vector<1x1x8x32xbf16> to vector<8x32xbf16>
    %c3_72 = arith.constant 3 : index
    %c0_73 = arith.constant 0 : index
    %c0_74 = arith.constant 0 : index
    %84 = vector.load %arg3[%c3_72, %c0_73, %c0_74] : memref<4x32x16xbf16, #tpu.memory_space<vmem>>, vector<1x32x16xbf16>
    %85 = vector.shape_cast %84 : vector<1x32x16xbf16> to vector<32x16xbf16>
    %cst_75 = arith.constant dense<0.000000e+00> : vector<8x16xf32>
    %86 = tpu.matmul %83, %85, %cst_75 {dimension_numbers = #tpu.dot_dimension_numbers<[1], [0], [0], [1], [0, 0, 1, 1], [], []>} : vector<8x32xbf16>, vector<32x16xbf16>, vector<8x16xf32> -> vector<8x16xf32>
    %87 = arith.addf %78, %86 : vector<8x16xf32>
    %88 = vector.broadcast %2 : vector<1x16xf32> to vector<8x16xf32>
    %89 = arith.addf %87, %88 : vector<8x16xf32>
    %cst_76 = arith.constant 0.000000e+00 : f32
    %90 = vector.broadcast %cst_76 : f32 to vector<8x16xf32>
    %91 = arith.cmpf ogt, %89, %90 : vector<8x16xf32>
    %cst_77 = arith.constant 2.000000e-01 : f32
    %92 = vector.broadcast %cst_77 : f32 to vector<8x16xf32>
    %93 = arith.mulf %92, %89 : vector<8x16xf32>
    %94 = arith.select %91, %89, %93 : vector<8x16xi1>, vector<8x16xf32>
    %95 = arith.truncf %94 : vector<8x16xf32> to vector<8x16xbf16>
    %c0_78 = arith.constant 0 : index
    %c1_79 = arith.constant 1 : index
    %c0_80 = arith.constant 0 : index
    %c0_81 = arith.constant 0 : index
    %96 = vector.load %arg5[%c0_78, %c1_79, %c0_80, %c0_81] : memref<1x8x8x16xbf16, #tpu.memory_space<vmem>>, vector<1x1x8x16xbf16>
    %97 = vector.shape_cast %96 : vector<1x1x8x16xbf16> to vector<8x16xbf16>
    %98 = vector.shape_cast %95 : vector<8x16xbf16> to vector<1x1x8x16xbf16>
    tpu.vector_store %arg5[%c0_78, %c1_79, %c0_80, %c0_81], %98 {strides = array<i32>} : memref<1x8x8x16xbf16, #tpu.memory_space<vmem>>, vector<1x1x8x16xbf16>,
    %cst_82 = arith.constant 0.000000e+00 : f32
    %99 = vector.broadcast %cst_82 : f32 to vector<8x16xf32>
    %c2_i32 = arith.constant 2 : i32
    %100 = arith.addi %0, %c2_i32 : i32
    %c0_i32_83 = arith.constant 0 : i32
    %101 = arith.addi %100, %c0_i32_83 : i32
    %c0_84 = arith.constant 0 : index
    %102 = arith.index_cast %101 : i32 to index
    %c0_85 = arith.constant 0 : index
    %c0_86 = arith.constant 0 : index
    %103 = vector.load %arg2[%c0_84, %102, %c0_85, %c0_86] : memref<1x9x9x32xbf16, #tpu.memory_space<vmem>>, vector<1x1x8x32xbf16>
    %104 = vector.shape_cast %103 : vector<1x1x8x32xbf16> to vector<8x32xbf16>
    %c0_87 = arith.constant 0 : index
    %c0_88 = arith.constant 0 : index
    %c0_89 = arith.constant 0 : index
    %105 = vector.load %arg3[%c0_87, %c0_88, %c0_89] : memref<4x32x16xbf16, #tpu.memory_space<vmem>>, vector<1x32x16xbf16>
    %106 = vector.shape_cast %105 : vector<1x32x16xbf16> to vector<32x16xbf16>
    %cst_90 = arith.constant dense<0.000000e+00> : vector<8x16xf32>
    %107 = tpu.matmul %104, %106, %cst_90 {dimension_numbers = #tpu.dot_dimension_numbers<[1], [0], [0], [1], [0, 0, 1, 1], [], []>} : vector<8x32xbf16>, vector<32x16xbf16>, vector<8x16xf32> -> vector<8x16xf32>
    %108 = arith.addf %99, %107 : vector<8x16xf32>
    %c2_i32_91 = arith.constant 2 : i32
    %109 = arith.addi %0, %c2_i32_91 : i32
    %c0_i32_92 = arith.constant 0 : i32
    %110 = arith.addi %109, %c0_i32_92 : i32
    %c0_93 = arith.constant 0 : index
    %111 = arith.index_cast %110 : i32 to index
    %c1_94 = arith.constant 1 : index
    %c0_95 = arith.constant 0 : index
    %112 = vector.load %arg2[%c0_93, %111, %c1_94, %c0_95] : memref<1x9x9x32xbf16, #tpu.memory_space<vmem>>, vector<1x1x8x32xbf16>
    %113 = vector.shape_cast %112 : vector<1x1x8x32xbf16> to vector<8x32xbf16>
    %c1_96 = arith.constant 1 : index
    %c0_97 = arith.constant 0 : index
    %c0_98 = arith.constant 0 : index
    %114 = vector.load %arg3[%c1_96, %c0_97, %c0_98] : memref<4x32x16xbf16, #tpu.memory_space<vmem>>, vector<1x32x16xbf16>
    %115 = vector.shape_cast %114 : vector<1x32x16xbf16> to vector<32x16xbf16>
    %cst_99 = arith.constant dense<0.000000e+00> : vector<8x16xf32>
    %116 = tpu.matmul %113, %115, %cst_99 {dimension_numbers = #tpu.dot_dimension_numbers<[1], [0], [0], [1], [0, 0, 1, 1], [], []>} : vector<8x32xbf16>, vector<32x16xbf16>, vector<8x16xf32> -> vector<8x16xf32>
    %117 = arith.addf %108, %116 : vector<8x16xf32>
    %c2_i32_100 = arith.constant 2 : i32
    %118 = arith.addi %0, %c2_i32_100 : i32
    %c1_i32_101 = arith.constant 1 : i32
    %119 = arith.addi %118, %c1_i32_101 : i32
    %c0_102 = arith.constant 0 : index
    %120 = arith.index_cast %119 : i32 to index
    %c0_103 = arith.constant 0 : index
    %c0_104 = arith.constant 0 : index
    %121 = vector.load %arg2[%c0_102, %120, %c0_103, %c0_104] : memref<1x9x9x32xbf16, #tpu.memory_space<vmem>>, vector<1x1x8x32xbf16>
    %122 = vector.shape_cast %121 : vector<1x1x8x32xbf16> to vector<8x32xbf16>
    %c2_105 = arith.constant 2 : index
    %c0_106 = arith.constant 0 : index
    %c0_107 = arith.constant 0 : index
    %123 = vector.load %arg3[%c2_105, %c0_106, %c0_107] : memref<4x32x16xbf16, #tpu.memory_space<vmem>>, vector<1x32x16xbf16>
    %124 = vector.shape_cast %123 : vector<1x32x16xbf16> to vector<32x16xbf16>
    %cst_108 = arith.constant dense<0.000000e+00> : vector<8x16xf32>
    %125 = tpu.matmul %122, %124, %cst_108 {dimension_numbers = #tpu.dot_dimension_numbers<[1], [0], [0], [1], [0, 0, 1, 1], [], []>} : vector<8x32xbf16>, vector<32x16xbf16>, vector<8x16xf32> -> vector<8x16xf32>
    %126 = arith.addf %117, %125 : vector<8x16xf32>
    %c2_i32_109 = arith.constant 2 : i32
    %127 = arith.addi %0, %c2_i32_109 : i32
    %c1_i32_110 = arith.constant 1 : i32
    %128 = arith.addi %127, %c1_i32_110 : i32
    %c0_111 = arith.constant 0 : index
    %129 = arith.index_cast %128 : i32 to index
    %c1_112 = arith.constant 1 : index
    %c0_113 = arith.constant 0 : index
    %130 = vector.load %arg2[%c0_111, %129, %c1_112, %c0_113] : memref<1x9x9x32xbf16, #tpu.memory_space<vmem>>, vector<1x1x8x32xbf16>
    %131 = vector.shape_cast %130 : vector<1x1x8x32xbf16> to vector<8x32xbf16>
    %c3_114 = arith.constant 3 : index
    %c0_115 = arith.constant 0 : index
    %c0_116 = arith.constant 0 : index
    %132 = vector.load %arg3[%c3_114, %c0_115, %c0_116] : memref<4x32x16xbf16, #tpu.memory_space<vmem>>, vector<1x32x16xbf16>
    %133 = vector.shape_cast %132 : vector<1x32x16xbf16> to vector<32x16xbf16>
    %cst_117 = arith.constant dense<0.000000e+00> : vector<8x16xf32>
    %134 = tpu.matmul %131, %133, %cst_117 {dimension_numbers = #tpu.dot_dimension_numbers<[1], [0], [0], [1], [0, 0, 1, 1], [], []>} : vector<8x32xbf16>, vector<32x16xbf16>, vector<8x16xf32> -> vector<8x16xf32>
    %135 = arith.addf %126, %134 : vector<8x16xf32>
    %136 = vector.broadcast %2 : vector<1x16xf32> to vector<8x16xf32>
    %137 = arith.addf %135, %136 : vector<8x16xf32>
    %cst_118 = arith.constant 0.000000e+00 : f32
    %138 = vector.broadcast %cst_118 : f32 to vector<8x16xf32>
    %139 = arith.cmpf ogt, %137, %138 : vector<8x16xf32>
    %cst_119 = arith.constant 2.000000e-01 : f32
    %140 = vector.broadcast %cst_119 : f32 to vector<8x16xf32>
    %141 = arith.mulf %140, %137 : vector<8x16xf32>
    %142 = arith.select %139, %137, %141 : vector<8x16xi1>, vector<8x16xf32>
    %143 = arith.truncf %142 : vector<8x16xf32> to vector<8x16xbf16>
    %c0_120 = arith.constant 0 : index
    %c2_121 = arith.constant 2 : index
    %c0_122 = arith.constant 0 : index
    %c0_123 = arith.constant 0 : index
    %144 = vector.load %arg5[%c0_120, %c2_121, %c0_122, %c0_123] : memref<1x8x8x16xbf16, #tpu.memory_space<vmem>>, vector<1x1x8x16xbf16>
    %145 = vector.shape_cast %144 : vector<1x1x8x16xbf16> to vector<8x16xbf16>
    %146 = vector.shape_cast %143 : vector<8x16xbf16> to vector<1x1x8x16xbf16>
    tpu.vector_store %arg5[%c0_120, %c2_121, %c0_122, %c0_123], %146 {strides = array<i32>} : memref<1x8x8x16xbf16, #tpu.memory_space<vmem>>, vector<1x1x8x16xbf16>,
    %cst_124 = arith.constant 0.000000e+00 : f32
    %147 = vector.broadcast %cst_124 : f32 to vector<8x16xf32>
    %c3_i32 = arith.constant 3 : i32
    %148 = arith.addi %0, %c3_i32 : i32
    %c0_i32_125 = arith.constant 0 : i32
    %149 = arith.addi %148, %c0_i32_125 : i32
    %c0_126 = arith.constant 0 : index
    %150 = arith.index_cast %149 : i32 to index
    %c0_127 = arith.constant 0 : index
    %c0_128 = arith.constant 0 : index
    %151 = vector.load %arg2[%c0_126, %150, %c0_127, %c0_128] : memref<1x9x9x32xbf16, #tpu.memory_space<vmem>>, vector<1x1x8x32xbf16>
    %152 = vector.shape_cast %151 : vector<1x1x8x32xbf16> to vector<8x32xbf16>
    %c0_129 = arith.constant 0 : index
    %c0_130 = arith.constant 0 : index
    %c0_131 = arith.constant 0 : index
    %153 = vector.load %arg3[%c0_129, %c0_130, %c0_131] : memref<4x32x16xbf16, #tpu.memory_space<vmem>>, vector<1x32x16xbf16>
    %154 = vector.shape_cast %153 : vector<1x32x16xbf16> to vector<32x16xbf16>
    %cst_132 = arith.constant dense<0.000000e+00> : vector<8x16xf32>
    %155 = tpu.matmul %152, %154, %cst_132 {dimension_numbers = #tpu.dot_dimension_numbers<[1], [0], [0], [1], [0, 0, 1, 1], [], []>} : vector<8x32xbf16>, vector<32x16xbf16>, vector<8x16xf32> -> vector<8x16xf32>
    %156 = arith.addf %147, %155 : vector<8x16xf32>
    %c3_i32_133 = arith.constant 3 : i32
    %157 = arith.addi %0, %c3_i32_133 : i32
    %c0_i32_134 = arith.constant 0 : i32
    %158 = arith.addi %157, %c0_i32_134 : i32
    %c0_135 = arith.constant 0 : index
    %159 = arith.index_cast %158 : i32 to index
    %c1_136 = arith.constant 1 : index
    %c0_137 = arith.constant 0 : index
    %160 = vector.load %arg2[%c0_135, %159, %c1_136, %c0_137] : memref<1x9x9x32xbf16, #tpu.memory_space<vmem>>, vector<1x1x8x32xbf16>
    %161 = vector.shape_cast %160 : vector<1x1x8x32xbf16> to vector<8x32xbf16>
    %c1_138 = arith.constant 1 : index
    %c0_139 = arith.constant 0 : index
    %c0_140 = arith.constant 0 : index
    %162 = vector.load %arg3[%c1_138, %c0_139, %c0_140] : memref<4x32x16xbf16, #tpu.memory_space<vmem>>, vector<1x32x16xbf16>
    %163 = vector.shape_cast %162 : vector<1x32x16xbf16> to vector<32x16xbf16>
    %cst_141 = arith.constant dense<0.000000e+00> : vector<8x16xf32>
    %164 = tpu.matmul %161, %163, %cst_141 {dimension_numbers = #tpu.dot_dimension_numbers<[1], [0], [0], [1], [0, 0, 1, 1], [], []>} : vector<8x32xbf16>, vector<32x16xbf16>, vector<8x16xf32> -> vector<8x16xf32>
    %165 = arith.addf %156, %164 : vector<8x16xf32>
    %c3_i32_142 = arith.constant 3 : i32
    %166 = arith.addi %0, %c3_i32_142 : i32
    %c1_i32_143 = arith.constant 1 : i32
    %167 = arith.addi %166, %c1_i32_143 : i32
    %c0_144 = arith.constant 0 : index
    %168 = arith.index_cast %167 : i32 to index
    %c0_145 = arith.constant 0 : index
    %c0_146 = arith.constant 0 : index
    %169 = vector.load %arg2[%c0_144, %168, %c0_145, %c0_146] : memref<1x9x9x32xbf16, #tpu.memory_space<vmem>>, vector<1x1x8x32xbf16>
    %170 = vector.shape_cast %169 : vector<1x1x8x32xbf16> to vector<8x32xbf16>
    %c2_147 = arith.constant 2 : index
    %c0_148 = arith.constant 0 : index
    %c0_149 = arith.constant 0 : index
    %171 = vector.load %arg3[%c2_147, %c0_148, %c0_149] : memref<4x32x16xbf16, #tpu.memory_space<vmem>>, vector<1x32x16xbf16>
    %172 = vector.shape_cast %171 : vector<1x32x16xbf16> to vector<32x16xbf16>
    %cst_150 = arith.constant dense<0.000000e+00> : vector<8x16xf32>
    %173 = tpu.matmul %170, %172, %cst_150 {dimension_numbers = #tpu.dot_dimension_numbers<[1], [0], [0], [1], [0, 0, 1, 1], [], []>} : vector<8x32xbf16>, vector<32x16xbf16>, vector<8x16xf32> -> vector<8x16xf32>
    %174 = arith.addf %165, %173 : vector<8x16xf32>
    %c3_i32_151 = arith.constant 3 : i32
    %175 = arith.addi %0, %c3_i32_151 : i32
    %c1_i32_152 = arith.constant 1 : i32
    %176 = arith.addi %175, %c1_i32_152 : i32
    %c0_153 = arith.constant 0 : index
    %177 = arith.index_cast %176 : i32 to index
    %c1_154 = arith.constant 1 : index
    %c0_155 = arith.constant 0 : index
    %178 = vector.load %arg2[%c0_153, %177, %c1_154, %c0_155] : memref<1x9x9x32xbf16, #tpu.memory_space<vmem>>, vector<1x1x8x32xbf16>
    %179 = vector.shape_cast %178 : vector<1x1x8x32xbf16> to vector<8x32xbf16>
    %c3_156 = arith.constant 3 : index
    %c0_157 = arith.constant 0 : index
    %c0_158 = arith.constant 0 : index
    %180 = vector.load %arg3[%c3_156, %c0_157, %c0_158] : memref<4x32x16xbf16, #tpu.memory_space<vmem>>, vector<1x32x16xbf16>
    %181 = vector.shape_cast %180 : vector<1x32x16xbf16> to vector<32x16xbf16>
    %cst_159 = arith.constant dense<0.000000e+00> : vector<8x16xf32>
    %182 = tpu.matmul %179, %181, %cst_159 {dimension_numbers = #tpu.dot_dimension_numbers<[1], [0], [0], [1], [0, 0, 1, 1], [], []>} : vector<8x32xbf16>, vector<32x16xbf16>, vector<8x16xf32> -> vector<8x16xf32>
    %183 = arith.addf %174, %182 : vector<8x16xf32>
    %184 = vector.broadcast %2 : vector<1x16xf32> to vector<8x16xf32>
    %185 = arith.addf %183, %184 : vector<8x16xf32>
    %cst_160 = arith.constant 0.000000e+00 : f32
    %186 = vector.broadcast %cst_160 : f32 to vector<8x16xf32>
    %187 = arith.cmpf ogt, %185, %186 : vector<8x16xf32>
    %cst_161 = arith.constant 2.000000e-01 : f32
    %188 = vector.broadcast %cst_161 : f32 to vector<8x16xf32>
    %189 = arith.mulf %188, %185 : vector<8x16xf32>
    %190 = arith.select %187, %185, %189 : vector<8x16xi1>, vector<8x16xf32>
    %191 = arith.truncf %190 : vector<8x16xf32> to vector<8x16xbf16>
    %c0_162 = arith.constant 0 : index
    %c3_163 = arith.constant 3 : index
    %c0_164 = arith.constant 0 : index
    %c0_165 = arith.constant 0 : index
    %192 = vector.load %arg5[%c0_162, %c3_163, %c0_164, %c0_165] : memref<1x8x8x16xbf16, #tpu.memory_space<vmem>>, vector<1x1x8x16xbf16>
    %193 = vector.shape_cast %192 : vector<1x1x8x16xbf16> to vector<8x16xbf16>
    %194 = vector.shape_cast %191 : vector<8x16xbf16> to vector<1x1x8x16xbf16>
    tpu.vector_store %arg5[%c0_162, %c3_163, %c0_164, %c0_165], %194 {strides = array<i32>} : memref<1x8x8x16xbf16, #tpu.memory_space<vmem>>, vector<1x1x8x16xbf16>,
    %cst_166 = arith.constant 0.000000e+00 : f32
    %195 = vector.broadcast %cst_166 : f32 to vector<8x16xf32>
    %c4_i32 = arith.constant 4 : i32
    %196 = arith.addi %0, %c4_i32 : i32
    %c0_i32_167 = arith.constant 0 : i32
    %197 = arith.addi %196, %c0_i32_167 : i32
    %c0_168 = arith.constant 0 : index
    %198 = arith.index_cast %197 : i32 to index
    %c0_169 = arith.constant 0 : index
    %c0_170 = arith.constant 0 : index
    %199 = vector.load %arg2[%c0_168, %198, %c0_169, %c0_170] : memref<1x9x9x32xbf16, #tpu.memory_space<vmem>>, vector<1x1x8x32xbf16>
    %200 = vector.shape_cast %199 : vector<1x1x8x32xbf16> to vector<8x32xbf16>
    %c0_171 = arith.constant 0 : index
    %c0_172 = arith.constant 0 : index
    %c0_173 = arith.constant 0 : index
    %201 = vector.load %arg3[%c0_171, %c0_172, %c0_173] : memref<4x32x16xbf16, #tpu.memory_space<vmem>>, vector<1x32x16xbf16>
    %202 = vector.shape_cast %201 : vector<1x32x16xbf16> to vector<32x16xbf16>
    %cst_174 = arith.constant dense<0.000000e+00> : vector<8x16xf32>
    %203 = tpu.matmul %200, %202, %cst_174 {dimension_numbers = #tpu.dot_dimension_numbers<[1], [0], [0], [1], [0, 0, 1, 1], [], []>} : vector<8x32xbf16>, vector<32x16xbf16>, vector<8x16xf32> -> vector<8x16xf32>
    %204 = arith.addf %195, %203 : vector<8x16xf32>
    %c4_i32_175 = arith.constant 4 : i32
    %205 = arith.addi %0, %c4_i32_175 : i32
    %c0_i32_176 = arith.constant 0 : i32
    %206 = arith.addi %205, %c0_i32_176 : i32
    %c0_177 = arith.constant 0 : index
    %207 = arith.index_cast %206 : i32 to index
    %c1_178 = arith.constant 1 : index
    %c0_179 = arith.constant 0 : index
    %208 = vector.load %arg2[%c0_177, %207, %c1_178, %c0_179] : memref<1x9x9x32xbf16, #tpu.memory_space<vmem>>, vector<1x1x8x32xbf16>
    %209 = vector.shape_cast %208 : vector<1x1x8x32xbf16> to vector<8x32xbf16>
    %c1_180 = arith.constant 1 : index
    %c0_181 = arith.constant 0 : index
    %c0_182 = arith.constant 0 : index
    %210 = vector.load %arg3[%c1_180, %c0_181, %c0_182] : memref<4x32x16xbf16, #tpu.memory_space<vmem>>, vector<1x32x16xbf16>
    %211 = vector.shape_cast %210 : vector<1x32x16xbf16> to vector<32x16xbf16>
    %cst_183 = arith.constant dense<0.000000e+00> : vector<8x16xf32>
    %212 = tpu.matmul %209, %211, %cst_183 {dimension_numbers = #tpu.dot_dimension_numbers<[1], [0], [0], [1], [0, 0, 1, 1], [], []>} : vector<8x32xbf16>, vector<32x16xbf16>, vector<8x16xf32> -> vector<8x16xf32>
    %213 = arith.addf %204, %212 : vector<8x16xf32>
    %c4_i32_184 = arith.constant 4 : i32
    %214 = arith.addi %0, %c4_i32_184 : i32
    %c1_i32_185 = arith.constant 1 : i32
    %215 = arith.addi %214, %c1_i32_185 : i32
    %c0_186 = arith.constant 0 : index
    %216 = arith.index_cast %215 : i32 to index
    %c0_187 = arith.constant 0 : index
    %c0_188 = arith.constant 0 : index
    %217 = vector.load %arg2[%c0_186, %216, %c0_187, %c0_188] : memref<1x9x9x32xbf16, #tpu.memory_space<vmem>>, vector<1x1x8x32xbf16>
    %218 = vector.shape_cast %217 : vector<1x1x8x32xbf16> to vector<8x32xbf16>
    %c2_189 = arith.constant 2 : index
    %c0_190 = arith.constant 0 : index
    %c0_191 = arith.constant 0 : index
    %219 = vector.load %arg3[%c2_189, %c0_190, %c0_191] : memref<4x32x16xbf16, #tpu.memory_space<vmem>>, vector<1x32x16xbf16>
    %220 = vector.shape_cast %219 : vector<1x32x16xbf16> to vector<32x16xbf16>
    %cst_192 = arith.constant dense<0.000000e+00> : vector<8x16xf32>
    %221 = tpu.matmul %218, %220, %cst_192 {dimension_numbers = #tpu.dot_dimension_numbers<[1], [0], [0], [1], [0, 0, 1, 1], [], []>} : vector<8x32xbf16>, vector<32x16xbf16>, vector<8x16xf32> -> vector<8x16xf32>
    %222 = arith.addf %213, %221 : vector<8x16xf32>
    %c4_i32_193 = arith.constant 4 : i32
    %223 = arith.addi %0, %c4_i32_193 : i32
    %c1_i32_194 = arith.constant 1 : i32
    %224 = arith.addi %223, %c1_i32_194 : i32
    %c0_195 = arith.constant 0 : index
    %225 = arith.index_cast %224 : i32 to index
    %c1_196 = arith.constant 1 : index
    %c0_197 = arith.constant 0 : index
    %226 = vector.load %arg2[%c0_195, %225, %c1_196, %c0_197] : memref<1x9x9x32xbf16, #tpu.memory_space<vmem>>, vector<1x1x8x32xbf16>
    %227 = vector.shape_cast %226 : vector<1x1x8x32xbf16> to vector<8x32xbf16>
    %c3_198 = arith.constant 3 : index
    %c0_199 = arith.constant 0 : index
    %c0_200 = arith.constant 0 : index
    %228 = vector.load %arg3[%c3_198, %c0_199, %c0_200] : memref<4x32x16xbf16, #tpu.memory_space<vmem>>, vector<1x32x16xbf16>
    %229 = vector.shape_cast %228 : vector<1x32x16xbf16> to vector<32x16xbf16>
    %cst_201 = arith.constant dense<0.000000e+00> : vector<8x16xf32>
    %230 = tpu.matmul %227, %229, %cst_201 {dimension_numbers = #tpu.dot_dimension_numbers<[1], [0], [0], [1], [0, 0, 1, 1], [], []>} : vector<8x32xbf16>, vector<32x16xbf16>, vector<8x16xf32> -> vector<8x16xf32>
    %231 = arith.addf %222, %230 : vector<8x16xf32>
    %232 = vector.broadcast %2 : vector<1x16xf32> to vector<8x16xf32>
    %233 = arith.addf %231, %232 : vector<8x16xf32>
    %cst_202 = arith.constant 0.000000e+00 : f32
    %234 = vector.broadcast %cst_202 : f32 to vector<8x16xf32>
    %235 = arith.cmpf ogt, %233, %234 : vector<8x16xf32>
    %cst_203 = arith.constant 2.000000e-01 : f32
    %236 = vector.broadcast %cst_203 : f32 to vector<8x16xf32>
    %237 = arith.mulf %236, %233 : vector<8x16xf32>
    %238 = arith.select %235, %233, %237 : vector<8x16xi1>, vector<8x16xf32>
    %239 = arith.truncf %238 : vector<8x16xf32> to vector<8x16xbf16>
    %c0_204 = arith.constant 0 : index
    %c4 = arith.constant 4 : index
    %c0_205 = arith.constant 0 : index
    %c0_206 = arith.constant 0 : index
    %240 = vector.load %arg5[%c0_204, %c4, %c0_205, %c0_206] : memref<1x8x8x16xbf16, #tpu.memory_space<vmem>>, vector<1x1x8x16xbf16>
    %241 = vector.shape_cast %240 : vector<1x1x8x16xbf16> to vector<8x16xbf16>
    %242 = vector.shape_cast %239 : vector<8x16xbf16> to vector<1x1x8x16xbf16>
    tpu.vector_store %arg5[%c0_204, %c4, %c0_205, %c0_206], %242 {strides = array<i32>} : memref<1x8x8x16xbf16, #tpu.memory_space<vmem>>, vector<1x1x8x16xbf16>,
    %cst_207 = arith.constant 0.000000e+00 : f32
    %243 = vector.broadcast %cst_207 : f32 to vector<8x16xf32>
    %c5_i32 = arith.constant 5 : i32
    %244 = arith.addi %0, %c5_i32 : i32
    %c0_i32_208 = arith.constant 0 : i32
    %245 = arith.addi %244, %c0_i32_208 : i32
    %c0_209 = arith.constant 0 : index
    %246 = arith.index_cast %245 : i32 to index
    %c0_210 = arith.constant 0 : index
    %c0_211 = arith.constant 0 : index
    %247 = vector.load %arg2[%c0_209, %246, %c0_210, %c0_211] : memref<1x9x9x32xbf16, #tpu.memory_space<vmem>>, vector<1x1x8x32xbf16>
    %248 = vector.shape_cast %247 : vector<1x1x8x32xbf16> to vector<8x32xbf16>
    %c0_212 = arith.constant 0 : index
    %c0_213 = arith.constant 0 : index
    %c0_214 = arith.constant 0 : index
    %249 = vector.load %arg3[%c0_212, %c0_213, %c0_214] : memref<4x32x16xbf16, #tpu.memory_space<vmem>>, vector<1x32x16xbf16>
    %250 = vector.shape_cast %249 : vector<1x32x16xbf16> to vector<32x16xbf16>
    %cst_215 = arith.constant dense<0.000000e+00> : vector<8x16xf32>
    %251 = tpu.matmul %248, %250, %cst_215 {dimension_numbers = #tpu.dot_dimension_numbers<[1], [0], [0], [1], [0, 0, 1, 1], [], []>} : vector<8x32xbf16>, vector<32x16xbf16>, vector<8x16xf32> -> vector<8x16xf32>
    %252 = arith.addf %243, %251 : vector<8x16xf32>
    %c5_i32_216 = arith.constant 5 : i32
    %253 = arith.addi %0, %c5_i32_216 : i32
    %c0_i32_217 = arith.constant 0 : i32
    %254 = arith.addi %253, %c0_i32_217 : i32
    %c0_218 = arith.constant 0 : index
    %255 = arith.index_cast %254 : i32 to index
    %c1_219 = arith.constant 1 : index
    %c0_220 = arith.constant 0 : index
    %256 = vector.load %arg2[%c0_218, %255, %c1_219, %c0_220] : memref<1x9x9x32xbf16, #tpu.memory_space<vmem>>, vector<1x1x8x32xbf16>
    %257 = vector.shape_cast %256 : vector<1x1x8x32xbf16> to vector<8x32xbf16>
    %c1_221 = arith.constant 1 : index
    %c0_222 = arith.constant 0 : index
    %c0_223 = arith.constant 0 : index
    %258 = vector.load %arg3[%c1_221, %c0_222, %c0_223] : memref<4x32x16xbf16, #tpu.memory_space<vmem>>, vector<1x32x16xbf16>
    %259 = vector.shape_cast %258 : vector<1x32x16xbf16> to vector<32x16xbf16>
    %cst_224 = arith.constant dense<0.000000e+00> : vector<8x16xf32>
    %260 = tpu.matmul %257, %259, %cst_224 {dimension_numbers = #tpu.dot_dimension_numbers<[1], [0], [0], [1], [0, 0, 1, 1], [], []>} : vector<8x32xbf16>, vector<32x16xbf16>, vector<8x16xf32> -> vector<8x16xf32>
    %261 = arith.addf %252, %260 : vector<8x16xf32>
    %c5_i32_225 = arith.constant 5 : i32
    %262 = arith.addi %0, %c5_i32_225 : i32
    %c1_i32_226 = arith.constant 1 : i32
    %263 = arith.addi %262, %c1_i32_226 : i32
    %c0_227 = arith.constant 0 : index
    %264 = arith.index_cast %263 : i32 to index
    %c0_228 = arith.constant 0 : index
    %c0_229 = arith.constant 0 : index
    %265 = vector.load %arg2[%c0_227, %264, %c0_228, %c0_229] : memref<1x9x9x32xbf16, #tpu.memory_space<vmem>>, vector<1x1x8x32xbf16>
    %266 = vector.shape_cast %265 : vector<1x1x8x32xbf16> to vector<8x32xbf16>
    %c2_230 = arith.constant 2 : index
    %c0_231 = arith.constant 0 : index
    %c0_232 = arith.constant 0 : index
    %267 = vector.load %arg3[%c2_230, %c0_231, %c0_232] : memref<4x32x16xbf16, #tpu.memory_space<vmem>>, vector<1x32x16xbf16>
    %268 = vector.shape_cast %267 : vector<1x32x16xbf16> to vector<32x16xbf16>
    %cst_233 = arith.constant dense<0.000000e+00> : vector<8x16xf32>
    %269 = tpu.matmul %266, %268, %cst_233 {dimension_numbers = #tpu.dot_dimension_numbers<[1], [0], [0], [1], [0, 0, 1, 1], [], []>} : vector<8x32xbf16>, vector<32x16xbf16>, vector<8x16xf32> -> vector<8x16xf32>
    %270 = arith.addf %261, %269 : vector<8x16xf32>
    %c5_i32_234 = arith.constant 5 : i32
    %271 = arith.addi %0, %c5_i32_234 : i32
    %c1_i32_235 = arith.constant 1 : i32
    %272 = arith.addi %271, %c1_i32_235 : i32
    %c0_236 = arith.constant 0 : index
    %273 = arith.index_cast %272 : i32 to index
    %c1_237 = arith.constant 1 : index
    %c0_238 = arith.constant 0 : index
    %274 = vector.load %arg2[%c0_236, %273, %c1_237, %c0_238] : memref<1x9x9x32xbf16, #tpu.memory_space<vmem>>, vector<1x1x8x32xbf16>
    %275 = vector.shape_cast %274 : vector<1x1x8x32xbf16> to vector<8x32xbf16>
    %c3_239 = arith.constant 3 : index
    %c0_240 = arith.constant 0 : index
    %c0_241 = arith.constant 0 : index
    %276 = vector.load %arg3[%c3_239, %c0_240, %c0_241] : memref<4x32x16xbf16, #tpu.memory_space<vmem>>, vector<1x32x16xbf16>
    %277 = vector.shape_cast %276 : vector<1x32x16xbf16> to vector<32x16xbf16>
    %cst_242 = arith.constant dense<0.000000e+00> : vector<8x16xf32>
    %278 = tpu.matmul %275, %277, %cst_242 {dimension_numbers = #tpu.dot_dimension_numbers<[1], [0], [0], [1], [0, 0, 1, 1], [], []>} : vector<8x32xbf16>, vector<32x16xbf16>, vector<8x16xf32> -> vector<8x16xf32>
    %279 = arith.addf %270, %278 : vector<8x16xf32>
    %280 = vector.broadcast %2 : vector<1x16xf32> to vector<8x16xf32>
    %281 = arith.addf %279, %280 : vector<8x16xf32>
    %cst_243 = arith.constant 0.000000e+00 : f32
    %282 = vector.broadcast %cst_243 : f32 to vector<8x16xf32>
    %283 = arith.cmpf ogt, %281, %282 : vector<8x16xf32>
    %cst_244 = arith.constant 2.000000e-01 : f32
    %284 = vector.broadcast %cst_244 : f32 to vector<8x16xf32>
    %285 = arith.mulf %284, %281 : vector<8x16xf32>
    %286 = arith.select %283, %281, %285 : vector<8x16xi1>, vector<8x16xf32>
    %287 = arith.truncf %286 : vector<8x16xf32> to vector<8x16xbf16>
    %c0_245 = arith.constant 0 : index
    %c5 = arith.constant 5 : index
    %c0_246 = arith.constant 0 : index
    %c0_247 = arith.constant 0 : index
    %288 = vector.load %arg5[%c0_245, %c5, %c0_246, %c0_247] : memref<1x8x8x16xbf16, #tpu.memory_space<vmem>>, vector<1x1x8x16xbf16>
    %289 = vector.shape_cast %288 : vector<1x1x8x16xbf16> to vector<8x16xbf16>
    %290 = vector.shape_cast %287 : vector<8x16xbf16> to vector<1x1x8x16xbf16>
    tpu.vector_store %arg5[%c0_245, %c5, %c0_246, %c0_247], %290 {strides = array<i32>} : memref<1x8x8x16xbf16, #tpu.memory_space<vmem>>, vector<1x1x8x16xbf16>,
    %cst_248 = arith.constant 0.000000e+00 : f32
    %291 = vector.broadcast %cst_248 : f32 to vector<8x16xf32>
    %c6_i32 = arith.constant 6 : i32
    %292 = arith.addi %0, %c6_i32 : i32
    %c0_i32_249 = arith.constant 0 : i32
    %293 = arith.addi %292, %c0_i32_249 : i32
    %c0_250 = arith.constant 0 : index
    %294 = arith.index_cast %293 : i32 to index
    %c0_251 = arith.constant 0 : index
    %c0_252 = arith.constant 0 : index
    %295 = vector.load %arg2[%c0_250, %294, %c0_251, %c0_252] : memref<1x9x9x32xbf16, #tpu.memory_space<vmem>>, vector<1x1x8x32xbf16>
    %296 = vector.shape_cast %295 : vector<1x1x8x32xbf16> to vector<8x32xbf16>
    %c0_253 = arith.constant 0 : index
    %c0_254 = arith.constant 0 : index
    %c0_255 = arith.constant 0 : index
    %297 = vector.load %arg3[%c0_253, %c0_254, %c0_255] : memref<4x32x16xbf16, #tpu.memory_space<vmem>>, vector<1x32x16xbf16>
    %298 = vector.shape_cast %297 : vector<1x32x16xbf16> to vector<32x16xbf16>
    %cst_256 = arith.constant dense<0.000000e+00> : vector<8x16xf32>
    %299 = tpu.matmul %296, %298, %cst_256 {dimension_numbers = #tpu.dot_dimension_numbers<[1], [0], [0], [1], [0, 0, 1, 1], [], []>} : vector<8x32xbf16>, vector<32x16xbf16>, vector<8x16xf32> -> vector<8x16xf32>
    %300 = arith.addf %291, %299 : vector<8x16xf32>
    %c6_i32_257 = arith.constant 6 : i32
    %301 = arith.addi %0, %c6_i32_257 : i32
    %c0_i32_258 = arith.constant 0 : i32
    %302 = arith.addi %301, %c0_i32_258 : i32
    %c0_259 = arith.constant 0 : index
    %303 = arith.index_cast %302 : i32 to index
    %c1_260 = arith.constant 1 : index
    %c0_261 = arith.constant 0 : index
    %304 = vector.load %arg2[%c0_259, %303, %c1_260, %c0_261] : memref<1x9x9x32xbf16, #tpu.memory_space<vmem>>, vector<1x1x8x32xbf16>
    %305 = vector.shape_cast %304 : vector<1x1x8x32xbf16> to vector<8x32xbf16>
    %c1_262 = arith.constant 1 : index
    %c0_263 = arith.constant 0 : index
    %c0_264 = arith.constant 0 : index
    %306 = vector.load %arg3[%c1_262, %c0_263, %c0_264] : memref<4x32x16xbf16, #tpu.memory_space<vmem>>, vector<1x32x16xbf16>
    %307 = vector.shape_cast %306 : vector<1x32x16xbf16> to vector<32x16xbf16>
    %cst_265 = arith.constant dense<0.000000e+00> : vector<8x16xf32>
    %308 = tpu.matmul %305, %307, %cst_265 {dimension_numbers = #tpu.dot_dimension_numbers<[1], [0], [0], [1], [0, 0, 1, 1], [], []>} : vector<8x32xbf16>, vector<32x16xbf16>, vector<8x16xf32> -> vector<8x16xf32>
    %309 = arith.addf %300, %308 : vector<8x16xf32>
    %c6_i32_266 = arith.constant 6 : i32
    %310 = arith.addi %0, %c6_i32_266 : i32
    %c1_i32_267 = arith.constant 1 : i32
    %311 = arith.addi %310, %c1_i32_267 : i32
    %c0_268 = arith.constant 0 : index
    %312 = arith.index_cast %311 : i32 to index
    %c0_269 = arith.constant 0 : index
    %c0_270 = arith.constant 0 : index
    %313 = vector.load %arg2[%c0_268, %312, %c0_269, %c0_270] : memref<1x9x9x32xbf16, #tpu.memory_space<vmem>>, vector<1x1x8x32xbf16>
    %314 = vector.shape_cast %313 : vector<1x1x8x32xbf16> to vector<8x32xbf16>
    %c2_271 = arith.constant 2 : index
    %c0_272 = arith.constant 0 : index
    %c0_273 = arith.constant 0 : index
    %315 = vector.load %arg3[%c2_271, %c0_272, %c0_273] : memref<4x32x16xbf16, #tpu.memory_space<vmem>>, vector<1x32x16xbf16>
    %316 = vector.shape_cast %315 : vector<1x32x16xbf16> to vector<32x16xbf16>
    %cst_274 = arith.constant dense<0.000000e+00> : vector<8x16xf32>
    %317 = tpu.matmul %314, %316, %cst_274 {dimension_numbers = #tpu.dot_dimension_numbers<[1], [0], [0], [1], [0, 0, 1, 1], [], []>} : vector<8x32xbf16>, vector<32x16xbf16>, vector<8x16xf32> -> vector<8x16xf32>
    %318 = arith.addf %309, %317 : vector<8x16xf32>
    %c6_i32_275 = arith.constant 6 : i32
    %319 = arith.addi %0, %c6_i32_275 : i32
    %c1_i32_276 = arith.constant 1 : i32
    %320 = arith.addi %319, %c1_i32_276 : i32
    %c0_277 = arith.constant 0 : index
    %321 = arith.index_cast %320 : i32 to index
    %c1_278 = arith.constant 1 : index
    %c0_279 = arith.constant 0 : index
    %322 = vector.load %arg2[%c0_277, %321, %c1_278, %c0_279] : memref<1x9x9x32xbf16, #tpu.memory_space<vmem>>, vector<1x1x8x32xbf16>
    %323 = vector.shape_cast %322 : vector<1x1x8x32xbf16> to vector<8x32xbf16>
    %c3_280 = arith.constant 3 : index
    %c0_281 = arith.constant 0 : index
    %c0_282 = arith.constant 0 : index
    %324 = vector.load %arg3[%c3_280, %c0_281, %c0_282] : memref<4x32x16xbf16, #tpu.memory_space<vmem>>, vector<1x32x16xbf16>
    %325 = vector.shape_cast %324 : vector<1x32x16xbf16> to vector<32x16xbf16>
    %cst_283 = arith.constant dense<0.000000e+00> : vector<8x16xf32>
    %326 = tpu.matmul %323, %325, %cst_283 {dimension_numbers = #tpu.dot_dimension_numbers<[1], [0], [0], [1], [0, 0, 1, 1], [], []>} : vector<8x32xbf16>, vector<32x16xbf16>, vector<8x16xf32> -> vector<8x16xf32>
    %327 = arith.addf %318, %326 : vector<8x16xf32>
    %328 = vector.broadcast %2 : vector<1x16xf32> to vector<8x16xf32>
    %329 = arith.addf %327, %328 : vector<8x16xf32>
    %cst_284 = arith.constant 0.000000e+00 : f32
    %330 = vector.broadcast %cst_284 : f32 to vector<8x16xf32>
    %331 = arith.cmpf ogt, %329, %330 : vector<8x16xf32>
    %cst_285 = arith.constant 2.000000e-01 : f32
    %332 = vector.broadcast %cst_285 : f32 to vector<8x16xf32>
    %333 = arith.mulf %332, %329 : vector<8x16xf32>
    %334 = arith.select %331, %329, %333 : vector<8x16xi1>, vector<8x16xf32>
    %335 = arith.truncf %334 : vector<8x16xf32> to vector<8x16xbf16>
    %c0_286 = arith.constant 0 : index
    %c6 = arith.constant 6 : index
    %c0_287 = arith.constant 0 : index
    %c0_288 = arith.constant 0 : index
    %336 = vector.load %arg5[%c0_286, %c6, %c0_287, %c0_288] : memref<1x8x8x16xbf16, #tpu.memory_space<vmem>>, vector<1x1x8x16xbf16>
    %337 = vector.shape_cast %336 : vector<1x1x8x16xbf16> to vector<8x16xbf16>
    %338 = vector.shape_cast %335 : vector<8x16xbf16> to vector<1x1x8x16xbf16>
    tpu.vector_store %arg5[%c0_286, %c6, %c0_287, %c0_288], %338 {strides = array<i32>} : memref<1x8x8x16xbf16, #tpu.memory_space<vmem>>, vector<1x1x8x16xbf16>,
    %cst_289 = arith.constant 0.000000e+00 : f32
    %339 = vector.broadcast %cst_289 : f32 to vector<8x16xf32>
    %c7_i32 = arith.constant 7 : i32
    %340 = arith.addi %0, %c7_i32 : i32
    %c0_i32_290 = arith.constant 0 : i32
    %341 = arith.addi %340, %c0_i32_290 : i32
    %c0_291 = arith.constant 0 : index
    %342 = arith.index_cast %341 : i32 to index
    %c0_292 = arith.constant 0 : index
    %c0_293 = arith.constant 0 : index
    %343 = vector.load %arg2[%c0_291, %342, %c0_292, %c0_293] : memref<1x9x9x32xbf16, #tpu.memory_space<vmem>>, vector<1x1x8x32xbf16>
    %344 = vector.shape_cast %343 : vector<1x1x8x32xbf16> to vector<8x32xbf16>
    %c0_294 = arith.constant 0 : index
    %c0_295 = arith.constant 0 : index
    %c0_296 = arith.constant 0 : index
    %345 = vector.load %arg3[%c0_294, %c0_295, %c0_296] : memref<4x32x16xbf16, #tpu.memory_space<vmem>>, vector<1x32x16xbf16>
    %346 = vector.shape_cast %345 : vector<1x32x16xbf16> to vector<32x16xbf16>
    %cst_297 = arith.constant dense<0.000000e+00> : vector<8x16xf32>
    %347 = tpu.matmul %344, %346, %cst_297 {dimension_numbers = #tpu.dot_dimension_numbers<[1], [0], [0], [1], [0, 0, 1, 1], [], []>} : vector<8x32xbf16>, vector<32x16xbf16>, vector<8x16xf32> -> vector<8x16xf32>
    %348 = arith.addf %339, %347 : vector<8x16xf32>
    %c7_i32_298 = arith.constant 7 : i32
    %349 = arith.addi %0, %c7_i32_298 : i32
    %c0_i32_299 = arith.constant 0 : i32
    %350 = arith.addi %349, %c0_i32_299 : i32
    %c0_300 = arith.constant 0 : index
    %351 = arith.index_cast %350 : i32 to index
    %c1_301 = arith.constant 1 : index
    %c0_302 = arith.constant 0 : index
    %352 = vector.load %arg2[%c0_300, %351, %c1_301, %c0_302] : memref<1x9x9x32xbf16, #tpu.memory_space<vmem>>, vector<1x1x8x32xbf16>
    %353 = vector.shape_cast %352 : vector<1x1x8x32xbf16> to vector<8x32xbf16>
    %c1_303 = arith.constant 1 : index
    %c0_304 = arith.constant 0 : index
    %c0_305 = arith.constant 0 : index
    %354 = vector.load %arg3[%c1_303, %c0_304, %c0_305] : memref<4x32x16xbf16, #tpu.memory_space<vmem>>, vector<1x32x16xbf16>
    %355 = vector.shape_cast %354 : vector<1x32x16xbf16> to vector<32x16xbf16>
    %cst_306 = arith.constant dense<0.000000e+00> : vector<8x16xf32>
    %356 = tpu.matmul %353, %355, %cst_306 {dimension_numbers = #tpu.dot_dimension_numbers<[1], [0], [0], [1], [0, 0, 1, 1], [], []>} : vector<8x32xbf16>, vector<32x16xbf16>, vector<8x16xf32> -> vector<8x16xf32>
    %357 = arith.addf %348, %356 : vector<8x16xf32>
    %c7_i32_307 = arith.constant 7 : i32
    %358 = arith.addi %0, %c7_i32_307 : i32
    %c1_i32_308 = arith.constant 1 : i32
    %359 = arith.addi %358, %c1_i32_308 : i32
    %c0_309 = arith.constant 0 : index
    %360 = arith.index_cast %359 : i32 to index
    %c0_310 = arith.constant 0 : index
    %c0_311 = arith.constant 0 : index
    %361 = vector.load %arg2[%c0_309, %360, %c0_310, %c0_311] : memref<1x9x9x32xbf16, #tpu.memory_space<vmem>>, vector<1x1x8x32xbf16>
    %362 = vector.shape_cast %361 : vector<1x1x8x32xbf16> to vector<8x32xbf16>
    %c2_312 = arith.constant 2 : index
    %c0_313 = arith.constant 0 : index
    %c0_314 = arith.constant 0 : index
    %363 = vector.load %arg3[%c2_312, %c0_313, %c0_314] : memref<4x32x16xbf16, #tpu.memory_space<vmem>>, vector<1x32x16xbf16>
    %364 = vector.shape_cast %363 : vector<1x32x16xbf16> to vector<32x16xbf16>
    %cst_315 = arith.constant dense<0.000000e+00> : vector<8x16xf32>
    %365 = tpu.matmul %362, %364, %cst_315 {dimension_numbers = #tpu.dot_dimension_numbers<[1], [0], [0], [1], [0, 0, 1, 1], [], []>} : vector<8x32xbf16>, vector<32x16xbf16>, vector<8x16xf32> -> vector<8x16xf32>
    %366 = arith.addf %357, %365 : vector<8x16xf32>
    %c7_i32_316 = arith.constant 7 : i32
    %367 = arith.addi %0, %c7_i32_316 : i32
    %c1_i32_317 = arith.constant 1 : i32
    %368 = arith.addi %367, %c1_i32_317 : i32
    %c0_318 = arith.constant 0 : index
    %369 = arith.index_cast %368 : i32 to index
    %c1_319 = arith.constant 1 : index
    %c0_320 = arith.constant 0 : index
    %370 = vector.load %arg2[%c0_318, %369, %c1_319, %c0_320] : memref<1x9x9x32xbf16, #tpu.memory_space<vmem>>, vector<1x1x8x32xbf16>
    %371 = vector.shape_cast %370 : vector<1x1x8x32xbf16> to vector<8x32xbf16>
    %c3_321 = arith.constant 3 : index
    %c0_322 = arith.constant 0 : index
    %c0_323 = arith.constant 0 : index
    %372 = vector.load %arg3[%c3_321, %c0_322, %c0_323] : memref<4x32x16xbf16, #tpu.memory_space<vmem>>, vector<1x32x16xbf16>
    %373 = vector.shape_cast %372 : vector<1x32x16xbf16> to vector<32x16xbf16>
    %cst_324 = arith.constant dense<0.000000e+00> : vector<8x16xf32>
    %374 = tpu.matmul %371, %373, %cst_324 {dimension_numbers = #tpu.dot_dimension_numbers<[1], [0], [0], [1], [0, 0, 1, 1], [], []>} : vector<8x32xbf16>, vector<32x16xbf16>, vector<8x16xf32> -> vector<8x16xf32>
    %375 = arith.addf %366, %374 : vector<8x16xf32>
    %376 = vector.broadcast %2 : vector<1x16xf32> to vector<8x16xf32>
    %377 = arith.addf %375, %376 : vector<8x16xf32>
    %cst_325 = arith.constant 0.000000e+00 : f32
    %378 = vector.broadcast %cst_325 : f32 to vector<8x16xf32>
    %379 = arith.cmpf ogt, %377, %378 : vector<8x16xf32>
    %cst_326 = arith.constant 2.000000e-01 : f32
    %380 = vector.broadcast %cst_326 : f32 to vector<8x16xf32>
    %381 = arith.mulf %380, %377 : vector<8x16xf32>
    %382 = arith.select %379, %377, %381 : vector<8x16xi1>, vector<8x16xf32>
    %383 = arith.truncf %382 : vector<8x16xf32> to vector<8x16xbf16>
    %c0_327 = arith.constant 0 : index
    %c7 = arith.constant 7 : index
    %c0_328 = arith.constant 0 : index
    %c0_329 = arith.constant 0 : index
    %384 = vector.load %arg5[%c0_327, %c7, %c0_328, %c0_329] : memref<1x8x8x16xbf16, #tpu.memory_space<vmem>>, vector<1x1x8x16xbf16>
    %385 = vector.shape_cast %384 : vector<1x1x8x16xbf16> to vector<8x16xbf16>
    %386 = vector.shape_cast %383 : vector<8x16xbf16> to vector<1x1x8x16xbf16>
    tpu.vector_store %arg5[%c0_327, %c7, %c0_328, %c0_329], %386 {strides = array<i32>} : memref<1x8x8x16xbf16, #tpu.memory_space<vmem>>, vector<1x1x8x16xbf16>,
    return
  }
  func.func @transform_0(%arg0: i32, %arg1: i32) -> (i32, i32, i32, i32) {
    %c0_i32 = arith.constant 0 : i32
    %c0_i32_0 = arith.constant 0 : i32
    %c0_i32_1 = arith.constant 0 : i32
    %c0_i32_2 = arith.constant 0 : i32
    return %arg0, %c0_i32, %c0_i32_0, %c0_i32_1 : i32, i32, i32, i32
  }
  func.func @transform_1(%arg0: i32, %arg1: i32) -> (i32, i32, i32) {
    %c0_i32 = arith.constant 0 : i32
    %c0_i32_0 = arith.constant 0 : i32
    %c0_i32_1 = arith.constant 0 : i32
    %c0_i32_2 = arith.constant 0 : i32
    return %c0_i32, %c0_i32_0, %c0_i32_1 : i32, i32, i32
  }
  func.func @transform_2(%arg0: i32, %arg1: i32) -> (i32, i32, i32) {
    %c0_i32 = arith.constant 0 : i32
    %c0_i32_0 = arith.constant 0 : i32
    %c0_i32_1 = arith.constant 0 : i32
    %c0_i32_2 = arith.constant 0 : i32
    return %c0_i32, %c0_i32_0, %c0_i32_1 : i32, i32, i32
  }
  func.func @transform_3(%arg0: i32, %arg1: i32) -> (i32, i32, i32, i32) {
    %c0_i32 = arith.constant 0 : i32
    %c0_i32_0 = arith.constant 0 : i32
    %c0_i32_1 = arith.constant 0 : i32
    return %arg0, %arg1, %c0_i32, %c0_i32_0 : i32, i32, i32, i32
  }
}

module attributes {stable_mosaic.version = 11 : i64} {
  func.func @_conv4x4s2_kernel(%arg0: i32, %arg1: i32, %arg2: memref<1x5x5x64xbf16, #tpu.memory_space<vmem>>, %arg3: memref<4x64x32xbf16, #tpu.memory_space<vmem>>, %arg4: memref<1x1x32xf32, #tpu.memory_space<vmem>>, %arg5: memref<1x4x4x32xbf16, #tpu.memory_space<vmem>>) attributes {dimension_semantics = [#tpu.dimension_semantics<parallel>, #tpu.dimension_semantics<arbitrary>], iteration_bounds = array<i64: 2, 1>, scalar_prefetch = 0 : i64, scratch_operands = 0 : i64, tpu.core_type = #tpu.core_type<tc>, window_params = [{transform_indices = @transform_0, window_bounds = array<i64: 1, 5, 5, 64>}, {pipeline_mode = #tpu.pipeline_mode<synchronous>, transform_indices = @transform_1, window_bounds = array<i64: 4, 64, 32>}, {pipeline_mode = #tpu.pipeline_mode<synchronous>, transform_indices = @transform_2, window_bounds = array<i64: 1, 1, 32>}, {transform_indices = @transform_3, window_bounds = array<i64: 1, 4, 4, 32>}]} {
    %c4_i32 = arith.constant 4 : i32
    %0 = arith.muli %arg1, %c4_i32 : i32
    %c0 = arith.constant 0 : index
    %c0_0 = arith.constant 0 : index
    %c0_1 = arith.constant 0 : index
    %1 = vector.load %arg4[%c0, %c0_0, %c0_1] : memref<1x1x32xf32, #tpu.memory_space<vmem>>, vector<1x1x32xf32>
    %2 = vector.shape_cast %1 : vector<1x1x32xf32> to vector<1x32xf32>
    %cst = arith.constant 0.000000e+00 : f32
    %3 = vector.broadcast %cst : f32 to vector<4x32xf32>
    %c0_i32 = arith.constant 0 : i32
    %4 = arith.addi %0, %c0_i32 : i32
    %c0_i32_2 = arith.constant 0 : i32
    %5 = arith.addi %4, %c0_i32_2 : i32
    %c0_3 = arith.constant 0 : index
    %6 = arith.index_cast %5 : i32 to index
    %c0_4 = arith.constant 0 : index
    %c0_5 = arith.constant 0 : index
    %7 = vector.load %arg2[%c0_3, %6, %c0_4, %c0_5] : memref<1x5x5x64xbf16, #tpu.memory_space<vmem>>, vector<1x1x4x64xbf16>
    %8 = vector.shape_cast %7 : vector<1x1x4x64xbf16> to vector<4x64xbf16>
    %c0_6 = arith.constant 0 : index
    %c0_7 = arith.constant 0 : index
    %c0_8 = arith.constant 0 : index
    %9 = vector.load %arg3[%c0_6, %c0_7, %c0_8] : memref<4x64x32xbf16, #tpu.memory_space<vmem>>, vector<1x64x32xbf16>
    %10 = vector.shape_cast %9 : vector<1x64x32xbf16> to vector<64x32xbf16>
    %cst_9 = arith.constant dense<0.000000e+00> : vector<4x32xf32>
    %11 = tpu.matmul %8, %10, %cst_9 {dimension_numbers = #tpu.dot_dimension_numbers<[1], [0], [0], [1], [0, 0, 1, 1], [], []>} : vector<4x64xbf16>, vector<64x32xbf16>, vector<4x32xf32> -> vector<4x32xf32>
    %12 = arith.addf %3, %11 : vector<4x32xf32>
    %c0_i32_10 = arith.constant 0 : i32
    %13 = arith.addi %0, %c0_i32_10 : i32
    %c0_i32_11 = arith.constant 0 : i32
    %14 = arith.addi %13, %c0_i32_11 : i32
    %c0_12 = arith.constant 0 : index
    %15 = arith.index_cast %14 : i32 to index
    %c1 = arith.constant 1 : index
    %c0_13 = arith.constant 0 : index
    %16 = vector.load %arg2[%c0_12, %15, %c1, %c0_13] : memref<1x5x5x64xbf16, #tpu.memory_space<vmem>>, vector<1x1x4x64xbf16>
    %17 = vector.shape_cast %16 : vector<1x1x4x64xbf16> to vector<4x64xbf16>
    %c1_14 = arith.constant 1 : index
    %c0_15 = arith.constant 0 : index
    %c0_16 = arith.constant 0 : index
    %18 = vector.load %arg3[%c1_14, %c0_15, %c0_16] : memref<4x64x32xbf16, #tpu.memory_space<vmem>>, vector<1x64x32xbf16>
    %19 = vector.shape_cast %18 : vector<1x64x32xbf16> to vector<64x32xbf16>
    %cst_17 = arith.constant dense<0.000000e+00> : vector<4x32xf32>
    %20 = tpu.matmul %17, %19, %cst_17 {dimension_numbers = #tpu.dot_dimension_numbers<[1], [0], [0], [1], [0, 0, 1, 1], [], []>} : vector<4x64xbf16>, vector<64x32xbf16>, vector<4x32xf32> -> vector<4x32xf32>
    %21 = arith.addf %12, %20 : vector<4x32xf32>
    %c0_i32_18 = arith.constant 0 : i32
    %22 = arith.addi %0, %c0_i32_18 : i32
    %c1_i32 = arith.constant 1 : i32
    %23 = arith.addi %22, %c1_i32 : i32
    %c0_19 = arith.constant 0 : index
    %24 = arith.index_cast %23 : i32 to index
    %c0_20 = arith.constant 0 : index
    %c0_21 = arith.constant 0 : index
    %25 = vector.load %arg2[%c0_19, %24, %c0_20, %c0_21] : memref<1x5x5x64xbf16, #tpu.memory_space<vmem>>, vector<1x1x4x64xbf16>
    %26 = vector.shape_cast %25 : vector<1x1x4x64xbf16> to vector<4x64xbf16>
    %c2 = arith.constant 2 : index
    %c0_22 = arith.constant 0 : index
    %c0_23 = arith.constant 0 : index
    %27 = vector.load %arg3[%c2, %c0_22, %c0_23] : memref<4x64x32xbf16, #tpu.memory_space<vmem>>, vector<1x64x32xbf16>
    %28 = vector.shape_cast %27 : vector<1x64x32xbf16> to vector<64x32xbf16>
    %cst_24 = arith.constant dense<0.000000e+00> : vector<4x32xf32>
    %29 = tpu.matmul %26, %28, %cst_24 {dimension_numbers = #tpu.dot_dimension_numbers<[1], [0], [0], [1], [0, 0, 1, 1], [], []>} : vector<4x64xbf16>, vector<64x32xbf16>, vector<4x32xf32> -> vector<4x32xf32>
    %30 = arith.addf %21, %29 : vector<4x32xf32>
    %c0_i32_25 = arith.constant 0 : i32
    %31 = arith.addi %0, %c0_i32_25 : i32
    %c1_i32_26 = arith.constant 1 : i32
    %32 = arith.addi %31, %c1_i32_26 : i32
    %c0_27 = arith.constant 0 : index
    %33 = arith.index_cast %32 : i32 to index
    %c1_28 = arith.constant 1 : index
    %c0_29 = arith.constant 0 : index
    %34 = vector.load %arg2[%c0_27, %33, %c1_28, %c0_29] : memref<1x5x5x64xbf16, #tpu.memory_space<vmem>>, vector<1x1x4x64xbf16>
    %35 = vector.shape_cast %34 : vector<1x1x4x64xbf16> to vector<4x64xbf16>
    %c3 = arith.constant 3 : index
    %c0_30 = arith.constant 0 : index
    %c0_31 = arith.constant 0 : index
    %36 = vector.load %arg3[%c3, %c0_30, %c0_31] : memref<4x64x32xbf16, #tpu.memory_space<vmem>>, vector<1x64x32xbf16>
    %37 = vector.shape_cast %36 : vector<1x64x32xbf16> to vector<64x32xbf16>
    %cst_32 = arith.constant dense<0.000000e+00> : vector<4x32xf32>
    %38 = tpu.matmul %35, %37, %cst_32 {dimension_numbers = #tpu.dot_dimension_numbers<[1], [0], [0], [1], [0, 0, 1, 1], [], []>} : vector<4x64xbf16>, vector<64x32xbf16>, vector<4x32xf32> -> vector<4x32xf32>
    %39 = arith.addf %30, %38 : vector<4x32xf32>
    %40 = vector.broadcast %2 : vector<1x32xf32> to vector<4x32xf32>
    %41 = arith.addf %39, %40 : vector<4x32xf32>
    %cst_33 = arith.constant 0.000000e+00 : f32
    %42 = vector.broadcast %cst_33 : f32 to vector<4x32xf32>
    %43 = arith.cmpf ogt, %41, %42 : vector<4x32xf32>
    %cst_34 = arith.constant 2.000000e-01 : f32
    %44 = vector.broadcast %cst_34 : f32 to vector<4x32xf32>
    %45 = arith.mulf %44, %41 : vector<4x32xf32>
    %46 = arith.select %43, %41, %45 : vector<4x32xi1>, vector<4x32xf32>
    %47 = arith.truncf %46 : vector<4x32xf32> to vector<4x32xbf16>
    %c0_35 = arith.constant 0 : index
    %c0_36 = arith.constant 0 : index
    %c0_37 = arith.constant 0 : index
    %c0_38 = arith.constant 0 : index
    %48 = vector.load %arg5[%c0_35, %c0_36, %c0_37, %c0_38] : memref<1x4x4x32xbf16, #tpu.memory_space<vmem>>, vector<1x1x4x32xbf16>
    %49 = vector.shape_cast %48 : vector<1x1x4x32xbf16> to vector<4x32xbf16>
    %50 = vector.shape_cast %47 : vector<4x32xbf16> to vector<1x1x4x32xbf16>
    tpu.vector_store %arg5[%c0_35, %c0_36, %c0_37, %c0_38], %50 {strides = array<i32>} : memref<1x4x4x32xbf16, #tpu.memory_space<vmem>>, vector<1x1x4x32xbf16>,
    %cst_39 = arith.constant 0.000000e+00 : f32
    %51 = vector.broadcast %cst_39 : f32 to vector<4x32xf32>
    %c1_i32_40 = arith.constant 1 : i32
    %52 = arith.addi %0, %c1_i32_40 : i32
    %c0_i32_41 = arith.constant 0 : i32
    %53 = arith.addi %52, %c0_i32_41 : i32
    %c0_42 = arith.constant 0 : index
    %54 = arith.index_cast %53 : i32 to index
    %c0_43 = arith.constant 0 : index
    %c0_44 = arith.constant 0 : index
    %55 = vector.load %arg2[%c0_42, %54, %c0_43, %c0_44] : memref<1x5x5x64xbf16, #tpu.memory_space<vmem>>, vector<1x1x4x64xbf16>
    %56 = vector.shape_cast %55 : vector<1x1x4x64xbf16> to vector<4x64xbf16>
    %c0_45 = arith.constant 0 : index
    %c0_46 = arith.constant 0 : index
    %c0_47 = arith.constant 0 : index
    %57 = vector.load %arg3[%c0_45, %c0_46, %c0_47] : memref<4x64x32xbf16, #tpu.memory_space<vmem>>, vector<1x64x32xbf16>
    %58 = vector.shape_cast %57 : vector<1x64x32xbf16> to vector<64x32xbf16>
    %cst_48 = arith.constant dense<0.000000e+00> : vector<4x32xf32>
    %59 = tpu.matmul %56, %58, %cst_48 {dimension_numbers = #tpu.dot_dimension_numbers<[1], [0], [0], [1], [0, 0, 1, 1], [], []>} : vector<4x64xbf16>, vector<64x32xbf16>, vector<4x32xf32> -> vector<4x32xf32>
    %60 = arith.addf %51, %59 : vector<4x32xf32>
    %c1_i32_49 = arith.constant 1 : i32
    %61 = arith.addi %0, %c1_i32_49 : i32
    %c0_i32_50 = arith.constant 0 : i32
    %62 = arith.addi %61, %c0_i32_50 : i32
    %c0_51 = arith.constant 0 : index
    %63 = arith.index_cast %62 : i32 to index
    %c1_52 = arith.constant 1 : index
    %c0_53 = arith.constant 0 : index
    %64 = vector.load %arg2[%c0_51, %63, %c1_52, %c0_53] : memref<1x5x5x64xbf16, #tpu.memory_space<vmem>>, vector<1x1x4x64xbf16>
    %65 = vector.shape_cast %64 : vector<1x1x4x64xbf16> to vector<4x64xbf16>
    %c1_54 = arith.constant 1 : index
    %c0_55 = arith.constant 0 : index
    %c0_56 = arith.constant 0 : index
    %66 = vector.load %arg3[%c1_54, %c0_55, %c0_56] : memref<4x64x32xbf16, #tpu.memory_space<vmem>>, vector<1x64x32xbf16>
    %67 = vector.shape_cast %66 : vector<1x64x32xbf16> to vector<64x32xbf16>
    %cst_57 = arith.constant dense<0.000000e+00> : vector<4x32xf32>
    %68 = tpu.matmul %65, %67, %cst_57 {dimension_numbers = #tpu.dot_dimension_numbers<[1], [0], [0], [1], [0, 0, 1, 1], [], []>} : vector<4x64xbf16>, vector<64x32xbf16>, vector<4x32xf32> -> vector<4x32xf32>
    %69 = arith.addf %60, %68 : vector<4x32xf32>
    %c1_i32_58 = arith.constant 1 : i32
    %70 = arith.addi %0, %c1_i32_58 : i32
    %c1_i32_59 = arith.constant 1 : i32
    %71 = arith.addi %70, %c1_i32_59 : i32
    %c0_60 = arith.constant 0 : index
    %72 = arith.index_cast %71 : i32 to index
    %c0_61 = arith.constant 0 : index
    %c0_62 = arith.constant 0 : index
    %73 = vector.load %arg2[%c0_60, %72, %c0_61, %c0_62] : memref<1x5x5x64xbf16, #tpu.memory_space<vmem>>, vector<1x1x4x64xbf16>
    %74 = vector.shape_cast %73 : vector<1x1x4x64xbf16> to vector<4x64xbf16>
    %c2_63 = arith.constant 2 : index
    %c0_64 = arith.constant 0 : index
    %c0_65 = arith.constant 0 : index
    %75 = vector.load %arg3[%c2_63, %c0_64, %c0_65] : memref<4x64x32xbf16, #tpu.memory_space<vmem>>, vector<1x64x32xbf16>
    %76 = vector.shape_cast %75 : vector<1x64x32xbf16> to vector<64x32xbf16>
    %cst_66 = arith.constant dense<0.000000e+00> : vector<4x32xf32>
    %77 = tpu.matmul %74, %76, %cst_66 {dimension_numbers = #tpu.dot_dimension_numbers<[1], [0], [0], [1], [0, 0, 1, 1], [], []>} : vector<4x64xbf16>, vector<64x32xbf16>, vector<4x32xf32> -> vector<4x32xf32>
    %78 = arith.addf %69, %77 : vector<4x32xf32>
    %c1_i32_67 = arith.constant 1 : i32
    %79 = arith.addi %0, %c1_i32_67 : i32
    %c1_i32_68 = arith.constant 1 : i32
    %80 = arith.addi %79, %c1_i32_68 : i32
    %c0_69 = arith.constant 0 : index
    %81 = arith.index_cast %80 : i32 to index
    %c1_70 = arith.constant 1 : index
    %c0_71 = arith.constant 0 : index
    %82 = vector.load %arg2[%c0_69, %81, %c1_70, %c0_71] : memref<1x5x5x64xbf16, #tpu.memory_space<vmem>>, vector<1x1x4x64xbf16>
    %83 = vector.shape_cast %82 : vector<1x1x4x64xbf16> to vector<4x64xbf16>
    %c3_72 = arith.constant 3 : index
    %c0_73 = arith.constant 0 : index
    %c0_74 = arith.constant 0 : index
    %84 = vector.load %arg3[%c3_72, %c0_73, %c0_74] : memref<4x64x32xbf16, #tpu.memory_space<vmem>>, vector<1x64x32xbf16>
    %85 = vector.shape_cast %84 : vector<1x64x32xbf16> to vector<64x32xbf16>
    %cst_75 = arith.constant dense<0.000000e+00> : vector<4x32xf32>
    %86 = tpu.matmul %83, %85, %cst_75 {dimension_numbers = #tpu.dot_dimension_numbers<[1], [0], [0], [1], [0, 0, 1, 1], [], []>} : vector<4x64xbf16>, vector<64x32xbf16>, vector<4x32xf32> -> vector<4x32xf32>
    %87 = arith.addf %78, %86 : vector<4x32xf32>
    %88 = vector.broadcast %2 : vector<1x32xf32> to vector<4x32xf32>
    %89 = arith.addf %87, %88 : vector<4x32xf32>
    %cst_76 = arith.constant 0.000000e+00 : f32
    %90 = vector.broadcast %cst_76 : f32 to vector<4x32xf32>
    %91 = arith.cmpf ogt, %89, %90 : vector<4x32xf32>
    %cst_77 = arith.constant 2.000000e-01 : f32
    %92 = vector.broadcast %cst_77 : f32 to vector<4x32xf32>
    %93 = arith.mulf %92, %89 : vector<4x32xf32>
    %94 = arith.select %91, %89, %93 : vector<4x32xi1>, vector<4x32xf32>
    %95 = arith.truncf %94 : vector<4x32xf32> to vector<4x32xbf16>
    %c0_78 = arith.constant 0 : index
    %c1_79 = arith.constant 1 : index
    %c0_80 = arith.constant 0 : index
    %c0_81 = arith.constant 0 : index
    %96 = vector.load %arg5[%c0_78, %c1_79, %c0_80, %c0_81] : memref<1x4x4x32xbf16, #tpu.memory_space<vmem>>, vector<1x1x4x32xbf16>
    %97 = vector.shape_cast %96 : vector<1x1x4x32xbf16> to vector<4x32xbf16>
    %98 = vector.shape_cast %95 : vector<4x32xbf16> to vector<1x1x4x32xbf16>
    tpu.vector_store %arg5[%c0_78, %c1_79, %c0_80, %c0_81], %98 {strides = array<i32>} : memref<1x4x4x32xbf16, #tpu.memory_space<vmem>>, vector<1x1x4x32xbf16>,
    %cst_82 = arith.constant 0.000000e+00 : f32
    %99 = vector.broadcast %cst_82 : f32 to vector<4x32xf32>
    %c2_i32 = arith.constant 2 : i32
    %100 = arith.addi %0, %c2_i32 : i32
    %c0_i32_83 = arith.constant 0 : i32
    %101 = arith.addi %100, %c0_i32_83 : i32
    %c0_84 = arith.constant 0 : index
    %102 = arith.index_cast %101 : i32 to index
    %c0_85 = arith.constant 0 : index
    %c0_86 = arith.constant 0 : index
    %103 = vector.load %arg2[%c0_84, %102, %c0_85, %c0_86] : memref<1x5x5x64xbf16, #tpu.memory_space<vmem>>, vector<1x1x4x64xbf16>
    %104 = vector.shape_cast %103 : vector<1x1x4x64xbf16> to vector<4x64xbf16>
    %c0_87 = arith.constant 0 : index
    %c0_88 = arith.constant 0 : index
    %c0_89 = arith.constant 0 : index
    %105 = vector.load %arg3[%c0_87, %c0_88, %c0_89] : memref<4x64x32xbf16, #tpu.memory_space<vmem>>, vector<1x64x32xbf16>
    %106 = vector.shape_cast %105 : vector<1x64x32xbf16> to vector<64x32xbf16>
    %cst_90 = arith.constant dense<0.000000e+00> : vector<4x32xf32>
    %107 = tpu.matmul %104, %106, %cst_90 {dimension_numbers = #tpu.dot_dimension_numbers<[1], [0], [0], [1], [0, 0, 1, 1], [], []>} : vector<4x64xbf16>, vector<64x32xbf16>, vector<4x32xf32> -> vector<4x32xf32>
    %108 = arith.addf %99, %107 : vector<4x32xf32>
    %c2_i32_91 = arith.constant 2 : i32
    %109 = arith.addi %0, %c2_i32_91 : i32
    %c0_i32_92 = arith.constant 0 : i32
    %110 = arith.addi %109, %c0_i32_92 : i32
    %c0_93 = arith.constant 0 : index
    %111 = arith.index_cast %110 : i32 to index
    %c1_94 = arith.constant 1 : index
    %c0_95 = arith.constant 0 : index
    %112 = vector.load %arg2[%c0_93, %111, %c1_94, %c0_95] : memref<1x5x5x64xbf16, #tpu.memory_space<vmem>>, vector<1x1x4x64xbf16>
    %113 = vector.shape_cast %112 : vector<1x1x4x64xbf16> to vector<4x64xbf16>
    %c1_96 = arith.constant 1 : index
    %c0_97 = arith.constant 0 : index
    %c0_98 = arith.constant 0 : index
    %114 = vector.load %arg3[%c1_96, %c0_97, %c0_98] : memref<4x64x32xbf16, #tpu.memory_space<vmem>>, vector<1x64x32xbf16>
    %115 = vector.shape_cast %114 : vector<1x64x32xbf16> to vector<64x32xbf16>
    %cst_99 = arith.constant dense<0.000000e+00> : vector<4x32xf32>
    %116 = tpu.matmul %113, %115, %cst_99 {dimension_numbers = #tpu.dot_dimension_numbers<[1], [0], [0], [1], [0, 0, 1, 1], [], []>} : vector<4x64xbf16>, vector<64x32xbf16>, vector<4x32xf32> -> vector<4x32xf32>
    %117 = arith.addf %108, %116 : vector<4x32xf32>
    %c2_i32_100 = arith.constant 2 : i32
    %118 = arith.addi %0, %c2_i32_100 : i32
    %c1_i32_101 = arith.constant 1 : i32
    %119 = arith.addi %118, %c1_i32_101 : i32
    %c0_102 = arith.constant 0 : index
    %120 = arith.index_cast %119 : i32 to index
    %c0_103 = arith.constant 0 : index
    %c0_104 = arith.constant 0 : index
    %121 = vector.load %arg2[%c0_102, %120, %c0_103, %c0_104] : memref<1x5x5x64xbf16, #tpu.memory_space<vmem>>, vector<1x1x4x64xbf16>
    %122 = vector.shape_cast %121 : vector<1x1x4x64xbf16> to vector<4x64xbf16>
    %c2_105 = arith.constant 2 : index
    %c0_106 = arith.constant 0 : index
    %c0_107 = arith.constant 0 : index
    %123 = vector.load %arg3[%c2_105, %c0_106, %c0_107] : memref<4x64x32xbf16, #tpu.memory_space<vmem>>, vector<1x64x32xbf16>
    %124 = vector.shape_cast %123 : vector<1x64x32xbf16> to vector<64x32xbf16>
    %cst_108 = arith.constant dense<0.000000e+00> : vector<4x32xf32>
    %125 = tpu.matmul %122, %124, %cst_108 {dimension_numbers = #tpu.dot_dimension_numbers<[1], [0], [0], [1], [0, 0, 1, 1], [], []>} : vector<4x64xbf16>, vector<64x32xbf16>, vector<4x32xf32> -> vector<4x32xf32>
    %126 = arith.addf %117, %125 : vector<4x32xf32>
    %c2_i32_109 = arith.constant 2 : i32
    %127 = arith.addi %0, %c2_i32_109 : i32
    %c1_i32_110 = arith.constant 1 : i32
    %128 = arith.addi %127, %c1_i32_110 : i32
    %c0_111 = arith.constant 0 : index
    %129 = arith.index_cast %128 : i32 to index
    %c1_112 = arith.constant 1 : index
    %c0_113 = arith.constant 0 : index
    %130 = vector.load %arg2[%c0_111, %129, %c1_112, %c0_113] : memref<1x5x5x64xbf16, #tpu.memory_space<vmem>>, vector<1x1x4x64xbf16>
    %131 = vector.shape_cast %130 : vector<1x1x4x64xbf16> to vector<4x64xbf16>
    %c3_114 = arith.constant 3 : index
    %c0_115 = arith.constant 0 : index
    %c0_116 = arith.constant 0 : index
    %132 = vector.load %arg3[%c3_114, %c0_115, %c0_116] : memref<4x64x32xbf16, #tpu.memory_space<vmem>>, vector<1x64x32xbf16>
    %133 = vector.shape_cast %132 : vector<1x64x32xbf16> to vector<64x32xbf16>
    %cst_117 = arith.constant dense<0.000000e+00> : vector<4x32xf32>
    %134 = tpu.matmul %131, %133, %cst_117 {dimension_numbers = #tpu.dot_dimension_numbers<[1], [0], [0], [1], [0, 0, 1, 1], [], []>} : vector<4x64xbf16>, vector<64x32xbf16>, vector<4x32xf32> -> vector<4x32xf32>
    %135 = arith.addf %126, %134 : vector<4x32xf32>
    %136 = vector.broadcast %2 : vector<1x32xf32> to vector<4x32xf32>
    %137 = arith.addf %135, %136 : vector<4x32xf32>
    %cst_118 = arith.constant 0.000000e+00 : f32
    %138 = vector.broadcast %cst_118 : f32 to vector<4x32xf32>
    %139 = arith.cmpf ogt, %137, %138 : vector<4x32xf32>
    %cst_119 = arith.constant 2.000000e-01 : f32
    %140 = vector.broadcast %cst_119 : f32 to vector<4x32xf32>
    %141 = arith.mulf %140, %137 : vector<4x32xf32>
    %142 = arith.select %139, %137, %141 : vector<4x32xi1>, vector<4x32xf32>
    %143 = arith.truncf %142 : vector<4x32xf32> to vector<4x32xbf16>
    %c0_120 = arith.constant 0 : index
    %c2_121 = arith.constant 2 : index
    %c0_122 = arith.constant 0 : index
    %c0_123 = arith.constant 0 : index
    %144 = vector.load %arg5[%c0_120, %c2_121, %c0_122, %c0_123] : memref<1x4x4x32xbf16, #tpu.memory_space<vmem>>, vector<1x1x4x32xbf16>
    %145 = vector.shape_cast %144 : vector<1x1x4x32xbf16> to vector<4x32xbf16>
    %146 = vector.shape_cast %143 : vector<4x32xbf16> to vector<1x1x4x32xbf16>
    tpu.vector_store %arg5[%c0_120, %c2_121, %c0_122, %c0_123], %146 {strides = array<i32>} : memref<1x4x4x32xbf16, #tpu.memory_space<vmem>>, vector<1x1x4x32xbf16>,
    %cst_124 = arith.constant 0.000000e+00 : f32
    %147 = vector.broadcast %cst_124 : f32 to vector<4x32xf32>
    %c3_i32 = arith.constant 3 : i32
    %148 = arith.addi %0, %c3_i32 : i32
    %c0_i32_125 = arith.constant 0 : i32
    %149 = arith.addi %148, %c0_i32_125 : i32
    %c0_126 = arith.constant 0 : index
    %150 = arith.index_cast %149 : i32 to index
    %c0_127 = arith.constant 0 : index
    %c0_128 = arith.constant 0 : index
    %151 = vector.load %arg2[%c0_126, %150, %c0_127, %c0_128] : memref<1x5x5x64xbf16, #tpu.memory_space<vmem>>, vector<1x1x4x64xbf16>
    %152 = vector.shape_cast %151 : vector<1x1x4x64xbf16> to vector<4x64xbf16>
    %c0_129 = arith.constant 0 : index
    %c0_130 = arith.constant 0 : index
    %c0_131 = arith.constant 0 : index
    %153 = vector.load %arg3[%c0_129, %c0_130, %c0_131] : memref<4x64x32xbf16, #tpu.memory_space<vmem>>, vector<1x64x32xbf16>
    %154 = vector.shape_cast %153 : vector<1x64x32xbf16> to vector<64x32xbf16>
    %cst_132 = arith.constant dense<0.000000e+00> : vector<4x32xf32>
    %155 = tpu.matmul %152, %154, %cst_132 {dimension_numbers = #tpu.dot_dimension_numbers<[1], [0], [0], [1], [0, 0, 1, 1], [], []>} : vector<4x64xbf16>, vector<64x32xbf16>, vector<4x32xf32> -> vector<4x32xf32>
    %156 = arith.addf %147, %155 : vector<4x32xf32>
    %c3_i32_133 = arith.constant 3 : i32
    %157 = arith.addi %0, %c3_i32_133 : i32
    %c0_i32_134 = arith.constant 0 : i32
    %158 = arith.addi %157, %c0_i32_134 : i32
    %c0_135 = arith.constant 0 : index
    %159 = arith.index_cast %158 : i32 to index
    %c1_136 = arith.constant 1 : index
    %c0_137 = arith.constant 0 : index
    %160 = vector.load %arg2[%c0_135, %159, %c1_136, %c0_137] : memref<1x5x5x64xbf16, #tpu.memory_space<vmem>>, vector<1x1x4x64xbf16>
    %161 = vector.shape_cast %160 : vector<1x1x4x64xbf16> to vector<4x64xbf16>
    %c1_138 = arith.constant 1 : index
    %c0_139 = arith.constant 0 : index
    %c0_140 = arith.constant 0 : index
    %162 = vector.load %arg3[%c1_138, %c0_139, %c0_140] : memref<4x64x32xbf16, #tpu.memory_space<vmem>>, vector<1x64x32xbf16>
    %163 = vector.shape_cast %162 : vector<1x64x32xbf16> to vector<64x32xbf16>
    %cst_141 = arith.constant dense<0.000000e+00> : vector<4x32xf32>
    %164 = tpu.matmul %161, %163, %cst_141 {dimension_numbers = #tpu.dot_dimension_numbers<[1], [0], [0], [1], [0, 0, 1, 1], [], []>} : vector<4x64xbf16>, vector<64x32xbf16>, vector<4x32xf32> -> vector<4x32xf32>
    %165 = arith.addf %156, %164 : vector<4x32xf32>
    %c3_i32_142 = arith.constant 3 : i32
    %166 = arith.addi %0, %c3_i32_142 : i32
    %c1_i32_143 = arith.constant 1 : i32
    %167 = arith.addi %166, %c1_i32_143 : i32
    %c0_144 = arith.constant 0 : index
    %168 = arith.index_cast %167 : i32 to index
    %c0_145 = arith.constant 0 : index
    %c0_146 = arith.constant 0 : index
    %169 = vector.load %arg2[%c0_144, %168, %c0_145, %c0_146] : memref<1x5x5x64xbf16, #tpu.memory_space<vmem>>, vector<1x1x4x64xbf16>
    %170 = vector.shape_cast %169 : vector<1x1x4x64xbf16> to vector<4x64xbf16>
    %c2_147 = arith.constant 2 : index
    %c0_148 = arith.constant 0 : index
    %c0_149 = arith.constant 0 : index
    %171 = vector.load %arg3[%c2_147, %c0_148, %c0_149] : memref<4x64x32xbf16, #tpu.memory_space<vmem>>, vector<1x64x32xbf16>
    %172 = vector.shape_cast %171 : vector<1x64x32xbf16> to vector<64x32xbf16>
    %cst_150 = arith.constant dense<0.000000e+00> : vector<4x32xf32>
    %173 = tpu.matmul %170, %172, %cst_150 {dimension_numbers = #tpu.dot_dimension_numbers<[1], [0], [0], [1], [0, 0, 1, 1], [], []>} : vector<4x64xbf16>, vector<64x32xbf16>, vector<4x32xf32> -> vector<4x32xf32>
    %174 = arith.addf %165, %173 : vector<4x32xf32>
    %c3_i32_151 = arith.constant 3 : i32
    %175 = arith.addi %0, %c3_i32_151 : i32
    %c1_i32_152 = arith.constant 1 : i32
    %176 = arith.addi %175, %c1_i32_152 : i32
    %c0_153 = arith.constant 0 : index
    %177 = arith.index_cast %176 : i32 to index
    %c1_154 = arith.constant 1 : index
    %c0_155 = arith.constant 0 : index
    %178 = vector.load %arg2[%c0_153, %177, %c1_154, %c0_155] : memref<1x5x5x64xbf16, #tpu.memory_space<vmem>>, vector<1x1x4x64xbf16>
    %179 = vector.shape_cast %178 : vector<1x1x4x64xbf16> to vector<4x64xbf16>
    %c3_156 = arith.constant 3 : index
    %c0_157 = arith.constant 0 : index
    %c0_158 = arith.constant 0 : index
    %180 = vector.load %arg3[%c3_156, %c0_157, %c0_158] : memref<4x64x32xbf16, #tpu.memory_space<vmem>>, vector<1x64x32xbf16>
    %181 = vector.shape_cast %180 : vector<1x64x32xbf16> to vector<64x32xbf16>
    %cst_159 = arith.constant dense<0.000000e+00> : vector<4x32xf32>
    %182 = tpu.matmul %179, %181, %cst_159 {dimension_numbers = #tpu.dot_dimension_numbers<[1], [0], [0], [1], [0, 0, 1, 1], [], []>} : vector<4x64xbf16>, vector<64x32xbf16>, vector<4x32xf32> -> vector<4x32xf32>
    %183 = arith.addf %174, %182 : vector<4x32xf32>
    %184 = vector.broadcast %2 : vector<1x32xf32> to vector<4x32xf32>
    %185 = arith.addf %183, %184 : vector<4x32xf32>
    %cst_160 = arith.constant 0.000000e+00 : f32
    %186 = vector.broadcast %cst_160 : f32 to vector<4x32xf32>
    %187 = arith.cmpf ogt, %185, %186 : vector<4x32xf32>
    %cst_161 = arith.constant 2.000000e-01 : f32
    %188 = vector.broadcast %cst_161 : f32 to vector<4x32xf32>
    %189 = arith.mulf %188, %185 : vector<4x32xf32>
    %190 = arith.select %187, %185, %189 : vector<4x32xi1>, vector<4x32xf32>
    %191 = arith.truncf %190 : vector<4x32xf32> to vector<4x32xbf16>
    %c0_162 = arith.constant 0 : index
    %c3_163 = arith.constant 3 : index
    %c0_164 = arith.constant 0 : index
    %c0_165 = arith.constant 0 : index
    %192 = vector.load %arg5[%c0_162, %c3_163, %c0_164, %c0_165] : memref<1x4x4x32xbf16, #tpu.memory_space<vmem>>, vector<1x1x4x32xbf16>
    %193 = vector.shape_cast %192 : vector<1x1x4x32xbf16> to vector<4x32xbf16>
    %194 = vector.shape_cast %191 : vector<4x32xbf16> to vector<1x1x4x32xbf16>
    tpu.vector_store %arg5[%c0_162, %c3_163, %c0_164, %c0_165], %194 {strides = array<i32>} : memref<1x4x4x32xbf16, #tpu.memory_space<vmem>>, vector<1x1x4x32xbf16>,
    return
  }
  func.func @transform_0(%arg0: i32, %arg1: i32) -> (i32, i32, i32, i32) {
    %c0_i32 = arith.constant 0 : i32
    %c0_i32_0 = arith.constant 0 : i32
    %c0_i32_1 = arith.constant 0 : i32
    %c0_i32_2 = arith.constant 0 : i32
    return %arg0, %c0_i32, %c0_i32_0, %c0_i32_1 : i32, i32, i32, i32
  }
  func.func @transform_1(%arg0: i32, %arg1: i32) -> (i32, i32, i32) {
    %c0_i32 = arith.constant 0 : i32
    %c0_i32_0 = arith.constant 0 : i32
    %c0_i32_1 = arith.constant 0 : i32
    %c0_i32_2 = arith.constant 0 : i32
    return %c0_i32, %c0_i32_0, %c0_i32_1 : i32, i32, i32
  }
  func.func @transform_2(%arg0: i32, %arg1: i32) -> (i32, i32, i32) {
    %c0_i32 = arith.constant 0 : i32
    %c0_i32_0 = arith.constant 0 : i32
    %c0_i32_1 = arith.constant 0 : i32
    %c0_i32_2 = arith.constant 0 : i32
    return %c0_i32, %c0_i32_0, %c0_i32_1 : i32, i32, i32
  }
  func.func @transform_3(%arg0: i32, %arg1: i32) -> (i32, i32, i32, i32) {
    %c0_i32 = arith.constant 0 : i32
    %c0_i32_0 = arith.constant 0 : i32
    %c0_i32_1 = arith.constant 0 : i32
    return %arg0, %arg1, %c0_i32, %c0_i32_0 : i32, i32, i32, i32
  }
}

module attributes {stable_mosaic.version = 11 : i64} {
  func.func @_conv4x4s2_kernel(%arg0: i32, %arg1: i32, %arg2: memref<1x3x3x128xbf16, #tpu.memory_space<vmem>>, %arg3: memref<4x128x64xbf16, #tpu.memory_space<vmem>>, %arg4: memref<1x1x64xf32, #tpu.memory_space<vmem>>, %arg5: memref<1x2x2x64xbf16, #tpu.memory_space<vmem>>) attributes {dimension_semantics = [#tpu.dimension_semantics<parallel>, #tpu.dimension_semantics<arbitrary>], iteration_bounds = array<i64: 2, 1>, scalar_prefetch = 0 : i64, scratch_operands = 0 : i64, tpu.core_type = #tpu.core_type<tc>, window_params = [{transform_indices = @transform_0, window_bounds = array<i64: 1, 3, 3, 128>}, {pipeline_mode = #tpu.pipeline_mode<synchronous>, transform_indices = @transform_1, window_bounds = array<i64: 4, 128, 64>}, {pipeline_mode = #tpu.pipeline_mode<synchronous>, transform_indices = @transform_2, window_bounds = array<i64: 1, 1, 64>}, {transform_indices = @transform_3, window_bounds = array<i64: 1, 2, 2, 64>}]} {
    %c2_i32 = arith.constant 2 : i32
    %0 = arith.muli %arg1, %c2_i32 : i32
    %c0 = arith.constant 0 : index
    %c0_0 = arith.constant 0 : index
    %c0_1 = arith.constant 0 : index
    %1 = vector.load %arg4[%c0, %c0_0, %c0_1] : memref<1x1x64xf32, #tpu.memory_space<vmem>>, vector<1x1x64xf32>
    %2 = vector.shape_cast %1 : vector<1x1x64xf32> to vector<1x64xf32>
    %cst = arith.constant 0.000000e+00 : f32
    %3 = vector.broadcast %cst : f32 to vector<2x64xf32>
    %c0_i32 = arith.constant 0 : i32
    %4 = arith.addi %0, %c0_i32 : i32
    %c0_i32_2 = arith.constant 0 : i32
    %5 = arith.addi %4, %c0_i32_2 : i32
    %c0_3 = arith.constant 0 : index
    %6 = arith.index_cast %5 : i32 to index
    %c0_4 = arith.constant 0 : index
    %c0_5 = arith.constant 0 : index
    %7 = vector.load %arg2[%c0_3, %6, %c0_4, %c0_5] : memref<1x3x3x128xbf16, #tpu.memory_space<vmem>>, vector<1x1x2x128xbf16>
    %8 = vector.shape_cast %7 : vector<1x1x2x128xbf16> to vector<2x128xbf16>
    %c0_6 = arith.constant 0 : index
    %c0_7 = arith.constant 0 : index
    %c0_8 = arith.constant 0 : index
    %9 = vector.load %arg3[%c0_6, %c0_7, %c0_8] : memref<4x128x64xbf16, #tpu.memory_space<vmem>>, vector<1x128x64xbf16>
    %10 = vector.shape_cast %9 : vector<1x128x64xbf16> to vector<128x64xbf16>
    %cst_9 = arith.constant dense<0.000000e+00> : vector<2x64xf32>
    %11 = tpu.matmul %8, %10, %cst_9 {dimension_numbers = #tpu.dot_dimension_numbers<[1], [0], [0], [1], [0, 0, 1, 1], [], []>} : vector<2x128xbf16>, vector<128x64xbf16>, vector<2x64xf32> -> vector<2x64xf32>
    %12 = arith.addf %3, %11 : vector<2x64xf32>
    %c0_i32_10 = arith.constant 0 : i32
    %13 = arith.addi %0, %c0_i32_10 : i32
    %c0_i32_11 = arith.constant 0 : i32
    %14 = arith.addi %13, %c0_i32_11 : i32
    %c0_12 = arith.constant 0 : index
    %15 = arith.index_cast %14 : i32 to index
    %c1 = arith.constant 1 : index
    %c0_13 = arith.constant 0 : index
    %16 = vector.load %arg2[%c0_12, %15, %c1, %c0_13] : memref<1x3x3x128xbf16, #tpu.memory_space<vmem>>, vector<1x1x2x128xbf16>
    %17 = vector.shape_cast %16 : vector<1x1x2x128xbf16> to vector<2x128xbf16>
    %c1_14 = arith.constant 1 : index
    %c0_15 = arith.constant 0 : index
    %c0_16 = arith.constant 0 : index
    %18 = vector.load %arg3[%c1_14, %c0_15, %c0_16] : memref<4x128x64xbf16, #tpu.memory_space<vmem>>, vector<1x128x64xbf16>
    %19 = vector.shape_cast %18 : vector<1x128x64xbf16> to vector<128x64xbf16>
    %cst_17 = arith.constant dense<0.000000e+00> : vector<2x64xf32>
    %20 = tpu.matmul %17, %19, %cst_17 {dimension_numbers = #tpu.dot_dimension_numbers<[1], [0], [0], [1], [0, 0, 1, 1], [], []>} : vector<2x128xbf16>, vector<128x64xbf16>, vector<2x64xf32> -> vector<2x64xf32>
    %21 = arith.addf %12, %20 : vector<2x64xf32>
    %c0_i32_18 = arith.constant 0 : i32
    %22 = arith.addi %0, %c0_i32_18 : i32
    %c1_i32 = arith.constant 1 : i32
    %23 = arith.addi %22, %c1_i32 : i32
    %c0_19 = arith.constant 0 : index
    %24 = arith.index_cast %23 : i32 to index
    %c0_20 = arith.constant 0 : index
    %c0_21 = arith.constant 0 : index
    %25 = vector.load %arg2[%c0_19, %24, %c0_20, %c0_21] : memref<1x3x3x128xbf16, #tpu.memory_space<vmem>>, vector<1x1x2x128xbf16>
    %26 = vector.shape_cast %25 : vector<1x1x2x128xbf16> to vector<2x128xbf16>
    %c2 = arith.constant 2 : index
    %c0_22 = arith.constant 0 : index
    %c0_23 = arith.constant 0 : index
    %27 = vector.load %arg3[%c2, %c0_22, %c0_23] : memref<4x128x64xbf16, #tpu.memory_space<vmem>>, vector<1x128x64xbf16>
    %28 = vector.shape_cast %27 : vector<1x128x64xbf16> to vector<128x64xbf16>
    %cst_24 = arith.constant dense<0.000000e+00> : vector<2x64xf32>
    %29 = tpu.matmul %26, %28, %cst_24 {dimension_numbers = #tpu.dot_dimension_numbers<[1], [0], [0], [1], [0, 0, 1, 1], [], []>} : vector<2x128xbf16>, vector<128x64xbf16>, vector<2x64xf32> -> vector<2x64xf32>
    %30 = arith.addf %21, %29 : vector<2x64xf32>
    %c0_i32_25 = arith.constant 0 : i32
    %31 = arith.addi %0, %c0_i32_25 : i32
    %c1_i32_26 = arith.constant 1 : i32
    %32 = arith.addi %31, %c1_i32_26 : i32
    %c0_27 = arith.constant 0 : index
    %33 = arith.index_cast %32 : i32 to index
    %c1_28 = arith.constant 1 : index
    %c0_29 = arith.constant 0 : index
    %34 = vector.load %arg2[%c0_27, %33, %c1_28, %c0_29] : memref<1x3x3x128xbf16, #tpu.memory_space<vmem>>, vector<1x1x2x128xbf16>
    %35 = vector.shape_cast %34 : vector<1x1x2x128xbf16> to vector<2x128xbf16>
    %c3 = arith.constant 3 : index
    %c0_30 = arith.constant 0 : index
    %c0_31 = arith.constant 0 : index
    %36 = vector.load %arg3[%c3, %c0_30, %c0_31] : memref<4x128x64xbf16, #tpu.memory_space<vmem>>, vector<1x128x64xbf16>
    %37 = vector.shape_cast %36 : vector<1x128x64xbf16> to vector<128x64xbf16>
    %cst_32 = arith.constant dense<0.000000e+00> : vector<2x64xf32>
    %38 = tpu.matmul %35, %37, %cst_32 {dimension_numbers = #tpu.dot_dimension_numbers<[1], [0], [0], [1], [0, 0, 1, 1], [], []>} : vector<2x128xbf16>, vector<128x64xbf16>, vector<2x64xf32> -> vector<2x64xf32>
    %39 = arith.addf %30, %38 : vector<2x64xf32>
    %40 = vector.broadcast %2 : vector<1x64xf32> to vector<2x64xf32>
    %41 = arith.addf %39, %40 : vector<2x64xf32>
    %cst_33 = arith.constant 0.000000e+00 : f32
    %42 = vector.broadcast %cst_33 : f32 to vector<2x64xf32>
    %43 = arith.cmpf ogt, %41, %42 : vector<2x64xf32>
    %cst_34 = arith.constant 2.000000e-01 : f32
    %44 = vector.broadcast %cst_34 : f32 to vector<2x64xf32>
    %45 = arith.mulf %44, %41 : vector<2x64xf32>
    %46 = arith.select %43, %41, %45 : vector<2x64xi1>, vector<2x64xf32>
    %47 = arith.truncf %46 : vector<2x64xf32> to vector<2x64xbf16>
    %c0_35 = arith.constant 0 : index
    %c0_36 = arith.constant 0 : index
    %c0_37 = arith.constant 0 : index
    %c0_38 = arith.constant 0 : index
    %48 = vector.load %arg5[%c0_35, %c0_36, %c0_37, %c0_38] : memref<1x2x2x64xbf16, #tpu.memory_space<vmem>>, vector<1x1x2x64xbf16>
    %49 = vector.shape_cast %48 : vector<1x1x2x64xbf16> to vector<2x64xbf16>
    %50 = vector.shape_cast %47 : vector<2x64xbf16> to vector<1x1x2x64xbf16>
    tpu.vector_store %arg5[%c0_35, %c0_36, %c0_37, %c0_38], %50 {strides = array<i32>} : memref<1x2x2x64xbf16, #tpu.memory_space<vmem>>, vector<1x1x2x64xbf16>,
    %cst_39 = arith.constant 0.000000e+00 : f32
    %51 = vector.broadcast %cst_39 : f32 to vector<2x64xf32>
    %c1_i32_40 = arith.constant 1 : i32
    %52 = arith.addi %0, %c1_i32_40 : i32
    %c0_i32_41 = arith.constant 0 : i32
    %53 = arith.addi %52, %c0_i32_41 : i32
    %c0_42 = arith.constant 0 : index
    %54 = arith.index_cast %53 : i32 to index
    %c0_43 = arith.constant 0 : index
    %c0_44 = arith.constant 0 : index
    %55 = vector.load %arg2[%c0_42, %54, %c0_43, %c0_44] : memref<1x3x3x128xbf16, #tpu.memory_space<vmem>>, vector<1x1x2x128xbf16>
    %56 = vector.shape_cast %55 : vector<1x1x2x128xbf16> to vector<2x128xbf16>
    %c0_45 = arith.constant 0 : index
    %c0_46 = arith.constant 0 : index
    %c0_47 = arith.constant 0 : index
    %57 = vector.load %arg3[%c0_45, %c0_46, %c0_47] : memref<4x128x64xbf16, #tpu.memory_space<vmem>>, vector<1x128x64xbf16>
    %58 = vector.shape_cast %57 : vector<1x128x64xbf16> to vector<128x64xbf16>
    %cst_48 = arith.constant dense<0.000000e+00> : vector<2x64xf32>
    %59 = tpu.matmul %56, %58, %cst_48 {dimension_numbers = #tpu.dot_dimension_numbers<[1], [0], [0], [1], [0, 0, 1, 1], [], []>} : vector<2x128xbf16>, vector<128x64xbf16>, vector<2x64xf32> -> vector<2x64xf32>
    %60 = arith.addf %51, %59 : vector<2x64xf32>
    %c1_i32_49 = arith.constant 1 : i32
    %61 = arith.addi %0, %c1_i32_49 : i32
    %c0_i32_50 = arith.constant 0 : i32
    %62 = arith.addi %61, %c0_i32_50 : i32
    %c0_51 = arith.constant 0 : index
    %63 = arith.index_cast %62 : i32 to index
    %c1_52 = arith.constant 1 : index
    %c0_53 = arith.constant 0 : index
    %64 = vector.load %arg2[%c0_51, %63, %c1_52, %c0_53] : memref<1x3x3x128xbf16, #tpu.memory_space<vmem>>, vector<1x1x2x128xbf16>
    %65 = vector.shape_cast %64 : vector<1x1x2x128xbf16> to vector<2x128xbf16>
    %c1_54 = arith.constant 1 : index
    %c0_55 = arith.constant 0 : index
    %c0_56 = arith.constant 0 : index
    %66 = vector.load %arg3[%c1_54, %c0_55, %c0_56] : memref<4x128x64xbf16, #tpu.memory_space<vmem>>, vector<1x128x64xbf16>
    %67 = vector.shape_cast %66 : vector<1x128x64xbf16> to vector<128x64xbf16>
    %cst_57 = arith.constant dense<0.000000e+00> : vector<2x64xf32>
    %68 = tpu.matmul %65, %67, %cst_57 {dimension_numbers = #tpu.dot_dimension_numbers<[1], [0], [0], [1], [0, 0, 1, 1], [], []>} : vector<2x128xbf16>, vector<128x64xbf16>, vector<2x64xf32> -> vector<2x64xf32>
    %69 = arith.addf %60, %68 : vector<2x64xf32>
    %c1_i32_58 = arith.constant 1 : i32
    %70 = arith.addi %0, %c1_i32_58 : i32
    %c1_i32_59 = arith.constant 1 : i32
    %71 = arith.addi %70, %c1_i32_59 : i32
    %c0_60 = arith.constant 0 : index
    %72 = arith.index_cast %71 : i32 to index
    %c0_61 = arith.constant 0 : index
    %c0_62 = arith.constant 0 : index
    %73 = vector.load %arg2[%c0_60, %72, %c0_61, %c0_62] : memref<1x3x3x128xbf16, #tpu.memory_space<vmem>>, vector<1x1x2x128xbf16>
    %74 = vector.shape_cast %73 : vector<1x1x2x128xbf16> to vector<2x128xbf16>
    %c2_63 = arith.constant 2 : index
    %c0_64 = arith.constant 0 : index
    %c0_65 = arith.constant 0 : index
    %75 = vector.load %arg3[%c2_63, %c0_64, %c0_65] : memref<4x128x64xbf16, #tpu.memory_space<vmem>>, vector<1x128x64xbf16>
    %76 = vector.shape_cast %75 : vector<1x128x64xbf16> to vector<128x64xbf16>
    %cst_66 = arith.constant dense<0.000000e+00> : vector<2x64xf32>
    %77 = tpu.matmul %74, %76, %cst_66 {dimension_numbers = #tpu.dot_dimension_numbers<[1], [0], [0], [1], [0, 0, 1, 1], [], []>} : vector<2x128xbf16>, vector<128x64xbf16>, vector<2x64xf32> -> vector<2x64xf32>
    %78 = arith.addf %69, %77 : vector<2x64xf32>
    %c1_i32_67 = arith.constant 1 : i32
    %79 = arith.addi %0, %c1_i32_67 : i32
    %c1_i32_68 = arith.constant 1 : i32
    %80 = arith.addi %79, %c1_i32_68 : i32
    %c0_69 = arith.constant 0 : index
    %81 = arith.index_cast %80 : i32 to index
    %c1_70 = arith.constant 1 : index
    %c0_71 = arith.constant 0 : index
    %82 = vector.load %arg2[%c0_69, %81, %c1_70, %c0_71] : memref<1x3x3x128xbf16, #tpu.memory_space<vmem>>, vector<1x1x2x128xbf16>
    %83 = vector.shape_cast %82 : vector<1x1x2x128xbf16> to vector<2x128xbf16>
    %c3_72 = arith.constant 3 : index
    %c0_73 = arith.constant 0 : index
    %c0_74 = arith.constant 0 : index
    %84 = vector.load %arg3[%c3_72, %c0_73, %c0_74] : memref<4x128x64xbf16, #tpu.memory_space<vmem>>, vector<1x128x64xbf16>
    %85 = vector.shape_cast %84 : vector<1x128x64xbf16> to vector<128x64xbf16>
    %cst_75 = arith.constant dense<0.000000e+00> : vector<2x64xf32>
    %86 = tpu.matmul %83, %85, %cst_75 {dimension_numbers = #tpu.dot_dimension_numbers<[1], [0], [0], [1], [0, 0, 1, 1], [], []>} : vector<2x128xbf16>, vector<128x64xbf16>, vector<2x64xf32> -> vector<2x64xf32>
    %87 = arith.addf %78, %86 : vector<2x64xf32>
    %88 = vector.broadcast %2 : vector<1x64xf32> to vector<2x64xf32>
    %89 = arith.addf %87, %88 : vector<2x64xf32>
    %cst_76 = arith.constant 0.000000e+00 : f32
    %90 = vector.broadcast %cst_76 : f32 to vector<2x64xf32>
    %91 = arith.cmpf ogt, %89, %90 : vector<2x64xf32>
    %cst_77 = arith.constant 2.000000e-01 : f32
    %92 = vector.broadcast %cst_77 : f32 to vector<2x64xf32>
    %93 = arith.mulf %92, %89 : vector<2x64xf32>
    %94 = arith.select %91, %89, %93 : vector<2x64xi1>, vector<2x64xf32>
    %95 = arith.truncf %94 : vector<2x64xf32> to vector<2x64xbf16>
    %c0_78 = arith.constant 0 : index
    %c1_79 = arith.constant 1 : index
    %c0_80 = arith.constant 0 : index
    %c0_81 = arith.constant 0 : index
    %96 = vector.load %arg5[%c0_78, %c1_79, %c0_80, %c0_81] : memref<1x2x2x64xbf16, #tpu.memory_space<vmem>>, vector<1x1x2x64xbf16>
    %97 = vector.shape_cast %96 : vector<1x1x2x64xbf16> to vector<2x64xbf16>
    %98 = vector.shape_cast %95 : vector<2x64xbf16> to vector<1x1x2x64xbf16>
    tpu.vector_store %arg5[%c0_78, %c1_79, %c0_80, %c0_81], %98 {strides = array<i32>} : memref<1x2x2x64xbf16, #tpu.memory_space<vmem>>, vector<1x1x2x64xbf16>,
    return
  }
  func.func @transform_0(%arg0: i32, %arg1: i32) -> (i32, i32, i32, i32) {
    %c0_i32 = arith.constant 0 : i32
    %c0_i32_0 = arith.constant 0 : i32
    %c0_i32_1 = arith.constant 0 : i32
    %c0_i32_2 = arith.constant 0 : i32
    return %arg0, %c0_i32, %c0_i32_0, %c0_i32_1 : i32, i32, i32, i32
  }
  func.func @transform_1(%arg0: i32, %arg1: i32) -> (i32, i32, i32) {
    %c0_i32 = arith.constant 0 : i32
    %c0_i32_0 = arith.constant 0 : i32
    %c0_i32_1 = arith.constant 0 : i32
    %c0_i32_2 = arith.constant 0 : i32
    return %c0_i32, %c0_i32_0, %c0_i32_1 : i32, i32, i32
  }
  func.func @transform_2(%arg0: i32, %arg1: i32) -> (i32, i32, i32) {
    %c0_i32 = arith.constant 0 : i32
    %c0_i32_0 = arith.constant 0 : i32
    %c0_i32_1 = arith.constant 0 : i32
    %c0_i32_2 = arith.constant 0 : i32
    return %c0_i32, %c0_i32_0, %c0_i32_1 : i32, i32, i32
  }
  func.func @transform_3(%arg0: i32, %arg1: i32) -> (i32, i32, i32, i32) {
    %c0_i32 = arith.constant 0 : i32
    %c0_i32_0 = arith.constant 0 : i32
    %c0_i32_1 = arith.constant 0 : i32
    return %arg0, %arg1, %c0_i32, %c0_i32_0 : i32, i32, i32, i32
  }
}

module attributes {stable_mosaic.version = 11 : i64} {
  func.func @_classifier4x4s2_kernel(%arg0: i32, %arg1: i32, %arg2: memref<1x2x2x256xbf16, #tpu.memory_space<vmem>>, %arg3: memref<4x1x256xf32, #tpu.memory_space<vmem>>, %arg4: memref<1x1xf32, #tpu.memory_space<vmem>>, %arg5: memref<1x1x1x1xf32, #tpu.memory_space<vmem>>) attributes {dimension_semantics = [#tpu.dimension_semantics<parallel>, #tpu.dimension_semantics<arbitrary>], iteration_bounds = array<i64: 2, 1>, scalar_prefetch = 0 : i64, scratch_operands = 0 : i64, tpu.core_type = #tpu.core_type<tc>, window_params = [{transform_indices = @transform_0, window_bounds = array<i64: 1, 2, 2, 256>}, {pipeline_mode = #tpu.pipeline_mode<synchronous>, transform_indices = @transform_1, window_bounds = array<i64: 4, 1, 256>}, {pipeline_mode = #tpu.pipeline_mode<synchronous>, transform_indices = @transform_2, window_bounds = array<i64: 1, 1>}, {transform_indices = @transform_3, window_bounds = array<i64: 1, 1, 1, 1>}]} {
    %cst = arith.constant 0.000000e+00 : f32
    %0 = vector.broadcast %cst : f32 to vector<1x256xf32>
    %c0_i32 = arith.constant 0 : i32
    %1 = arith.addi %arg1, %c0_i32 : i32
    %c0 = arith.constant 0 : index
    %2 = arith.index_cast %1 : i32 to index
    %c0_0 = arith.constant 0 : index
    %c0_1 = arith.constant 0 : index
    %3 = vector.load %arg2[%c0, %2, %c0_0, %c0_1] : memref<1x2x2x256xbf16, #tpu.memory_space<vmem>>, vector<1x1x1x256xbf16>
    %4 = vector.shape_cast %3 : vector<1x1x1x256xbf16> to vector<1x256xbf16>
    %5 = arith.extf %4 : vector<1x256xbf16> to vector<1x256xf32>
    %c0_2 = arith.constant 0 : index
    %c0_3 = arith.constant 0 : index
    %c0_4 = arith.constant 0 : index
    %6 = vector.load %arg3[%c0_2, %c0_3, %c0_4] : memref<4x1x256xf32, #tpu.memory_space<vmem>>, vector<1x1x256xf32>
    %7 = vector.shape_cast %6 : vector<1x1x256xf32> to vector<1x256xf32>
    %8 = arith.mulf %5, %7 : vector<1x256xf32>
    %9 = arith.addf %0, %8 : vector<1x256xf32>
    %c0_i32_5 = arith.constant 0 : i32
    %10 = arith.addi %arg1, %c0_i32_5 : i32
    %c0_6 = arith.constant 0 : index
    %11 = arith.index_cast %10 : i32 to index
    %c1 = arith.constant 1 : index
    %c0_7 = arith.constant 0 : index
    %12 = vector.load %arg2[%c0_6, %11, %c1, %c0_7] : memref<1x2x2x256xbf16, #tpu.memory_space<vmem>>, vector<1x1x1x256xbf16>
    %13 = vector.shape_cast %12 : vector<1x1x1x256xbf16> to vector<1x256xbf16>
    %14 = arith.extf %13 : vector<1x256xbf16> to vector<1x256xf32>
    %c1_8 = arith.constant 1 : index
    %c0_9 = arith.constant 0 : index
    %c0_10 = arith.constant 0 : index
    %15 = vector.load %arg3[%c1_8, %c0_9, %c0_10] : memref<4x1x256xf32, #tpu.memory_space<vmem>>, vector<1x1x256xf32>
    %16 = vector.shape_cast %15 : vector<1x1x256xf32> to vector<1x256xf32>
    %17 = arith.mulf %14, %16 : vector<1x256xf32>
    %18 = arith.addf %9, %17 : vector<1x256xf32>
    %c1_i32 = arith.constant 1 : i32
    %19 = arith.addi %arg1, %c1_i32 : i32
    %c0_11 = arith.constant 0 : index
    %20 = arith.index_cast %19 : i32 to index
    %c0_12 = arith.constant 0 : index
    %c0_13 = arith.constant 0 : index
    %21 = vector.load %arg2[%c0_11, %20, %c0_12, %c0_13] : memref<1x2x2x256xbf16, #tpu.memory_space<vmem>>, vector<1x1x1x256xbf16>
    %22 = vector.shape_cast %21 : vector<1x1x1x256xbf16> to vector<1x256xbf16>
    %23 = arith.extf %22 : vector<1x256xbf16> to vector<1x256xf32>
    %c2 = arith.constant 2 : index
    %c0_14 = arith.constant 0 : index
    %c0_15 = arith.constant 0 : index
    %24 = vector.load %arg3[%c2, %c0_14, %c0_15] : memref<4x1x256xf32, #tpu.memory_space<vmem>>, vector<1x1x256xf32>
    %25 = vector.shape_cast %24 : vector<1x1x256xf32> to vector<1x256xf32>
    %26 = arith.mulf %23, %25 : vector<1x256xf32>
    %27 = arith.addf %18, %26 : vector<1x256xf32>
    %c1_i32_16 = arith.constant 1 : i32
    %28 = arith.addi %arg1, %c1_i32_16 : i32
    %c0_17 = arith.constant 0 : index
    %29 = arith.index_cast %28 : i32 to index
    %c1_18 = arith.constant 1 : index
    %c0_19 = arith.constant 0 : index
    %30 = vector.load %arg2[%c0_17, %29, %c1_18, %c0_19] : memref<1x2x2x256xbf16, #tpu.memory_space<vmem>>, vector<1x1x1x256xbf16>
    %31 = vector.shape_cast %30 : vector<1x1x1x256xbf16> to vector<1x256xbf16>
    %32 = arith.extf %31 : vector<1x256xbf16> to vector<1x256xf32>
    %c3 = arith.constant 3 : index
    %c0_20 = arith.constant 0 : index
    %c0_21 = arith.constant 0 : index
    %33 = vector.load %arg3[%c3, %c0_20, %c0_21] : memref<4x1x256xf32, #tpu.memory_space<vmem>>, vector<1x1x256xf32>
    %34 = vector.shape_cast %33 : vector<1x1x256xf32> to vector<1x256xf32>
    %35 = arith.mulf %32, %34 : vector<1x256xf32>
    %36 = arith.addf %27, %35 : vector<1x256xf32>
    %cst_22 = arith.constant dense<0.000000e+00> : vector<1xf32>
    %37 = vector.multi_reduction <add>, %36, %cst_22 [1] : vector<1x256xf32> to vector<1xf32>
    %38 = vector.shape_cast %37 : vector<1xf32> to vector<1x1xf32>
    %c0_23 = arith.constant 0 : index
    %c0_24 = arith.constant 0 : index
    %39 = vector.load %arg4[%c0_23, %c0_24] : memref<1x1xf32, #tpu.memory_space<vmem>>, vector<1x1xf32>
    %40 = arith.addf %38, %39 : vector<1x1xf32>
    %c0_25 = arith.constant 0 : index
    %c0_26 = arith.constant 0 : index
    %c0_27 = arith.constant 0 : index
    %c0_28 = arith.constant 0 : index
    %41 = vector.load %arg5[%c0_25, %c0_26, %c0_27, %c0_28] : memref<1x1x1x1xf32, #tpu.memory_space<vmem>>, vector<1x1x1x1xf32>
    %42 = vector.shape_cast %41 : vector<1x1x1x1xf32> to vector<1x1xf32>
    %43 = vector.shape_cast %40 : vector<1x1xf32> to vector<1x1x1x1xf32>
    tpu.vector_store %arg5[%c0_25, %c0_26, %c0_27, %c0_28], %43 {strides = array<i32>} : memref<1x1x1x1xf32, #tpu.memory_space<vmem>>, vector<1x1x1x1xf32>,
    return
  }
  func.func @transform_0(%arg0: i32, %arg1: i32) -> (i32, i32, i32, i32) {
    %c0_i32 = arith.constant 0 : i32
    %c0_i32_0 = arith.constant 0 : i32
    %c0_i32_1 = arith.constant 0 : i32
    %c0_i32_2 = arith.constant 0 : i32
    return %arg0, %c0_i32, %c0_i32_0, %c0_i32_1 : i32, i32, i32, i32
  }
  func.func @transform_1(%arg0: i32, %arg1: i32) -> (i32, i32, i32) {
    %c0_i32 = arith.constant 0 : i32
    %c0_i32_0 = arith.constant 0 : i32
    %c0_i32_1 = arith.constant 0 : i32
    %c0_i32_2 = arith.constant 0 : i32
    return %c0_i32, %c0_i32_0, %c0_i32_1 : i32, i32, i32
  }
  func.func @transform_2(%arg0: i32, %arg1: i32) -> (i32, i32) {
    %c0_i32 = arith.constant 0 : i32
    %c0_i32_0 = arith.constant 0 : i32
    %c0_i32_1 = arith.constant 0 : i32
    return %c0_i32, %c0_i32_0 : i32, i32
  }
  func.func @transform_3(%arg0: i32, %arg1: i32) -> (i32, i32, i32, i32) {
    %c0_i32 = arith.constant 0 : i32
    %c0_i32_0 = arith.constant 0 : i32
    %c0_i32_1 = arith.constant 0 : i32
    return %arg0, %arg1, %c0_i32, %c0_i32_0 : i32, i32, i32, i32
  }
}

</mosaic_0001>

<bundles_post_ra>
// kernel: domain_classifier_forward.5
= control target key start
LH: loop header
LB: loop body
LE: loop exit
PB: predicated region body
PF: predicated region fallthrough
CT: control target
= control target key end

     0   :  { %s3358_s12 = smov 0   ;;  %s3360_s13 = smov 0   ;;  %s3754_s0 = inlined_call_operand.vmem [shape: bf16[2,17,17,16], index: 0, kind: input, shape index: {}]   ;;  %s3755_s1 = inlined_call_operand.vmem [shape: bf16[4,16,8], index: 1, kind: input, shape index: {}]   ;;  %s3756_s2 = inlined_call_operand.vmem [shape: f32[1,1,8], index: 2, kind: input, shape index: {}]   ;;  %s3757_s3 = inlined_call_operand.vmem [shape: bf16[2,16,16,8], index: 3, kind: output, shape index: {}]  }
   0x1   :  { %s3362_s14 = smov 0   ;;  %s3364_s15 = smov 0  }
   0x2   :  { %s3366_s16 = smov 0  }
   0x3 LB: > { %s22_s17 = sadd.s32 1, %s3326_s14  ;;  %s25_s18 = sadd.s32 1, %s3330_s15  ;;  %s3334_s16 = sphi %s3366_s16, %s13_s16   ;;  %s3330_s15 = sphi %s3364_s15, %s3761_s15   ;;  %s3326_s14 = sphi %s3362_s14, %s3760_s14   ;;  %s3322_s13 = sphi %s3360_s13, %s3759_s13   ;;  %s3318_s12 = sphi %s3358_s12, %s3758_s12  }
   0x4   : > { %p23_p0 = scmp.ge.s32.totalorder %s22_s17, 2  ;;  %p2637_p1 = scmp.ge.s32.totalorder %s3334_s16, 1 }
   0x5   : > { %p151_p2 = scmp.lt.s32.totalorder %s3334_s16, 5 }
   0x6   : > { %s3763_s17 = smov (%p23_p0, %s22_s17), 0  ;;  %s3765_s18 = smov (!%p23_p0, %s25_s18), %s3330_s15 }
   0x7   : > { %p152_p3 = pnand %p2637_p1, %p151_p2  ;;  %p27_p4 = scmp.ge.s32.totalorder %s3765_s18, 2 }
   0x8   : > { %v3224_v0 = vld [vmem:[%s3755_s1 + $0x8] sm:$0xff] (!%p152_p3)   ;;  %v3336_v1 = vmov (!%p152_p3), 0.0   ;;  %v3225_v2 = vld [vmem:[%s3755_s1] sm:$0xff] (!%p152_p3)   ;;  %vm3337_vm0 = vmmov (!%p152_p3), 0   ;;  %p180_p5 = scmp.lt.s32.totalorder (!%p152_p3), %s3322_s13, 1  ;;  %s2908_s23 = smul.u32 (!%p152_p3), 96, %s3318_s12 }
   0x9   : > { %s3767_s18 = smov (%p27_p4, %s3765_s18), 0  ;;  %155 = sbr.rel (%p152_p3) target bundleno = 375 (0x177), region = 32 }
   0xa   : > { %2989 = vmatprep.subr.bf16.mxu0 (!%p152_p3), %v3336_v1  ;;  %2995 = vmatprep.subr.bf16.mxu1 (!%p152_p3), %v3336_v1  ;;  %vm218_vm1 = vsmask.f32 (!%p152_p3), 7424  ;;  %vm237_vm2 = vcmask (!%p152_p3), 130048   ;;  %v3229_v3 = vld [vmem:[%s3755_s1 + $0x18] sm:$0xff] (!%p152_p3)   ;;  %v3228_v12 = vld [vmem:[%s3755_s1 + $0x10] sm:$0xff] (!%p152_p3)   ;;  %v3234_v23 = vld [vmem:[%s3755_s1] sm:$0xff] (!%p152_p3)  }
   0xb   : > { %2990 = vmatpush3.bf16.msra.mxu0 (!%p152_p3), %v3224_v0  ;;  %2997 = vmatprep.mubr.msk.bf16.mxu1 (!%p152_p3), %vm3337_vm0, %v3336_v1  ;;  %v3233_v31 = vld [vmem:[%s3755_s1 + $0x8] sm:$0xff] (!%p152_p3)   ;;  %v3238_v35 = vld [vmem:[%s3755_s1 + $0x18] sm:$0xff] (!%p152_p3)   ;;  %v3237_v41 = vld [vmem:[%s3755_s1 + $0x10] sm:$0xff] (!%p152_p3)   ;;  %s2639_s5 = sshll.u32 (!%p152_p3), %s3318_s12, 3  ;;  %vm497_vm4 = vcmask (!%p152_p3), 60416  }
   0xc   : > { %2996 = vmatpush3.bf16.msra.mxu1 (!%p152_p3), %v3225_v2  ;;  %2991 = vmatprep.mubr.msk.bf16.mxu0 (!%p152_p3), %vm3337_vm0, %v3336_v1  ;;  %v3243_v46 = vld [vmem:[%s3755_s1] sm:$0xff] (!%p152_p3)   ;;  %v3242_v51 = vld [vmem:[%s3755_s1 + $0x8] sm:$0xff] (!%p152_p3)   ;;  %v3247_v58 = vld [vmem:[%s3755_s1 + $0x18] sm:$0xff] (!%p152_p3)   ;;  %p188_p6 = scmp.lt.s32.totalorder (!%p152_p3), %s2639_s5, 15 }
   0xd   : > { %3001 = vmatprep.subr.bf16.mxu0 (!%p152_p3), %v3336_v1  ;;  %3007 = vmatprep.subr.bf16.mxu1 (!%p152_p3), %v3336_v1 }
  0x10   : > { %s3769_s13 = smov (!%p180_p5, %s3322_s13), 1  ;;  %s3771_s5 = smov (!%p188_p6, %s2639_s5), 15 }
  0x11   : > { %s3181_s24 = smul.u32 204, %s3769_s13  ;;  %s2641_s6 = sshll.u32 %s3769_s13, 5 }
  0x13   : > { %s184_s27 = scalar_lea.vmem %s3754_s0, %s3181_s24 }
  0x14   : > { %s3411_s28 = scalar_lea.vmem %s184_s27, %s2908_s23 }
  0x15   : > { %v3226_v4 = vld [vmem:[%s3411_s28] sm:$0xff]   ;;  %v3227_v5 = vld [vmem:[%s3411_s28 + $0x8] ss:$0 sps:$4 sm:$0x11]   ;;  %v3230_v6 = vld [vmem:[%s3411_s28 + $0xc] sm:$0xff]  }
  0x16   : > { %2998 = vmatmul.mubr.msk.bf16.vlgmr.msra.gmra.mrb[0].mxu1 %vm237_vm2, %v3226_v4  ;;  %v220_v7 = vshrl.u32 %v3226_v4, 16  ;;  %v222_v8 = vshll.u32 %v3226_v4, 16  ;;  %v227_v9 = vshll.u32 %v3227_v5, 16  ;;  %v3231_v10 = vld [vmem:[%s3411_s28 + $0x14] ss:$0 sps:$4 sm:$0x11]  }
  0x17   : > { %3008 = vmatpush3.bf16.msra.mxu1 %v3229_v3  ;;  %3009 = vmatprep.mubr.msk.bf16.mxu1 %vm3337_vm0, %v3336_v1  ;;  %v412_v13 = vshrl.u32 %v3230_v6, 16  ;;  %v414_v14 = vshll.u32 %v3230_v6, 16  ;;  %v419_v16 = vshll.u32 %v3231_v10, 16  ;;  %v3235_v19 = vld [vmem:[%s3411_s28 + $0xc] sm:$0xff]   ;;  %v3239_v25 = vld [vmem:[%s3411_s28 + $0x18] sm:$0xff]   ;;  %v3248_v49 = vld [vmem:[%s3411_s28 + $0x24] sm:$0xff]  }
  0x18   : > { %v224_v11 = vrot.slane %v222_v8, 1  ;;  %3019 = vmatprep.subr.bf16.mxu1 %v3336_v1  ;;  %v229_v15 = vrot.slane %v227_v9, 1  ;;  %v3236_v24 = vld [vmem:[%s3411_s28 + $0x14] ss:$0 sps:$4 sm:$0x11]   ;;  %v518_v27 = vshll.u32 %v3235_v19, 16 }
  0x19   : > { %v416_v18 = vrot.slane %v414_v14, 1  ;;  %v421_v20 = vrot.slane %v419_v16, 1  ;;  %v3240_v28 = vld [vmem:[%s3411_s28 + $0x20] ss:$0 sps:$4 sm:$0x11]   ;;  %v707_v29 = vshll.u32 %v3239_v25, 16 }
  0x1a   : > { %v225_v17 = vor.u32 %v224_v11, %v220_v7  ;;  %v3232_v30 = vld [vmem:[%s3411_s28 + $0xc] sm:$0xff]   ;;  %v516_v32 = vshrl.u32 %v3235_v19, 16  ;;  %v520_v33 = vrot.slane %v518_v27, 1  ;;  %v523_v34 = vshll.u32 %v3236_v24, 16  ;;  %v3244_v45 = vld [vmem:[%s3411_s28 + $0x18] sm:$0xff]   ;;  %v3253_v5 = vld [vmem:[%s3411_s28 + $0x24] sm:$0xff]  }
  0x1b   : > { %v417_v22 = vor.u32 %v416_v18, %v412_v13  ;;  %v705_v36 = vshrl.u32 %v3239_v25, 16  ;;  %v709_v37 = vrot.slane %v707_v29, 1  ;;  %v712_v38 = vshll.u32 %v3240_v28, 16  ;;  %v3245_v48 = vld [vmem:[%s3411_s28 + $0x20] ss:$0 sps:$4 sm:$0x11]  }
  0x1c   : > { %v230_v21 = vsel %vm218_vm1, %v225_v17, %v229_v15  ;;  %v521_v39 = vor.u32 %v520_v33, %v516_v32  ;;  %v525_v40 = vrot.slane %v523_v34, 1  ;;  %v805_v50 = vshll.u32 %v3244_v45, 16  ;;  %v3249_v52 = vld [vmem:[%s3411_s28 + $0x2c] ss:$0 sps:$4 sm:$0x11]   ;;  %v3241_v54 = vld [vmem:[%s3411_s28 + $0x18] sm:$0xff]  }
  0x1d   : > { %2992 = vmatmul.mubr.msk.bf16.vlgmr.msra.gmra.mrb[0].mxu0 %vm237_vm2, %v230_v21  ;;  %v422_v26 = vsel %vm218_vm1, %v417_v22, %v421_v20  ;;  %v710_v42 = vor.u32 %v709_v37, %v705_v36  ;;  %v714_v43 = vrot.slane %v712_v38, 1  ;;  %v994_v53 = vshll.u32 %v3248_v49, 16  ;;  %v3246_v3 = vld [vmem:[%s3755_s1 + $0x10] sm:$0xff]   ;;  %v3252_v6 = vld [vmem:[%s3755_s1] sm:$0xff]   ;;  %v3251_v14 = vld [vmem:[%s3755_s1 + $0x8] sm:$0xff]  }
  0x1e   : > { %3002 = vmatpush3.bf16.msra.mxu0 %v3228_v12  ;;  %3003 = vmatprep.mubr.msk.bf16.mxu0 %vm3337_vm0, %v3336_v1  ;;  %v526_v44 = vsel %vm218_vm1, %v521_v39, %v525_v40  ;;  %v803_v55 = vshrl.u32 %v3244_v45, 16  ;;  %v807_v56 = vrot.slane %v805_v50, 1  ;;  %v810_v57 = vshll.u32 %v3245_v48, 16  ;;  %v3257_v8 = vld [vmem:[%s3411_s28 + $0x30] sm:$0xff]   ;;  %v3250_v13 = vld [vmem:[%s3411_s28 + $0x24] sm:$0xff]   ;;  %v3256_v18 = vld [vmem:[%s3755_s1 + $0x18] sm:$0xff]  }
  0x1f   : > { %3010 = vmatmul.mubr.msk.bf16.vlgmr.msra.gmra.mrb[4].mxu1 %vm237_vm2, %v422_v26  ;;  %3013 = vmatprep.subr.bf16.mxu0 %v3336_v1  ;;  %v715_v47 = vsel %vm218_vm1, %v710_v42, %v714_v43  ;;  %v992_v59 = vshrl.u32 %v3248_v49, 16  ;;  %v996_v60 = vrot.slane %v994_v53, 1  ;;  %v999_v61 = vshll.u32 %v3249_v52, 16  ;;  %v3254_v9 = vld [vmem:[%s3411_s28 + $0x2c] ss:$0 sps:$4 sm:$0x11]  }
  0x20   : > { %3020 = vmatpush3.bf16.msra.mxu1 %v3234_v23  ;;  %3021 = vmatprep.mubr.msk.bf16.mxu1 %vm3337_vm0, %v3336_v1  ;;  %v808_v62 = vor.u32 %v807_v56, %v803_v55  ;;  %v812_v63 = vrot.slane %v810_v57, 1  ;;  %v1092_v10 = vshll.u32 %v3253_v5, 16  ;;  %v3258_v11 = vld [vmem:[%s3411_s28 + $0x38] ss:$0 sps:$4 sm:$0x11]   ;;  %v1281_v12 = vshll.u32 %v3257_v8, 16 }
  0x21   : > { %3031 = vmatprep.subr.bf16.mxu1 %v3336_v1  ;;  %v997_v0 = vor.u32 %v996_v60, %v992_v59  ;;  %v1001_v2 = vrot.slane %v999_v61, 1  ;;  %v1090_v15 = vshrl.u32 %v3253_v5, 16  ;;  %v1097_v17 = vshll.u32 %v3254_v9, 16  ;;  %v3255_v27 = vld [vmem:[%s3755_s1 + $0x10] sm:$0xff]   ;;  %v3261_v29 = vld [vmem:[%s3755_s1] sm:$0xff]   ;;  %v3269_v60 = vld [vmem:[%s3755_s1 + $0x8] sm:$0xff]  }
  0x22   : > { %v813_v4 = vsel %vm218_vm1, %v808_v62, %v812_v63  ;;  %v1094_v16 = vrot.slane %v1092_v10, 1  ;;  %v1283_v20 = vrot.slane %v1281_v12, 1  ;;  %v1286_v21 = vshll.u32 %v3258_v11, 16  ;;  %v3262_v28 = vld [vmem:[%s3411_s28 + $0x30] sm:$0xff]   ;;  %v3266_v32 = vld [vmem:[%s3411_s28 + $0x3c] sm:$0xff]   ;;  %v3280_v11 = vld [vmem:[%s3411_s28 + $0x48] sm:$0xff]  }
  0x23   : > { %v1002_v7 = vsel %vm218_vm1, %v997_v0, %v1001_v2  ;;  %v1099_v23 = vrot.slane %v1097_v17, 1  ;;  %v1379_v33 = vshll.u32 %v3262_v28, 16  ;;  %v3259_v34 = vld [vmem:[%s3411_s28 + $0x30] sm:$0xff]   ;;  %v1377_v36 = vshrl.u32 %v3262_v28, 16  ;;  %v3270_v53 = vld [vmem:[%s3755_s1] sm:$0xff]   ;;  %v3274_v0 = vld [vmem:[%s3755_s1 + $0x18] sm:$0xff]  }
  0x24   : > { %v1095_v22 = vor.u32 %v1094_v16, %v1090_v15  ;;  %v1288_v25 = vrot.slane %v1286_v21, 1  ;;  %v3267_v37 = vld [vmem:[%s3411_s28 + $0x44] ss:$0 sps:$4 sm:$0x11]   ;;  %v1568_v38 = vshll.u32 %v3266_v32, 16  ;;  %v1566_v42 = vshrl.u32 %v3266_v32, 16 }
  0x25   : > { %3004 = vmatmul.mubr.msk.bf16.vlgmr.msra.gmra.mrb[4].mxu0 %vm237_vm2, %v3232_v30  ;;  %v1381_v39 = vrot.slane %v1379_v33, 1  ;;  %v3264_v50 = vld [vmem:[%s3755_s1 + $0x10] sm:$0xff]   ;;  %v3272_v55 = vld [vmem:[%s3411_s28 + $0x44] ss:$0 sps:$4 sm:$0x11]   ;;  %v3268_v59 = vld [vmem:[%s3411_s28 + $0x3c] sm:$0xff]  }
  0x26   : > { %3014 = vmatpush3.bf16.msra.mxu0 %v3233_v31  ;;  %3015 = vmatprep.mubr.msk.bf16.mxu0 %vm3337_vm0, %v3336_v1  ;;  %v1100_v26 = vsel %vm218_vm1, %v1095_v22, %v1099_v23  ;;  %v3263_v31 = vld [vmem:[%s3411_s28 + $0x38] ss:$0 sps:$4 sm:$0x11]   ;;  %v1570_v43 = vrot.slane %v1568_v38, 1  ;;  %v1671_v63 = vshll.u32 %v3272_v55, 16  ;;  %v3273_v10 = vld [vmem:[%s3755_s1 + $0x10] sm:$0xff]  }
  0x27   : > { %3022 = vmatmul.mubr.msk.bf16.vlgmr.msra.gmra.mrb[8].mxu1 %vm237_vm2, %v3235_v19  ;;  %3025 = vmatprep.subr.bf16.mxu0 %v3336_v1  ;;  %v1279_v19 = vshrl.u32 %v3257_v8, 16  ;;  %v1384_v40 = vshll.u32 %v3263_v31, 16  ;;  %v3276_v57 = vld [vmem:[%s3411_s28 + $0x50] ss:$0 sps:$4 sm:$0x11]   ;;  %v1953_v16 = vshll.u32 %v3280_v11, 16 }
  0x28   : > { %3032 = vmatpush3.bf16.msra.mxu1 %v3238_v35  ;;  %3033 = vmatprep.mubr.msk.bf16.mxu1 %vm3337_vm0, %v3336_v1  ;;  %v3260_v35 = vld [vmem:[%s3755_s1 + $0x8] sm:$0xff]   ;;  %v3281_v15 = vld [vmem:[%s3411_s28 + $0x50] ss:$0 sps:$4 sm:$0x11]   ;;  %v1951_v21 = vshrl.u32 %v3280_v11, 16 }
  0x29   : > { %3043 = vmatprep.subr.bf16.mxu1 %v3336_v1  ;;  %v1284_v24 = vor.u32 %v1283_v20, %v1279_v19  ;;  %v3285_v17 = vld [vmem:[%s3411_s28 + $0x5c] ss:$0 sps:$4 sm:$0x11]   ;;  %v3277_v19 = vld [vmem:[%s3411_s28 + $0x48] sm:$0xff]   ;;  %v1955_v22 = vrot.slane %v1953_v16, 1  ;;  %v1958_v23 = vshll.u32 %v3281_v15, 16 }
  0x2a   : > { %v3278_v20 = vld [vmem:[%s3755_s1 + $0x8] sm:$0xff]   ;;  %v3282_v33 = vld [vmem:[%s3755_s1 + $0x10] sm:$0xff]   ;;  %v3290_v38 = vld [vmem:[%s3411_s28 + $0x5c] ss:$0 sps:$4 sm:$0x11]  }
  0x2b   : > { %v1289_v30 = vsel %vm218_vm1, %v1284_v24, %v1288_v25  ;;  %v3283_v24 = vld [vmem:[%s3755_s1 + $0x18] sm:$0xff]  }
  0x2d   : > { %3016 = vmatmul.mubr.msk.bf16.vlgmr.msra.gmra.mrb[8].mxu0 %vm237_vm2, %v526_v44  ;;  %v1573_v44 = vshll.u32 %v3267_v37, 16  ;;  %v3293_v37 = vld [vmem:[%s3411_s28 + $0x60] sm:$0xff]  }
  0x2e   : > { %3026 = vmatpush3.bf16.msra.mxu0 %v3237_v41  ;;  %3027 = vmatprep.mubr.msk.bf16.mxu0 %vm3337_vm0, %v3336_v1  ;;  %v3265_v41 = vld [vmem:[%s3755_s1 + $0x18] sm:$0xff]  }
  0x2f   : > { %3034 = vmatmul.mubr.msk.bf16.vlgmr.msra.gmra.mrb[12].mxu1 %vm237_vm2, %v715_v47  ;;  %3037 = vmatprep.subr.bf16.mxu0 %v3336_v1  ;;  %v1571_v47 = vor.u32 %v1570_v43, %v1566_v42  ;;  %v1575_v48 = vrot.slane %v1573_v44, 1  ;;  %v3286_v42 = vld [vmem:[%s3411_s28 + $0x54] sm:$0xff]   ;;  %v3287_v43 = vld [vmem:[%s3755_s1 + $0x8] sm:$0xff]  }
  0x30   : > { %3044 = vmatpush3.bf16.msra.mxu1 %v3243_v46  ;;  %3045 = vmatprep.mubr.msk.bf16.mxu1 %vm3337_vm0, %v3336_v1  ;;  %v1386_v46 = vrot.slane %v1384_v40, 1  ;;  %v3294_v40 = vld [vmem:[%s3411_s28 + $0x68] ss:$0 sps:$4 sm:$0x11]  }
  0x31   : > { %3055 = vmatprep.subr.bf16.mxu1 %v3336_v1  ;;  %v1576_v52 = vsel %vm218_vm1, %v1571_v47, %v1575_v48  ;;  %v3292_v47 = vld [vmem:[%s3755_s1 + $0x18] sm:$0xff]   ;;  %v2427_v48 = vshrl.u32 %v3293_v37, 16 }
  0x35   : > { %3028 = vmatmul.mubr.msk.bf16.vlgmr.msra.gmra.mrb[12].mxu0 %vm237_vm2, %v3241_v54  ;;  %v3275_v54 = vld [vmem:[%s3411_s28 + $0x48] sm:$0xff]  }
  0x36   : > { %3038 = vmatpush3.bf16.msra.mxu0 %v3242_v51  ;;  %3039 = vmatprep.mubr.msk.bf16.mxu0 %vm3337_vm0, %v3336_v1  ;;  %v3271_v51 = vld [vmem:[%s3411_s28 + $0x3c] sm:$0xff]   ;;  %v1853_v2 = vshrl.u32 %v3275_v54, 16 }
  0x37   : > { %3046 = vmatmul.mubr.msk.bf16.vlgmr.msra.gmra.mrb[16].mxu1 %vm237_vm2, %v3244_v45  ;;  %3049 = vmatprep.subr.bf16.mxu0 %v3336_v1  ;;  %v1382_v45 = vor.u32 %v1381_v39, %v1377_v36  ;;  %v1666_v56 = vshll.u32 %v3271_v51, 16  ;;  %v1664_v61 = vshrl.u32 %v3271_v51, 16  ;;  %v3288_v36 = vld [vmem:[%s3755_s1] sm:$0xff]  }
  0x38   : > { %3056 = vmatpush3.bf16.msra.mxu1 %v3247_v58  ;;  %3057 = vmatprep.mubr.msk.bf16.mxu1 %vm3337_vm0, %v3336_v1  ;;  %v1855_v58 = vshll.u32 %v3275_v54, 16 }
  0x39   : > { %3067 = vmatprep.subr.bf16.mxu1 %v3336_v1  ;;  %v1387_v49 = vsel %vm218_vm1, %v1382_v45, %v1386_v46  ;;  %v1668_v62 = vrot.slane %v1666_v56, 1  ;;  %v2245_v46 = vshll.u32 %v3290_v38, 16  ;;  %v3291_v56 = vld [vmem:[%s3755_s1 + $0x10] sm:$0xff]  }
  0x3d   : > { %3040 = vmatmul.mubr.msk.bf16.vlgmr.msra.gmra.mrb[16].mxu0 %vm237_vm2, %v813_v4  ;;  %v1860_v4 = vshll.u32 %v3276_v57, 16 }
  0x3e   : > { %3050 = vmatpush3.bf16.msra.mxu0 %v3246_v3  ;;  %3051 = vmatprep.mubr.msk.bf16.mxu0 %vm3337_vm0, %v3336_v1  ;;  %v1857_v3 = vrot.slane %v1855_v58, 1  ;;  %v3295_v58 = vld [vmem:[%s3411_s28 + $0x60] sm:$0xff]  }
  0x3f   : > { %3058 = vmatmul.mubr.msk.bf16.vlgmr.msra.gmra.mrb[20].mxu1 %vm237_vm2, %v1002_v7  ;;  %3061 = vmatprep.subr.bf16.mxu0 %v3336_v1  ;;  %v1862_v8 = vrot.slane %v1860_v4, 1 }
  0x40   : > { %3068 = vmatpush3.bf16.msra.mxu1 %v3252_v6  ;;  %3069 = vmatprep.mubr.msk.bf16.mxu1 %vm3337_vm0, %v3336_v1  ;;  %v1673_v6 = vrot.slane %v1671_v63, 1  ;;  %v1858_v7 = vor.u32 %v1857_v3, %v1853_v2 }
  0x41   : > { %3079 = vmatprep.subr.bf16.mxu1 %v3336_v1 }
  0x42   : > { %v1863_v12 = vsel %vm218_vm1, %v1858_v7, %v1862_v8 }
  0x45   : > { %3052 = vmatmul.mubr.msk.bf16.vlgmr.msra.gmra.mrb[20].mxu0 %vm237_vm2, %v3250_v13  ;;  %v3279_v13 = vld [vmem:[%s3755_s1] sm:$0xff]  }
  0x46   : > { %3062 = vmatpush3.bf16.msra.mxu0 %v3251_v14  ;;  %3063 = vmatprep.mubr.msk.bf16.mxu0 %vm3337_vm0, %v3336_v1  ;;  %v3284_v14 = vld [vmem:[%s3411_s28 + $0x54] sm:$0xff]  }
  0x47   : > { %3070 = vmatmul.mubr.msk.bf16.vlgmr.msra.gmra.mrb[24].mxu1 %vm237_vm2, %v3253_v5  ;;  %3073 = vmatprep.subr.bf16.mxu0 %v3336_v1  ;;  %v1669_v5 = vor.u32 %v1668_v62, %v1664_v61  ;;  %v2140_v25 = vshrl.u32 %v3284_v14, 16 }
  0x48   : > { %3080 = vmatpush3.bf16.msra.mxu1 %v3256_v18  ;;  %3081 = vmatprep.mubr.msk.bf16.mxu1 %vm3337_vm0, %v3336_v1  ;;  %v2142_v18 = vshll.u32 %v3284_v14, 16 }
  0x49   : > { %3091 = vmatprep.subr.bf16.mxu1 %v3336_v1  ;;  %v1674_v9 = vsel %vm218_vm1, %v1669_v5, %v1673_v6 }
  0x4d   : > { %3064 = vmatmul.mubr.msk.bf16.vlgmr.msra.gmra.mrb[24].mxu0 %vm237_vm2, %v1100_v26  ;;  %v2144_v26 = vrot.slane %v2142_v18, 1 }
  0x4e   : > { %3074 = vmatpush3.bf16.msra.mxu0 %v3255_v27  ;;  %3075 = vmatprep.mubr.msk.bf16.mxu0 %vm3337_vm0, %v3336_v1  ;;  %v2147_v27 = vshll.u32 %v3285_v17, 16 }
  0x4f   : > { %3082 = vmatmul.mubr.msk.bf16.vlgmr.msra.gmra.mrb[28].mxu1 %vm237_vm2, %v1289_v30  ;;  %3085 = vmatprep.subr.bf16.mxu0 %v3336_v1  ;;  %v2145_v30 = vor.u32 %v2144_v26, %v2140_v25 }
  0x50   : > { %3092 = vmatpush3.bf16.msra.mxu1 %v3261_v29  ;;  %3093 = vmatprep.mubr.msk.bf16.mxu1 %vm3337_vm0, %v3336_v1  ;;  %v1960_v29 = vrot.slane %v1958_v23, 1  ;;  %v2149_v31 = vrot.slane %v2147_v27, 1 }
  0x51   : > { %3103 = vmatprep.subr.bf16.mxu1 %v3336_v1 }
  0x55   : > { %3076 = vmatmul.mubr.msk.bf16.vlgmr.msra.gmra.mrb[28].mxu0 %vm237_vm2, %v3259_v34  ;;  %v3289_v34 = vld [vmem:[%s3411_s28 + $0x54] sm:$0xff]   ;;  %s2640_s28 = sshll.u32 %s3771_s5, 1 }
  0x56   : > { %3086 = vmatpush3.bf16.msra.mxu0 %v3260_v35  ;;  %3087 = vmatprep.mubr.msk.bf16.mxu0 %vm3337_vm0, %v3336_v1  ;;  %v2150_v35 = vsel %vm218_vm1, %v2145_v30, %v2149_v31  ;;  %v2240_v39 = vshll.u32 %v3289_v34, 16  ;;  %v2238_v44 = vshrl.u32 %v3289_v34, 16  ;;  %s192_s12 = sadd.s32 %s2641_s6, %s2640_s28 }
  0x57   : > { %3094 = vmatmul.mubr.msk.bf16.vlgmr.msra.gmra.mrb[32].mxu1 %vm237_vm2, %v3262_v28  ;;  %3097 = vmatprep.subr.bf16.mxu0 %v3336_v1  ;;  %v1956_v28 = vor.u32 %v1955_v22, %v1951_v21  ;;  %s2642_s13 = sshll.u32 %s192_s12, 2 }
  0x58   : > { %3104 = vmatpush3.bf16.msra.mxu1 %v3265_v41  ;;  %3105 = vmatprep.mubr.msk.bf16.mxu1 %vm3337_vm0, %v3336_v1  ;;  %v2429_v41 = vshll.u32 %v3293_v37, 16  ;;  %v2242_v45 = vrot.slane %v2240_v39, 1  ;;  %s3691_s11 = scalar_lea.vmem %s3757_s3, %s2642_s13 }
  0x59   : > { %3115 = vmatprep.subr.bf16.mxu1 %v3336_v1  ;;  %v1961_v32 = vsel %vm218_vm1, %v1956_v28, %v1960_v29 }
  0x5d   : > { %3088 = vmatmul.mubr.msk.bf16.vlgmr.msra.gmra.mrb[32].mxu0 %vm237_vm2, %v1387_v49  ;;  %v2431_v49 = vrot.slane %v2429_v41, 1 }
  0x5e   : > { %3098 = vmatpush3.bf16.msra.mxu0 %v3264_v50  ;;  %3099 = vmatprep.mubr.msk.bf16.mxu0 %vm3337_vm0, %v3336_v1  ;;  %v2434_v50 = vshll.u32 %v3294_v40, 16 }
  0x5f   : > { %3106 = vmatmul.mubr.msk.bf16.vlgmr.msra.gmra.mrb[36].mxu1 %vm237_vm2, %v1576_v52  ;;  %3109 = vmatprep.subr.bf16.mxu0 %v3336_v1  ;;  %v2247_v52 = vrot.slane %v2245_v46, 1 }
  0x60   : > { %3116 = vmatpush3.bf16.msra.mxu1 %v3270_v53  ;;  %3117 = vmatprep.mubr.msk.bf16.mxu1 %vm3337_vm0, %v3336_v1  ;;  %v2432_v53 = vor.u32 %v2431_v49, %v2427_v48  ;;  %v2436_v54 = vrot.slane %v2434_v50, 1 }
  0x61   : > { %3127 = vmatprep.subr.bf16.mxu1 %v3336_v1 }
  0x62   : > { %v2437_v57 = vsel %vm218_vm1, %v2432_v53, %v2436_v54 }
  0x65   : > { %3100 = vmatmul.mubr.msk.bf16.vlgmr.msra.gmra.mrb[36].mxu0 %vm237_vm2, %v3268_v59 }
  0x66   : > { %3110 = vmatpush3.bf16.msra.mxu0 %v3269_v60  ;;  %3111 = vmatprep.mubr.msk.bf16.mxu0 %vm3337_vm0, %v3336_v1 }
  0x67   : > { %3118 = vmatmul.mubr.msk.bf16.vlgmr.msra.gmra.mrb[40].mxu1 %vm237_vm2, %v3271_v51  ;;  %3121 = vmatprep.subr.bf16.mxu0 %v3336_v1  ;;  %v2243_v51 = vor.u32 %v2242_v45, %v2238_v44 }
  0x68   : > { %3128 = vmatpush3.bf16.msra.mxu1 %v3274_v0  ;;  %3129 = vmatprep.mubr.msk.bf16.mxu1 %vm3337_vm0, %v3336_v1 }
  0x69   : > { %3139 = vmatprep.subr.bf16.mxu1 %v3336_v1  ;;  %v2248_v55 = vsel %vm218_vm1, %v2243_v51, %v2247_v52 }
  0x6d   : > { %3112 = vmatmul.mubr.msk.bf16.vlgmr.msra.gmra.mrb[40].mxu0 %vm237_vm2, %v1674_v9 }
  0x6e   : > { %3122 = vmatpush3.bf16.msra.mxu0 %v3273_v10  ;;  %3123 = vmatprep.mubr.msk.bf16.mxu0 %vm3337_vm0, %v3336_v1 }
  0x6f   : > { %3130 = vmatmul.mubr.msk.bf16.vlgmr.msra.gmra.mrb[44].mxu1 %vm237_vm2, %v1863_v12  ;;  %3133 = vmatprep.subr.bf16.mxu0 %v3336_v1  ;;  %v3684_v12 = vld [vmem:[%s3756_s2] ss:$0 sm:$0xff] }
  0x70   : > { %3140 = vmatpush3.bf16.msra.mxu1 %v3279_v13  ;;  %3141 = vmatprep.mubr.msk.bf16.mxu1 %vm3337_vm0, %v3336_v1 }
  0x71   : > { %3151 = vmatprep.subr.bf16.mxu1 %v3336_v1 }
  0x75   : > { %3124 = vmatmul.mubr.msk.bf16.vlgmr.msra.gmra.mrb[44].mxu0 %vm237_vm2, %v3277_v19 }
  0x76   : > { %3134 = vmatpush3.bf16.msra.mxu0 %v3278_v20  ;;  %3135 = vmatprep.mubr.msk.bf16.mxu0 %vm3337_vm0, %v3336_v1 }
  0x77   : > { %3142 = vmatmul.mubr.msk.bf16.vlgmr.msra.gmra.mrb[48].mxu1 %vm237_vm2, %v3280_v11  ;;  %3145 = vmatprep.subr.bf16.mxu0 %v3336_v1 }
  0x78   : > { %3152 = vmatpush3.bf16.msra.mxu1 %v3283_v24  ;;  %3153 = vmatprep.mubr.msk.bf16.mxu1 %vm3337_vm0, %v3336_v1 }
  0x79   : > { %3163 = vmatprep.subr.bf16.mxu1 %v3336_v1 }
  0x7d   : > { %3136 = vmatmul.mubr.msk.bf16.vlgmr.msra.gmra.mrb[48].mxu0 %vm237_vm2, %v1961_v32 }
  0x7e   : > { %3146 = vmatpush3.bf16.msra.mxu0 %v3282_v33  ;;  %3147 = vmatprep.mubr.msk.bf16.mxu0 %vm3337_vm0, %v3336_v1 }
  0x7f   : > { %3154 = vmatmul.mubr.msk.bf16.vlgmr.msra.gmra.mrb[52].mxu1 %vm237_vm2, %v2150_v35  ;;  %3157 = vmatprep.subr.bf16.mxu0 %v3336_v1 }
  0x80   : > { %3164 = vmatpush3.bf16.msra.mxu1 %v3288_v36  ;;  %3165 = vmatprep.mubr.msk.bf16.mxu1 %vm3337_vm0, %v3336_v1 }
  0x81   : > { %3175 = vmatprep.subr.bf16.mxu1 %v3336_v1 }
  0x85   : > { %3148 = vmatmul.mubr.msk.bf16.vlgmr.msra.gmra.mrb[52].mxu0 %vm237_vm2, %v3286_v42 }
  0x86   : > { %3158 = vmatpush3.bf16.msra.mxu0 %v3287_v43  ;;  %3159 = vmatprep.mubr.msk.bf16.mxu0 %vm3337_vm0, %v3336_v1 }
  0x87   : > { %3166 = vmatmul.mubr.msk.bf16.vlgmr.msra.gmra.mrb[56].mxu1 %vm237_vm2, %v3289_v34  ;;  %3169 = vmatprep.subr.bf16.mxu0 %v3336_v1 }
  0x88   : > { %3176 = vmatpush3.bf16.msra.mxu1 %v3292_v47  ;;  %3177 = vmatprep.mubr.msk.bf16.mxu1 %vm3337_vm0, %v3336_v1 }
  0x8d   : > { %3160 = vmatmul.mubr.msk.bf16.vlgmr.msra.gmra.mrb[56].mxu0 %vm237_vm2, %v2248_v55 }
  0x8e   : > { %3170 = vmatpush3.bf16.msra.mxu0 %v3291_v56  ;;  %3171 = vmatprep.mubr.msk.bf16.mxu0 %vm3337_vm0, %v3336_v1 }
  0x8f   : > { %3178 = vmatmul.mubr.msk.bf16.vlgmr.msra.gmra.mrb[60].mxu1 %vm237_vm2, %v2437_v57 }
  0x95   : > { %3172 = vmatmul.mubr.msk.bf16.vlgmr.msra.gmra.mrb[60].mxu0 %vm237_vm2, %v3295_v58 }
  0xe9   : > { %v324_v59 = vpop.f32.mrb[0].mxu1 }
  0xea   : > { %v2999_v60 = vpop.f32.mrb[1].mxu1 }
  0xeb   : > { %v327_v61 = vpop.f32.mrb[2].mxu1 }
  0xec   : > { %v3000_v62 = vpop.f32.mrb[3].mxu1 }
  0xf0   : > { %v275_v63 = vpop.f32.mrb[0].mxu0 }
  0xf1   : > { %v325_v0 = vadd.f32 %v324_v59, %v275_v63  ;;  %v2993_v2 = vpop.f32.mrb[1].mxu0 }
  0xf2   : > { %v278_v3 = vpop.f32.mrb[2].mxu0  ;;  %v466_v4 = vpop.f32.mrb[4].mxu1 }
  0xf3   : > { %v328_v5 = vadd.f32 %v327_v61, %v278_v3  ;;  %v2994_v6 = vpop.f32.mrb[3].mxu0  ;;  %v3011_v1 = vpop.f32.mrb[5].mxu1 }
  0xf4   : > { %v469_v7 = vpop.f32.mrb[6].mxu1 }
  0xf5   : > { %v3012_v8 = vpop.f32.mrb[7].mxu1 }
  0xf8   : > { %v388_v9 = vpop.f32.mrb[4].mxu0 }
  0xf9   : > { %v395_v10 = vadd.f32 %v388_v9, %v325_v0  ;;  %v3005_v11 = vpop.f32.mrb[5].mxu0 }
  0xfa   : > { %v391_v13 = vpop.f32.mrb[6].mxu0  ;;  %v619_v14 = vpop.f32.mrb[8].mxu1 }
  0xfb   : > { %v473_v15 = vadd.f32 %v466_v4, %v395_v10  ;;  %v396_v16 = vadd.f32 %v391_v13, %v328_v5  ;;  %v3006_v17 = vpop.f32.mrb[7].mxu0  ;;  %v3023_v18 = vpop.f32.mrb[9].mxu1 }
  0xfc   : > { %v622_v19 = vpop.f32.mrb[10].mxu1 }
  0xfd   : > { %v481_v20 = vadd.f32 %v3684_v12, %v473_v15  ;;  %v474_v21 = vadd.f32 %v469_v7, %v396_v16  ;;  %v3024_v22 = vpop.f32.mrb[11].mxu1 }
  0xff   : > { %vm483_vm3 = vcmp.gt.f32.partialorder %v481_v20, 0.0  ;;  %v485_v23 = vmul.f32 0.2, %v481_v20  ;;  %v482_v24 = vadd.f32 %v3684_v12, %v474_v21 }
 0x100   : > { %v570_v25 = vpop.f32.mrb[8].mxu0 }
 0x101   : > { %v487_v26 = vsel %vm483_vm3, %v481_v20, %v485_v23  ;;  %vm484_vm5 = vcmp.gt.f32.partialorder %v482_v24, 0.0  ;;  %v486_v27 = vmul.f32 0.2, %v482_v24  ;;  %v620_v28 = vadd.f32 %v619_v14, %v570_v25  ;;  %v3017_v29 = vpop.f32.mrb[9].mxu0 }
 0x102   : > { %v2909_v30 = vpack.c.bf16 %v487_v26, %v487_v26  ;;  %v573_v31 = vpop.f32.mrb[10].mxu0  ;;  %v759_v32 = vpop.f32.mrb[12].mxu1 }
 0x103   : > { %v488_v33 = vsel %vm484_vm5, %v482_v24, %v486_v27  ;;  %v623_v34 = vadd.f32 %v622_v19, %v573_v31  ;;  %v3018_v35 = vpop.f32.mrb[11].mxu0  ;;  %v3035_v36 = vpop.f32.mrb[13].mxu1 }
 0x104   : > { %498 = vst.msk [vmem:[%s3691_s11] sm:$0xf] %vm497_vm4, %v2909_v30  ;;  %v2910_v37 = vpack.c.bf16 %v488_v33, %v488_v33  ;;  %v762_v38 = vpop.f32.mrb[14].mxu1 }
 0x105   : > { %v3036_v39 = vpop.f32.mrb[15].mxu1 }
 0x106   : > { %499 = vst.msk [vmem:[%s3691_s11 + $0x4] sm:$0xf] %vm497_vm4, %v2910_v37 }
 0x108   : > { %v682_v40 = vpop.f32.mrb[12].mxu0 }
 0x109   : > { %v689_v41 = vadd.f32 %v682_v40, %v620_v28  ;;  %v3029_v42 = vpop.f32.mrb[13].mxu0 }
 0x10a   : > { %v685_v43 = vpop.f32.mrb[14].mxu0  ;;  %v906_v44 = vpop.f32.mrb[16].mxu1 }
 0x10b   : > { %v766_v45 = vadd.f32 %v759_v32, %v689_v41  ;;  %v690_v46 = vadd.f32 %v685_v43, %v623_v34  ;;  %v3030_v47 = vpop.f32.mrb[15].mxu0  ;;  %v3047_v48 = vpop.f32.mrb[17].mxu1 }
 0x10c   : > { %v909_v49 = vpop.f32.mrb[18].mxu1 }
 0x10d   : > { %v768_v50 = vadd.f32 %v3684_v12, %v766_v45  ;;  %v767_v51 = vadd.f32 %v762_v38, %v690_v46  ;;  %v3048_v52 = vpop.f32.mrb[19].mxu1 }
 0x10f   : > { %vm770_vm6 = vcmp.gt.f32.partialorder %v768_v50, 0.0  ;;  %v772_v53 = vmul.f32 0.2, %v768_v50  ;;  %v769_v54 = vadd.f32 %v3684_v12, %v767_v51 }
 0x110   : > { %v857_v55 = vpop.f32.mrb[16].mxu0 }
 0x111   : > { %v774_v56 = vsel %vm770_vm6, %v768_v50, %v772_v53  ;;  %vm771_vm7 = vcmp.gt.f32.partialorder %v769_v54, 0.0  ;;  %v773_v57 = vmul.f32 0.2, %v769_v54  ;;  %v907_v58 = vadd.f32 %v906_v44, %v857_v55  ;;  %v3041_v59 = vpop.f32.mrb[17].mxu0 }
 0x112   : > { %v2911_v60 = vpack.c.bf16 %v774_v56, %v774_v56  ;;  %v860_v61 = vpop.f32.mrb[18].mxu0  ;;  %v1046_v62 = vpop.f32.mrb[20].mxu1 }
 0x113   : > { %v775_v63 = vsel %vm771_vm7, %v769_v54, %v773_v57  ;;  %v910_v0 = vadd.f32 %v909_v49, %v860_v61  ;;  %v3042_v2 = vpop.f32.mrb[19].mxu0  ;;  %v3059_v3 = vpop.f32.mrb[21].mxu1 }
 0x114   : > { %2706 = vst.msk [vmem:[%s3691_s11 + $0x8] sm:$0xf] %vm497_vm4, %v2911_v60  ;;  %v2912_v4 = vpack.c.bf16 %v775_v63, %v775_v63  ;;  %v1049_v5 = vpop.f32.mrb[22].mxu1 }
 0x115   : > { %v3060_v6 = vpop.f32.mrb[23].mxu1 }
 0x116   : > { %2707 = vst.msk [vmem:[%s3691_s11 + $0xc] sm:$0xf] %vm497_vm4, %v2912_v4 }
 0x118   : > { %v969_v1 = vpop.f32.mrb[20].mxu0 }
 0x119   : > { %v976_v7 = vadd.f32 %v969_v1, %v907_v58  ;;  %v3053_v8 = vpop.f32.mrb[21].mxu0 }
 0x11a   : > { %v972_v9 = vpop.f32.mrb[22].mxu0  ;;  %v1193_v10 = vpop.f32.mrb[24].mxu1 }
 0x11b   : > { %v1053_v11 = vadd.f32 %v1046_v62, %v976_v7  ;;  %v977_v13 = vadd.f32 %v972_v9, %v910_v0  ;;  %v3054_v14 = vpop.f32.mrb[23].mxu0  ;;  %v3071_v15 = vpop.f32.mrb[25].mxu1 }
 0x11c   : > { %v1196_v16 = vpop.f32.mrb[26].mxu1 }
 0x11d   : > { %v1055_v17 = vadd.f32 %v3684_v12, %v1053_v11  ;;  %v1054_v18 = vadd.f32 %v1049_v5, %v977_v13  ;;  %v3072_v19 = vpop.f32.mrb[27].mxu1 }
 0x11f   : > { %vm1057_vm8 = vcmp.gt.f32.partialorder %v1055_v17, 0.0  ;;  %v1059_v20 = vmul.f32 0.2, %v1055_v17  ;;  %v1056_v21 = vadd.f32 %v3684_v12, %v1054_v18 }
 0x120   : > { %v1144_v22 = vpop.f32.mrb[24].mxu0 }
 0x121   : > { %v1061_v23 = vsel %vm1057_vm8, %v1055_v17, %v1059_v20  ;;  %vm1058_vm9 = vcmp.gt.f32.partialorder %v1056_v21, 0.0  ;;  %v1060_v24 = vmul.f32 0.2, %v1056_v21  ;;  %v1194_v25 = vadd.f32 %v1193_v10, %v1144_v22  ;;  %v3065_v26 = vpop.f32.mrb[25].mxu0 }
 0x122   : > { %v2913_v27 = vpack.c.bf16 %v1061_v23, %v1061_v23  ;;  %v1147_v28 = vpop.f32.mrb[26].mxu0  ;;  %v1333_v29 = vpop.f32.mrb[28].mxu1 }
 0x123   : > { %v1062_v30 = vsel %vm1058_vm9, %v1056_v21, %v1060_v24  ;;  %v1197_v31 = vadd.f32 %v1196_v16, %v1147_v28  ;;  %v3066_v32 = vpop.f32.mrb[27].mxu0  ;;  %v3083_v33 = vpop.f32.mrb[29].mxu1 }
 0x124   : > { %2739 = vst.msk [vmem:[%s3691_s11 + $0x10] sm:$0xf] %vm497_vm4, %v2913_v27  ;;  %v2914_v34 = vpack.c.bf16 %v1062_v30, %v1062_v30  ;;  %v1336_v35 = vpop.f32.mrb[30].mxu1 }
 0x125   : > { %v3084_v36 = vpop.f32.mrb[31].mxu1 }
 0x126   : > { %2740 = vst.msk [vmem:[%s3691_s11 + $0x14] sm:$0xf] %vm497_vm4, %v2914_v34 }
 0x128   : > { %v1256_v37 = vpop.f32.mrb[28].mxu0 }
 0x129   : > { %v1263_v38 = vadd.f32 %v1256_v37, %v1194_v25  ;;  %v3077_v39 = vpop.f32.mrb[29].mxu0 }
 0x12a   : > { %v1259_v40 = vpop.f32.mrb[30].mxu0  ;;  %v1480_v41 = vpop.f32.mrb[32].mxu1 }
 0x12b   : > { %v1340_v42 = vadd.f32 %v1333_v29, %v1263_v38  ;;  %v1264_v43 = vadd.f32 %v1259_v40, %v1197_v31  ;;  %v3078_v44 = vpop.f32.mrb[31].mxu0  ;;  %v3095_v45 = vpop.f32.mrb[33].mxu1 }
 0x12c   : > { %v1483_v46 = vpop.f32.mrb[34].mxu1 }
 0x12d   : > { %v1342_v47 = vadd.f32 %v3684_v12, %v1340_v42  ;;  %v1341_v48 = vadd.f32 %v1336_v35, %v1264_v43  ;;  %v3096_v49 = vpop.f32.mrb[35].mxu1 }
 0x12f   : > { %vm1344_vm10 = vcmp.gt.f32.partialorder %v1342_v47, 0.0  ;;  %v1346_v50 = vmul.f32 0.2, %v1342_v47  ;;  %v1343_v51 = vadd.f32 %v3684_v12, %v1341_v48 }
 0x130   : > { %v1431_v52 = vpop.f32.mrb[32].mxu0 }
 0x131   : > { %v1348_v53 = vsel %vm1344_vm10, %v1342_v47, %v1346_v50  ;;  %vm1345_vm11 = vcmp.gt.f32.partialorder %v1343_v51, 0.0  ;;  %v1347_v54 = vmul.f32 0.2, %v1343_v51  ;;  %v1481_v55 = vadd.f32 %v1480_v41, %v1431_v52  ;;  %v3089_v56 = vpop.f32.mrb[33].mxu0 }
 0x132   : > { %v2915_v57 = vpack.c.bf16 %v1348_v53, %v1348_v53  ;;  %v1434_v58 = vpop.f32.mrb[34].mxu0  ;;  %v1620_v59 = vpop.f32.mrb[36].mxu1 }
 0x133   : > { %v1349_v60 = vsel %vm1345_vm11, %v1343_v51, %v1347_v54  ;;  %v1484_v61 = vadd.f32 %v1483_v46, %v1434_v58  ;;  %v3090_v62 = vpop.f32.mrb[35].mxu0  ;;  %v3107_v63 = vpop.f32.mrb[37].mxu1 }
 0x134   : > { %2772 = vst.msk [vmem:[%s3691_s11 + $0x18] sm:$0xf] %vm497_vm4, %v2915_v57  ;;  %v2916_v0 = vpack.c.bf16 %v1349_v60, %v1349_v60  ;;  %v1623_v2 = vpop.f32.mrb[38].mxu1 }
 0x135   : > { %v3108_v3 = vpop.f32.mrb[39].mxu1 }
 0x136   : > { %2773 = vst.msk [vmem:[%s3691_s11 + $0x1c] sm:$0xf] %vm497_vm4, %v2916_v0 }
 0x138   : > { %v1543_v4 = vpop.f32.mrb[36].mxu0 }
 0x139   : > { %v1550_v5 = vadd.f32 %v1543_v4, %v1481_v55  ;;  %v3101_v6 = vpop.f32.mrb[37].mxu0 }
 0x13a   : > { %v1546_v1 = vpop.f32.mrb[38].mxu0  ;;  %v1767_v7 = vpop.f32.mrb[40].mxu1 }
 0x13b   : > { %v1627_v8 = vadd.f32 %v1620_v59, %v1550_v5  ;;  %v1551_v9 = vadd.f32 %v1546_v1, %v1484_v61  ;;  %v3102_v10 = vpop.f32.mrb[39].mxu0  ;;  %v3119_v11 = vpop.f32.mrb[41].mxu1 }
 0x13c   : > { %v1770_v13 = vpop.f32.mrb[42].mxu1 }
 0x13d   : > { %v1629_v14 = vadd.f32 %v3684_v12, %v1627_v8  ;;  %v1628_v15 = vadd.f32 %v1623_v2, %v1551_v9  ;;  %v3120_v16 = vpop.f32.mrb[43].mxu1 }
 0x13f   : > { %vm1631_vm12 = vcmp.gt.f32.partialorder %v1629_v14, 0.0  ;;  %v1633_v17 = vmul.f32 0.2, %v1629_v14  ;;  %v1630_v18 = vadd.f32 %v3684_v12, %v1628_v15 }
 0x140   : > { %v1718_v19 = vpop.f32.mrb[40].mxu0 }
 0x141   : > { %v1635_v20 = vsel %vm1631_vm12, %v1629_v14, %v1633_v17  ;;  %vm1632_vm13 = vcmp.gt.f32.partialorder %v1630_v18, 0.0  ;;  %v1634_v21 = vmul.f32 0.2, %v1630_v18  ;;  %v1768_v22 = vadd.f32 %v1767_v7, %v1718_v19  ;;  %v3113_v23 = vpop.f32.mrb[41].mxu0 }
 0x142   : > { %v2917_v24 = vpack.c.bf16 %v1635_v20, %v1635_v20  ;;  %v1721_v25 = vpop.f32.mrb[42].mxu0  ;;  %v1907_v26 = vpop.f32.mrb[44].mxu1 }
 0x143   : > { %v1636_v27 = vsel %vm1632_vm13, %v1630_v18, %v1634_v21  ;;  %v1771_v28 = vadd.f32 %v1770_v13, %v1721_v25  ;;  %v3114_v29 = vpop.f32.mrb[43].mxu0  ;;  %v3131_v30 = vpop.f32.mrb[45].mxu1 }
 0x144   : > { %2805 = vst.msk [vmem:[%s3691_s11 + $0x20] sm:$0xf] %vm497_vm4, %v2917_v24  ;;  %v2918_v31 = vpack.c.bf16 %v1636_v27, %v1636_v27  ;;  %v1910_v32 = vpop.f32.mrb[46].mxu1 }
 0x145   : > { %v3132_v33 = vpop.f32.mrb[47].mxu1 }
 0x146   : > { %2806 = vst.msk [vmem:[%s3691_s11 + $0x24] sm:$0xf] %vm497_vm4, %v2918_v31 }
 0x148   : > { %v1830_v34 = vpop.f32.mrb[44].mxu0 }
 0x149   : > { %v1837_v35 = vadd.f32 %v1830_v34, %v1768_v22  ;;  %v3125_v36 = vpop.f32.mrb[45].mxu0 }
 0x14a   : > { %v1833_v37 = vpop.f32.mrb[46].mxu0  ;;  %v2054_v38 = vpop.f32.mrb[48].mxu1 }
 0x14b   : > { %v1914_v39 = vadd.f32 %v1907_v26, %v1837_v35  ;;  %v1838_v40 = vadd.f32 %v1833_v37, %v1771_v28  ;;  %v3126_v41 = vpop.f32.mrb[47].mxu0  ;;  %v3143_v42 = vpop.f32.mrb[49].mxu1 }
 0x14c   : > { %v2057_v43 = vpop.f32.mrb[50].mxu1 }
 0x14d   : > { %v1916_v44 = vadd.f32 %v3684_v12, %v1914_v39  ;;  %v1915_v45 = vadd.f32 %v1910_v32, %v1838_v40  ;;  %v3144_v46 = vpop.f32.mrb[51].mxu1 }
 0x14f   : > { %vm1918_vm14 = vcmp.gt.f32.partialorder %v1916_v44, 0.0  ;;  %v1920_v47 = vmul.f32 0.2, %v1916_v44  ;;  %v1917_v48 = vadd.f32 %v3684_v12, %v1915_v45 }
 0x150   : > { %v2005_v49 = vpop.f32.mrb[48].mxu0 }
 0x151   : > { %v1922_v50 = vsel %vm1918_vm14, %v1916_v44, %v1920_v47  ;;  %vm1919_vm15 = vcmp.gt.f32.partialorder %v1917_v48, 0.0  ;;  %v1921_v51 = vmul.f32 0.2, %v1917_v48  ;;  %v2055_v52 = vadd.f32 %v2054_v38, %v2005_v49  ;;  %v3137_v53 = vpop.f32.mrb[49].mxu0 }
 0x152   : > { %v2919_v54 = vpack.c.bf16 %v1922_v50, %v1922_v50  ;;  %v2008_v55 = vpop.f32.mrb[50].mxu0  ;;  %v2194_v56 = vpop.f32.mrb[52].mxu1 }
 0x153   : > { %v1923_v57 = vsel %vm1919_vm15, %v1917_v48, %v1921_v51  ;;  %v2058_v58 = vadd.f32 %v2057_v43, %v2008_v55  ;;  %v3138_v59 = vpop.f32.mrb[51].mxu0  ;;  %v3155_v60 = vpop.f32.mrb[53].mxu1 }
 0x154   : > { %2838 = vst.msk [vmem:[%s3691_s11 + $0x28] sm:$0xf] %vm497_vm4, %v2919_v54  ;;  %v2920_v61 = vpack.c.bf16 %v1923_v57, %v1923_v57  ;;  %v2197_v62 = vpop.f32.mrb[54].mxu1 }
 0x155   : > { %v3156_v63 = vpop.f32.mrb[55].mxu1 }
 0x156   : > { %2839 = vst.msk [vmem:[%s3691_s11 + $0x2c] sm:$0xf] %vm497_vm4, %v2920_v61 }
 0x158   : > { %v2117_v0 = vpop.f32.mrb[52].mxu0 }
 0x159   : > { %v2124_v2 = vadd.f32 %v2117_v0, %v2055_v52  ;;  %v3149_v3 = vpop.f32.mrb[53].mxu0 }
 0x15a   : > { %v2120_v4 = vpop.f32.mrb[54].mxu0  ;;  %v2341_v5 = vpop.f32.mrb[56].mxu1 }
 0x15b   : > { %v2201_v6 = vadd.f32 %v2194_v56, %v2124_v2  ;;  %v2125_v1 = vadd.f32 %v2120_v4, %v2058_v58  ;;  %v3150_v7 = vpop.f32.mrb[55].mxu0  ;;  %v3167_v8 = vpop.f32.mrb[57].mxu1 }
 0x15c   : > { %v2344_v9 = vpop.f32.mrb[58].mxu1 }
 0x15d   : > { %v2203_v10 = vadd.f32 %v3684_v12, %v2201_v6  ;;  %v2202_v11 = vadd.f32 %v2197_v62, %v2125_v1  ;;  %v3168_v13 = vpop.f32.mrb[59].mxu1 }
 0x15f   : > { %vm2205_vm0 = vcmp.gt.f32.partialorder %v2203_v10, 0.0  ;;  %v2207_v14 = vmul.f32 0.2, %v2203_v10  ;;  %v2204_v15 = vadd.f32 %v3684_v12, %v2202_v11 }
 0x160   : > { %v2292_v16 = vpop.f32.mrb[56].mxu0 }
 0x161   : > { %v2209_v17 = vsel %vm2205_vm0, %v2203_v10, %v2207_v14  ;;  %vm2206_vm1 = vcmp.gt.f32.partialorder %v2204_v15, 0.0  ;;  %v2208_v18 = vmul.f32 0.2, %v2204_v15  ;;  %v2342_v19 = vadd.f32 %v2341_v5, %v2292_v16  ;;  %v3161_v20 = vpop.f32.mrb[57].mxu0 }
 0x162   : > { %v2921_v21 = vpack.c.bf16 %v2209_v17, %v2209_v17  ;;  %v2295_v22 = vpop.f32.mrb[58].mxu0  ;;  %v2481_v23 = vpop.f32.mrb[60].mxu1 }
 0x163   : > { %v2210_v24 = vsel %vm2206_vm1, %v2204_v15, %v2208_v18  ;;  %v2345_v25 = vadd.f32 %v2344_v9, %v2295_v22  ;;  %v3162_v26 = vpop.f32.mrb[59].mxu0  ;;  %v3179_v27 = vpop.f32.mrb[61].mxu1 }
 0x164   : > { %2871 = vst.msk [vmem:[%s3691_s11 + $0x30] sm:$0xf] %vm497_vm4, %v2921_v21  ;;  %v2922_v28 = vpack.c.bf16 %v2210_v24, %v2210_v24  ;;  %v2484_v29 = vpop.f32.mrb[62].mxu1 }
 0x165   : > { %v3180_v30 = vpop.f32.mrb[63].mxu1 }
 0x166   : > { %2872 = vst.msk [vmem:[%s3691_s11 + $0x34] sm:$0xf] %vm497_vm4, %v2922_v28 }
 0x168   : > { %v2404_v31 = vpop.f32.mrb[60].mxu0 }
 0x169   : > { %v2411_v32 = vadd.f32 %v2404_v31, %v2342_v19  ;;  %v3173_v33 = vpop.f32.mrb[61].mxu0 }
 0x16a   : > { %v2407_v34 = vpop.f32.mrb[62].mxu0 }
 0x16b   : > { %v2488_v35 = vadd.f32 %v2481_v23, %v2411_v32  ;;  %v2412_v36 = vadd.f32 %v2407_v34, %v2345_v25  ;;  %v3174_v37 = vpop.f32.mrb[63].mxu0 }
 0x16d   : > { %v2490_v38 = vadd.f32 %v3684_v12, %v2488_v35  ;;  %v2489_v39 = vadd.f32 %v2484_v29, %v2412_v36 }
 0x16f   : > { %vm2492_vm2 = vcmp.gt.f32.partialorder %v2490_v38, 0.0  ;;  %v2494_v40 = vmul.f32 0.2, %v2490_v38  ;;  %v2491_v41 = vadd.f32 %v3684_v12, %v2489_v39 }
 0x171   : > { %v2496_v42 = vsel %vm2492_vm2, %v2490_v38, %v2494_v40  ;;  %vm2493_vm3 = vcmp.gt.f32.partialorder %v2491_v41, 0.0  ;;  %v2495_v43 = vmul.f32 0.2, %v2491_v41 }
 0x172   : > { %v2923_v44 = vpack.c.bf16 %v2496_v42, %v2496_v42 }
 0x173   : > { %v2497_v45 = vsel %vm2493_vm3, %v2491_v41, %v2495_v43 }
 0x174   : > { %2904 = vst.msk [vmem:[%s3691_s11 + $0x38] sm:$0xf] %vm497_vm4, %v2923_v44  ;;  %v2924_v46 = vpack.c.bf16 %v2497_v45, %v2497_v45 }
 0x176   : > { %2905 = vst.msk [vmem:[%s3691_s11 + $0x3c] sm:$0xf] %vm497_vm4, %v2924_v46 }
 0x177 PF: > { %s13_s16 = sadd.s32 1, %s3334_s16   ;;  %s3758_s12 = smov %s3326_s14 }
 0x178   : > { %p10_p7 = scmp.ge.s32.totalorder %s13_s16, 6   ;;  %s3759_s13 = smov %s3330_s15 }
 0x179   : > { %s3760_s14 = smov %s3763_s17  ;;  %s3761_s15 = smov %s3767_s18 }
 0x17a   :  { %12 = sbr.rel (!%p10_p7) target bundleno = 3 (0x3), region = 81 }

// kernel: domain_classifier_forward.6
= control target key start
LH: loop header
LB: loop body
LE: loop exit
PB: predicated region body
PF: predicated region fallthrough
CT: control target
= control target key end

     0   :  { %s3319_s12 = smov 0   ;;  %s3321_s13 = smov 0   ;;  %s3773_s0 = inlined_call_operand.vmem [shape: bf16[2,9,9,32], index: 0, kind: input, shape index: {}]   ;;  %s3774_s1 = inlined_call_operand.vmem [shape: bf16[4,32,16], index: 1, kind: input, shape index: {}]   ;;  %s3775_s2 = inlined_call_operand.vmem [shape: f32[1,1,16], index: 2, kind: input, shape index: {}]   ;;  %s3776_s3 = inlined_call_operand.vmem [shape: bf16[2,8,8,16], index: 3, kind: output, shape index: {}]  }
   0x1   :  { %s3323_s14 = smov 0  }
   0x2 LB: > { %s25_s15 = sadd.s32 1, %s3291_s13  ;;  %p2553_p0 = scmp.ge.s32.totalorder %s3295_s14, 1  ;;  %s3295_s14 = sphi %s3323_s14, %s13_s14   ;;  %s3291_s13 = sphi %s3321_s13, %s3778_s13   ;;  %s3287_s12 = sphi %s3319_s12, %s3777_s12  }
   0x3   : > { %p27_p1 = scmp.ge.s32.totalorder %s25_s15, 2  ;;  %p151_p2 = scmp.lt.s32.totalorder %s3295_s14, 3 }
   0x5   : > { %s3780_s15 = smov (%p27_p1, %s25_s15), 0  ;;  %p152_p3 = pnand %p2553_p0, %p151_p2 }
   0x6   : > { %v3193_v0 = vld [vmem:[%s3774_s1 + $0x10] sm:$0xff] (!%p152_p3)   ;;  %v3297_v1 = vmov (!%p152_p3), 0.0   ;;  %v3194_v2 = vld [vmem:[%s3774_s1] sm:$0xff] (!%p152_p3)   ;;  %v3195_v3 = vld [vmem:[%s3774_s1 + $0x18] sm:$0xff] (!%p152_p3)   ;;  %vm3298_vm0 = vmmov (!%p152_p3), 0   ;;  %p179_p4 = scmp.lt.s32.totalorder (!%p152_p3), %s3287_s12, 1 }
   0x7   : > { %155 = sbr.rel (%p152_p3) target bundleno = 371 (0x173), region = 32  ;;  %2910 = vmatprep.subr.bf16.mxu0 (!%p152_p3), %v3297_v1  ;;  %2918 = vmatprep.subr.bf16.mxu1 (!%p152_p3), %v3297_v1  ;;  %v3196_v4 = vld [vmem:[%s3774_s1 + $0x8] sm:$0xff] (!%p152_p3)   ;;  %vm235_vm1 = vcmask (!%p152_p3), 261120   ;;  %v3199_v5 = vld [vmem:[%s3774_s1 + $0x30] sm:$0xff] (!%p152_p3)   ;;  %v3201_v10 = vld [vmem:[%s3774_s1 + $0x38] sm:$0xff] (!%p152_p3)   ;;  %vm486_vm3 = vcmask (!%p152_p3), 125952  }
   0x8   : > { %2911 = vmatpush3.bf16.msra.mxu0 (!%p152_p3), %v3193_v0  ;;  %2922 = vmatprep.mubr.msk.bf16.mxu1 (!%p152_p3), %vm3298_vm0, %v3297_v1  ;;  %v3198_v16 = vld [vmem:[%s3774_s1 + $0x20] sm:$0xff] (!%p152_p3)   ;;  %v3200_v23 = vld [vmem:[%s3774_s1 + $0x28] sm:$0xff] (!%p152_p3)   ;;  %v3203_v28 = vld [vmem:[%s3774_s1 + $0x10] sm:$0xff] (!%p152_p3)  }
   0x9   : > { %2919 = vmatpush3.bf16.msra.mxu1 (!%p152_p3), %v3194_v2  ;;  %2912 = vmatprep.subr.bf16.mxu0 (!%p152_p3), %v3297_v1  ;;  %v3204_v18 = vld [vmem:[%s3774_s1] sm:$0xff] (!%p152_p3)   ;;  %v3206_v25 = vld [vmem:[%s3774_s1 + $0x8] sm:$0xff] (!%p152_p3)   ;;  %v3209_v31 = vld [vmem:[%s3774_s1 + $0x30] sm:$0xff] (!%p152_p3)  }
   0xa   : > { %2920 = vmatprep.subr.bf16.mxu1 (!%p152_p3), %v3297_v1  ;;  %2914 = vmatprep.mubr.msk.bf16.mxu0 (!%p152_p3), %vm3298_vm0, %v3297_v1  ;;  %v3205_v34 = vld [vmem:[%s3774_s1 + $0x18] sm:$0xff] (!%p152_p3)   ;;  %v3208_v39 = vld [vmem:[%s3774_s1 + $0x20] sm:$0xff] (!%p152_p3)   ;;  %v3210_v45 = vld [vmem:[%s3774_s1 + $0x28] sm:$0xff] (!%p152_p3)  }
   0xb   : > { %v3211_v35 = vld [vmem:[%s3774_s1 + $0x38] sm:$0xff] (!%p152_p3)   ;;  %v3214_v43 = vld [vmem:[%s3774_s1] sm:$0xff] (!%p152_p3)   ;;  %v3216_v47 = vld [vmem:[%s3774_s1 + $0x8] sm:$0xff] (!%p152_p3)  }
   0xc   : > { %2913 = vmatpush3.bf16.msra.mxu0 (!%p152_p3), %v3195_v3  ;;  %v3213_v49 = vld [vmem:[%s3774_s1 + $0x10] sm:$0xff] (!%p152_p3)   ;;  %v3215_v53 = vld [vmem:[%s3774_s1 + $0x18] sm:$0xff] (!%p152_p3)   ;;  %v3218_v58 = vld [vmem:[%s3774_s1 + $0x20] sm:$0xff] (!%p152_p3)  }
   0xd   : > { %2921 = vmatpush3.bf16.msra.mxu1 (!%p152_p3), %v3196_v4  ;;  %2926 = vmatprep.subr.bf16.mxu0 (!%p152_p3), %v3297_v1  ;;  %v3219_v51 = vld [vmem:[%s3774_s1 + $0x30] sm:$0xff] (!%p152_p3)   ;;  %v3221_v59 = vld [vmem:[%s3774_s1 + $0x38] sm:$0xff] (!%p152_p3)   ;;  %v3224_v0 = vld [vmem:[%s3774_s1] sm:$0xff] (!%p152_p3)  }
   0xe   : > { %s3782_s12 = smov (!%p179_p4, %s3287_s12), 1  ;;  %2934 = vmatprep.subr.bf16.mxu1 %v3297_v1  ;;  %v3220_v2 = vld [vmem:[%s3774_s1 + $0x28] sm:$0xff]  }
   0xf   : > { %s3166_s24 = smul.u32 72, %s3782_s12  ;;  %v3226_v4 = vld [vmem:[%s3774_s1 + $0x8] sm:$0xff]   ;;  %s2813_s16 = sshll.u32 %s3782_s12, 5 }
  0x10   : > { %s3739_s19 = scalar_lea.vmem %s3776_s3, %s2813_s16 }
  0x11   : > { %s3367_s29 = scalar_lea.vmem %s3773_s0, %s3166_s24 }
  0x12   : > { %v200_v6 = vld [vmem:[%s3367_s29] sm:$0xf]  ;;  %v205_v7 = vld [vmem:[%s3367_s29 + $0x4] sm:$0x1]  ;;  %v3202_v9 = vld [vmem:[%s3367_s29 + $0x8] sm:$0x1f]  }
  0x13   : > { %v2561_v8 = vcombine.low %v200_v6, %v205_v7  ;;  %2923 = vmatmul.mubr.msk.bf16.vlgmr.msra.gmra.mrb[0].mxu1 %vm235_vm1, %v200_v6  ;;  %v413_v13 = vshrl.u32 %v3202_v9, 16  ;;  %v415_v14 = vshll.u32 %v3202_v9, 16  ;;  %v2587_v19 = vld [vmem:[%s3367_s29 + $0x8] sm:$0xf]  ;;  %v2588_v20 = vld [vmem:[%s3367_s29 + $0xc] sm:$0x1] }
  0x14   : > { %2935 = vmatpush3.bf16.msra.mxu1 %v3199_v5  ;;  %2938 = vmatprep.mubr.msk.bf16.mxu1 %vm3298_vm0, %v3297_v1  ;;  %v2593_v24 = vcombine.low %v2587_v19, %v2588_v20  ;;  %v3212_v26 = vld [vmem:[%s3367_s29 + $0x10] sm:$0x1f]   ;;  %v2568_v27 = vld [vmem:[%s3367_s29 + $0x8] sm:$0xf]  ;;  %v3222_v46 = vld [vmem:[%s3367_s29 + $0x18] sm:$0x1f]  }
  0x15   : > { %v217_v11 = vshrl.u32 %v2561_v8, 16  ;;  %v219_v12 = vshll.u32 %v2561_v8, 16  ;;  %2936 = vmatprep.subr.bf16.mxu1 %v3297_v1  ;;  %v417_v17 = vrot.slane %v415_v14, 1  ;;  %v699_v30 = vshll.u32 %v3212_v26, 16  ;;  %v2619_v40 = vld [vmem:[%s3367_s29 + $0x10] sm:$0xf] }
  0x16   : > { %v506_v29 = vshll.u32 %v2593_v24, 16  ;;  %v504_v32 = vshrl.u32 %v2593_v24, 16  ;;  %v697_v36 = vshrl.u32 %v3212_v26, 16  ;;  %v2620_v41 = vld [vmem:[%s3367_s29 + $0x14] sm:$0x1]  ;;  %v977_v52 = vshll.u32 %v3222_v46, 16 }
  0x17   : > { %v221_v15 = vrot.slane %v219_v12, 1  ;;  %v418_v22 = vor.u32 %v417_v17, %v413_v13  ;;  %v701_v37 = vrot.slane %v699_v30, 1  ;;  %v2625_v44 = vcombine.low %v2619_v40, %v2620_v41  ;;  %v2600_v48 = vld [vmem:[%s3367_s29 + $0x10] sm:$0xf]  ;;  %v2651_v61 = vld [vmem:[%s3367_s29 + $0x18] sm:$0xf] }
  0x18   : > { %2937 = vmatpush3.bf16.msra.mxu1 %v3201_v10  ;;  %v508_v33 = vrot.slane %v506_v29, 1  ;;  %v975_v56 = vshrl.u32 %v3222_v46, 16  ;;  %v979_v57 = vrot.slane %v977_v52, 1  ;;  %v2652_v62 = vld [vmem:[%s3367_s29 + $0x1c] sm:$0x1]  ;;  %v3223_v8 = vld [vmem:[%s3774_s1 + $0x10] sm:$0xff]  }
  0x19   : > { %v222_v21 = vor.u32 %v221_v15, %v217_v11  ;;  %2950 = vmatprep.subr.bf16.mxu1 %v3297_v1  ;;  %v702_v42 = vor.u32 %v701_v37, %v697_v36  ;;  %v784_v50 = vshll.u32 %v2625_v44, 16  ;;  %v782_v54 = vshrl.u32 %v2625_v44, 16  ;;  %v3232_v5 = vld [vmem:[%s3367_s29 + $0x20] sm:$0x1f]   ;;  %v2632_v6 = vld [vmem:[%s3367_s29 + $0x18] sm:$0xf] }
  0x1a   : > { %v509_v38 = vor.u32 %v508_v33, %v504_v32  ;;  %v980_v63 = vor.u32 %v979_v57, %v975_v56  ;;  %v2657_v3 = vcombine.low %v2651_v61, %v2652_v62  ;;  %v1255_v9 = vshll.u32 %v3232_v5, 16  ;;  %v3229_v10 = vld [vmem:[%s3774_s1 + $0x30] sm:$0xff]   ;;  %v3225_v11 = vld [vmem:[%s3774_s1 + $0x18] sm:$0xff]   ;;  %v3228_v17 = vld [vmem:[%s3774_s1 + $0x20] sm:$0xff]  }
  0x1b   : > { %2915 = vmatmul.mubr.msk.bf16.vlgmr.msra.gmra.mrb[0].mxu0 %vm235_vm1, %v222_v21  ;;  %2939 = vmatmul.mubr.msk.bf16.vlgmr.msra.gmra.mrb[4].mxu1 %vm235_vm1, %v418_v22  ;;  %v786_v55 = vrot.slane %v784_v50, 1  ;;  %v3231_v14 = vld [vmem:[%s3774_s1 + $0x38] sm:$0xff]   ;;  %v1253_v15 = vshrl.u32 %v3232_v5, 16  ;;  %v2684_v20 = vld [vmem:[%s3367_s29 + $0x24] sm:$0x1]  ;;  %v3230_v24 = vld [vmem:[%s3774_s1 + $0x28] sm:$0xff]  }
  0x1c   : > { %2927 = vmatpush3.bf16.msra.mxu0 %v3198_v16  ;;  %2930 = vmatprep.mubr.msk.bf16.mxu0 %vm3298_vm0, %v3297_v1  ;;  %v1062_v7 = vshll.u32 %v2657_v3, 16  ;;  %v1060_v12 = vshrl.u32 %v2657_v3, 16  ;;  %v1257_v16 = vrot.slane %v1255_v9, 1  ;;  %v3234_v22 = vld [vmem:[%s3774_s1] sm:$0xff]   ;;  %v3242_v26 = vld [vmem:[%s3367_s29 + $0x28] sm:$0x1f]  }
  0x1d   : > { %2928 = vmatprep.subr.bf16.mxu0 %v3297_v1  ;;  %2951 = vmatpush3.bf16.msra.mxu1 %v3204_v18  ;;  %v787_v60 = vor.u32 %v786_v55, %v782_v54  ;;  %v3239_v30 = vld [vmem:[%s3774_s1 + $0x30] sm:$0xff]   ;;  %v3238_v37 = vld [vmem:[%s3774_s1 + $0x20] sm:$0xff]   ;;  %v2716_v41 = vld [vmem:[%s3367_s29 + $0x2c] sm:$0x1] }
  0x1e   : > { %2952 = vmatprep.subr.bf16.mxu1 %v3297_v1  ;;  %2954 = vmatprep.mubr.msk.bf16.mxu1 %vm3298_vm0, %v3297_v1  ;;  %v1064_v13 = vrot.slane %v1062_v7, 1  ;;  %v1258_v21 = vor.u32 %v1257_v16, %v1253_v15  ;;  %v3252_v46 = vld [vmem:[%s3367_s29 + $0x30] sm:$0x1f]   ;;  %v3245_v55 = vld [vmem:[%s3774_s1 + $0x18] sm:$0xff]   ;;  %v3250_v3 = vld [vmem:[%s3774_s1 + $0x28] sm:$0xff]  }
  0x1f   : > { %v3243_v50 = vld [vmem:[%s3774_s1 + $0x10] sm:$0xff]   ;;  %v1809_v56 = vshrl.u32 %v3252_v46, 16  ;;  %v3256_v5 = vld [vmem:[%s3774_s1 + $0x8] sm:$0xff]   ;;  %v3261_v16 = vld [vmem:[%s3774_s1 + $0x38] sm:$0xff]  }
  0x20   : > { %2929 = vmatpush3.bf16.msra.mxu0 %v3200_v23  ;;  %v1065_v18 = vor.u32 %v1064_v13, %v1060_v12  ;;  %v3249_v52 = vld [vmem:[%s3774_s1 + $0x30] sm:$0xff]   ;;  %v3255_v13 = vld [vmem:[%s3774_s1 + $0x18] sm:$0xff]  }
  0x21   : > { %2942 = vmatprep.subr.bf16.mxu0 %v3297_v1  ;;  %2953 = vmatpush3.bf16.msra.mxu1 %v3206_v25  ;;  %v3236_v25 = vld [vmem:[%s3774_s1 + $0x8] sm:$0xff]   ;;  %v2748_v62 = vld [vmem:[%s3367_s29 + $0x34] sm:$0x1]  ;;  %v2728_v7 = vld [vmem:[%s3367_s29 + $0x30] sm:$0xf] }
  0x22   : > { %2966 = vmatprep.subr.bf16.mxu1 %v3297_v1 }
  0x23   : > { %2931 = vmatmul.mubr.msk.bf16.vlgmr.msra.gmra.mrb[4].mxu0 %vm235_vm1, %v2568_v27  ;;  %v2664_v27 = vld [vmem:[%s3367_s29 + $0x20] sm:$0xf] }
  0x24   : > { %2943 = vmatpush3.bf16.msra.mxu0 %v3203_v28  ;;  %2946 = vmatprep.mubr.msk.bf16.mxu0 %vm3298_vm0, %v3297_v1  ;;  %v3233_v28 = vld [vmem:[%s3774_s1 + $0x10] sm:$0xff]  }
  0x25   : > { %2944 = vmatprep.subr.bf16.mxu0 %v3297_v1  ;;  %2955 = vmatmul.mubr.msk.bf16.vlgmr.msra.gmra.mrb[8].mxu1 %vm235_vm1, %v2587_v19  ;;  %v2683_v19 = vld [vmem:[%s3367_s29 + $0x20] sm:$0xf] }
  0x26   : > { %2967 = vmatpush3.bf16.msra.mxu1 %v3209_v31  ;;  %2970 = vmatprep.mubr.msk.bf16.mxu1 %vm3298_vm0, %v3297_v1  ;;  %v2689_v23 = vcombine.low %v2683_v19, %v2684_v20  ;;  %v1533_v31 = vshll.u32 %v3242_v26, 16  ;;  %v2780_v20 = vld [vmem:[%s3367_s29 + $0x3c] sm:$0x1] }
  0x27   : > { %2968 = vmatprep.subr.bf16.mxu1 %v3297_v1 }
  0x28   : > { %2945 = vmatpush3.bf16.msra.mxu0 %v3205_v34  ;;  %v1340_v29 = vshll.u32 %v2689_v23, 16  ;;  %v1338_v32 = vshrl.u32 %v2689_v23, 16  ;;  %v3235_v34 = vld [vmem:[%s3774_s1 + $0x18] sm:$0xff]   ;;  %v1535_v36 = vrot.slane %v1533_v31, 1  ;;  %v3269_v31 = vld [vmem:[%s3774_s1 + $0x30] sm:$0xff]  }
  0x29   : > { %2958 = vmatprep.subr.bf16.mxu0 %v3297_v1 }
  0x2a   : > { %2969 = vmatpush3.bf16.msra.mxu1 %v3211_v35  ;;  %v1342_v33 = vrot.slane %v1340_v29, 1  ;;  %v1531_v35 = vshrl.u32 %v3242_v26, 16  ;;  %v3266_v26 = vld [vmem:[%s3774_s1 + $0x8] sm:$0xff]   ;;  %v3263_v29 = vld [vmem:[%s3774_s1 + $0x10] sm:$0xff]  }
  0x2b   : > { %2947 = vmatmul.mubr.msk.bf16.vlgmr.msra.gmra.mrb[8].mxu0 %vm235_vm1, %v509_v38  ;;  %2982 = vmatprep.subr.bf16.mxu1 %v3297_v1  ;;  %v3241_v38 = vld [vmem:[%s3774_s1 + $0x38] sm:$0xff]  }
  0x2c   : > { %2959 = vmatpush3.bf16.msra.mxu0 %v3208_v39  ;;  %2962 = vmatprep.mubr.msk.bf16.mxu0 %vm3298_vm0, %v3297_v1  ;;  %v1343_v39 = vor.u32 %v1342_v33, %v1338_v32 }
  0x2d   : > { %2960 = vmatprep.subr.bf16.mxu0 %v3297_v1  ;;  %2971 = vmatmul.mubr.msk.bf16.vlgmr.msra.gmra.mrb[12].mxu1 %vm235_vm1, %v702_v42  ;;  %v1536_v42 = vor.u32 %v1535_v36, %v1531_v35 }
  0x2e   : > { %2983 = vmatpush3.bf16.msra.mxu1 %v3214_v43  ;;  %2986 = vmatprep.mubr.msk.bf16.mxu1 %vm3298_vm0, %v3297_v1  ;;  %v3244_v43 = vld [vmem:[%s3774_s1] sm:$0xff]  }
  0x2f   : > { %2984 = vmatprep.subr.bf16.mxu1 %v3297_v1 }
  0x30   : > { %2961 = vmatpush3.bf16.msra.mxu0 %v3210_v45  ;;  %v3240_v45 = vld [vmem:[%s3774_s1 + $0x28] sm:$0xff]  }
  0x31   : > { %2974 = vmatprep.subr.bf16.mxu0 %v3297_v1 }
  0x32   : > { %2985 = vmatpush3.bf16.msra.mxu1 %v3216_v47  ;;  %v3246_v47 = vld [vmem:[%s3774_s1 + $0x8] sm:$0xff]  }
  0x33   : > { %2963 = vmatmul.mubr.msk.bf16.vlgmr.msra.gmra.mrb[12].mxu0 %vm235_vm1, %v2600_v48  ;;  %2998 = vmatprep.subr.bf16.mxu1 %v3297_v1 }
  0x34   : > { %2975 = vmatpush3.bf16.msra.mxu0 %v3213_v49  ;;  %2978 = vmatprep.mubr.msk.bf16.mxu0 %vm3298_vm0, %v3297_v1  ;;  %v2696_v49 = vld [vmem:[%s3367_s29 + $0x28] sm:$0xf] }
  0x35   : > { %2976 = vmatprep.subr.bf16.mxu0 %v3297_v1  ;;  %2987 = vmatmul.mubr.msk.bf16.vlgmr.msra.gmra.mrb[16].mxu1 %vm235_vm1, %v2619_v40  ;;  %v2715_v40 = vld [vmem:[%s3367_s29 + $0x28] sm:$0xf] }
  0x36   : > { %2999 = vmatpush3.bf16.msra.mxu1 %v3219_v51  ;;  %3002 = vmatprep.mubr.msk.bf16.mxu1 %vm3298_vm0, %v3297_v1  ;;  %v2721_v44 = vcombine.low %v2715_v40, %v2716_v41  ;;  %v1811_v51 = vshll.u32 %v3252_v46, 16  ;;  %v3270_v41 = vld [vmem:[%s3774_s1 + $0x28] sm:$0xff]  }
  0x37   : > { %3000 = vmatprep.subr.bf16.mxu1 %v3297_v1 }
  0x38   : > { %2977 = vmatpush3.bf16.msra.mxu0 %v3215_v53  ;;  %v1618_v48 = vshll.u32 %v2721_v44, 16  ;;  %v1616_v53 = vshrl.u32 %v2721_v44, 16  ;;  %v1813_v57 = vrot.slane %v1811_v51, 1 }
  0x39   : > { %2990 = vmatprep.subr.bf16.mxu0 %v3297_v1 }
  0x3a   : > { %3001 = vmatpush3.bf16.msra.mxu1 %v3221_v59  ;;  %v1620_v54 = vrot.slane %v1618_v48, 1 }
  0x3b   : > { %2979 = vmatmul.mubr.msk.bf16.vlgmr.msra.gmra.mrb[16].mxu0 %vm235_vm1, %v787_v60  ;;  %3014 = vmatprep.subr.bf16.mxu1 %v3297_v1  ;;  %v3248_v60 = vld [vmem:[%s3774_s1 + $0x20] sm:$0xff]  }
  0x3c   : > { %2991 = vmatpush3.bf16.msra.mxu0 %v3218_v58  ;;  %2994 = vmatprep.mubr.msk.bf16.mxu0 %vm3298_vm0, %v3297_v1  ;;  %v3251_v58 = vld [vmem:[%s3774_s1 + $0x38] sm:$0xff]   ;;  %v1621_v59 = vor.u32 %v1620_v54, %v1616_v53 }
  0x3d   : > { %2992 = vmatprep.subr.bf16.mxu0 %v3297_v1  ;;  %3003 = vmatmul.mubr.msk.bf16.vlgmr.msra.gmra.mrb[20].mxu1 %vm235_vm1, %v980_v63  ;;  %v1814_v63 = vor.u32 %v1813_v57, %v1809_v56 }
  0x3e   : > { %3015 = vmatpush3.bf16.msra.mxu1 %v3224_v0  ;;  %3018 = vmatprep.mubr.msk.bf16.mxu1 %vm3298_vm0, %v3297_v1  ;;  %v3254_v0 = vld [vmem:[%s3774_s1] sm:$0xff]  }
  0x3f   : > { %3016 = vmatprep.subr.bf16.mxu1 %v3297_v1 }
  0x40   : > { %2993 = vmatpush3.bf16.msra.mxu0 %v3220_v2 }
  0x41   : > { %3006 = vmatprep.subr.bf16.mxu0 %v3297_v1 }
  0x42   : > { %3017 = vmatpush3.bf16.msra.mxu1 %v3226_v4  ;;  %v3262_v4 = vld [vmem:[%s3367_s29 + $0x38] sm:$0x1f]  }
  0x43   : > { %2995 = vmatmul.mubr.msk.bf16.vlgmr.msra.gmra.mrb[20].mxu0 %vm235_vm1, %v2632_v6  ;;  %3030 = vmatprep.subr.bf16.mxu1 %v3297_v1  ;;  %v2089_v9 = vshll.u32 %v3262_v4, 16 }
  0x44   : > { %3007 = vmatpush3.bf16.msra.mxu0 %v3223_v8  ;;  %3010 = vmatprep.mubr.msk.bf16.mxu0 %vm3298_vm0, %v3297_v1  ;;  %v3253_v8 = vld [vmem:[%s3774_s1 + $0x10] sm:$0xff]  }
  0x45   : > { %3008 = vmatprep.subr.bf16.mxu0 %v3297_v1  ;;  %3019 = vmatmul.mubr.msk.bf16.vlgmr.msra.gmra.mrb[24].mxu1 %vm235_vm1, %v2651_v61  ;;  %v2747_v61 = vld [vmem:[%s3367_s29 + $0x30] sm:$0xf]  ;;  %v2091_v15 = vrot.slane %v2089_v9, 1 }
  0x46   : > { %3031 = vmatpush3.bf16.msra.mxu1 %v3229_v10  ;;  %3034 = vmatprep.mubr.msk.bf16.mxu1 %vm3298_vm0, %v3297_v1  ;;  %v2753_v2 = vcombine.low %v2747_v61, %v2748_v62  ;;  %v3259_v10 = vld [vmem:[%s3774_s1 + $0x30] sm:$0xff]  }
  0x47   : > { %3032 = vmatprep.subr.bf16.mxu1 %v3297_v1 }
  0x48   : > { %3009 = vmatpush3.bf16.msra.mxu0 %v3225_v11  ;;  %v1896_v6 = vshll.u32 %v2753_v2, 16  ;;  %v1894_v11 = vshrl.u32 %v2753_v2, 16 }
  0x49   : > { %3022 = vmatprep.subr.bf16.mxu0 %v3297_v1 }
  0x4a   : > { %3033 = vmatpush3.bf16.msra.mxu1 %v3231_v14  ;;  %v1898_v12 = vrot.slane %v1896_v6, 1  ;;  %v2087_v14 = vshrl.u32 %v3262_v4, 16 }
  0x4b   : > { %3011 = vmatmul.mubr.msk.bf16.vlgmr.msra.gmra.mrb[24].mxu0 %vm235_vm1, %v1065_v18  ;;  %3046 = vmatprep.subr.bf16.mxu1 %v3297_v1  ;;  %v3258_v18 = vld [vmem:[%s3774_s1 + $0x20] sm:$0xff]  }
  0x4c   : > { %3023 = vmatpush3.bf16.msra.mxu0 %v3228_v17  ;;  %3026 = vmatprep.mubr.msk.bf16.mxu0 %vm3298_vm0, %v3297_v1  ;;  %v1899_v17 = vor.u32 %v1898_v12, %v1894_v11 }
  0x4d   : > { %3024 = vmatprep.subr.bf16.mxu0 %v3297_v1  ;;  %3035 = vmatmul.mubr.msk.bf16.vlgmr.msra.gmra.mrb[28].mxu1 %vm235_vm1, %v1258_v21  ;;  %v2092_v21 = vor.u32 %v2091_v15, %v2087_v14 }
  0x4e   : > { %3047 = vmatpush3.bf16.msra.mxu1 %v3234_v22  ;;  %3050 = vmatprep.mubr.msk.bf16.mxu1 %vm3298_vm0, %v3297_v1  ;;  %v3264_v22 = vld [vmem:[%s3774_s1] sm:$0xff]  }
  0x4f   : > { %3048 = vmatprep.subr.bf16.mxu1 %v3297_v1 }
  0x50   : > { %3025 = vmatpush3.bf16.msra.mxu0 %v3230_v24  ;;  %v3260_v24 = vld [vmem:[%s3774_s1 + $0x28] sm:$0xff]  }
  0x51   : > { %3038 = vmatprep.subr.bf16.mxu0 %v3297_v1 }
  0x52   : > { %3049 = vmatpush3.bf16.msra.mxu1 %v3236_v25  ;;  %v3272_v25 = vld [vmem:[%s3367_s29 + $0x40] sm:$0x1f]  }
  0x53   : > { %3027 = vmatmul.mubr.msk.bf16.vlgmr.msra.gmra.mrb[28].mxu0 %vm235_vm1, %v2664_v27  ;;  %3062 = vmatprep.subr.bf16.mxu1 %v3297_v1  ;;  %v2365_v35 = vshrl.u32 %v3272_v25, 16 }
  0x54   : > { %3039 = vmatpush3.bf16.msra.mxu0 %v3233_v28  ;;  %3042 = vmatprep.mubr.msk.bf16.mxu0 %vm3298_vm0, %v3297_v1  ;;  %v2760_v28 = vld [vmem:[%s3367_s29 + $0x38] sm:$0xf] }
  0x55   : > { %3040 = vmatprep.subr.bf16.mxu0 %v3297_v1  ;;  %3051 = vmatmul.mubr.msk.bf16.vlgmr.msra.gmra.mrb[32].mxu1 %vm235_vm1, %v2683_v19  ;;  %v2779_v19 = vld [vmem:[%s3367_s29 + $0x38] sm:$0xf] }
  0x56   : > { %3063 = vmatpush3.bf16.msra.mxu1 %v3239_v30  ;;  %3066 = vmatprep.mubr.msk.bf16.mxu1 %vm3298_vm0, %v3297_v1  ;;  %v2785_v23 = vcombine.low %v2779_v19, %v2780_v20  ;;  %v2367_v30 = vshll.u32 %v3272_v25, 16 }
  0x57   : > { %3064 = vmatprep.subr.bf16.mxu1 %v3297_v1 }
  0x58   : > { %3041 = vmatpush3.bf16.msra.mxu0 %v3235_v34  ;;  %v2174_v27 = vshll.u32 %v2785_v23, 16  ;;  %v2172_v32 = vshrl.u32 %v2785_v23, 16  ;;  %v3265_v34 = vld [vmem:[%s3774_s1 + $0x18] sm:$0xff]   ;;  %v2369_v36 = vrot.slane %v2367_v30, 1 }
  0x59   : > { %3054 = vmatprep.subr.bf16.mxu0 %v3297_v1 }
  0x5a   : > { %3065 = vmatpush3.bf16.msra.mxu1 %v3241_v38  ;;  %v2176_v33 = vrot.slane %v2174_v27, 1 }
  0x5b   : > { %3043 = vmatmul.mubr.msk.bf16.vlgmr.msra.gmra.mrb[32].mxu0 %vm235_vm1, %v1343_v39  ;;  %3078 = vmatprep.subr.bf16.mxu1 %v3297_v1  ;;  %v3268_v39 = vld [vmem:[%s3774_s1 + $0x20] sm:$0xff]  }
  0x5c   : > { %3055 = vmatpush3.bf16.msra.mxu0 %v3238_v37  ;;  %3058 = vmatprep.mubr.msk.bf16.mxu0 %vm3298_vm0, %v3297_v1  ;;  %v3271_v37 = vld [vmem:[%s3774_s1 + $0x38] sm:$0xff]   ;;  %v2177_v38 = vor.u32 %v2176_v33, %v2172_v32 }
  0x5d   : > { %3056 = vmatprep.subr.bf16.mxu0 %v3297_v1  ;;  %3067 = vmatmul.mubr.msk.bf16.vlgmr.msra.gmra.mrb[36].mxu1 %vm235_vm1, %v1536_v42  ;;  %v2792_v42 = vld [vmem:[%s3367_s29 + $0x40] sm:$0xf] }
  0x5e   : > { %3079 = vmatpush3.bf16.msra.mxu1 %v3244_v43  ;;  %3082 = vmatprep.mubr.msk.bf16.mxu1 %vm3298_vm0, %v3297_v1 }
  0x5f   : > { %3080 = vmatprep.subr.bf16.mxu1 %v3297_v1 }
  0x60   : > { %3057 = vmatpush3.bf16.msra.mxu0 %v3240_v45 }
  0x61   : > { %3070 = vmatprep.subr.bf16.mxu0 %v3297_v1 }
  0x62   : > { %3081 = vmatpush3.bf16.msra.mxu1 %v3246_v47 }
  0x63   : > { %3059 = vmatmul.mubr.msk.bf16.vlgmr.msra.gmra.mrb[36].mxu0 %vm235_vm1, %v2696_v49  ;;  %3094 = vmatprep.subr.bf16.mxu1 %v3297_v1 }
  0x64   : > { %3071 = vmatpush3.bf16.msra.mxu0 %v3243_v50  ;;  %3074 = vmatprep.mubr.msk.bf16.mxu0 %vm3298_vm0, %v3297_v1 }
  0x65   : > { %3072 = vmatprep.subr.bf16.mxu0 %v3297_v1  ;;  %3083 = vmatmul.mubr.msk.bf16.vlgmr.msra.gmra.mrb[40].mxu1 %vm235_vm1, %v2715_v40  ;;  %v2370_v40 = vor.u32 %v2369_v36, %v2365_v35 }
  0x66   : > { %3095 = vmatpush3.bf16.msra.mxu1 %v3249_v52  ;;  %3098 = vmatprep.mubr.msk.bf16.mxu1 %vm3298_vm0, %v3297_v1 }
  0x67   : > { %3096 = vmatprep.subr.bf16.mxu1 %v3297_v1 }
  0x68   : > { %3073 = vmatpush3.bf16.msra.mxu0 %v3245_v55 }
  0x69   : > { %3086 = vmatprep.subr.bf16.mxu0 %v3297_v1 }
  0x6a   : > { %3097 = vmatpush3.bf16.msra.mxu1 %v3251_v58  ;;  %v3732_v58 = vld [vmem:[%s3775_s2] ss:$0 sm:$0xff] }
  0x6b   : > { %3075 = vmatmul.mubr.msk.bf16.vlgmr.msra.gmra.mrb[40].mxu0 %vm235_vm1, %v1621_v59  ;;  %3110 = vmatprep.subr.bf16.mxu1 %v3297_v1 }
  0x6c   : > { %3087 = vmatpush3.bf16.msra.mxu0 %v3248_v60  ;;  %3090 = vmatprep.mubr.msk.bf16.mxu0 %vm3298_vm0, %v3297_v1 }
  0x6d   : > { %3088 = vmatprep.subr.bf16.mxu0 %v3297_v1  ;;  %3099 = vmatmul.mubr.msk.bf16.vlgmr.msra.gmra.mrb[44].mxu1 %vm235_vm1, %v1814_v63 }
  0x6e   : > { %3111 = vmatpush3.bf16.msra.mxu1 %v3254_v0  ;;  %3114 = vmatprep.mubr.msk.bf16.mxu1 %vm3298_vm0, %v3297_v1 }
  0x6f   : > { %3112 = vmatprep.subr.bf16.mxu1 %v3297_v1 }
  0x70   : > { %3089 = vmatpush3.bf16.msra.mxu0 %v3250_v3 }
  0x71   : > { %3102 = vmatprep.subr.bf16.mxu0 %v3297_v1 }
  0x72   : > { %3113 = vmatpush3.bf16.msra.mxu1 %v3256_v5 }
  0x73   : > { %3091 = vmatmul.mubr.msk.bf16.vlgmr.msra.gmra.mrb[44].mxu0 %vm235_vm1, %v2728_v7  ;;  %3126 = vmatprep.subr.bf16.mxu1 %v3297_v1 }
  0x74   : > { %3103 = vmatpush3.bf16.msra.mxu0 %v3253_v8  ;;  %3106 = vmatprep.mubr.msk.bf16.mxu0 %vm3298_vm0, %v3297_v1 }
  0x75   : > { %3104 = vmatprep.subr.bf16.mxu0 %v3297_v1  ;;  %3115 = vmatmul.mubr.msk.bf16.vlgmr.msra.gmra.mrb[48].mxu1 %vm235_vm1, %v2747_v61 }
  0x76   : > { %3127 = vmatpush3.bf16.msra.mxu1 %v3259_v10  ;;  %3130 = vmatprep.mubr.msk.bf16.mxu1 %vm3298_vm0, %v3297_v1 }
  0x77   : > { %3128 = vmatprep.subr.bf16.mxu1 %v3297_v1 }
  0x78   : > { %3105 = vmatpush3.bf16.msra.mxu0 %v3255_v13 }
  0x79   : > { %3118 = vmatprep.subr.bf16.mxu0 %v3297_v1 }
  0x7a   : > { %3129 = vmatpush3.bf16.msra.mxu1 %v3261_v16 }
  0x7b   : > { %3107 = vmatmul.mubr.msk.bf16.vlgmr.msra.gmra.mrb[48].mxu0 %vm235_vm1, %v1899_v17  ;;  %3142 = vmatprep.subr.bf16.mxu1 %v3297_v1 }
  0x7c   : > { %3119 = vmatpush3.bf16.msra.mxu0 %v3258_v18  ;;  %3122 = vmatprep.mubr.msk.bf16.mxu0 %vm3298_vm0, %v3297_v1 }
  0x7d   : > { %3120 = vmatprep.subr.bf16.mxu0 %v3297_v1  ;;  %3131 = vmatmul.mubr.msk.bf16.vlgmr.msra.gmra.mrb[52].mxu1 %vm235_vm1, %v2092_v21 }
  0x7e   : > { %3143 = vmatpush3.bf16.msra.mxu1 %v3264_v22  ;;  %3146 = vmatprep.mubr.msk.bf16.mxu1 %vm3298_vm0, %v3297_v1 }
  0x7f   : > { %3144 = vmatprep.subr.bf16.mxu1 %v3297_v1 }
  0x80   : > { %3121 = vmatpush3.bf16.msra.mxu0 %v3260_v24 }
  0x81   : > { %3134 = vmatprep.subr.bf16.mxu0 %v3297_v1 }
  0x82   : > { %3145 = vmatpush3.bf16.msra.mxu1 %v3266_v26 }
  0x83   : > { %3123 = vmatmul.mubr.msk.bf16.vlgmr.msra.gmra.mrb[52].mxu0 %vm235_vm1, %v2760_v28  ;;  %3158 = vmatprep.subr.bf16.mxu1 %v3297_v1 }
  0x84   : > { %3135 = vmatpush3.bf16.msra.mxu0 %v3263_v29  ;;  %3138 = vmatprep.mubr.msk.bf16.mxu0 %vm3298_vm0, %v3297_v1 }
  0x85   : > { %3136 = vmatprep.subr.bf16.mxu0 %v3297_v1  ;;  %3147 = vmatmul.mubr.msk.bf16.vlgmr.msra.gmra.mrb[56].mxu1 %vm235_vm1, %v2779_v19 }
  0x86   : > { %3159 = vmatpush3.bf16.msra.mxu1 %v3269_v31  ;;  %3162 = vmatprep.mubr.msk.bf16.mxu1 %vm3298_vm0, %v3297_v1 }
  0x87   : > { %3160 = vmatprep.subr.bf16.mxu1 %v3297_v1 }
  0x88   : > { %3137 = vmatpush3.bf16.msra.mxu0 %v3265_v34 }
  0x89   : > { %3150 = vmatprep.subr.bf16.mxu0 %v3297_v1 }
  0x8a   : > { %3161 = vmatpush3.bf16.msra.mxu1 %v3271_v37 }
  0x8b   : > { %3139 = vmatmul.mubr.msk.bf16.vlgmr.msra.gmra.mrb[56].mxu0 %vm235_vm1, %v2177_v38 }
  0x8c   : > { %3151 = vmatpush3.bf16.msra.mxu0 %v3268_v39  ;;  %3154 = vmatprep.mubr.msk.bf16.mxu0 %vm3298_vm0, %v3297_v1 }
  0x8d   : > { %3152 = vmatprep.subr.bf16.mxu0 %v3297_v1  ;;  %3163 = vmatmul.mubr.msk.bf16.vlgmr.msra.gmra.mrb[60].mxu1 %vm235_vm1, %v2370_v40 }
  0x90   : > { %3153 = vmatpush3.bf16.msra.mxu0 %v3270_v41 }
  0x93   : > { %3155 = vmatmul.mubr.msk.bf16.vlgmr.msra.gmra.mrb[60].mxu0 %vm235_vm1, %v2792_v42 }
  0xe6   : > { %v328_v43 = vpop.f32.mrb[0].mxu1 }
  0xe7   : > { %v2924_v44 = vpop.f32.mrb[1].mxu1 }
  0xe8   : > { %v331_v45 = vpop.f32.mrb[2].mxu1 }
  0xe9   : > { %v2925_v46 = vpop.f32.mrb[3].mxu1 }
  0xee   : > { %v273_v47 = vpop.f32.mrb[0].mxu0  ;;  %v468_v48 = vpop.f32.mrb[4].mxu1 }
  0xef   : > { %v329_v49 = vadd.f32 %v328_v43, %v273_v47  ;;  %v2916_v50 = vpop.f32.mrb[1].mxu0  ;;  %v2940_v51 = vpop.f32.mrb[5].mxu1 }
  0xf0   : > { %v276_v52 = vpop.f32.mrb[2].mxu0  ;;  %v471_v53 = vpop.f32.mrb[6].mxu1 }
  0xf1   : > { %v2917_v54 = vpop.f32.mrb[3].mxu0  ;;  %v2941_v1 = vpop.f32.mrb[7].mxu1 }
  0xf6   : > { %v393_v55 = vpop.f32.mrb[4].mxu0 }
  0xf7   : > { %v399_v56 = vadd.f32 %v393_v55, %v329_v49  ;;  %v2932_v57 = vpop.f32.mrb[5].mxu0 }
  0xf8   : > { %v396_v59 = vpop.f32.mrb[6].mxu0  ;;  %v614_v60 = vpop.f32.mrb[8].mxu1 }
  0xf9   : > { %v474_v61 = vadd.f32 %v468_v48, %v399_v56  ;;  %v2933_v62 = vpop.f32.mrb[7].mxu0  ;;  %v2956_v63 = vpop.f32.mrb[9].mxu1 }
  0xfa   : > { %v617_v0 = vpop.f32.mrb[10].mxu1 }
  0xfb   : > { %v481_v2 = vadd.f32 %v3732_v58, %v474_v61  ;;  %v2957_v3 = vpop.f32.mrb[11].mxu1 }
  0xfd   : > { %vm482_vm2 = vcmp.gt.f32.partialorder %v481_v2, 0.0  ;;  %v483_v4 = vmul.f32 0.2, %v481_v2 }
  0xfe   : > { %v559_v5 = vpop.f32.mrb[8].mxu0 }
  0xff   : > { %v484_v6 = vsel %vm482_vm2, %v481_v2, %v483_v4  ;;  %v615_v7 = vadd.f32 %v614_v60, %v559_v5  ;;  %v2948_v8 = vpop.f32.mrb[9].mxu0 }
 0x100   : > { %v485_v9 = vpack.c.bf16 %v484_v6, %v484_v6  ;;  %v562_v10 = vpop.f32.mrb[10].mxu0  ;;  %v752_v11 = vpop.f32.mrb[12].mxu1 }
 0x101   : > { %v2949_v12 = vpop.f32.mrb[11].mxu0  ;;  %v2972_v13 = vpop.f32.mrb[13].mxu1 }
 0x102   : > { %487 = vst.msk [vmem:[%s3739_s19] sm:$0xf] %vm486_vm3, %v485_v9  ;;  %v755_v14 = vpop.f32.mrb[14].mxu1 }
 0x103   : > { %v2973_v15 = vpop.f32.mrb[15].mxu1 }
 0x106   : > { %v678_v16 = vpop.f32.mrb[12].mxu0 }
 0x107   : > { %v684_v17 = vadd.f32 %v678_v16, %v615_v7  ;;  %v2964_v18 = vpop.f32.mrb[13].mxu0 }
 0x108   : > { %v681_v19 = vpop.f32.mrb[14].mxu0  ;;  %v892_v20 = vpop.f32.mrb[16].mxu1 }
 0x109   : > { %v758_v21 = vadd.f32 %v752_v11, %v684_v17  ;;  %v2965_v22 = vpop.f32.mrb[15].mxu0  ;;  %v2988_v23 = vpop.f32.mrb[17].mxu1 }
 0x10a   : > { %v895_v24 = vpop.f32.mrb[18].mxu1 }
 0x10b   : > { %v759_v25 = vadd.f32 %v3732_v58, %v758_v21  ;;  %v2989_v26 = vpop.f32.mrb[19].mxu1 }
 0x10d   : > { %vm760_vm4 = vcmp.gt.f32.partialorder %v759_v25, 0.0  ;;  %v761_v27 = vmul.f32 0.2, %v759_v25 }
 0x10e   : > { %v837_v28 = vpop.f32.mrb[16].mxu0 }
 0x10f   : > { %v762_v29 = vsel %vm760_vm4, %v759_v25, %v761_v27  ;;  %v893_v30 = vadd.f32 %v892_v20, %v837_v28  ;;  %v2980_v31 = vpop.f32.mrb[17].mxu0 }
 0x110   : > { %v763_v32 = vpack.c.bf16 %v762_v29, %v762_v29  ;;  %v840_v33 = vpop.f32.mrb[18].mxu0  ;;  %v1030_v34 = vpop.f32.mrb[20].mxu1 }
 0x111   : > { %v2981_v35 = vpop.f32.mrb[19].mxu0  ;;  %v3004_v36 = vpop.f32.mrb[21].mxu1 }
 0x112   : > { %2618 = vst.msk [vmem:[%s3739_s19 + $0x4] sm:$0xf] %vm486_vm3, %v763_v32  ;;  %v1033_v37 = vpop.f32.mrb[22].mxu1 }
 0x113   : > { %v3005_v38 = vpop.f32.mrb[23].mxu1 }
 0x116   : > { %v956_v39 = vpop.f32.mrb[20].mxu0 }
 0x117   : > { %v962_v40 = vadd.f32 %v956_v39, %v893_v30  ;;  %v2996_v41 = vpop.f32.mrb[21].mxu0 }
 0x118   : > { %v959_v42 = vpop.f32.mrb[22].mxu0  ;;  %v1170_v43 = vpop.f32.mrb[24].mxu1 }
 0x119   : > { %v1036_v44 = vadd.f32 %v1030_v34, %v962_v40  ;;  %v2997_v45 = vpop.f32.mrb[23].mxu0  ;;  %v3020_v46 = vpop.f32.mrb[25].mxu1 }
 0x11a   : > { %v1173_v47 = vpop.f32.mrb[26].mxu1 }
 0x11b   : > { %v1037_v48 = vadd.f32 %v3732_v58, %v1036_v44  ;;  %v3021_v49 = vpop.f32.mrb[27].mxu1 }
 0x11d   : > { %vm1038_vm5 = vcmp.gt.f32.partialorder %v1037_v48, 0.0  ;;  %v1039_v50 = vmul.f32 0.2, %v1037_v48 }
 0x11e   : > { %v1115_v51 = vpop.f32.mrb[24].mxu0 }
 0x11f   : > { %v1040_v52 = vsel %vm1038_vm5, %v1037_v48, %v1039_v50  ;;  %v1171_v53 = vadd.f32 %v1170_v43, %v1115_v51  ;;  %v3012_v54 = vpop.f32.mrb[25].mxu0 }
 0x120   : > { %v1041_v1 = vpack.c.bf16 %v1040_v52, %v1040_v52  ;;  %v1118_v55 = vpop.f32.mrb[26].mxu0  ;;  %v1308_v56 = vpop.f32.mrb[28].mxu1 }
 0x121   : > { %v3013_v57 = vpop.f32.mrb[27].mxu0  ;;  %v3036_v59 = vpop.f32.mrb[29].mxu1 }
 0x122   : > { %2650 = vst.msk [vmem:[%s3739_s19 + $0x8] sm:$0xf] %vm486_vm3, %v1041_v1  ;;  %v1311_v60 = vpop.f32.mrb[30].mxu1 }
 0x123   : > { %v3037_v61 = vpop.f32.mrb[31].mxu1 }
 0x126   : > { %v1234_v62 = vpop.f32.mrb[28].mxu0 }
 0x127   : > { %v1240_v63 = vadd.f32 %v1234_v62, %v1171_v53  ;;  %v3028_v0 = vpop.f32.mrb[29].mxu0 }
 0x128   : > { %v1237_v2 = vpop.f32.mrb[30].mxu0  ;;  %v1448_v3 = vpop.f32.mrb[32].mxu1 }
 0x129   : > { %v1314_v4 = vadd.f32 %v1308_v56, %v1240_v63  ;;  %v3029_v5 = vpop.f32.mrb[31].mxu0  ;;  %v3052_v6 = vpop.f32.mrb[33].mxu1 }
 0x12a   : > { %v1451_v7 = vpop.f32.mrb[34].mxu1 }
 0x12b   : > { %v1315_v8 = vadd.f32 %v3732_v58, %v1314_v4  ;;  %v3053_v9 = vpop.f32.mrb[35].mxu1 }
 0x12d   : > { %vm1316_vm6 = vcmp.gt.f32.partialorder %v1315_v8, 0.0  ;;  %v1317_v10 = vmul.f32 0.2, %v1315_v8 }
 0x12e   : > { %v1393_v11 = vpop.f32.mrb[32].mxu0 }
 0x12f   : > { %v1318_v12 = vsel %vm1316_vm6, %v1315_v8, %v1317_v10  ;;  %v1449_v13 = vadd.f32 %v1448_v3, %v1393_v11  ;;  %v3044_v14 = vpop.f32.mrb[33].mxu0 }
 0x130   : > { %v1319_v15 = vpack.c.bf16 %v1318_v12, %v1318_v12  ;;  %v1396_v16 = vpop.f32.mrb[34].mxu0  ;;  %v1586_v17 = vpop.f32.mrb[36].mxu1 }
 0x131   : > { %v3045_v18 = vpop.f32.mrb[35].mxu0  ;;  %v3068_v19 = vpop.f32.mrb[37].mxu1 }
 0x132   : > { %2682 = vst.msk [vmem:[%s3739_s19 + $0xc] sm:$0xf] %vm486_vm3, %v1319_v15  ;;  %v1589_v20 = vpop.f32.mrb[38].mxu1 }
 0x133   : > { %v3069_v21 = vpop.f32.mrb[39].mxu1 }
 0x136   : > { %v1512_v22 = vpop.f32.mrb[36].mxu0 }
 0x137   : > { %v1518_v23 = vadd.f32 %v1512_v22, %v1449_v13  ;;  %v3060_v24 = vpop.f32.mrb[37].mxu0 }
 0x138   : > { %v1515_v25 = vpop.f32.mrb[38].mxu0  ;;  %v1726_v26 = vpop.f32.mrb[40].mxu1 }
 0x139   : > { %v1592_v27 = vadd.f32 %v1586_v17, %v1518_v23  ;;  %v3061_v28 = vpop.f32.mrb[39].mxu0  ;;  %v3084_v29 = vpop.f32.mrb[41].mxu1 }
 0x13a   : > { %v1729_v30 = vpop.f32.mrb[42].mxu1 }
 0x13b   : > { %v1593_v31 = vadd.f32 %v3732_v58, %v1592_v27  ;;  %v3085_v32 = vpop.f32.mrb[43].mxu1 }
 0x13d   : > { %vm1594_vm7 = vcmp.gt.f32.partialorder %v1593_v31, 0.0  ;;  %v1595_v33 = vmul.f32 0.2, %v1593_v31 }
 0x13e   : > { %v1671_v34 = vpop.f32.mrb[40].mxu0 }
 0x13f   : > { %v1596_v35 = vsel %vm1594_vm7, %v1593_v31, %v1595_v33  ;;  %v1727_v36 = vadd.f32 %v1726_v26, %v1671_v34  ;;  %v3076_v37 = vpop.f32.mrb[41].mxu0 }
 0x140   : > { %v1597_v38 = vpack.c.bf16 %v1596_v35, %v1596_v35  ;;  %v1674_v39 = vpop.f32.mrb[42].mxu0  ;;  %v1864_v40 = vpop.f32.mrb[44].mxu1 }
 0x141   : > { %v3077_v41 = vpop.f32.mrb[43].mxu0  ;;  %v3100_v42 = vpop.f32.mrb[45].mxu1 }
 0x142   : > { %2714 = vst.msk [vmem:[%s3739_s19 + $0x10] sm:$0xf] %vm486_vm3, %v1597_v38  ;;  %v1867_v43 = vpop.f32.mrb[46].mxu1 }
 0x143   : > { %v3101_v44 = vpop.f32.mrb[47].mxu1 }
 0x146   : > { %v1790_v45 = vpop.f32.mrb[44].mxu0 }
 0x147   : > { %v1796_v46 = vadd.f32 %v1790_v45, %v1727_v36  ;;  %v3092_v47 = vpop.f32.mrb[45].mxu0 }
 0x148   : > { %v1793_v48 = vpop.f32.mrb[46].mxu0  ;;  %v2004_v49 = vpop.f32.mrb[48].mxu1 }
 0x149   : > { %v1870_v50 = vadd.f32 %v1864_v40, %v1796_v46  ;;  %v3093_v51 = vpop.f32.mrb[47].mxu0  ;;  %v3116_v52 = vpop.f32.mrb[49].mxu1 }
 0x14a   : > { %v2007_v53 = vpop.f32.mrb[50].mxu1 }
 0x14b   : > { %v1871_v54 = vadd.f32 %v3732_v58, %v1870_v50  ;;  %v3117_v1 = vpop.f32.mrb[51].mxu1 }
 0x14d   : > { %vm1872_vm8 = vcmp.gt.f32.partialorder %v1871_v54, 0.0  ;;  %v1873_v55 = vmul.f32 0.2, %v1871_v54 }
 0x14e   : > { %v1949_v56 = vpop.f32.mrb[48].mxu0 }
 0x14f   : > { %v1874_v57 = vsel %vm1872_vm8, %v1871_v54, %v1873_v55  ;;  %v2005_v59 = vadd.f32 %v2004_v49, %v1949_v56  ;;  %v3108_v60 = vpop.f32.mrb[49].mxu0 }
 0x150   : > { %v1875_v61 = vpack.c.bf16 %v1874_v57, %v1874_v57  ;;  %v1952_v62 = vpop.f32.mrb[50].mxu0  ;;  %v2142_v63 = vpop.f32.mrb[52].mxu1 }
 0x151   : > { %v3109_v0 = vpop.f32.mrb[51].mxu0  ;;  %v3132_v2 = vpop.f32.mrb[53].mxu1 }
 0x152   : > { %2746 = vst.msk [vmem:[%s3739_s19 + $0x14] sm:$0xf] %vm486_vm3, %v1875_v61  ;;  %v2145_v3 = vpop.f32.mrb[54].mxu1 }
 0x153   : > { %v3133_v4 = vpop.f32.mrb[55].mxu1 }
 0x156   : > { %v2068_v5 = vpop.f32.mrb[52].mxu0 }
 0x157   : > { %v2074_v6 = vadd.f32 %v2068_v5, %v2005_v59  ;;  %v3124_v7 = vpop.f32.mrb[53].mxu0 }
 0x158   : > { %v2071_v8 = vpop.f32.mrb[54].mxu0  ;;  %v2282_v9 = vpop.f32.mrb[56].mxu1 }
 0x159   : > { %v2148_v10 = vadd.f32 %v2142_v63, %v2074_v6  ;;  %v3125_v11 = vpop.f32.mrb[55].mxu0  ;;  %v3148_v12 = vpop.f32.mrb[57].mxu1 }
 0x15a   : > { %v2285_v13 = vpop.f32.mrb[58].mxu1 }
 0x15b   : > { %v2149_v14 = vadd.f32 %v3732_v58, %v2148_v10  ;;  %v3149_v15 = vpop.f32.mrb[59].mxu1 }
 0x15d   : > { %vm2150_vm9 = vcmp.gt.f32.partialorder %v2149_v14, 0.0  ;;  %v2151_v16 = vmul.f32 0.2, %v2149_v14 }
 0x15e   : > { %v2227_v17 = vpop.f32.mrb[56].mxu0 }
 0x15f   : > { %v2152_v18 = vsel %vm2150_vm9, %v2149_v14, %v2151_v16  ;;  %v2283_v19 = vadd.f32 %v2282_v9, %v2227_v17  ;;  %v3140_v20 = vpop.f32.mrb[57].mxu0 }
 0x160   : > { %v2153_v21 = vpack.c.bf16 %v2152_v18, %v2152_v18  ;;  %v2230_v22 = vpop.f32.mrb[58].mxu0  ;;  %v2420_v23 = vpop.f32.mrb[60].mxu1 }
 0x161   : > { %v3141_v24 = vpop.f32.mrb[59].mxu0  ;;  %v3164_v25 = vpop.f32.mrb[61].mxu1 }
 0x162   : > { %2778 = vst.msk [vmem:[%s3739_s19 + $0x18] sm:$0xf] %vm486_vm3, %v2153_v21  ;;  %v2423_v26 = vpop.f32.mrb[62].mxu1 }
 0x163   : > { %v3165_v27 = vpop.f32.mrb[63].mxu1 }
 0x166   : > { %v2346_v28 = vpop.f32.mrb[60].mxu0 }
 0x167   : > { %v2352_v29 = vadd.f32 %v2346_v28, %v2283_v19  ;;  %v3156_v30 = vpop.f32.mrb[61].mxu0 }
 0x168   : > { %v2349_v31 = vpop.f32.mrb[62].mxu0 }
 0x169   : > { %v2426_v32 = vadd.f32 %v2420_v23, %v2352_v29  ;;  %v3157_v33 = vpop.f32.mrb[63].mxu0 }
 0x16b   : > { %v2427_v34 = vadd.f32 %v3732_v58, %v2426_v32 }
 0x16d   : > { %vm2428_vm10 = vcmp.gt.f32.partialorder %v2427_v34, 0.0  ;;  %v2429_v35 = vmul.f32 0.2, %v2427_v34 }
 0x16f   : > { %v2430_v36 = vsel %vm2428_vm10, %v2427_v34, %v2429_v35 }
 0x170   : > { %v2431_v37 = vpack.c.bf16 %v2430_v36, %v2430_v36 }
 0x172   : > { %2810 = vst.msk [vmem:[%s3739_s19 + $0x1c] sm:$0xf] %vm486_vm3, %v2431_v37 }
 0x173 PF: > { %s13_s14 = sadd.s32 1, %s3295_s14   ;;  %s3777_s12 = smov %s3291_s13 }
 0x174   : > { %p10_p5 = scmp.ge.s32.totalorder %s13_s14, 4   ;;  %s3778_s13 = smov %s3780_s15 }
 0x176   :  { %12 = sbr.rel (!%p10_p5) target bundleno = 2 (0x2), region = 81 }

// kernel: domain_classifier_forward.7
= control target key start
LH: loop header
LB: loop body
LE: loop exit
PB: predicated region body
PF: predicated region fallthrough
CT: control target
= control target key end

     0   :  { %s2282_s12 = smov 0   ;;  %s2284_s13 = smov 0   ;;  %s2660_s0 = inlined_call_operand.vmem [shape: bf16[2,5,5,64], index: 0, kind: input, shape index: {}]   ;;  %s2661_s1 = inlined_call_operand.vmem [shape: bf16[4,64,32], index: 1, kind: input, shape index: {}]   ;;  %s2662_s2 = inlined_call_operand.vmem [shape: f32[1,1,32], index: 2, kind: input, shape index: {}]   ;;  %s2663_s3 = inlined_call_operand.vmem [shape: bf16[2,4,4,32], index: 3, kind: output, shape index: {}]  }
   0x1   :  { %s2286_s14 = smov 0  }
   0x2 LB: > { %s25_s15 = sadd.s32 1, %s2254_s13  ;;  %p1656_p0 = scmp.ge.s32.totalorder %s2258_s14, 1  ;;  %s2258_s14 = sphi %s2286_s14, %s13_s14   ;;  %s2254_s13 = sphi %s2284_s13, %s2665_s13   ;;  %s2250_s12 = sphi %s2282_s12, %s2664_s12  }
   0x3   : > { %p27_p1 = scmp.ge.s32.totalorder %s25_s15, 2  ;;  %p151_p2 = scmp.lt.s32.totalorder %s2258_s14, 3 }
   0x5   : > { %s2667_s15 = smov (%p27_p1, %s25_s15), 0  ;;  %p152_p3 = pnand %p1656_p0, %p151_p2 }
   0x6   : > { %v2164_v0 = vld [vmem:[%s2661_s1 + $0x20] sm:$0xff] (!%p152_p3)   ;;  %v2260_v1 = vmov (!%p152_p3), 0.0   ;;  %v2166_v3 = vld [vmem:[%s2661_s1 + $0x28] sm:$0xff] (!%p152_p3)   ;;  %vm2261_vm0 = vmmov (!%p152_p3), 0   ;;  %p179_p4 = scmp.lt.s32.totalorder (!%p152_p3), %s2250_s12, 1  ;;  %v2168_v5 = vld [vmem:[%s2661_s1 + $0x30] sm:$0xff] (!%p152_p3)  }
   0x7   : > { %155 = sbr.rel (%p152_p3) target bundleno = 361 (0x169), region = 32  ;;  %1945 = vmatprep.subr.bf16.mxu0 (!%p152_p3), %v2260_v1  ;;  %1957 = vmatprep.subr.bf16.mxu1 (!%p152_p3), %v2260_v1  ;;  %v2165_v2 = vld [vmem:[%s2661_s1] sm:$0xff] (!%p152_p3)   ;;  %v2167_v4 = vld [vmem:[%s2661_s1 + $0x8] sm:$0xff] (!%p152_p3)   ;;  %v2169_v6 = vld [vmem:[%s2661_s1 + $0x10] sm:$0xff] (!%p152_p3)   ;;  %vm252_vm1 = vcmask (!%p152_p3), 523264   ;;  %vm543_vm3 = vcmask (!%p152_p3), 254976  }
   0x8   : > { %1946 = vmatpush3.bf16.msra.mxu0 (!%p152_p3), %v2164_v0  ;;  %1953 = vmatprep.mubr.msk.bf16.mxu0 (!%p152_p3), %vm2261_vm0, %v2260_v1  ;;  %v2170_v7 = vld [vmem:[%s2661_s1 + $0x38] sm:$0xff] (!%p152_p3)   ;;  %v2173_v13 = vld [vmem:[%s2661_s1 + $0x40] sm:$0xff] (!%p152_p3)   ;;  %v2175_v17 = vld [vmem:[%s2661_s1 + $0x48] sm:$0xff] (!%p152_p3)  }
   0x9   : > { %1958 = vmatpush3.bf16.msra.mxu1 (!%p152_p3), %v2165_v2  ;;  %1947 = vmatprep.subr.bf16.mxu0 (!%p152_p3), %v2260_v1  ;;  %v2171_v9 = vld [vmem:[%s2661_s1 + $0x18] sm:$0xff] (!%p152_p3)   ;;  %v2174_v14 = vld [vmem:[%s2661_s1 + $0x60] sm:$0xff] (!%p152_p3)   ;;  %v2176_v18 = vld [vmem:[%s2661_s1 + $0x68] sm:$0xff] (!%p152_p3)  }
   0xa   : > { %1959 = vmatprep.subr.bf16.mxu1 (!%p152_p3), %v2260_v1  ;;  %1965 = vmatprep.mubr.msk.bf16.mxu1 (!%p152_p3), %vm2261_vm0, %v2260_v1  ;;  %v2177_v20 = vld [vmem:[%s2661_s1 + $0x50] sm:$0xff] (!%p152_p3)   ;;  %v2179_v23 = vld [vmem:[%s2661_s1 + $0x58] sm:$0xff] (!%p152_p3)   ;;  %v2182_v29 = vld [vmem:[%s2661_s1 + $0x20] sm:$0xff] (!%p152_p3)  }
   0xb   : > { %v2178_v22 = vld [vmem:[%s2661_s1 + $0x70] sm:$0xff] (!%p152_p3)   ;;  %v2180_v26 = vld [vmem:[%s2661_s1 + $0x78] sm:$0xff] (!%p152_p3)   ;;  %v2183_v31 = vld [vmem:[%s2661_s1] sm:$0xff] (!%p152_p3)  }
   0xc   : > { %1948 = vmatpush3.bf16.msra.mxu0 (!%p152_p3), %v2166_v3  ;;  %v2184_v32 = vld [vmem:[%s2661_s1 + $0x28] sm:$0xff] (!%p152_p3)   ;;  %v2186_v35 = vld [vmem:[%s2661_s1 + $0x30] sm:$0xff] (!%p152_p3)   ;;  %v2188_v39 = vld [vmem:[%s2661_s1 + $0x38] sm:$0xff] (!%p152_p3)  }
   0xd   : > { %1960 = vmatpush3.bf16.msra.mxu1 (!%p152_p3), %v2167_v4  ;;  %1949 = vmatprep.subr.bf16.mxu0 (!%p152_p3), %v2260_v1  ;;  %v2185_v33 = vld [vmem:[%s2661_s1 + $0x8] sm:$0xff] (!%p152_p3)   ;;  %v2187_v36 = vld [vmem:[%s2661_s1 + $0x10] sm:$0xff] (!%p152_p3)   ;;  %v2189_v40 = vld [vmem:[%s2661_s1 + $0x18] sm:$0xff] (!%p152_p3)  }
   0xe   : > { %s2669_s12 = smov (!%p179_p4, %s2250_s12), 1  ;;  %1961 = vmatprep.subr.bf16.mxu1 %v2260_v1  ;;  %v2191_v43 = vld [vmem:[%s2661_s1 + $0x40] sm:$0xff]   ;;  %v2193_v46 = vld [vmem:[%s2661_s1 + $0x48] sm:$0xff]   ;;  %v2195_v48 = vld [vmem:[%s2661_s1 + $0x50] sm:$0xff]  }
   0xf   : > { %s2137_s26 = smul.u32 20, %s2669_s12  ;;  %v2192_v44 = vld [vmem:[%s2661_s1 + $0x60] sm:$0xff]   ;;  %v2194_v47 = vld [vmem:[%s2661_s1 + $0x68] sm:$0xff]   ;;  %v2196_v49 = vld [vmem:[%s2661_s1 + $0x70] sm:$0xff]   ;;  %s1864_s16 = sshll.u32 %s2669_s12, 3 }
  0x10   : > { %1950 = vmatpush3.bf16.msra.mxu0 %v2168_v5  ;;  %v2197_v51 = vld [vmem:[%s2661_s1 + $0x58] sm:$0xff]   ;;  %v2200_v57 = vld [vmem:[%s2661_s1 + $0x20] sm:$0xff]   ;;  %v2202_v60 = vld [vmem:[%s2661_s1 + $0x28] sm:$0xff]   ;;  %s2638_s19 = scalar_lea.vmem %s2663_s3, %s1864_s16 }
  0x11   : > { %s2334_s4 = scalar_lea.vmem %s2660_s0, %s2137_s26  ;;  %1962 = vmatpush3.bf16.msra.mxu1 %v2169_v6  ;;  %1951 = vmatprep.subr.bf16.mxu0 %v2260_v1  ;;  %v2198_v54 = vld [vmem:[%s2661_s1 + $0x78] sm:$0xff]   ;;  %v2201_v58 = vld [vmem:[%s2661_s1] sm:$0xff]   ;;  %v2203_v61 = vld [vmem:[%s2661_s1 + $0x8] sm:$0xff]  }
  0x12   : > { %v2172_v8 = vld [vmem:[%s2334_s4] ss:$0 sps:$4 sm:$0x77]   ;;  %1963 = vmatprep.subr.bf16.mxu1 %v2260_v1  ;;  %v2181_v19 = vld [vmem:[%s2334_s4 + $0x4] ss:$0 sps:$4 sm:$0x77]  }
  0x13   : > { %v222_v10 = vshrl.u32 %v2172_v8, 16  ;;  %v224_v11 = vshll.u32 %v2172_v8, 16  ;;  %v199_v16 = vld [vmem:[%s2334_s4] sm:$0x3]  ;;  %v460_v21 = vshll.u32 %v2181_v19, 16  ;;  %v458_v24 = vshrl.u32 %v2181_v19, 16 }
  0x14   : > { %1952 = vmatpush3.bf16.msra.mxu0 %v2170_v7  ;;  %v1679_v27 = vld [vmem:[%s2334_s4 + $0x4] sm:$0x3]  ;;  %v2199_v45 = vld [vmem:[%s2334_s4 + $0x8] ss:$0 sps:$4 sm:$0x77]   ;;  %v2204_v63 = vld [vmem:[%s2661_s1 + $0x30] sm:$0xff]  }
  0x15   : > { %v226_v12 = vrot.slane %v224_v11, 1  ;;  %1964 = vmatpush3.bf16.msra.mxu1 %v2171_v9  ;;  %1969 = vmatprep.subr.bf16.mxu0 %v2260_v1  ;;  %v462_v25 = vrot.slane %v460_v21, 1  ;;  %v2190_v30 = vld [vmem:[%s2334_s4 + $0x4] ss:$0 sps:$4 sm:$0x77]   ;;  %v802_v50 = vshll.u32 %v2199_v45, 16 }
  0x16   : > { %1981 = vmatprep.subr.bf16.mxu1 %v2260_v1  ;;  %v569_v34 = vshll.u32 %v2190_v30, 16  ;;  %v567_v37 = vshrl.u32 %v2190_v30, 16  ;;  %v1709_v42 = vld [vmem:[%s2334_s4 + $0x4] sm:$0x3]  ;;  %v800_v52 = vshrl.u32 %v2199_v45, 16  ;;  %v2205_v0 = vld [vmem:[%s2661_s1 + $0x10] sm:$0xff]  }
  0x17   : > { %v227_v15 = vor.u32 %v226_v12, %v222_v10  ;;  %v463_v28 = vor.u32 %v462_v25, %v458_v24  ;;  %v804_v53 = vrot.slane %v802_v50, 1  ;;  %v1730_v55 = vld [vmem:[%s2334_s4 + $0x8] sm:$0x3]  ;;  %v2206_v4 = vld [vmem:[%s2661_s1 + $0x38] sm:$0xff]   ;;  %v2209_v7 = vld [vmem:[%s2661_s1 + $0x40] sm:$0xff]  }
  0x18   : > { %1966 = vmatmul.mubr.msk.bf16.vlgmr.msra.gmra.mrb[0].mxu1 %vm252_vm1, %v199_v16  ;;  %v571_v38 = vrot.slane %v569_v34, 1  ;;  %v2208_v59 = vld [vmem:[%s2334_s4 + $0x8] ss:$0 sps:$4 sm:$0x77]   ;;  %v2207_v5 = vld [vmem:[%s2661_s1 + $0x18] sm:$0xff]   ;;  %v2210_v9 = vld [vmem:[%s2661_s1 + $0x60] sm:$0xff]  }
  0x19   : > { %1954 = vmatmul.mubr.msk.bf16.vlgmr.msra.gmra.mrb[0].mxu0 %vm252_vm1, %v227_v15  ;;  %1982 = vmatpush3.bf16.msra.mxu1 %v2174_v14  ;;  %v805_v56 = vor.u32 %v804_v53, %v800_v52  ;;  %v905_v62 = vshll.u32 %v2208_v59, 16  ;;  %v903_v2 = vshrl.u32 %v2208_v59, 16  ;;  %v1760_v8 = vld [vmem:[%s2334_s4 + $0x8] sm:$0x3]  ;;  %v2214_v15 = vld [vmem:[%s2661_s1 + $0x70] sm:$0xff]   ;;  %v2215_v16 = vld [vmem:[%s2661_s1 + $0x58] sm:$0xff]  }
  0x1a   : > { %1970 = vmatpush3.bf16.msra.mxu0 %v2173_v13  ;;  %1983 = vmatprep.subr.bf16.mxu1 %v2260_v1  ;;  %v572_v41 = vor.u32 %v571_v38, %v567_v37  ;;  %v2211_v10 = vld [vmem:[%s2661_s1 + $0x48] sm:$0xff]   ;;  %v2213_v13 = vld [vmem:[%s2661_s1 + $0x50] sm:$0xff]   ;;  %v2216_v19 = vld [vmem:[%s2661_s1 + $0x78] sm:$0xff]  }
  0x1b   : > { %1971 = vmatprep.subr.bf16.mxu0 %v2260_v1  ;;  %1977 = vmatprep.mubr.msk.bf16.mxu0 %vm2261_vm0, %v2260_v1  ;;  %v907_v3 = vrot.slane %v905_v62, 1  ;;  %v2217_v11 = vld [vmem:[%s2334_s4 + $0xc] ss:$0 sps:$4 sm:$0x77]   ;;  %v2228_v37 = vld [vmem:[%s2661_s1 + $0x60] sm:$0xff]  }
  0x1c   : > { %1989 = vmatprep.mubr.msk.bf16.mxu1 %vm2261_vm0, %v2260_v1  ;;  %v2212_v12 = vld [vmem:[%s2661_s1 + $0x68] sm:$0xff]   ;;  %v1138_v14 = vshll.u32 %v2217_v11, 16  ;;  %v2631_v62 = vld [vmem:[%s2662_s2] ss:$0 sm:$0xff] }
  0x1d   : > { %1984 = vmatpush3.bf16.msra.mxu1 %v2176_v18  ;;  %v908_v6 = vor.u32 %v907_v3, %v903_v2  ;;  %v2226_v24 = vld [vmem:[%s2334_s4 + $0xc] ss:$0 sps:$4 sm:$0x77]  }
  0x1e   : > { %1972 = vmatpush3.bf16.msra.mxu0 %v2175_v17  ;;  %1985 = vmatprep.subr.bf16.mxu1 %v2260_v1  ;;  %v1136_v17 = vshrl.u32 %v2217_v11, 16  ;;  %v1140_v18 = vrot.slane %v1138_v14, 1  ;;  %v2220_v25 = vld [vmem:[%s2661_s1 + $0x28] sm:$0xff]   ;;  %v1239_v30 = vshrl.u32 %v2226_v24, 16 }
  0x1f   : > { %1973 = vmatprep.subr.bf16.mxu0 %v2260_v1  ;;  %v2229_v38 = vld [vmem:[%s2661_s1 + $0x48] sm:$0xff]  }
  0x20   : > { %v1141_v21 = vor.u32 %v1140_v18, %v1136_v17 }
  0x21   : > { %1986 = vmatpush3.bf16.msra.mxu1 %v2178_v22  ;;  %v2218_v22 = vld [vmem:[%s2661_s1 + $0x20] sm:$0xff]  }
  0x22   : > { %1974 = vmatpush3.bf16.msra.mxu0 %v2177_v20  ;;  %1987 = vmatprep.subr.bf16.mxu1 %v2260_v1  ;;  %v1781_v20 = vld [vmem:[%s2334_s4 + $0xc] sm:$0x3] }
  0x23   : > { %1975 = vmatprep.subr.bf16.mxu0 %v2260_v1 }
  0x25   : > { %1988 = vmatpush3.bf16.msra.mxu1 %v2180_v26  ;;  %v2221_v26 = vld [vmem:[%s2661_s1 + $0x8] sm:$0xff]  }
  0x26   : > { %1976 = vmatpush3.bf16.msra.mxu0 %v2179_v23  ;;  %2005 = vmatprep.subr.bf16.mxu1 %v2260_v1  ;;  %v2219_v23 = vld [vmem:[%s2661_s1] sm:$0xff]  }
  0x27   : > { %1993 = vmatprep.subr.bf16.mxu0 %v2260_v1 }
  0x28   : > { %1990 = vmatmul.mubr.msk.bf16.vlgmr.msra.gmra.mrb[4].mxu1 %vm252_vm1, %v463_v28  ;;  %v2222_v28 = vld [vmem:[%s2661_s1 + $0x30] sm:$0xff]  }
  0x29   : > { %1978 = vmatmul.mubr.msk.bf16.vlgmr.msra.gmra.mrb[4].mxu0 %vm252_vm1, %v1679_v27  ;;  %2006 = vmatpush3.bf16.msra.mxu1 %v2183_v31  ;;  %v1241_v27 = vshll.u32 %v2226_v24, 16 }
  0x2a   : > { %1994 = vmatpush3.bf16.msra.mxu0 %v2182_v29  ;;  %2007 = vmatprep.subr.bf16.mxu1 %v2260_v1  ;;  %v2223_v29 = vld [vmem:[%s2661_s1 + $0x10] sm:$0xff]  }
  0x2b   : > { %1995 = vmatprep.subr.bf16.mxu0 %v2260_v1  ;;  %2001 = vmatprep.mubr.msk.bf16.mxu0 %vm2261_vm0, %v2260_v1  ;;  %v1243_v31 = vrot.slane %v1241_v27, 1 }
  0x2c   : > { %2013 = vmatprep.mubr.msk.bf16.mxu1 %vm2261_vm0, %v2260_v1 }
  0x2d   : > { %2008 = vmatpush3.bf16.msra.mxu1 %v2185_v33  ;;  %v2225_v33 = vld [vmem:[%s2661_s1 + $0x18] sm:$0xff]   ;;  %v1244_v34 = vor.u32 %v1243_v31, %v1239_v30 }
  0x2e   : > { %1996 = vmatpush3.bf16.msra.mxu0 %v2184_v32  ;;  %2009 = vmatprep.subr.bf16.mxu1 %v2260_v1  ;;  %v2224_v32 = vld [vmem:[%s2661_s1 + $0x38] sm:$0xff]  }
  0x2f   : > { %1997 = vmatprep.subr.bf16.mxu0 %v2260_v1 }
  0x31   : > { %2010 = vmatpush3.bf16.msra.mxu1 %v2187_v36  ;;  %v1811_v36 = vld [vmem:[%s2334_s4 + $0xc] sm:$0x3] }
  0x32   : > { %1998 = vmatpush3.bf16.msra.mxu0 %v2186_v35  ;;  %2011 = vmatprep.subr.bf16.mxu1 %v2260_v1  ;;  %v2227_v35 = vld [vmem:[%s2661_s1 + $0x40] sm:$0xff]  }
  0x33   : > { %1999 = vmatprep.subr.bf16.mxu0 %v2260_v1 }
  0x35   : > { %2012 = vmatpush3.bf16.msra.mxu1 %v2189_v40  ;;  %v2230_v40 = vld [vmem:[%s2661_s1 + $0x68] sm:$0xff]  }
  0x36   : > { %2000 = vmatpush3.bf16.msra.mxu0 %v2188_v39  ;;  %2029 = vmatprep.subr.bf16.mxu1 %v2260_v1  ;;  %v2235_v39 = vld [vmem:[%s2334_s4 + $0x10] ss:$0 sps:$4 sm:$0x77]  }
  0x37   : > { %2017 = vmatprep.subr.bf16.mxu0 %v2260_v1  ;;  %v1472_v45 = vshrl.u32 %v2235_v39, 16 }
  0x38   : > { %2014 = vmatmul.mubr.msk.bf16.vlgmr.msra.gmra.mrb[8].mxu1 %vm252_vm1, %v1709_v42  ;;  %v1474_v42 = vshll.u32 %v2235_v39, 16 }
  0x39   : > { %2002 = vmatmul.mubr.msk.bf16.vlgmr.msra.gmra.mrb[8].mxu0 %vm252_vm1, %v572_v41  ;;  %2030 = vmatpush3.bf16.msra.mxu1 %v2192_v44  ;;  %v2231_v41 = vld [vmem:[%s2661_s1 + $0x50] sm:$0xff]   ;;  %v2233_v44 = vld [vmem:[%s2661_s1 + $0x58] sm:$0xff]  }
  0x3a   : > { %2018 = vmatpush3.bf16.msra.mxu0 %v2191_v43  ;;  %2031 = vmatprep.subr.bf16.mxu1 %v2260_v1  ;;  %v2232_v43 = vld [vmem:[%s2661_s1 + $0x70] sm:$0xff]  }
  0x3b   : > { %2019 = vmatprep.subr.bf16.mxu0 %v2260_v1  ;;  %2025 = vmatprep.mubr.msk.bf16.mxu0 %vm2261_vm0, %v2260_v1 }
  0x3c   : > { %2037 = vmatprep.mubr.msk.bf16.mxu1 %vm2261_vm0, %v2260_v1 }
  0x3d   : > { %2032 = vmatpush3.bf16.msra.mxu1 %v2194_v47  ;;  %v2234_v47 = vld [vmem:[%s2661_s1 + $0x78] sm:$0xff]  }
  0x3e   : > { %2020 = vmatpush3.bf16.msra.mxu0 %v2193_v46  ;;  %2033 = vmatprep.subr.bf16.mxu1 %v2260_v1  ;;  %v1476_v46 = vrot.slane %v1474_v42, 1 }
  0x3f   : > { %2021 = vmatprep.subr.bf16.mxu0 %v2260_v1 }
  0x41   : > { %2034 = vmatpush3.bf16.msra.mxu1 %v2196_v49  ;;  %v1477_v49 = vor.u32 %v1476_v46, %v1472_v45 }
  0x42   : > { %2022 = vmatpush3.bf16.msra.mxu0 %v2195_v48  ;;  %2035 = vmatprep.subr.bf16.mxu1 %v2260_v1  ;;  %v1832_v48 = vld [vmem:[%s2334_s4 + $0x10] sm:$0x3] }
  0x43   : > { %2023 = vmatprep.subr.bf16.mxu0 %v2260_v1 }
  0x45   : > { %2036 = vmatpush3.bf16.msra.mxu1 %v2198_v54 }
  0x46   : > { %2024 = vmatpush3.bf16.msra.mxu0 %v2197_v51  ;;  %2053 = vmatprep.subr.bf16.mxu1 %v2260_v1 }
  0x47   : > { %2041 = vmatprep.subr.bf16.mxu0 %v2260_v1 }
  0x48   : > { %2038 = vmatmul.mubr.msk.bf16.vlgmr.msra.gmra.mrb[12].mxu1 %vm252_vm1, %v805_v56 }
  0x49   : > { %2026 = vmatmul.mubr.msk.bf16.vlgmr.msra.gmra.mrb[12].mxu0 %vm252_vm1, %v1730_v55  ;;  %2054 = vmatpush3.bf16.msra.mxu1 %v2201_v58 }
  0x4a   : > { %2042 = vmatpush3.bf16.msra.mxu0 %v2200_v57  ;;  %2055 = vmatprep.subr.bf16.mxu1 %v2260_v1 }
  0x4b   : > { %2043 = vmatprep.subr.bf16.mxu0 %v2260_v1  ;;  %2049 = vmatprep.mubr.msk.bf16.mxu0 %vm2261_vm0, %v2260_v1 }
  0x4c   : > { %2061 = vmatprep.mubr.msk.bf16.mxu1 %vm2261_vm0, %v2260_v1 }
  0x4d   : > { %2056 = vmatpush3.bf16.msra.mxu1 %v2203_v61 }
  0x4e   : > { %2044 = vmatpush3.bf16.msra.mxu0 %v2202_v60  ;;  %2057 = vmatprep.subr.bf16.mxu1 %v2260_v1 }
  0x4f   : > { %2045 = vmatprep.subr.bf16.mxu0 %v2260_v1 }
  0x51   : > { %2058 = vmatpush3.bf16.msra.mxu1 %v2205_v0 }
  0x52   : > { %2046 = vmatpush3.bf16.msra.mxu0 %v2204_v63  ;;  %2059 = vmatprep.subr.bf16.mxu1 %v2260_v1 }
  0x53   : > { %2047 = vmatprep.subr.bf16.mxu0 %v2260_v1 }
  0x55   : > { %2060 = vmatpush3.bf16.msra.mxu1 %v2207_v5 }
  0x56   : > { %2048 = vmatpush3.bf16.msra.mxu0 %v2206_v4  ;;  %2077 = vmatprep.subr.bf16.mxu1 %v2260_v1 }
  0x57   : > { %2065 = vmatprep.subr.bf16.mxu0 %v2260_v1 }
  0x58   : > { %2062 = vmatmul.mubr.msk.bf16.vlgmr.msra.gmra.mrb[16].mxu1 %vm252_vm1, %v1760_v8 }
  0x59   : > { %2050 = vmatmul.mubr.msk.bf16.vlgmr.msra.gmra.mrb[16].mxu0 %vm252_vm1, %v908_v6  ;;  %2078 = vmatpush3.bf16.msra.mxu1 %v2210_v9 }
  0x5a   : > { %2066 = vmatpush3.bf16.msra.mxu0 %v2209_v7  ;;  %2079 = vmatprep.subr.bf16.mxu1 %v2260_v1 }
  0x5b   : > { %2067 = vmatprep.subr.bf16.mxu0 %v2260_v1  ;;  %2073 = vmatprep.mubr.msk.bf16.mxu0 %vm2261_vm0, %v2260_v1 }
  0x5c   : > { %2085 = vmatprep.mubr.msk.bf16.mxu1 %vm2261_vm0, %v2260_v1 }
  0x5d   : > { %2080 = vmatpush3.bf16.msra.mxu1 %v2212_v12 }
  0x5e   : > { %2068 = vmatpush3.bf16.msra.mxu0 %v2211_v10  ;;  %2081 = vmatprep.subr.bf16.mxu1 %v2260_v1 }
  0x5f   : > { %2069 = vmatprep.subr.bf16.mxu0 %v2260_v1 }
  0x61   : > { %2082 = vmatpush3.bf16.msra.mxu1 %v2214_v15 }
  0x62   : > { %2070 = vmatpush3.bf16.msra.mxu0 %v2213_v13  ;;  %2083 = vmatprep.subr.bf16.mxu1 %v2260_v1 }
  0x63   : > { %2071 = vmatprep.subr.bf16.mxu0 %v2260_v1 }
  0x65   : > { %2084 = vmatpush3.bf16.msra.mxu1 %v2216_v19 }
  0x66   : > { %2072 = vmatpush3.bf16.msra.mxu0 %v2215_v16  ;;  %2101 = vmatprep.subr.bf16.mxu1 %v2260_v1 }
  0x67   : > { %2089 = vmatprep.subr.bf16.mxu0 %v2260_v1 }
  0x68   : > { %2086 = vmatmul.mubr.msk.bf16.vlgmr.msra.gmra.mrb[20].mxu1 %vm252_vm1, %v1141_v21 }
  0x69   : > { %2074 = vmatmul.mubr.msk.bf16.vlgmr.msra.gmra.mrb[20].mxu0 %vm252_vm1, %v1781_v20  ;;  %2102 = vmatpush3.bf16.msra.mxu1 %v2219_v23 }
  0x6a   : > { %2090 = vmatpush3.bf16.msra.mxu0 %v2218_v22  ;;  %2103 = vmatprep.subr.bf16.mxu1 %v2260_v1 }
  0x6b   : > { %2091 = vmatprep.subr.bf16.mxu0 %v2260_v1  ;;  %2097 = vmatprep.mubr.msk.bf16.mxu0 %vm2261_vm0, %v2260_v1 }
  0x6c   : > { %2109 = vmatprep.mubr.msk.bf16.mxu1 %vm2261_vm0, %v2260_v1 }
  0x6d   : > { %2104 = vmatpush3.bf16.msra.mxu1 %v2221_v26 }
  0x6e   : > { %2092 = vmatpush3.bf16.msra.mxu0 %v2220_v25  ;;  %2105 = vmatprep.subr.bf16.mxu1 %v2260_v1 }
  0x6f   : > { %2093 = vmatprep.subr.bf16.mxu0 %v2260_v1 }
  0x71   : > { %2106 = vmatpush3.bf16.msra.mxu1 %v2223_v29 }
  0x72   : > { %2094 = vmatpush3.bf16.msra.mxu0 %v2222_v28  ;;  %2107 = vmatprep.subr.bf16.mxu1 %v2260_v1 }
  0x73   : > { %2095 = vmatprep.subr.bf16.mxu0 %v2260_v1 }
  0x75   : > { %2108 = vmatpush3.bf16.msra.mxu1 %v2225_v33 }
  0x76   : > { %2096 = vmatpush3.bf16.msra.mxu0 %v2224_v32  ;;  %2125 = vmatprep.subr.bf16.mxu1 %v2260_v1 }
  0x77   : > { %2113 = vmatprep.subr.bf16.mxu0 %v2260_v1 }
  0x78   : > { %2110 = vmatmul.mubr.msk.bf16.vlgmr.msra.gmra.mrb[24].mxu1 %vm252_vm1, %v1811_v36 }
  0x79   : > { %2098 = vmatmul.mubr.msk.bf16.vlgmr.msra.gmra.mrb[24].mxu0 %vm252_vm1, %v1244_v34  ;;  %2126 = vmatpush3.bf16.msra.mxu1 %v2228_v37 }
  0x7a   : > { %2114 = vmatpush3.bf16.msra.mxu0 %v2227_v35  ;;  %2127 = vmatprep.subr.bf16.mxu1 %v2260_v1 }
  0x7b   : > { %2115 = vmatprep.subr.bf16.mxu0 %v2260_v1  ;;  %2121 = vmatprep.mubr.msk.bf16.mxu0 %vm2261_vm0, %v2260_v1 }
  0x7c   : > { %2133 = vmatprep.mubr.msk.bf16.mxu1 %vm2261_vm0, %v2260_v1 }
  0x7d   : > { %2128 = vmatpush3.bf16.msra.mxu1 %v2230_v40 }
  0x7e   : > { %2116 = vmatpush3.bf16.msra.mxu0 %v2229_v38  ;;  %2129 = vmatprep.subr.bf16.mxu1 %v2260_v1 }
  0x7f   : > { %2117 = vmatprep.subr.bf16.mxu0 %v2260_v1 }
  0x81   : > { %2130 = vmatpush3.bf16.msra.mxu1 %v2232_v43 }
  0x82   : > { %2118 = vmatpush3.bf16.msra.mxu0 %v2231_v41  ;;  %2131 = vmatprep.subr.bf16.mxu1 %v2260_v1 }
  0x83   : > { %2119 = vmatprep.subr.bf16.mxu0 %v2260_v1 }
  0x85   : > { %2132 = vmatpush3.bf16.msra.mxu1 %v2234_v47 }
  0x86   : > { %2120 = vmatpush3.bf16.msra.mxu0 %v2233_v44 }
  0x88   : > { %2134 = vmatmul.mubr.msk.bf16.vlgmr.msra.gmra.mrb[28].mxu1 %vm252_vm1, %v1477_v49 }
  0x89   : > { %2122 = vmatmul.mubr.msk.bf16.vlgmr.msra.gmra.mrb[28].mxu0 %vm252_vm1, %v1832_v48 }
  0xeb   : > { %v357_v51 = vpop.f32.mrb[0].mxu1 }
  0xec   : > { %v290_v50 = vpop.f32.mrb[0].mxu0  ;;  %v1967_v54 = vpop.f32.mrb[1].mxu1 }
  0xed   : > { %v1955_v52 = vpop.f32.mrb[1].mxu0  ;;  %v358_v53 = vadd.f32 %v357_v51, %v290_v50  ;;  %v360_v56 = vpop.f32.mrb[2].mxu1 }
  0xee   : > { %v293_v55 = vpop.f32.mrb[2].mxu0  ;;  %v1968_v58 = vpop.f32.mrb[3].mxu1 }
  0xef   : > { %v1956_v57 = vpop.f32.mrb[3].mxu0 }
  0xfb   : > { %v525_v60 = vpop.f32.mrb[4].mxu1 }
  0xfc   : > { %v437_v59 = vpop.f32.mrb[4].mxu0  ;;  %v1991_v63 = vpop.f32.mrb[5].mxu1 }
  0xfd   : > { %v443_v1 = vadd.f32 %v437_v59, %v358_v53  ;;  %v1979_v61 = vpop.f32.mrb[5].mxu0  ;;  %v528_v3 = vpop.f32.mrb[6].mxu1 }
  0xfe   : > { %v440_v0 = vpop.f32.mrb[6].mxu0  ;;  %v1992_v5 = vpop.f32.mrb[7].mxu1 }
  0xff   : > { %v531_v2 = vadd.f32 %v525_v60, %v443_v1  ;;  %v1980_v4 = vpop.f32.mrb[7].mxu0 }
 0x101   : > { %v538_v6 = vadd.f32 %v2631_v62, %v531_v2 }
 0x103   : > { %vm539_vm2 = vcmp.gt.f32.partialorder %v538_v6, 0.0  ;;  %v540_v7 = vmul.f32 0.2, %v538_v6 }
 0x105   : > { %v541_v8 = vsel %vm539_vm2, %v538_v6, %v540_v7 }
 0x106   : > { %v542_v9 = vpack.c.bf16 %v541_v8, %v541_v8 }
 0x108   : > { %544 = vst.msk [vmem:[%s2638_s19] sm:$0x3] %vm543_vm3, %v542_v9 }
 0x10b   : > { %v701_v11 = vpop.f32.mrb[8].mxu1 }
 0x10c   : > { %v634_v10 = vpop.f32.mrb[8].mxu0  ;;  %v2015_v14 = vpop.f32.mrb[9].mxu1 }
 0x10d   : > { %v2003_v12 = vpop.f32.mrb[9].mxu0  ;;  %v702_v13 = vadd.f32 %v701_v11, %v634_v10  ;;  %v704_v16 = vpop.f32.mrb[10].mxu1 }
 0x10e   : > { %v637_v15 = vpop.f32.mrb[10].mxu0  ;;  %v2016_v18 = vpop.f32.mrb[11].mxu1 }
 0x10f   : > { %v2004_v17 = vpop.f32.mrb[11].mxu0 }
 0x11b   : > { %v867_v21 = vpop.f32.mrb[12].mxu1 }
 0x11c   : > { %v780_v19 = vpop.f32.mrb[12].mxu0  ;;  %v2039_v23 = vpop.f32.mrb[13].mxu1 }
 0x11d   : > { %v786_v20 = vadd.f32 %v780_v19, %v702_v13  ;;  %v2027_v22 = vpop.f32.mrb[13].mxu0  ;;  %v870_v26 = vpop.f32.mrb[14].mxu1 }
 0x11e   : > { %v783_v24 = vpop.f32.mrb[14].mxu0  ;;  %v2040_v28 = vpop.f32.mrb[15].mxu1 }
 0x11f   : > { %v873_v25 = vadd.f32 %v867_v21, %v786_v20  ;;  %v2028_v27 = vpop.f32.mrb[15].mxu0 }
 0x121   : > { %v874_v29 = vadd.f32 %v2631_v62, %v873_v25 }
 0x123   : > { %vm875_vm4 = vcmp.gt.f32.partialorder %v874_v29, 0.0  ;;  %v876_v30 = vmul.f32 0.2, %v874_v29 }
 0x125   : > { %v877_v31 = vsel %vm875_vm4, %v874_v29, %v876_v30 }
 0x126   : > { %v878_v32 = vpack.c.bf16 %v877_v31, %v877_v31 }
 0x128   : > { %1759 = vst.msk [vmem:[%s2638_s19 + $0x2] sm:$0x3] %vm543_vm3, %v878_v32 }
 0x12b   : > { %v1037_v34 = vpop.f32.mrb[16].mxu1 }
 0x12c   : > { %v970_v33 = vpop.f32.mrb[16].mxu0  ;;  %v2063_v37 = vpop.f32.mrb[17].mxu1 }
 0x12d   : > { %v2051_v35 = vpop.f32.mrb[17].mxu0  ;;  %v1038_v36 = vadd.f32 %v1037_v34, %v970_v33  ;;  %v1040_v39 = vpop.f32.mrb[18].mxu1 }
 0x12e   : > { %v973_v38 = vpop.f32.mrb[18].mxu0  ;;  %v2064_v41 = vpop.f32.mrb[19].mxu1 }
 0x12f   : > { %v2052_v40 = vpop.f32.mrb[19].mxu0 }
 0x13b   : > { %v1203_v44 = vpop.f32.mrb[20].mxu1 }
 0x13c   : > { %v1116_v42 = vpop.f32.mrb[20].mxu0  ;;  %v2087_v46 = vpop.f32.mrb[21].mxu1 }
 0x13d   : > { %v1122_v43 = vadd.f32 %v1116_v42, %v1038_v36  ;;  %v2075_v45 = vpop.f32.mrb[21].mxu0  ;;  %v1206_v49 = vpop.f32.mrb[22].mxu1 }
 0x13e   : > { %v1119_v47 = vpop.f32.mrb[22].mxu0  ;;  %v2088_v51 = vpop.f32.mrb[23].mxu1 }
 0x13f   : > { %v1209_v48 = vadd.f32 %v1203_v44, %v1122_v43  ;;  %v2076_v50 = vpop.f32.mrb[23].mxu0 }
 0x141   : > { %v1210_v52 = vadd.f32 %v2631_v62, %v1209_v48 }
 0x143   : > { %vm1211_vm5 = vcmp.gt.f32.partialorder %v1210_v52, 0.0  ;;  %v1212_v53 = vmul.f32 0.2, %v1210_v52 }
 0x145   : > { %v1213_v54 = vsel %vm1211_vm5, %v1210_v52, %v1212_v53 }
 0x146   : > { %v1214_v55 = vpack.c.bf16 %v1213_v54, %v1213_v54 }
 0x148   : > { %1810 = vst.msk [vmem:[%s2638_s19 + $0x4] sm:$0x3] %vm543_vm3, %v1214_v55 }
 0x14b   : > { %v1373_v57 = vpop.f32.mrb[24].mxu1 }
 0x14c   : > { %v1306_v56 = vpop.f32.mrb[24].mxu0  ;;  %v2111_v1 = vpop.f32.mrb[25].mxu1 }
 0x14d   : > { %v2099_v58 = vpop.f32.mrb[25].mxu0  ;;  %v1374_v59 = vadd.f32 %v1373_v57, %v1306_v56  ;;  %v1376_v61 = vpop.f32.mrb[26].mxu1 }
 0x14e   : > { %v1309_v60 = vpop.f32.mrb[26].mxu0  ;;  %v2112_v0 = vpop.f32.mrb[27].mxu1 }
 0x14f   : > { %v2100_v63 = vpop.f32.mrb[27].mxu0 }
 0x15b   : > { %v1539_v4 = vpop.f32.mrb[28].mxu1 }
 0x15c   : > { %v1452_v2 = vpop.f32.mrb[28].mxu0  ;;  %v2135_v6 = vpop.f32.mrb[29].mxu1 }
 0x15d   : > { %v1458_v3 = vadd.f32 %v1452_v2, %v1374_v59  ;;  %v2123_v5 = vpop.f32.mrb[29].mxu0  ;;  %v1542_v9 = vpop.f32.mrb[30].mxu1 }
 0x15e   : > { %v1455_v7 = vpop.f32.mrb[30].mxu0  ;;  %v2136_v11 = vpop.f32.mrb[31].mxu1 }
 0x15f   : > { %v1545_v8 = vadd.f32 %v1539_v4, %v1458_v3  ;;  %v2124_v10 = vpop.f32.mrb[31].mxu0 }
 0x161   : > { %v1546_v12 = vadd.f32 %v2631_v62, %v1545_v8 }
 0x163   : > { %vm1547_vm6 = vcmp.gt.f32.partialorder %v1546_v12, 0.0  ;;  %v1548_v13 = vmul.f32 0.2, %v1546_v12 }
 0x165   : > { %v1549_v14 = vsel %vm1547_vm6, %v1546_v12, %v1548_v13 }
 0x166   : > { %v1550_v15 = vpack.c.bf16 %v1549_v14, %v1549_v14 }
 0x168   : > { %1861 = vst.msk [vmem:[%s2638_s19 + $0x6] sm:$0x3] %vm543_vm3, %v1550_v15 }
 0x169 PF: > { %s13_s14 = sadd.s32 1, %s2258_s14   ;;  %s2664_s12 = smov %s2254_s13 }
 0x16a   : > { %p10_p5 = scmp.ge.s32.totalorder %s13_s14, 4   ;;  %s2665_s13 = smov %s2667_s15 }
 0x16c   :  { %12 = sbr.rel (!%p10_p5) target bundleno = 2 (0x2), region = 73 }

// kernel: domain_classifier_forward.9
= control target key start
LH: loop header
LB: loop body
LE: loop exit
PB: predicated region body
PF: predicated region fallthrough
CT: control target
= control target key end

     0   :  { %s432_s14 = smov 0   ;;  %s434_s15 = smov 0   ;;  %s481_s0 = inlined_call_operand.vmem [shape: bf16[2,2,2,256], index: 0, kind: input, shape index: {}]   ;;  %s482_s1 = inlined_call_operand.vmem [shape: f32[4,1,256], index: 1, kind: input, shape index: {}]   ;;  %s483_s2 = inlined_call_operand.<no memory space> [shape: f32[1,1], index: 2, kind: input, shape index: {}]   ;;  %s484_s3 = inlined_call_operand.vmem [shape: f32[2,1,1,1], index: 3, kind: output, shape index: {}]  }
   0x1   :  { %v8_v0 = vstv %s483_s2  ;;  %s436_s16 = smov 0  }
   0x2   :  { %9 = vst [vmem:[#allocation2] sm:$0x1] %v8_v0 }
   0x3 LB: > { %s27_s2 = sadd.s32 1, %s402_s15  ;;  %p349_p0 = scmp.ge.s32.totalorder %s406_s16, 1  ;;  %s406_s16 = sphi %s436_s16, %s15_s16   ;;  %s402_s15 = sphi %s434_s15, %s486_s15   ;;  %s398_s14 = sphi %s432_s14, %s485_s14  }
   0x4   : > { %p29_p1 = scmp.ge.s32.totalorder %s27_s2, 2  ;;  %p152_p2 = scmp.lt.s32.totalorder %s406_s16, 3 }
   0x6   : > { %s488_s2 = smov (%p29_p1, %s27_s2), 0  ;;  %p153_p3 = pnand %p349_p0, %p152_p2 }
   0x7   : > { %p176_p4 = scmp.lt.s32.totalorder (!%p153_p3), %s398_s14, 1  ;;  %v195_v1 = vlaneseq (!%p153_p3)  ;;  %v408_v2 = vmov (!%p153_p3), 857870592   ;;  %v190_v6 = vld [vmem:[%s482_s1] sm:$0x3] (!%p153_p3)  ;;  %vm265_vm0 = vcmask (!%p153_p3), 1040384  }
   0x8   : > { %156 = sbr.rel (%p153_p3) target bundleno = 181 (0xb5), region = 32  ;;  %v193_v3 = vunpack.c.l.s4 (!%p153_p3), %v408_v2  ;;  %v351_v7 = vld [vmem:[%s482_s1 + $0x2] sm:$0x3] (!%p153_p3)  ;;  %v354_v9 = vld [vmem:[%s482_s1 + $0x4] sm:$0x3] (!%p153_p3)  ;;  %vm273_vm1 = vcmask (!%p153_p3), 0  }
   0x9   : > { %v196_v4 = vshrl.u32 (!%p153_p3), %v195_v1, 7  ;;  %v355_v10 = vld [vmem:[%s482_s1 + $0x6] sm:$0x3] (!%p153_p3)  ;;  %v271_v35 = vld [vmem:[#allocation2] sm:$0x1] (!%p153_p3) }
   0xa   : > { %v194_v5 = vunpack.c.0.s8 (!%p153_p3), %v193_v3 }
   0xb   : > { %v257_v27 = vsub.s32 (!%p153_p3), 0, %v196_v4  ;;  %v261_v28 = vsub.s32 (!%p153_p3), 2, %v196_v4 }
   0xc   : > { %v197_v8 = vsub.s32 (!%p153_p3), %v194_v5, %v196_v4 }
   0xe   : > { %v198_v14 = vrot.slane (!%p153_p3), %v190_v6, %v197_v8  ;;  %v211_v15 = vrot.slane (!%p153_p3), %v351_v7, %v197_v8  ;;  %v233_v17 = vrot.slane (!%p153_p3), %v354_v9, %v197_v8  ;;  %v246_v18 = vrot.slane (!%p153_p3), %v355_v10, %v197_v8 }
   0xf   : > { %s490_s14 = smov (!%p176_p4, %s398_s14), 1 }
  0x10   : > { %s350_s17 = sshll.u32 %s490_s14, 2  ;;  %s185_s4 = scalar_lea.vmem %s484_s3, %s490_s14 }
  0x11   : > { %s179_s24 = scalar_lea.vmem %s481_s0, %s350_s17 }
  0x12   : > { %v188_v11 = vld [vmem:[%s179_s24] sm:$0x3]  ;;  %v353_v12 = vld [vmem:[%s179_s24 + $0x2] sm:$0x3] }
  0x13   : > { %v189_v13 = vunpack.c.l.bf16 %v188_v11  ;;  %v223_v16 = vunpack.c.l.bf16 %v353_v12 }
  0x15   : > { %v200_v19 = vmul.f32 %v198_v14, %v189_v13  ;;  %v213_v20 = vmul.f32 %v211_v15, %v189_v13  ;;  %v248_v21 = vmul.f32 %v246_v18, %v223_v16  ;;  %v235_v23 = vmul.f32 %v233_v17, %v223_v16 }
  0x17   : > { %v352_v22 = vrot.slane %v213_v20, 9  ;;  %v356_v25 = vrot.slane %v248_v21, 9 }
  0x19   : > { %v218_v24 = vadd.f32 %v352_v22, %v200_v19 }
  0x1b   : > { %v236_v26 = vadd.f32 %v235_v23, %v218_v24 }
  0x1d   : > { %v253_v29 = vadd.f32 %v356_v25, %v236_v26 }
  0x1f   : > { %v258_v30 = vrot.slane %v253_v29, %v257_v27  ;;  %v262_v31 = vrot.slane %v253_v29, %v261_v28 }
  0x21   : > { %v266_v32 = vsel %vm265_vm0, %v258_v30, 0.0  ;;  %v267_v33 = vsel %vm265_vm0, %v262_v31, 0.0 }
  0x22   : > { %v268_v34 = vadd.f32 %v267_v33, %v266_v32 }
  0x24   : > { %269 = vadd.xlane.f32.xlu0 %v268_v34 }
  0xb1   : > { %v270_v36 = vpop.xlane.xlu0 %269 }
  0xb2   : > { %v272_v37 = vadd.f32 %v271_v35, %v270_v36 }
  0xb4   : > { %274 = vst.msk [vmem:[%s185_s4] sm:$0x1] %vm273_vm1, %v272_v37 }
  0xb5 PF: > { %s15_s16 = sadd.s32 1, %s406_s16   ;;  %s485_s14 = smov %s402_s15 }
  0xb6   : > { %p12_p5 = scmp.ge.s32.totalorder %s15_s16, 4   ;;  %s486_s15 = smov %s488_s2 }
  0xb8   :  { %14 = sbr.rel (!%p12_p5) target bundleno = 3 (0x3), region = 67 }

// kernel: domain_classifier_forward.8
= control target key start
LH: loop header
LB: loop body
LE: loop exit
PB: predicated region body
PF: predicated region fallthrough
CT: control target
= control target key end

     0   :  { %s1769_s12 = smov 0   ;;  %s1771_s13 = smov 0   ;;  %s2092_s0 = inlined_call_operand.vmem [shape: bf16[2,3,3,128], index: 0, kind: input, shape index: {}]   ;;  %s2093_s1 = inlined_call_operand.vmem [shape: bf16[4,128,64], index: 1, kind: input, shape index: {}]   ;;  %s2094_s2 = inlined_call_operand.vmem [shape: f32[1,1,64], index: 2, kind: input, shape index: {}]   ;;  %s2095_s3 = inlined_call_operand.vmem [shape: bf16[2,2,2,64], index: 3, kind: output, shape index: {}]  }
   0x1   :  { %s1773_s14 = smov 0  }
   0x2 LB: > { %s25_s15 = sadd.s32 1, %s1741_s13  ;;  %p1223_p0 = scmp.ge.s32.totalorder %s1745_s14, 1  ;;  %s1745_s14 = sphi %s1773_s14, %s13_s14   ;;  %s1741_s13 = sphi %s1771_s13, %s2097_s13   ;;  %s1737_s12 = sphi %s1769_s12, %s2096_s12  }
   0x3   : > { %p27_p1 = scmp.ge.s32.totalorder %s25_s15, 2  ;;  %p151_p2 = scmp.lt.s32.totalorder %s1745_s14, 3 }
   0x5   : > { %s2099_s15 = smov (%p27_p1, %s25_s15), 0  ;;  %p152_p3 = pnand %p1223_p0, %p151_p2 }
   0x6   : > { %v1659_v0 = vld [vmem:[%s2093_s1 + $0x40] sm:$0xff] (!%p152_p3)   ;;  %v1747_v1 = vmov (!%p152_p3), 0.0   ;;  %v1661_v3 = vld [vmem:[%s2093_s1 + $0x48] sm:$0xff] (!%p152_p3)   ;;  %vm1748_vm0 = vmmov (!%p152_p3), 0   ;;  %p178_p4 = scmp.lt.s32.totalorder (!%p152_p3), %s1737_s12, 1  ;;  %v1663_v5 = vld [vmem:[%s2093_s1 + $0x50] sm:$0xff] (!%p152_p3)  }
   0x7   : > { %155 = sbr.rel (%p152_p3) target bundleno = 359 (0x167), region = 32  ;;  %1472 = vmatprep.subr.bf16.mxu0 (!%p152_p3), %v1747_v1  ;;  %1492 = vmatprep.subr.bf16.mxu1 (!%p152_p3), %v1747_v1  ;;  %v1660_v2 = vld [vmem:[%s2093_s1] sm:$0xff] (!%p152_p3)   ;;  %v1662_v4 = vld [vmem:[%s2093_s1 + $0x8] sm:$0xff] (!%p152_p3)   ;;  %v1664_v6 = vld [vmem:[%s2093_s1 + $0x10] sm:$0xff] (!%p152_p3)   ;;  %vm668_vm2 = vcmask (!%p152_p3), 516096  }
   0x8   : > { %1473 = vmatpush3.bf16.msra.mxu0 (!%p152_p3), %v1659_v0  ;;  %1488 = vmatprep.mubr.msk.bf16.mxu0 (!%p152_p3), %vm1748_vm0, %v1747_v1  ;;  %v1665_v7 = vld [vmem:[%s2093_s1 + $0x58] sm:$0xff] (!%p152_p3)   ;;  %v1667_v9 = vld [vmem:[%s2093_s1 + $0x60] sm:$0xff] (!%p152_p3)   ;;  %v1669_v12 = vld [vmem:[%s2093_s1 + $0x68] sm:$0xff] (!%p152_p3)  }
   0x9   : > { %1493 = vmatpush3.bf16.msra.mxu1 (!%p152_p3), %v1660_v2  ;;  %1474 = vmatprep.subr.bf16.mxu0 (!%p152_p3), %v1747_v1  ;;  %v1666_v8 = vld [vmem:[%s2093_s1 + $0x18] sm:$0xff] (!%p152_p3)   ;;  %v1668_v10 = vld [vmem:[%s2093_s1 + $0x20] sm:$0xff] (!%p152_p3)   ;;  %v1670_v13 = vld [vmem:[%s2093_s1 + $0x28] sm:$0xff] (!%p152_p3)  }
   0xa   : > { %1494 = vmatprep.subr.bf16.mxu1 (!%p152_p3), %v1747_v1  ;;  %1508 = vmatprep.mubr.msk.bf16.mxu1 (!%p152_p3), %vm1748_vm0, %v1747_v1  ;;  %v1671_v15 = vld [vmem:[%s2093_s1 + $0x70] sm:$0xff] (!%p152_p3)   ;;  %v1673_v19 = vld [vmem:[%s2093_s1 + $0x78] sm:$0xff] (!%p152_p3)   ;;  %v1675_v23 = vld [vmem:[%s2093_s1 + $0x80] sm:$0xff] (!%p152_p3)  }
   0xb   : > { %v1672_v16 = vld [vmem:[%s2093_s1 + $0x30] sm:$0xff] (!%p152_p3)   ;;  %v1674_v20 = vld [vmem:[%s2093_s1 + $0x38] sm:$0xff] (!%p152_p3)   ;;  %v1676_v24 = vld [vmem:[%s2093_s1 + $0xc0] sm:$0xff] (!%p152_p3)  }
   0xc   : > { %1475 = vmatpush3.bf16.msra.mxu0 (!%p152_p3), %v1661_v3  ;;  %v1677_v25 = vld [vmem:[%s2093_s1 + $0x88] sm:$0xff] (!%p152_p3)   ;;  %v1679_v27 = vld [vmem:[%s2093_s1 + $0x90] sm:$0xff] (!%p152_p3)   ;;  %v1681_v29 = vld [vmem:[%s2093_s1 + $0x98] sm:$0xff] (!%p152_p3)  }
   0xd   : > { %1495 = vmatpush3.bf16.msra.mxu1 (!%p152_p3), %v1662_v4  ;;  %1476 = vmatprep.subr.bf16.mxu0 (!%p152_p3), %v1747_v1  ;;  %v1678_v26 = vld [vmem:[%s2093_s1 + $0xc8] sm:$0xff] (!%p152_p3)   ;;  %v1680_v28 = vld [vmem:[%s2093_s1 + $0xd0] sm:$0xff] (!%p152_p3)   ;;  %v1682_v30 = vld [vmem:[%s2093_s1 + $0xd8] sm:$0xff] (!%p152_p3)  }
   0xe   : > { %s2101_s12 = smov (!%p178_p4, %s1737_s12), 1  ;;  %1496 = vmatprep.subr.bf16.mxu1 %v1747_v1  ;;  %v1683_v31 = vld [vmem:[%s2093_s1 + $0xa0] sm:$0xff]   ;;  %v1685_v33 = vld [vmem:[%s2093_s1 + $0xa8] sm:$0xff]   ;;  %v1687_v36 = vld [vmem:[%s2093_s1 + $0xb0] sm:$0xff]  }
   0xf   : > { %s1632_s28 = smul.u32 6, %s2101_s12  ;;  %v1684_v32 = vld [vmem:[%s2093_s1 + $0xe0] sm:$0xff]   ;;  %v1686_v35 = vld [vmem:[%s2093_s1 + $0xe8] sm:$0xff]   ;;  %v1688_v38 = vld [vmem:[%s2093_s1 + $0xf0] sm:$0xff]   ;;  %s1225_s16 = sshll.u32 %s2101_s12, 1 }
  0x10   : > { %1477 = vmatpush3.bf16.msra.mxu0 %v1663_v5  ;;  %v1689_v39 = vld [vmem:[%s2093_s1 + $0xb8] sm:$0xff]   ;;  %v1691_v45 = vld [vmem:[%s2093_s1 + $0x40] sm:$0xff]   ;;  %v1693_v47 = vld [vmem:[%s2093_s1 + $0x48] sm:$0xff]   ;;  %s190_s19 = scalar_lea.vmem %s2095_s3, %s1225_s16 }
  0x11   : > { %1497 = vmatpush3.bf16.msra.mxu1 %v1664_v6  ;;  %1478 = vmatprep.subr.bf16.mxu0 %v1747_v1  ;;  %s1829_s8 = scalar_lea.vmem %s2092_s0, %s1632_s28  ;;  %v1690_v42 = vld [vmem:[%s2093_s1 + $0xf8] sm:$0xff]   ;;  %v1692_v46 = vld [vmem:[%s2093_s1] sm:$0xff]   ;;  %v1694_v48 = vld [vmem:[%s2093_s1 + $0x8] sm:$0xff]  }
  0x12   : > { %1498 = vmatprep.subr.bf16.mxu1 %v1747_v1  ;;  %v1242_v11 = vld.sshfl [vmem:[%s1829_s8] sm:$0x3 pattern:$0x76325410]  ;;  %v1259_v43 = vld [vmem:[%s1829_s8 + $0x2] sm:$0x1] }
  0x13   : > { %v243_v14 = vshll.u32 %v1242_v11, 16  ;;  %v241_v17 = vshrl.u32 %v1242_v11, 16  ;;  %v197_v22 = vld [vmem:[%s1829_s8] sm:$0x1]  ;;  %v1695_v49 = vld [vmem:[%s2093_s1 + $0x50] sm:$0xff]   ;;  %v1697_v51 = vld [vmem:[%s2093_s1 + $0x58] sm:$0xff]  }
  0x14   : > { %1479 = vmatpush3.bf16.msra.mxu0 %v1665_v7  ;;  %v1301_v34 = vld.sshfl [vmem:[%s1829_s8 + $0x2] sm:$0x3 pattern:$0x76325410]  ;;  %v1696_v50 = vld [vmem:[%s2093_s1 + $0x10] sm:$0xff]   ;;  %v1698_v52 = vld [vmem:[%s2093_s1 + $0x18] sm:$0xff]  }
  0x15   : > { %1499 = vmatpush3.bf16.msra.mxu1 %v1666_v8  ;;  %1480 = vmatprep.subr.bf16.mxu0 %v1747_v1  ;;  %v245_v18 = vrot.slane %v243_v14, 1  ;;  %v563_v37 = vshll.u32 %v1301_v34, 16  ;;  %v561_v40 = vshrl.u32 %v1301_v34, 16  ;;  %v1699_v53 = vld [vmem:[%s2093_s1 + $0x60] sm:$0xff]   ;;  %v1701_v55 = vld [vmem:[%s2093_s1 + $0x68] sm:$0xff]   ;;  %v1703_v57 = vld [vmem:[%s2093_s1 + $0x70] sm:$0xff]  }
  0x16   : > { %1500 = vmatprep.subr.bf16.mxu1 %v1747_v1  ;;  %v1700_v54 = vld [vmem:[%s2093_s1 + $0x20] sm:$0xff]   ;;  %v1702_v56 = vld [vmem:[%s2093_s1 + $0x28] sm:$0xff]   ;;  %v1704_v58 = vld [vmem:[%s2093_s1 + $0x30] sm:$0xff]  }
  0x17   : > { %v246_v21 = vor.u32 %v245_v18, %v241_v17  ;;  %v565_v41 = vrot.slane %v563_v37, 1  ;;  %v1705_v59 = vld [vmem:[%s2093_s1 + $0x78] sm:$0xff]   ;;  %v1707_v61 = vld [vmem:[%s2093_s1 + $0x80] sm:$0xff]   ;;  %v1709_v0 = vld [vmem:[%s2093_s1 + $0x88] sm:$0xff]  }
  0x18   : > { %1481 = vmatpush3.bf16.msra.mxu0 %v1667_v9  ;;  %v1706_v60 = vld [vmem:[%s2093_s1 + $0x38] sm:$0xff]   ;;  %v1311_v62 = vld [vmem:[%s1829_s8 + $0x2] sm:$0x1]  ;;  %v1710_v2 = vld [vmem:[%s2093_s1 + $0xc8] sm:$0xff]  }
  0x19   : > { %1501 = vmatpush3.bf16.msra.mxu1 %v1668_v10  ;;  %1482 = vmatprep.subr.bf16.mxu0 %v1747_v1  ;;  %v566_v44 = vor.u32 %v565_v41, %v561_v40  ;;  %v1708_v63 = vld [vmem:[%s2093_s1 + $0xc0] sm:$0xff]   ;;  %v1711_v3 = vld [vmem:[%s2093_s1 + $0x90] sm:$0xff]   ;;  %v1713_v5 = vld [vmem:[%s2093_s1 + $0x98] sm:$0xff]  }
  0x1a   : > { %1502 = vmatprep.subr.bf16.mxu1 %v1747_v1  ;;  %v1712_v4 = vld [vmem:[%s2093_s1 + $0xd0] sm:$0xff]   ;;  %v1714_v6 = vld [vmem:[%s2093_s1 + $0xd8] sm:$0xff]   ;;  %v1715_v7 = vld [vmem:[%s2093_s1 + $0xa0] sm:$0xff]  }
  0x1b   : > { %v1716_v8 = vld [vmem:[%s2093_s1 + $0xe0] sm:$0xff]   ;;  %v1717_v9 = vld [vmem:[%s2093_s1 + $0xa8] sm:$0xff]   ;;  %v1720_v14 = vld [vmem:[%s2093_s1 + $0xf0] sm:$0xff]  }
  0x1c   : > { %1483 = vmatpush3.bf16.msra.mxu0 %v1669_v12  ;;  %v1718_v10 = vld [vmem:[%s2093_s1 + $0xe8] sm:$0xff]   ;;  %v1388_v11 = vld.sshfl [vmem:[%s1829_s8 + $0x4] sm:$0x3 pattern:$0x76325410]  ;;  %v1719_v12 = vld [vmem:[%s2093_s1 + $0xb0] sm:$0xff]  }
  0x1d   : > { %1503 = vmatpush3.bf16.msra.mxu1 %v1670_v13  ;;  %1484 = vmatprep.subr.bf16.mxu0 %v1747_v1  ;;  %v1033_v13 = vshll.u32 %v1388_v11, 16  ;;  %v1722_v18 = vld [vmem:[%s2093_s1 + $0xf8] sm:$0xff]  }
  0x1e   : > { %1504 = vmatprep.subr.bf16.mxu1 %v1747_v1 }
  0x1f   : > { %v1035_v17 = vrot.slane %v1033_v13, 1 }
  0x20   : > { %1485 = vmatpush3.bf16.msra.mxu0 %v1671_v15  ;;  %v1721_v15 = vld [vmem:[%s2093_s1 + $0xb8] sm:$0xff]  }
  0x21   : > { %1505 = vmatpush3.bf16.msra.mxu1 %v1672_v16  ;;  %1486 = vmatprep.subr.bf16.mxu0 %v1747_v1  ;;  %v1031_v16 = vshrl.u32 %v1388_v11, 16 }
  0x22   : > { %1506 = vmatprep.subr.bf16.mxu1 %v1747_v1 }
  0x24   : > { %1487 = vmatpush3.bf16.msra.mxu0 %v1673_v19  ;;  %v1346_v19 = vld [vmem:[%s1829_s8 + $0x4] sm:$0x1] }
  0x25   : > { %1507 = vmatpush3.bf16.msra.mxu1 %v1674_v20  ;;  %1512 = vmatprep.subr.bf16.mxu0 %v1747_v1  ;;  %v1036_v20 = vor.u32 %v1035_v17, %v1031_v16 }
  0x26   : > { %1532 = vmatprep.subr.bf16.mxu1 %v1747_v1 }
  0x27   : > { %1489 = vmatmul.mubr.bf16.vlgmr.msra.gmra.mrb[0].mxu0 %v246_v21 }
  0x28   : > { %1509 = vmatmul.mubr.bf16.vlgmr.msra.gmra.mrb[0].mxu1 %v197_v22  ;;  %1513 = vmatpush3.bf16.msra.mxu0 %v1675_v23 }
  0x29   : > { %1533 = vmatpush3.bf16.msra.mxu1 %v1676_v24  ;;  %1514 = vmatprep.subr.bf16.mxu0 %v1747_v1 }
  0x2a   : > { %1534 = vmatprep.subr.bf16.mxu1 %v1747_v1  ;;  %1528 = vmatprep.mubr.msk.bf16.mxu0 %vm1748_vm0, %v1747_v1 }
  0x2b   : > { %1548 = vmatprep.mubr.msk.bf16.mxu1 %vm1748_vm0, %v1747_v1 }
  0x2c   : > { %1515 = vmatpush3.bf16.msra.mxu0 %v1677_v25 }
  0x2d   : > { %1535 = vmatpush3.bf16.msra.mxu1 %v1678_v26  ;;  %1516 = vmatprep.subr.bf16.mxu0 %v1747_v1 }
  0x2e   : > { %1536 = vmatprep.subr.bf16.mxu1 %v1747_v1 }
  0x30   : > { %1517 = vmatpush3.bf16.msra.mxu0 %v1679_v27 }
  0x31   : > { %1537 = vmatpush3.bf16.msra.mxu1 %v1680_v28  ;;  %1518 = vmatprep.subr.bf16.mxu0 %v1747_v1 }
  0x32   : > { %1538 = vmatprep.subr.bf16.mxu1 %v1747_v1 }
  0x34   : > { %1519 = vmatpush3.bf16.msra.mxu0 %v1681_v29 }
  0x35   : > { %1539 = vmatpush3.bf16.msra.mxu1 %v1682_v30  ;;  %1520 = vmatprep.subr.bf16.mxu0 %v1747_v1 }
  0x36   : > { %1540 = vmatprep.subr.bf16.mxu1 %v1747_v1 }
  0x38   : > { %1521 = vmatpush3.bf16.msra.mxu0 %v1683_v31 }
  0x39   : > { %1541 = vmatpush3.bf16.msra.mxu1 %v1684_v32  ;;  %1522 = vmatprep.subr.bf16.mxu0 %v1747_v1 }
  0x3a   : > { %1542 = vmatprep.subr.bf16.mxu1 %v1747_v1 }
  0x3c   : > { %1523 = vmatpush3.bf16.msra.mxu0 %v1685_v33  ;;  %v1310_v33 = vld [vmem:[%s2094_s2] ss:$0 sm:$0xff] }
  0x3d   : > { %1543 = vmatpush3.bf16.msra.mxu1 %v1686_v35  ;;  %1524 = vmatprep.subr.bf16.mxu0 %v1747_v1 }
  0x3e   : > { %1544 = vmatprep.subr.bf16.mxu1 %v1747_v1 }
  0x40   : > { %1525 = vmatpush3.bf16.msra.mxu0 %v1687_v36 }
  0x41   : > { %1545 = vmatpush3.bf16.msra.mxu1 %v1688_v38  ;;  %1526 = vmatprep.subr.bf16.mxu0 %v1747_v1 }
  0x42   : > { %1546 = vmatprep.subr.bf16.mxu1 %v1747_v1 }
  0x44   : > { %1527 = vmatpush3.bf16.msra.mxu0 %v1689_v39 }
  0x45   : > { %1547 = vmatpush3.bf16.msra.mxu1 %v1690_v42  ;;  %1552 = vmatprep.subr.bf16.mxu0 %v1747_v1 }
  0x46   : > { %1572 = vmatprep.subr.bf16.mxu1 %v1747_v1 }
  0x47   : > { %1529 = vmatmul.mubr.bf16.vlgmr.msra.gmra.mrb[4].mxu0 %v1259_v43 }
  0x48   : > { %1549 = vmatmul.mubr.bf16.vlgmr.msra.gmra.mrb[4].mxu1 %v566_v44  ;;  %1553 = vmatpush3.bf16.msra.mxu0 %v1691_v45 }
  0x49   : > { %1573 = vmatpush3.bf16.msra.mxu1 %v1692_v46  ;;  %1554 = vmatprep.subr.bf16.mxu0 %v1747_v1 }
  0x4a   : > { %1574 = vmatprep.subr.bf16.mxu1 %v1747_v1  ;;  %1568 = vmatprep.mubr.msk.bf16.mxu0 %vm1748_vm0, %v1747_v1 }
  0x4b   : > { %1588 = vmatprep.mubr.msk.bf16.mxu1 %vm1748_vm0, %v1747_v1 }
  0x4c   : > { %1555 = vmatpush3.bf16.msra.mxu0 %v1693_v47 }
  0x4d   : > { %1575 = vmatpush3.bf16.msra.mxu1 %v1694_v48  ;;  %1556 = vmatprep.subr.bf16.mxu0 %v1747_v1 }
  0x4e   : > { %1576 = vmatprep.subr.bf16.mxu1 %v1747_v1 }
  0x50   : > { %1557 = vmatpush3.bf16.msra.mxu0 %v1695_v49 }
  0x51   : > { %1577 = vmatpush3.bf16.msra.mxu1 %v1696_v50  ;;  %1558 = vmatprep.subr.bf16.mxu0 %v1747_v1 }
  0x52   : > { %1578 = vmatprep.subr.bf16.mxu1 %v1747_v1 }
  0x54   : > { %1559 = vmatpush3.bf16.msra.mxu0 %v1697_v51 }
  0x55   : > { %1579 = vmatpush3.bf16.msra.mxu1 %v1698_v52  ;;  %1560 = vmatprep.subr.bf16.mxu0 %v1747_v1 }
  0x56   : > { %1580 = vmatprep.subr.bf16.mxu1 %v1747_v1 }
  0x58   : > { %1561 = vmatpush3.bf16.msra.mxu0 %v1699_v53 }
  0x59   : > { %1581 = vmatpush3.bf16.msra.mxu1 %v1700_v54  ;;  %1562 = vmatprep.subr.bf16.mxu0 %v1747_v1 }
  0x5a   : > { %1582 = vmatprep.subr.bf16.mxu1 %v1747_v1 }
  0x5c   : > { %1563 = vmatpush3.bf16.msra.mxu0 %v1701_v55 }
  0x5d   : > { %1583 = vmatpush3.bf16.msra.mxu1 %v1702_v56  ;;  %1564 = vmatprep.subr.bf16.mxu0 %v1747_v1 }
  0x5e   : > { %1584 = vmatprep.subr.bf16.mxu1 %v1747_v1 }
  0x60   : > { %1565 = vmatpush3.bf16.msra.mxu0 %v1703_v57 }
  0x61   : > { %1585 = vmatpush3.bf16.msra.mxu1 %v1704_v58  ;;  %1566 = vmatprep.subr.bf16.mxu0 %v1747_v1 }
  0x62   : > { %1586 = vmatprep.subr.bf16.mxu1 %v1747_v1 }
  0x64   : > { %1567 = vmatpush3.bf16.msra.mxu0 %v1705_v59 }
  0x65   : > { %1587 = vmatpush3.bf16.msra.mxu1 %v1706_v60  ;;  %1592 = vmatprep.subr.bf16.mxu0 %v1747_v1 }
  0x66   : > { %1612 = vmatprep.subr.bf16.mxu1 %v1747_v1 }
  0x67   : > { %1569 = vmatmul.mubr.bf16.vlgmr.msra.gmra.mrb[8].mxu0 %v566_v44 }
  0x68   : > { %1589 = vmatmul.mubr.bf16.vlgmr.msra.gmra.mrb[8].mxu1 %v1311_v62  ;;  %1593 = vmatpush3.bf16.msra.mxu0 %v1707_v61 }
  0x69   : > { %1613 = vmatpush3.bf16.msra.mxu1 %v1708_v63  ;;  %1594 = vmatprep.subr.bf16.mxu0 %v1747_v1 }
  0x6a   : > { %1614 = vmatprep.subr.bf16.mxu1 %v1747_v1  ;;  %1608 = vmatprep.mubr.msk.bf16.mxu0 %vm1748_vm0, %v1747_v1 }
  0x6b   : > { %1628 = vmatprep.mubr.msk.bf16.mxu1 %vm1748_vm0, %v1747_v1 }
  0x6c   : > { %1595 = vmatpush3.bf16.msra.mxu0 %v1709_v0 }
  0x6d   : > { %1615 = vmatpush3.bf16.msra.mxu1 %v1710_v2  ;;  %1596 = vmatprep.subr.bf16.mxu0 %v1747_v1 }
  0x6e   : > { %1616 = vmatprep.subr.bf16.mxu1 %v1747_v1 }
  0x70   : > { %1597 = vmatpush3.bf16.msra.mxu0 %v1711_v3 }
  0x71   : > { %1617 = vmatpush3.bf16.msra.mxu1 %v1712_v4  ;;  %1598 = vmatprep.subr.bf16.mxu0 %v1747_v1 }
  0x72   : > { %1618 = vmatprep.subr.bf16.mxu1 %v1747_v1 }
  0x74   : > { %1599 = vmatpush3.bf16.msra.mxu0 %v1713_v5 }
  0x75   : > { %1619 = vmatpush3.bf16.msra.mxu1 %v1714_v6  ;;  %1600 = vmatprep.subr.bf16.mxu0 %v1747_v1 }
  0x76   : > { %1620 = vmatprep.subr.bf16.mxu1 %v1747_v1 }
  0x78   : > { %1601 = vmatpush3.bf16.msra.mxu0 %v1715_v7 }
  0x79   : > { %1621 = vmatpush3.bf16.msra.mxu1 %v1716_v8  ;;  %1602 = vmatprep.subr.bf16.mxu0 %v1747_v1 }
  0x7a   : > { %1622 = vmatprep.subr.bf16.mxu1 %v1747_v1 }
  0x7c   : > { %1603 = vmatpush3.bf16.msra.mxu0 %v1717_v9 }
  0x7d   : > { %1623 = vmatpush3.bf16.msra.mxu1 %v1718_v10  ;;  %1604 = vmatprep.subr.bf16.mxu0 %v1747_v1 }
  0x7e   : > { %1624 = vmatprep.subr.bf16.mxu1 %v1747_v1 }
  0x80   : > { %1605 = vmatpush3.bf16.msra.mxu0 %v1719_v12 }
  0x81   : > { %1625 = vmatpush3.bf16.msra.mxu1 %v1720_v14  ;;  %1606 = vmatprep.subr.bf16.mxu0 %v1747_v1 }
  0x82   : > { %1626 = vmatprep.subr.bf16.mxu1 %v1747_v1 }
  0x84   : > { %1607 = vmatpush3.bf16.msra.mxu0 %v1721_v15 }
  0x85   : > { %1627 = vmatpush3.bf16.msra.mxu1 %v1722_v18 }
  0x87   : > { %1609 = vmatmul.mubr.bf16.vlgmr.msra.gmra.mrb[12].mxu0 %v1346_v19 }
  0x88   : > { %1629 = vmatmul.mubr.bf16.vlgmr.msra.gmra.mrb[12].mxu1 %v1036_v20 }
  0xfa   : > { %v330_v21 = vpop.f32.mrb[0].mxu0 }
  0xfb   : > { %v418_v22 = vpop.f32.mrb[0].mxu1  ;;  %v1490_v23 = vpop.f32.mrb[1].mxu0 }
  0xfc   : > { %v419_v24 = vadd.f32 %v418_v22, %v330_v21  ;;  %v1510_v25 = vpop.f32.mrb[1].mxu1  ;;  %v333_v26 = vpop.f32.mrb[2].mxu0 }
  0xfd   : > { %v421_v27 = vpop.f32.mrb[2].mxu1  ;;  %v1491_v28 = vpop.f32.mrb[3].mxu0 }
  0xfe   : > { %v1511_v29 = vpop.f32.mrb[3].mxu1 }
 0x11a   : > { %v527_v30 = vpop.f32.mrb[4].mxu0 }
 0x11b   : > { %v533_v31 = vadd.f32 %v527_v30, %v419_v24  ;;  %v650_v32 = vpop.f32.mrb[4].mxu1  ;;  %v1530_v1 = vpop.f32.mrb[5].mxu0 }
 0x11c   : > { %v1550_v34 = vpop.f32.mrb[5].mxu1  ;;  %v530_v35 = vpop.f32.mrb[6].mxu0 }
 0x11d   : > { %v656_v36 = vadd.f32 %v650_v32, %v533_v31  ;;  %v653_v37 = vpop.f32.mrb[6].mxu1  ;;  %v1531_v38 = vpop.f32.mrb[7].mxu0 }
 0x11e   : > { %v1551_v39 = vpop.f32.mrb[7].mxu1 }
 0x11f   : > { %v663_v40 = vadd.f32 %v1310_v33, %v656_v36 }
 0x121   : > { %vm664_vm1 = vcmp.gt.f32.partialorder %v663_v40, 0.0  ;;  %v665_v41 = vmul.f32 0.2, %v663_v40 }
 0x123   : > { %v666_v42 = vsel %vm664_vm1, %v663_v40, %v665_v41 }
 0x124   : > { %v667_v43 = vpack.c.bf16 %v666_v42, %v666_v42 }
 0x126   : > { %669 = vst.msk [vmem:[%s190_s19] sm:$0x1] %vm668_vm2, %v667_v43 }
 0x13a   : > { %v802_v44 = vpop.f32.mrb[8].mxu0 }
 0x13b   : > { %v890_v45 = vpop.f32.mrb[8].mxu1  ;;  %v1570_v46 = vpop.f32.mrb[9].mxu0 }
 0x13c   : > { %v891_v47 = vadd.f32 %v890_v45, %v802_v44  ;;  %v1590_v48 = vpop.f32.mrb[9].mxu1  ;;  %v805_v49 = vpop.f32.mrb[10].mxu0 }
 0x13d   : > { %v893_v50 = vpop.f32.mrb[10].mxu1  ;;  %v1571_v51 = vpop.f32.mrb[11].mxu0 }
 0x13e   : > { %v1591_v52 = vpop.f32.mrb[11].mxu1 }
 0x15a   : > { %v998_v53 = vpop.f32.mrb[12].mxu0 }
 0x15b   : > { %v1004_v54 = vadd.f32 %v998_v53, %v891_v47  ;;  %v1120_v55 = vpop.f32.mrb[12].mxu1  ;;  %v1610_v56 = vpop.f32.mrb[13].mxu0 }
 0x15c   : > { %v1630_v57 = vpop.f32.mrb[13].mxu1  ;;  %v1001_v58 = vpop.f32.mrb[14].mxu0 }
 0x15d   : > { %v1126_v59 = vadd.f32 %v1120_v55, %v1004_v54  ;;  %v1123_v60 = vpop.f32.mrb[14].mxu1  ;;  %v1611_v61 = vpop.f32.mrb[15].mxu0 }
 0x15e   : > { %v1631_v62 = vpop.f32.mrb[15].mxu1 }
 0x15f   : > { %v1127_v63 = vadd.f32 %v1310_v33, %v1126_v59 }
 0x161   : > { %vm1128_vm3 = vcmp.gt.f32.partialorder %v1127_v63, 0.0  ;;  %v1129_v0 = vmul.f32 0.2, %v1127_v63 }
 0x163   : > { %v1130_v2 = vsel %vm1128_vm3, %v1127_v63, %v1129_v0 }
 0x164   : > { %v1131_v3 = vpack.c.bf16 %v1130_v2, %v1130_v2 }
 0x166   : > { %1397 = vst.msk [vmem:[%s190_s19 + $0x1] sm:$0x1] %vm668_vm2, %v1131_v3 }
 0x167 PF: > { %s13_s14 = sadd.s32 1, %s1745_s14   ;;  %s2096_s12 = smov %s1741_s13 }
 0x168   : > { %p10_p5 = scmp.ge.s32.totalorder %s13_s14, 4   ;;  %s2097_s13 = smov %s2099_s15 }
 0x16a   :  { %12 = sbr.rel (!%p10_p5) target bundleno = 2 (0x2), region = 69 }

</bundles_post_ra>
